<compile_context>
chip_gen: v7x
topology: tpu7x:2x2x1
jax: 0.10.0
libtpu: 0.0.40
codegen_flags: <defaults>
</compile_context>

<pallas_src>
import functools
import numpy as np
import jax
import jax.numpy as jnp
from jax.experimental import pallas as pl
from jax.experimental.pallas import tpu as pltpu


def _edlk_kernel(
    x_ref,                                   # (1, C, HW) VMEM activation block
    wmask_ref,                               # (K, 1, HW) column-validity masks
    n1w, n1b,                                # (C, 1)            norm1
    c1w, c1b,                                # (DW, C), (DW, 1)  conv1 (1x1)
    dww, dwb,                                # (DW, K*K), (DW,1) conv2 (13x13 dw)
    seaw, seab,                              # (DWh, DW), (DWh,1) SE squeeze
    sebw, sebb,                              # (DW, DWh), (DW,1)  SE excite
    c3w, c3b,                                # (C, DW), (C, 1)   conv3 (1x1)
    n2w, n2b,                                # (C, 1)            norm2
    c4w, c4b,                                # (FF, C), (FF, 1)  conv4 (1x1)
    c5w, c5b,                                # (C, FF), (C, 1)   conv5 (1x1)
    beta, gamma,                             # (C, 1)
    o_ref,                                   # (1, C, HW) VMEM output block
    fpad_ref,                                # scratch (DW, HW + 2*PAD) f32 VMEM
    *, DW, DWh, W, K, HW, PAD, eps,
):
    P = K // 2
    f32 = jnp.float32

    def gelu(v):
        c0 = 0.7978845608028654  # sqrt(2/pi)
        return 0.5 * v * (1.0 + jnp.tanh(c0 * (v + 0.044715 * v * v * v)))

    def layer_norm(x, w_ref, b_ref):
        # x: (C, HW); per-pixel statistics over the channel (sublane) axis.
        inv_c = 1.0 / x.shape[0]
        mu = jnp.sum(x, axis=0, keepdims=True) * inv_c
        d = x - mu
        var = jnp.sum(d * d, axis=0, keepdims=True) * inv_c
        return w_ref[...] * (d * jax.lax.rsqrt(var + eps)) + b_ref[...]

    def conv1x1(x, w_ref, b_ref):
        # x: (Cin, HW), w: (Cout, Cin) -> (Cout, HW).  VPU broadcast-FMA path
        # (kept per review; switch to jnp.dot on the MXU for wide channels).
        w = w_ref[...]
        cin = x.shape[0]
        acc = w[:, 0:1] * x[0:1, :]
        for ci in range(1, cin):
            acc = acc + w[:, ci:ci + 1] * x[ci:ci + 1, :]
        return acc + b_ref[...]

    def dwconv13(x):
        # x: (DW, HW) f32.  Flat zero-padded scratch + per-row band loads +
        # masked column shifts (value slices), all DW channels at once.
        # Re-zero every grid step: scratch is per-core under "parallel"
        # semantics, and the full zero is only a handful of vector stores.
        fpad_ref[...] = jnp.zeros_like(fpad_ref)
        fpad_ref[:, PAD:PAD + HW] = x

        wmasks = [wmask_ref[kx] for kx in range(K)]     # 13 x (1, HW), hoisted

        acc0 = None
        acc1 = None
        for ky in range(K):
            b0 = PAD + (ky - P) * W - P                 # static offset
            band = fpad_ref[:, b0:b0 + HW + 2 * P]      # one load per row
            r0 = None
            r1 = None
            for kx in range(K):
                t = ky * K + kx
                w_t = dww[:, t:t + 1]                   # (DW, 1) tap weight
                term = w_t * (band[:, kx:kx + HW] * wmasks[kx])
                if kx % 2 == 0:
                    r0 = term if r0 is None else r0 + term
                else:
                    r1 = term if r1 is None else r1 + term
            row = r0 + r1
            if ky % 2 == 0:
                acc0 = row if acc0 is None else acc0 + row
            else:
                acc1 = row if acc1 is None else acc1 + row
        return acc0 + acc1 + dwb[...]

    def se_scale(x):
        # x: (DW, HW) -> sigmoid gate (DW, 1)
        pooled = jnp.sum(x, axis=1, keepdims=True) * (1.0 / HW)   # (DW, 1)
        wa = seaw[...]
        h = wa[:, 0:1] * pooled[0:1, :]
        for ci in range(1, DW):
            h = h + wa[:, ci:ci + 1] * pooled[ci:ci + 1, :]
        h = jnp.maximum(h + seab[...], 0.0)                       # ReLU, (DWh,1)
        wb = sebw[...]
        z = wb[:, 0:1] * h[0:1, :]
        for ci in range(1, DWh):
            z = z + wb[:, ci:ci + 1] * h[ci:ci + 1, :]
        z = z + sebb[...]
        return 1.0 / (1.0 + jnp.exp(-z))                          # sigmoid

    # ---------------- forward pass on (channels, H*W) slabs ----------------
    xin = x_ref[0].astype(f32)                 # (C, HW), f32 internal compute

    t = layer_norm(xin, n1w, n1b)              # norm1
    t = conv1x1(t, c1w, c1b)                   # conv1: C -> DW
    t = dwconv13(t)                            # conv2: 13x13 depthwise (deploy)
    t = gelu(t)                                # GELU
    t = t * se_scale(t)                        # x * se(x)
    t = conv1x1(t, c3w, c3b)                   # conv3: DW -> C
    # dropout1 is identity (drop_out_rate = 0)

    y = xin + t * beta[...]                    # y = inp + x * beta

    u = layer_norm(y, n2w, n2b)                # norm2
    u = conv1x1(u, c4w, c4b)                   # conv4: C -> FFN
    u = gelu(u)                                # GELU
    u = conv1x1(u, c5w, c5b)                   # conv5: FFN -> C
    # dropout2 is identity

    o_ref[0] = (y + u * gamma[...]).astype(o_ref.dtype)   # lane-dense store


def _full_spec(arr):
    zeros = (0,) * arr.ndim
    return pl.BlockSpec(arr.shape, lambda n, _z=zeros: _z)


def edlk_block(inp, params, *, eps=1e-6):
    """Fused Pallas TPU forward pass of EDLKBlock."""
    N, C, H, W = inp.shape
    DW = params['c1w'].shape[0]
    DWh = params['seaw'].shape[0]
    FF = params['c4w'].shape[0]
    K = params['dww'].shape[-1]
    P = K // 2
    HW = H * W
    PAD = P * W + P                      # flat halo so every tap hits zero-fill
    HWP = HW + 2 * PAD

    f32 = jnp.float32
    col = lambda v: v.reshape(-1, 1).astype(f32)

    # Column-validity masks for the flattened depthwise conv (built once with
    # numpy on the host; kills row-wrap leakage of the flat column shifts).
    wpos = np.arange(HW) % W
    wmask_np = np.stack(
        [((wpos + (kx - P) >= 0) & (wpos + (kx - P) < W)).astype(np.float32)
         for kx in range(K)], axis=0)[:, None, :]        # (K, 1, HW)
    wmask = jnp.asarray(wmask_np)

    weights = (
        wmask,
        col(params['n1w']), col(params['n1b']),
        params['c1w'].astype(f32), col(params['c1b']),
        params['dww'].reshape(DW, K * K).astype(f32), col(params['dwb']),
        params['seaw'].astype(f32), col(params['seab']),
        params['sebw'].astype(f32), col(params['sebb']),
        params['c3w'].astype(f32), col(params['c3b']),
        col(params['n2w']), col(params['n2b']),
        params['c4w'].astype(f32), col(params['c4b']),
        params['c5w'].astype(f32), col(params['c5b']),
        col(params['beta']), col(params['gamma']),
    )

    kernel = functools.partial(
        _edlk_kernel, DW=DW, DWh=DWh, W=W, K=K, HW=HW, PAD=PAD, eps=eps)

    # Lane-dense activation layout: (N, C, H*W) so the last dim is 256 >= 128.
    x_flat = inp.reshape(N, C, HW)
    act_spec = pl.BlockSpec((1, C, HW), lambda n: (n, 0, 0))

    out_flat = pl.pallas_call(
        kernel,
        out_shape=jax.ShapeDtypeStruct((N, C, HW), inp.dtype),
        grid_spec=pltpu.PrefetchScalarGridSpec(
            num_scalar_prefetch=0,
            grid=(N,),
            in_specs=[act_spec] + [_full_spec(w) for w in weights],
            out_specs=act_spec,
            scratch_shapes=[pltpu.VMEM((DW, HWP), jnp.float32)],
        ),
        compiler_params=pltpu.CompilerParams(
            dimension_semantics=("parallel",),
            # Actual footprint here is <1 MiB; set an explicit, conservative
            # limit so larger images don't silently hit the scoped default.
            vmem_limit_bytes=32 * 1024 * 1024,
        ),
    )(x_flat, *weights)

    return out_flat.reshape(N, C, H, W)


def _edlk_ref(x, params, eps=1e-6):
    """Pure-JAX reference mirroring the PyTorch EDLKBlock forward."""
    p = params
    K = p['dww'].shape[-1]
    pad = K // 2

    def bc(v):
        return v[None, :, None, None]

    def ln(x, w, b):
        mu = x.mean(axis=1, keepdims=True)
        var = ((x - mu) ** 2).mean(axis=1, keepdims=True)
        return bc(w) * ((x - mu) / jnp.sqrt(var + eps)) + bc(b)

    def conv1x1(x, w, b):
        return jnp.einsum('nchw,oc->nohw', x, w) + bc(b)

    def gelu(v):
        c0 = 0.7978845608028654
        return 0.5 * v * (1.0 + jnp.tanh(c0 * (v + 0.044715 * v ** 3)))

    def dwconv(x, w, b):
        out = jax.lax.conv_general_dilated(
            x, w[:, None, :, :], window_strides=(1, 1),
            padding=[(pad, pad), (pad, pad)],
            dimension_numbers=('NCHW', 'OIHW', 'NCHW'),
            feature_group_count=x.shape[1])
        return out + bc(b)

    def sigmoid(z):
        return 1.0 / (1.0 + jnp.exp(-z))

    t = ln(x, p['n1w'], p['n1b'])
    t = conv1x1(t, p['c1w'], p['c1b'])
    t = dwconv(t, p['dww'], p['dwb'])
    t = gelu(t)
    pooled = t.mean(axis=(2, 3), keepdims=True)
    h = jnp.maximum(jnp.einsum('ncij,oc->noij', pooled, p['seaw']) + bc(p['seab']), 0.0)
    s = sigmoid(jnp.einsum('ncij,oc->noij', h, p['sebw']) + bc(p['sebb']))
    t = t * s
    t = conv1x1(t, p['c3w'], p['c3b'])
    y = x + t * bc(p['beta'])
    u = conv1x1(ln(y, p['n2w'], p['n2b']), p['c4w'], p['c4b'])
    u = gelu(u)
    u = conv1x1(u, p['c5w'], p['c5b'])
    return y + u * bc(p['gamma'])


if __name__ == "__main__":
    key = jax.random.PRNGKey(0)
    N, c, H, W = 2, 4, 16, 16
    dw = c * 1          # DW_Expand = 1
    ffn = 2 * c         # FFN_Expand = 2
    K = 13

    def rnd(k, shape, fan_in=None):
        v = jax.random.normal(k, shape, dtype=jnp.float32)
        if fan_in is not None:
            v = v / np.sqrt(fan_in)
        return v

    ks = jax.random.split(key, 22)
    # The PyTorch module initializes beta/gamma to 0 and LayerNorm affine to
    # (1, 0); random params here exercise every branch of the fused kernel.
    params = {
        'n1w': rnd(ks[0], (c,)), 'n1b': rnd(ks[1], (c,)),
        'c1w': rnd(ks[2], (dw, c), c), 'c1b': rnd(ks[3], (dw,), c),
        'dww': rnd(ks[4], (dw, K, K), K * K), 'dwb': rnd(ks[5], (dw,), K * K),
        'seaw': rnd(ks[6], (dw // 2, dw), dw), 'seab': rnd(ks[7], (dw // 2,), dw),
        'sebw': rnd(ks[8], (dw, dw // 2), dw // 2), 'sebb': rnd(ks[9], (dw,), dw // 2),
        'c3w': rnd(ks[10], (c, dw), dw), 'c3b': rnd(ks[11], (c,), dw),
        'n2w': rnd(ks[12], (c,)), 'n2b': rnd(ks[13], (c,)),
        'c4w': rnd(ks[14], (ffn, c), c), 'c4b': rnd(ks[15], (ffn,), c),
        'c5w': rnd(ks[16], (c, ffn), ffn), 'c5b': rnd(ks[17], (c,), ffn),
        'beta': rnd(ks[18], (c,)), 'gamma': rnd(ks[19], (c,)),
    }
    x = jax.random.normal(ks[20], (N, c, H, W), dtype=jnp.float32)

    out = jax.block_until_ready(edlk_block(x, params))
    ref = _edlk_ref(x, params)

    assert out.shape == x.shape and out.dtype == x.dtype
    np.testing.assert_allclose(np.asarray(out), np.asarray(ref), rtol=2e-4, atol=2e-4)
    print("KERNEL_OK")
</pallas_src>

<mosaic_0001>
module attributes {stable_mosaic.version = 11 : i64} {
  func.func @_edlk_kernel(%arg0: i32, %arg1: memref<1x4x256xf32, #tpu.memory_space<vmem>>, %arg2: memref<13x1x256xf32, #tpu.memory_space<vmem>>, %arg3: memref<4x1xf32, #tpu.memory_space<vmem>>, %arg4: memref<4x1xf32, #tpu.memory_space<vmem>>, %arg5: memref<4x4xf32, #tpu.memory_space<vmem>>, %arg6: memref<4x1xf32, #tpu.memory_space<vmem>>, %arg7: memref<4x169xf32, #tpu.memory_space<vmem>>, %arg8: memref<4x1xf32, #tpu.memory_space<vmem>>, %arg9: memref<2x4xf32, #tpu.memory_space<vmem>>, %arg10: memref<2x1xf32, #tpu.memory_space<vmem>>, %arg11: memref<4x2xf32, #tpu.memory_space<vmem>>, %arg12: memref<4x1xf32, #tpu.memory_space<vmem>>, %arg13: memref<4x4xf32, #tpu.memory_space<vmem>>, %arg14: memref<4x1xf32, #tpu.memory_space<vmem>>, %arg15: memref<4x1xf32, #tpu.memory_space<vmem>>, %arg16: memref<4x1xf32, #tpu.memory_space<vmem>>, %arg17: memref<8x4xf32, #tpu.memory_space<vmem>>, %arg18: memref<8x1xf32, #tpu.memory_space<vmem>>, %arg19: memref<4x8xf32, #tpu.memory_space<vmem>>, %arg20: memref<4x1xf32, #tpu.memory_space<vmem>>, %arg21: memref<4x1xf32, #tpu.memory_space<vmem>>, %arg22: memref<4x1xf32, #tpu.memory_space<vmem>>, %arg23: memref<1x4x256xf32, #tpu.memory_space<vmem>>, %arg24: memref<4x460xf32, #tpu.memory_space<vmem>>) attributes {dimension_semantics = [#tpu.dimension_semantics<parallel>], iteration_bounds = array<i64: 2>, scalar_prefetch = 0 : i64, scratch_operands = 1 : i64, tpu.core_type = #tpu.core_type<tc>, window_params = [{transform_indices = @transform_0, window_bounds = array<i64: 1, 4, 256>}, {pipeline_mode = #tpu.pipeline_mode<synchronous>, transform_indices = @transform_1, window_bounds = array<i64: 13, 1, 256>}, {pipeline_mode = #tpu.pipeline_mode<synchronous>, transform_indices = @transform_2, window_bounds = array<i64: 4, 1>}, {pipeline_mode = #tpu.pipeline_mode<synchronous>, transform_indices = @transform_3, window_bounds = array<i64: 4, 1>}, {pipeline_mode = #tpu.pipeline_mode<synchronous>, transform_indices = @transform_4, window_bounds = array<i64: 4, 4>}, {pipeline_mode = #tpu.pipeline_mode<synchronous>, transform_indices = @transform_5, window_bounds = array<i64: 4, 1>}, {pipeline_mode = #tpu.pipeline_mode<synchronous>, transform_indices = @transform_6, window_bounds = array<i64: 4, 169>}, {pipeline_mode = #tpu.pipeline_mode<synchronous>, transform_indices = @transform_7, window_bounds = array<i64: 4, 1>}, {pipeline_mode = #tpu.pipeline_mode<synchronous>, transform_indices = @transform_8, window_bounds = array<i64: 2, 4>}, {pipeline_mode = #tpu.pipeline_mode<synchronous>, transform_indices = @transform_9, window_bounds = array<i64: 2, 1>}, {pipeline_mode = #tpu.pipeline_mode<synchronous>, transform_indices = @transform_10, window_bounds = array<i64: 4, 2>}, {pipeline_mode = #tpu.pipeline_mode<synchronous>, transform_indices = @transform_11, window_bounds = array<i64: 4, 1>}, {pipeline_mode = #tpu.pipeline_mode<synchronous>, transform_indices = @transform_12, window_bounds = array<i64: 4, 4>}, {pipeline_mode = #tpu.pipeline_mode<synchronous>, transform_indices = @transform_13, window_bounds = array<i64: 4, 1>}, {pipeline_mode = #tpu.pipeline_mode<synchronous>, transform_indices = @transform_14, window_bounds = array<i64: 4, 1>}, {pipeline_mode = #tpu.pipeline_mode<synchronous>, transform_indices = @transform_15, window_bounds = array<i64: 4, 1>}, {pipeline_mode = #tpu.pipeline_mode<synchronous>, transform_indices = @transform_16, window_bounds = array<i64: 8, 4>}, {pipeline_mode = #tpu.pipeline_mode<synchronous>, transform_indices = @transform_17, window_bounds = array<i64: 8, 1>}, {pipeline_mode = #tpu.pipeline_mode<synchronous>, transform_indices = @transform_18, window_bounds = array<i64: 4, 8>}, {pipeline_mode = #tpu.pipeline_mode<synchronous>, transform_indices = @transform_19, window_bounds = array<i64: 4, 1>}, {pipeline_mode = #tpu.pipeline_mode<synchronous>, transform_indices = @transform_20, window_bounds = array<i64: 4, 1>}, {pipeline_mode = #tpu.pipeline_mode<synchronous>, transform_indices = @transform_21, window_bounds = array<i64: 4, 1>}, {transform_indices = @transform_22, window_bounds = array<i64: 1, 4, 256>}]} {
    %c0 = arith.constant 0 : index
    %c0_0 = arith.constant 0 : index
    %c0_1 = arith.constant 0 : index
    %0 = vector.load %arg1[%c0, %c0_0, %c0_1] : memref<1x4x256xf32, #tpu.memory_space<vmem>>, vector<1x4x256xf32>
    %1 = vector.shape_cast %0 : vector<1x4x256xf32> to vector<4x256xf32>
    %cst = arith.constant dense<0.000000e+00> : vector<256xf32>
    %2 = vector.multi_reduction <add>, %1, %cst [0] : vector<4x256xf32> to vector<256xf32>
    %3 = vector.shape_cast %2 : vector<256xf32> to vector<1x256xf32>
    %cst_2 = arith.constant 2.500000e-01 : f32
    %4 = vector.broadcast %cst_2 : f32 to vector<1x256xf32>
    %5 = arith.mulf %3, %4 : vector<1x256xf32>
    %6 = vector.broadcast %5 : vector<1x256xf32> to vector<4x256xf32>
    %7 = arith.subf %1, %6 : vector<4x256xf32>
    %8 = arith.mulf %7, %7 : vector<4x256xf32>
    %cst_3 = arith.constant dense<0.000000e+00> : vector<256xf32>
    %9 = vector.multi_reduction <add>, %8, %cst_3 [0] : vector<4x256xf32> to vector<256xf32>
    %10 = vector.shape_cast %9 : vector<256xf32> to vector<1x256xf32>
    %cst_4 = arith.constant 2.500000e-01 : f32
    %11 = vector.broadcast %cst_4 : f32 to vector<1x256xf32>
    %12 = arith.mulf %10, %11 : vector<1x256xf32>
    %c0_5 = arith.constant 0 : index
    %c0_6 = arith.constant 0 : index
    %13 = vector.load %arg3[%c0_5, %c0_6] : memref<4x1xf32, #tpu.memory_space<vmem>>, vector<4x1xf32>
    %cst_7 = arith.constant 9.99999997E-7 : f32
    %14 = vector.broadcast %cst_7 : f32 to vector<1x256xf32>
    %15 = arith.addf %12, %14 : vector<1x256xf32>
    %16 = math.rsqrt %15 : vector<1x256xf32>
    %17 = vector.broadcast %16 : vector<1x256xf32> to vector<4x256xf32>
    %18 = arith.mulf %7, %17 : vector<4x256xf32>
    %19 = vector.broadcast %13 : vector<4x1xf32> to vector<4x256xf32>
    %20 = arith.mulf %19, %18 : vector<4x256xf32>
    %c0_8 = arith.constant 0 : index
    %c0_9 = arith.constant 0 : index
    %21 = vector.load %arg4[%c0_8, %c0_9] : memref<4x1xf32, #tpu.memory_space<vmem>>, vector<4x1xf32>
    %22 = vector.broadcast %21 : vector<4x1xf32> to vector<4x256xf32>
    %23 = arith.addf %20, %22 : vector<4x256xf32>
    %c0_10 = arith.constant 0 : index
    %c0_11 = arith.constant 0 : index
    %24 = vector.load %arg5[%c0_10, %c0_11] : memref<4x4xf32, #tpu.memory_space<vmem>>, vector<4x4xf32>
    %25 = vector.extract_strided_slice %24 {offsets = [0, 0], sizes = [4, 1], strides = [1, 1]} : vector<4x4xf32> to vector<4x1xf32>
    %26 = vector.extract_strided_slice %23 {offsets = [0, 0], sizes = [1, 256], strides = [1, 1]} : vector<4x256xf32> to vector<1x256xf32>
    %27 = vector.broadcast %25 : vector<4x1xf32> to vector<4x256xf32>
    %28 = vector.broadcast %26 : vector<1x256xf32> to vector<4x256xf32>
    %29 = arith.mulf %27, %28 : vector<4x256xf32>
    %30 = vector.extract_strided_slice %24 {offsets = [0, 1], sizes = [4, 1], strides = [1, 1]} : vector<4x4xf32> to vector<4x1xf32>
    %31 = vector.extract_strided_slice %23 {offsets = [1, 0], sizes = [1, 256], strides = [1, 1]} : vector<4x256xf32> to vector<1x256xf32>
    %32 = vector.broadcast %30 : vector<4x1xf32> to vector<4x256xf32>
    %33 = vector.broadcast %31 : vector<1x256xf32> to vector<4x256xf32>
    %34 = arith.mulf %32, %33 : vector<4x256xf32>
    %35 = arith.addf %29, %34 : vector<4x256xf32>
    %36 = vector.extract_strided_slice %24 {offsets = [0, 2], sizes = [4, 1], strides = [1, 1]} : vector<4x4xf32> to vector<4x1xf32>
    %37 = vector.extract_strided_slice %23 {offsets = [2, 0], sizes = [1, 256], strides = [1, 1]} : vector<4x256xf32> to vector<1x256xf32>
    %38 = vector.broadcast %36 : vector<4x1xf32> to vector<4x256xf32>
    %39 = vector.broadcast %37 : vector<1x256xf32> to vector<4x256xf32>
    %40 = arith.mulf %38, %39 : vector<4x256xf32>
    %41 = arith.addf %35, %40 : vector<4x256xf32>
    %42 = vector.extract_strided_slice %24 {offsets = [0, 3], sizes = [4, 1], strides = [1, 1]} : vector<4x4xf32> to vector<4x1xf32>
    %43 = vector.extract_strided_slice %23 {offsets = [3, 0], sizes = [1, 256], strides = [1, 1]} : vector<4x256xf32> to vector<1x256xf32>
    %44 = vector.broadcast %42 : vector<4x1xf32> to vector<4x256xf32>
    %45 = vector.broadcast %43 : vector<1x256xf32> to vector<4x256xf32>
    %46 = arith.mulf %44, %45 : vector<4x256xf32>
    %47 = arith.addf %41, %46 : vector<4x256xf32>
    %c0_12 = arith.constant 0 : index
    %c0_13 = arith.constant 0 : index
    %48 = vector.load %arg6[%c0_12, %c0_13] : memref<4x1xf32, #tpu.memory_space<vmem>>, vector<4x1xf32>
    %49 = vector.broadcast %48 : vector<4x1xf32> to vector<4x256xf32>
    %50 = arith.addf %47, %49 : vector<4x256xf32>
    %cst_14 = arith.constant 0.000000e+00 : f32
    %51 = vector.broadcast %cst_14 : f32 to vector<4x460xf32>
    %c0_15 = arith.constant 0 : index
    %c0_16 = arith.constant 0 : index
    %52 = vector.load %arg24[%c0_15, %c0_16] : memref<4x460xf32, #tpu.memory_space<vmem>>, vector<4x460xf32>
    tpu.vector_store %arg24[%c0_15, %c0_16], %51 {strides = array<i32>} : memref<4x460xf32, #tpu.memory_space<vmem>>, vector<4x460xf32>,
    %c0_17 = arith.constant 0 : index
    %c102 = arith.constant 102 : index
    %53 = vector.load %arg24[%c0_17, %c102] : memref<4x460xf32, #tpu.memory_space<vmem>>, vector<4x256xf32>
    tpu.vector_store %arg24[%c0_17, %c102], %50 {strides = array<i32>} : memref<4x460xf32, #tpu.memory_space<vmem>>, vector<4x256xf32>,
    %c0_18 = arith.constant 0 : index
    %c0_19 = arith.constant 0 : index
    %c0_20 = arith.constant 0 : index
    %54 = vector.load %arg2[%c0_18, %c0_19, %c0_20] : memref<13x1x256xf32, #tpu.memory_space<vmem>>, vector<1x1x256xf32>
    %55 = vector.shape_cast %54 : vector<1x1x256xf32> to vector<1x256xf32>
    %c1 = arith.constant 1 : index
    %c0_21 = arith.constant 0 : index
    %c0_22 = arith.constant 0 : index
    %56 = vector.load %arg2[%c1, %c0_21, %c0_22] : memref<13x1x256xf32, #tpu.memory_space<vmem>>, vector<1x1x256xf32>
    %57 = vector.shape_cast %56 : vector<1x1x256xf32> to vector<1x256xf32>
    %c2 = arith.constant 2 : index
    %c0_23 = arith.constant 0 : index
    %c0_24 = arith.constant 0 : index
    %58 = vector.load %arg2[%c2, %c0_23, %c0_24] : memref<13x1x256xf32, #tpu.memory_space<vmem>>, vector<1x1x256xf32>
    %59 = vector.shape_cast %58 : vector<1x1x256xf32> to vector<1x256xf32>
    %c3 = arith.constant 3 : index
    %c0_25 = arith.constant 0 : index
    %c0_26 = arith.constant 0 : index
    %60 = vector.load %arg2[%c3, %c0_25, %c0_26] : memref<13x1x256xf32, #tpu.memory_space<vmem>>, vector<1x1x256xf32>
    %61 = vector.shape_cast %60 : vector<1x1x256xf32> to vector<1x256xf32>
    %c4 = arith.constant 4 : index
    %c0_27 = arith.constant 0 : index
    %c0_28 = arith.constant 0 : index
    %62 = vector.load %arg2[%c4, %c0_27, %c0_28] : memref<13x1x256xf32, #tpu.memory_space<vmem>>, vector<1x1x256xf32>
    %63 = vector.shape_cast %62 : vector<1x1x256xf32> to vector<1x256xf32>
    %c5 = arith.constant 5 : index
    %c0_29 = arith.constant 0 : index
    %c0_30 = arith.constant 0 : index
    %64 = vector.load %arg2[%c5, %c0_29, %c0_30] : memref<13x1x256xf32, #tpu.memory_space<vmem>>, vector<1x1x256xf32>
    %65 = vector.shape_cast %64 : vector<1x1x256xf32> to vector<1x256xf32>
    %c6 = arith.constant 6 : index
    %c0_31 = arith.constant 0 : index
    %c0_32 = arith.constant 0 : index
    %66 = vector.load %arg2[%c6, %c0_31, %c0_32] : memref<13x1x256xf32, #tpu.memory_space<vmem>>, vector<1x1x256xf32>
    %67 = vector.shape_cast %66 : vector<1x1x256xf32> to vector<1x256xf32>
    %c7 = arith.constant 7 : index
    %c0_33 = arith.constant 0 : index
    %c0_34 = arith.constant 0 : index
    %68 = vector.load %arg2[%c7, %c0_33, %c0_34] : memref<13x1x256xf32, #tpu.memory_space<vmem>>, vector<1x1x256xf32>
    %69 = vector.shape_cast %68 : vector<1x1x256xf32> to vector<1x256xf32>
    %c8 = arith.constant 8 : index
    %c0_35 = arith.constant 0 : index
    %c0_36 = arith.constant 0 : index
    %70 = vector.load %arg2[%c8, %c0_35, %c0_36] : memref<13x1x256xf32, #tpu.memory_space<vmem>>, vector<1x1x256xf32>
    %71 = vector.shape_cast %70 : vector<1x1x256xf32> to vector<1x256xf32>
    %c9 = arith.constant 9 : index
    %c0_37 = arith.constant 0 : index
    %c0_38 = arith.constant 0 : index
    %72 = vector.load %arg2[%c9, %c0_37, %c0_38] : memref<13x1x256xf32, #tpu.memory_space<vmem>>, vector<1x1x256xf32>
    %73 = vector.shape_cast %72 : vector<1x1x256xf32> to vector<1x256xf32>
    %c10 = arith.constant 10 : index
    %c0_39 = arith.constant 0 : index
    %c0_40 = arith.constant 0 : index
    %74 = vector.load %arg2[%c10, %c0_39, %c0_40] : memref<13x1x256xf32, #tpu.memory_space<vmem>>, vector<1x1x256xf32>
    %75 = vector.shape_cast %74 : vector<1x1x256xf32> to vector<1x256xf32>
    %c11 = arith.constant 11 : index
    %c0_41 = arith.constant 0 : index
    %c0_42 = arith.constant 0 : index
    %76 = vector.load %arg2[%c11, %c0_41, %c0_42] : memref<13x1x256xf32, #tpu.memory_space<vmem>>, vector<1x1x256xf32>
    %77 = vector.shape_cast %76 : vector<1x1x256xf32> to vector<1x256xf32>
    %c12 = arith.constant 12 : index
    %c0_43 = arith.constant 0 : index
    %c0_44 = arith.constant 0 : index
    %78 = vector.load %arg2[%c12, %c0_43, %c0_44] : memref<13x1x256xf32, #tpu.memory_space<vmem>>, vector<1x1x256xf32>
    %79 = vector.shape_cast %78 : vector<1x1x256xf32> to vector<1x256xf32>
    %c0_45 = arith.constant 0 : index
    %c0_46 = arith.constant 0 : index
    %80 = vector.load %arg24[%c0_45, %c0_46] : memref<4x460xf32, #tpu.memory_space<vmem>>, vector<4x268xf32>
    %c0_47 = arith.constant 0 : index
    %c0_48 = arith.constant 0 : index
    %81 = vector.load %arg7[%c0_47, %c0_48] : memref<4x169xf32, #tpu.memory_space<vmem>>, vector<4x1xf32>
    %82 = vector.extract_strided_slice %80 {offsets = [0, 0], sizes = [4, 256], strides = [1, 1]} : vector<4x268xf32> to vector<4x256xf32>
    %83 = vector.broadcast %55 : vector<1x256xf32> to vector<4x256xf32>
    %84 = arith.mulf %82, %83 : vector<4x256xf32>
    %85 = vector.broadcast %81 : vector<4x1xf32> to vector<4x256xf32>
    %86 = arith.mulf %85, %84 : vector<4x256xf32>
    %c0_49 = arith.constant 0 : index
    %c1_50 = arith.constant 1 : index
    %87 = vector.load %arg7[%c0_49, %c1_50] : memref<4x169xf32, #tpu.memory_space<vmem>>, vector<4x1xf32>
    %88 = vector.extract_strided_slice %80 {offsets = [0, 1], sizes = [4, 256], strides = [1, 1]} : vector<4x268xf32> to vector<4x256xf32>
    %89 = vector.broadcast %57 : vector<1x256xf32> to vector<4x256xf32>
    %90 = arith.mulf %88, %89 : vector<4x256xf32>
    %91 = vector.broadcast %87 : vector<4x1xf32> to vector<4x256xf32>
    %92 = arith.mulf %91, %90 : vector<4x256xf32>
    %c0_51 = arith.constant 0 : index
    %c2_52 = arith.constant 2 : index
    %93 = vector.load %arg7[%c0_51, %c2_52] : memref<4x169xf32, #tpu.memory_space<vmem>>, vector<4x1xf32>
    %94 = vector.extract_strided_slice %80 {offsets = [0, 2], sizes = [4, 256], strides = [1, 1]} : vector<4x268xf32> to vector<4x256xf32>
    %95 = vector.broadcast %59 : vector<1x256xf32> to vector<4x256xf32>
    %96 = arith.mulf %94, %95 : vector<4x256xf32>
    %97 = vector.broadcast %93 : vector<4x1xf32> to vector<4x256xf32>
    %98 = arith.mulf %97, %96 : vector<4x256xf32>
    %99 = arith.addf %86, %98 : vector<4x256xf32>
    %c0_53 = arith.constant 0 : index
    %c3_54 = arith.constant 3 : index
    %100 = vector.load %arg7[%c0_53, %c3_54] : memref<4x169xf32, #tpu.memory_space<vmem>>, vector<4x1xf32>
    %101 = vector.extract_strided_slice %80 {offsets = [0, 3], sizes = [4, 256], strides = [1, 1]} : vector<4x268xf32> to vector<4x256xf32>
    %102 = vector.broadcast %61 : vector<1x256xf32> to vector<4x256xf32>
    %103 = arith.mulf %101, %102 : vector<4x256xf32>
    %104 = vector.broadcast %100 : vector<4x1xf32> to vector<4x256xf32>
    %105 = arith.mulf %104, %103 : vector<4x256xf32>
    %106 = arith.addf %92, %105 : vector<4x256xf32>
    %c0_55 = arith.constant 0 : index
    %c4_56 = arith.constant 4 : index
    %107 = vector.load %arg7[%c0_55, %c4_56] : memref<4x169xf32, #tpu.memory_space<vmem>>, vector<4x1xf32>
    %108 = vector.extract_strided_slice %80 {offsets = [0, 4], sizes = [4, 256], strides = [1, 1]} : vector<4x268xf32> to vector<4x256xf32>
    %109 = vector.broadcast %63 : vector<1x256xf32> to vector<4x256xf32>
    %110 = arith.mulf %108, %109 : vector<4x256xf32>
    %111 = vector.broadcast %107 : vector<4x1xf32> to vector<4x256xf32>
    %112 = arith.mulf %111, %110 : vector<4x256xf32>
    %113 = arith.addf %99, %112 : vector<4x256xf32>
    %c0_57 = arith.constant 0 : index
    %c5_58 = arith.constant 5 : index
    %114 = vector.load %arg7[%c0_57, %c5_58] : memref<4x169xf32, #tpu.memory_space<vmem>>, vector<4x1xf32>
    %115 = vector.extract_strided_slice %80 {offsets = [0, 5], sizes = [4, 256], strides = [1, 1]} : vector<4x268xf32> to vector<4x256xf32>
    %116 = vector.broadcast %65 : vector<1x256xf32> to vector<4x256xf32>
    %117 = arith.mulf %115, %116 : vector<4x256xf32>
    %118 = vector.broadcast %114 : vector<4x1xf32> to vector<4x256xf32>
    %119 = arith.mulf %118, %117 : vector<4x256xf32>
    %120 = arith.addf %106, %119 : vector<4x256xf32>
    %c0_59 = arith.constant 0 : index
    %c6_60 = arith.constant 6 : index
    %121 = vector.load %arg7[%c0_59, %c6_60] : memref<4x169xf32, #tpu.memory_space<vmem>>, vector<4x1xf32>
    %122 = vector.extract_strided_slice %80 {offsets = [0, 6], sizes = [4, 256], strides = [1, 1]} : vector<4x268xf32> to vector<4x256xf32>
    %123 = vector.broadcast %67 : vector<1x256xf32> to vector<4x256xf32>
    %124 = arith.mulf %122, %123 : vector<4x256xf32>
    %125 = vector.broadcast %121 : vector<4x1xf32> to vector<4x256xf32>
    %126 = arith.mulf %125, %124 : vector<4x256xf32>
    %127 = arith.addf %113, %126 : vector<4x256xf32>
    %c0_61 = arith.constant 0 : index
    %c7_62 = arith.constant 7 : index
    %128 = vector.load %arg7[%c0_61, %c7_62] : memref<4x169xf32, #tpu.memory_space<vmem>>, vector<4x1xf32>
    %129 = vector.extract_strided_slice %80 {offsets = [0, 7], sizes = [4, 256], strides = [1, 1]} : vector<4x268xf32> to vector<4x256xf32>
    %130 = vector.broadcast %69 : vector<1x256xf32> to vector<4x256xf32>
    %131 = arith.mulf %129, %130 : vector<4x256xf32>
    %132 = vector.broadcast %128 : vector<4x1xf32> to vector<4x256xf32>
    %133 = arith.mulf %132, %131 : vector<4x256xf32>
    %134 = arith.addf %120, %133 : vector<4x256xf32>
    %c0_63 = arith.constant 0 : index
    %c8_64 = arith.constant 8 : index
    %135 = vector.load %arg7[%c0_63, %c8_64] : memref<4x169xf32, #tpu.memory_space<vmem>>, vector<4x1xf32>
    %136 = vector.extract_strided_slice %80 {offsets = [0, 8], sizes = [4, 256], strides = [1, 1]} : vector<4x268xf32> to vector<4x256xf32>
    %137 = vector.broadcast %71 : vector<1x256xf32> to vector<4x256xf32>
    %138 = arith.mulf %136, %137 : vector<4x256xf32>
    %139 = vector.broadcast %135 : vector<4x1xf32> to vector<4x256xf32>
    %140 = arith.mulf %139, %138 : vector<4x256xf32>
    %141 = arith.addf %127, %140 : vector<4x256xf32>
    %c0_65 = arith.constant 0 : index
    %c9_66 = arith.constant 9 : index
    %142 = vector.load %arg7[%c0_65, %c9_66] : memref<4x169xf32, #tpu.memory_space<vmem>>, vector<4x1xf32>
    %143 = vector.extract_strided_slice %80 {offsets = [0, 9], sizes = [4, 256], strides = [1, 1]} : vector<4x268xf32> to vector<4x256xf32>
    %144 = vector.broadcast %73 : vector<1x256xf32> to vector<4x256xf32>
    %145 = arith.mulf %143, %144 : vector<4x256xf32>
    %146 = vector.broadcast %142 : vector<4x1xf32> to vector<4x256xf32>
    %147 = arith.mulf %146, %145 : vector<4x256xf32>
    %148 = arith.addf %134, %147 : vector<4x256xf32>
    %c0_67 = arith.constant 0 : index
    %c10_68 = arith.constant 10 : index
    %149 = vector.load %arg7[%c0_67, %c10_68] : memref<4x169xf32, #tpu.memory_space<vmem>>, vector<4x1xf32>
    %150 = vector.extract_strided_slice %80 {offsets = [0, 10], sizes = [4, 256], strides = [1, 1]} : vector<4x268xf32> to vector<4x256xf32>
    %151 = vector.broadcast %75 : vector<1x256xf32> to vector<4x256xf32>
    %152 = arith.mulf %150, %151 : vector<4x256xf32>
    %153 = vector.broadcast %149 : vector<4x1xf32> to vector<4x256xf32>
    %154 = arith.mulf %153, %152 : vector<4x256xf32>
    %155 = arith.addf %141, %154 : vector<4x256xf32>
    %c0_69 = arith.constant 0 : index
    %c11_70 = arith.constant 11 : index
    %156 = vector.load %arg7[%c0_69, %c11_70] : memref<4x169xf32, #tpu.memory_space<vmem>>, vector<4x1xf32>
    %157 = vector.extract_strided_slice %80 {offsets = [0, 11], sizes = [4, 256], strides = [1, 1]} : vector<4x268xf32> to vector<4x256xf32>
    %158 = vector.broadcast %77 : vector<1x256xf32> to vector<4x256xf32>
    %159 = arith.mulf %157, %158 : vector<4x256xf32>
    %160 = vector.broadcast %156 : vector<4x1xf32> to vector<4x256xf32>
    %161 = arith.mulf %160, %159 : vector<4x256xf32>
    %162 = arith.addf %148, %161 : vector<4x256xf32>
    %c0_71 = arith.constant 0 : index
    %c12_72 = arith.constant 12 : index
    %163 = vector.load %arg7[%c0_71, %c12_72] : memref<4x169xf32, #tpu.memory_space<vmem>>, vector<4x1xf32>
    %164 = vector.extract_strided_slice %80 {offsets = [0, 12], sizes = [4, 256], strides = [1, 1]} : vector<4x268xf32> to vector<4x256xf32>
    %165 = vector.broadcast %79 : vector<1x256xf32> to vector<4x256xf32>
    %166 = arith.mulf %164, %165 : vector<4x256xf32>
    %167 = vector.broadcast %163 : vector<4x1xf32> to vector<4x256xf32>
    %168 = arith.mulf %167, %166 : vector<4x256xf32>
    %169 = arith.addf %155, %168 : vector<4x256xf32>
    %170 = arith.addf %169, %162 : vector<4x256xf32>
    %c0_73 = arith.constant 0 : index
    %c16 = arith.constant 16 : index
    %171 = vector.load %arg24[%c0_73, %c16] : memref<4x460xf32, #tpu.memory_space<vmem>>, vector<4x268xf32>
    %c0_74 = arith.constant 0 : index
    %c13 = arith.constant 13 : index
    %172 = vector.load %arg7[%c0_74, %c13] : memref<4x169xf32, #tpu.memory_space<vmem>>, vector<4x1xf32>
    %173 = vector.extract_strided_slice %171 {offsets = [0, 0], sizes = [4, 256], strides = [1, 1]} : vector<4x268xf32> to vector<4x256xf32>
    %174 = vector.broadcast %55 : vector<1x256xf32> to vector<4x256xf32>
    %175 = arith.mulf %173, %174 : vector<4x256xf32>
    %176 = vector.broadcast %172 : vector<4x1xf32> to vector<4x256xf32>
    %177 = arith.mulf %176, %175 : vector<4x256xf32>
    %c0_75 = arith.constant 0 : index
    %c14 = arith.constant 14 : index
    %178 = vector.load %arg7[%c0_75, %c14] : memref<4x169xf32, #tpu.memory_space<vmem>>, vector<4x1xf32>
    %179 = vector.extract_strided_slice %171 {offsets = [0, 1], sizes = [4, 256], strides = [1, 1]} : vector<4x268xf32> to vector<4x256xf32>
    %180 = vector.broadcast %57 : vector<1x256xf32> to vector<4x256xf32>
    %181 = arith.mulf %179, %180 : vector<4x256xf32>
    %182 = vector.broadcast %178 : vector<4x1xf32> to vector<4x256xf32>
    %183 = arith.mulf %182, %181 : vector<4x256xf32>
    %c0_76 = arith.constant 0 : index
    %c15 = arith.constant 15 : index
    %184 = vector.load %arg7[%c0_76, %c15] : memref<4x169xf32, #tpu.memory_space<vmem>>, vector<4x1xf32>
    %185 = vector.extract_strided_slice %171 {offsets = [0, 2], sizes = [4, 256], strides = [1, 1]} : vector<4x268xf32> to vector<4x256xf32>
    %186 = vector.broadcast %59 : vector<1x256xf32> to vector<4x256xf32>
    %187 = arith.mulf %185, %186 : vector<4x256xf32>
    %188 = vector.broadcast %184 : vector<4x1xf32> to vector<4x256xf32>
    %189 = arith.mulf %188, %187 : vector<4x256xf32>
    %190 = arith.addf %177, %189 : vector<4x256xf32>
    %c0_77 = arith.constant 0 : index
    %c16_78 = arith.constant 16 : index
    %191 = vector.load %arg7[%c0_77, %c16_78] : memref<4x169xf32, #tpu.memory_space<vmem>>, vector<4x1xf32>
    %192 = vector.extract_strided_slice %171 {offsets = [0, 3], sizes = [4, 256], strides = [1, 1]} : vector<4x268xf32> to vector<4x256xf32>
    %193 = vector.broadcast %61 : vector<1x256xf32> to vector<4x256xf32>
    %194 = arith.mulf %192, %193 : vector<4x256xf32>
    %195 = vector.broadcast %191 : vector<4x1xf32> to vector<4x256xf32>
    %196 = arith.mulf %195, %194 : vector<4x256xf32>
    %197 = arith.addf %183, %196 : vector<4x256xf32>
    %c0_79 = arith.constant 0 : index
    %c17 = arith.constant 17 : index
    %198 = vector.load %arg7[%c0_79, %c17] : memref<4x169xf32, #tpu.memory_space<vmem>>, vector<4x1xf32>
    %199 = vector.extract_strided_slice %171 {offsets = [0, 4], sizes = [4, 256], strides = [1, 1]} : vector<4x268xf32> to vector<4x256xf32>
    %200 = vector.broadcast %63 : vector<1x256xf32> to vector<4x256xf32>
    %201 = arith.mulf %199, %200 : vector<4x256xf32>
    %202 = vector.broadcast %198 : vector<4x1xf32> to vector<4x256xf32>
    %203 = arith.mulf %202, %201 : vector<4x256xf32>
    %204 = arith.addf %190, %203 : vector<4x256xf32>
    %c0_80 = arith.constant 0 : index
    %c18 = arith.constant 18 : index
    %205 = vector.load %arg7[%c0_80, %c18] : memref<4x169xf32, #tpu.memory_space<vmem>>, vector<4x1xf32>
    %206 = vector.extract_strided_slice %171 {offsets = [0, 5], sizes = [4, 256], strides = [1, 1]} : vector<4x268xf32> to vector<4x256xf32>
    %207 = vector.broadcast %65 : vector<1x256xf32> to vector<4x256xf32>
    %208 = arith.mulf %206, %207 : vector<4x256xf32>
    %209 = vector.broadcast %205 : vector<4x1xf32> to vector<4x256xf32>
    %210 = arith.mulf %209, %208 : vector<4x256xf32>
    %211 = arith.addf %197, %210 : vector<4x256xf32>
    %c0_81 = arith.constant 0 : index
    %c19 = arith.constant 19 : index
    %212 = vector.load %arg7[%c0_81, %c19] : memref<4x169xf32, #tpu.memory_space<vmem>>, vector<4x1xf32>
    %213 = vector.extract_strided_slice %171 {offsets = [0, 6], sizes = [4, 256], strides = [1, 1]} : vector<4x268xf32> to vector<4x256xf32>
    %214 = vector.broadcast %67 : vector<1x256xf32> to vector<4x256xf32>
    %215 = arith.mulf %213, %214 : vector<4x256xf32>
    %216 = vector.broadcast %212 : vector<4x1xf32> to vector<4x256xf32>
    %217 = arith.mulf %216, %215 : vector<4x256xf32>
    %218 = arith.addf %204, %217 : vector<4x256xf32>
    %c0_82 = arith.constant 0 : index
    %c20 = arith.constant 20 : index
    %219 = vector.load %arg7[%c0_82, %c20] : memref<4x169xf32, #tpu.memory_space<vmem>>, vector<4x1xf32>
    %220 = vector.extract_strided_slice %171 {offsets = [0, 7], sizes = [4, 256], strides = [1, 1]} : vector<4x268xf32> to vector<4x256xf32>
    %221 = vector.broadcast %69 : vector<1x256xf32> to vector<4x256xf32>
    %222 = arith.mulf %220, %221 : vector<4x256xf32>
    %223 = vector.broadcast %219 : vector<4x1xf32> to vector<4x256xf32>
    %224 = arith.mulf %223, %222 : vector<4x256xf32>
    %225 = arith.addf %211, %224 : vector<4x256xf32>
    %c0_83 = arith.constant 0 : index
    %c21 = arith.constant 21 : index
    %226 = vector.load %arg7[%c0_83, %c21] : memref<4x169xf32, #tpu.memory_space<vmem>>, vector<4x1xf32>
    %227 = vector.extract_strided_slice %171 {offsets = [0, 8], sizes = [4, 256], strides = [1, 1]} : vector<4x268xf32> to vector<4x256xf32>
    %228 = vector.broadcast %71 : vector<1x256xf32> to vector<4x256xf32>
    %229 = arith.mulf %227, %228 : vector<4x256xf32>
    %230 = vector.broadcast %226 : vector<4x1xf32> to vector<4x256xf32>
    %231 = arith.mulf %230, %229 : vector<4x256xf32>
    %232 = arith.addf %218, %231 : vector<4x256xf32>
    %c0_84 = arith.constant 0 : index
    %c22 = arith.constant 22 : index
    %233 = vector.load %arg7[%c0_84, %c22] : memref<4x169xf32, #tpu.memory_space<vmem>>, vector<4x1xf32>
    %234 = vector.extract_strided_slice %171 {offsets = [0, 9], sizes = [4, 256], strides = [1, 1]} : vector<4x268xf32> to vector<4x256xf32>
    %235 = vector.broadcast %73 : vector<1x256xf32> to vector<4x256xf32>
    %236 = arith.mulf %234, %235 : vector<4x256xf32>
    %237 = vector.broadcast %233 : vector<4x1xf32> to vector<4x256xf32>
    %238 = arith.mulf %237, %236 : vector<4x256xf32>
    %239 = arith.addf %225, %238 : vector<4x256xf32>
    %c0_85 = arith.constant 0 : index
    %c23 = arith.constant 23 : index
    %240 = vector.load %arg7[%c0_85, %c23] : memref<4x169xf32, #tpu.memory_space<vmem>>, vector<4x1xf32>
    %241 = vector.extract_strided_slice %171 {offsets = [0, 10], sizes = [4, 256], strides = [1, 1]} : vector<4x268xf32> to vector<4x256xf32>
    %242 = vector.broadcast %75 : vector<1x256xf32> to vector<4x256xf32>
    %243 = arith.mulf %241, %242 : vector<4x256xf32>
    %244 = vector.broadcast %240 : vector<4x1xf32> to vector<4x256xf32>
    %245 = arith.mulf %244, %243 : vector<4x256xf32>
    %246 = arith.addf %232, %245 : vector<4x256xf32>
    %c0_86 = arith.constant 0 : index
    %c24 = arith.constant 24 : index
    %247 = vector.load %arg7[%c0_86, %c24] : memref<4x169xf32, #tpu.memory_space<vmem>>, vector<4x1xf32>
    %248 = vector.extract_strided_slice %171 {offsets = [0, 11], sizes = [4, 256], strides = [1, 1]} : vector<4x268xf32> to vector<4x256xf32>
    %249 = vector.broadcast %77 : vector<1x256xf32> to vector<4x256xf32>
    %250 = arith.mulf %248, %249 : vector<4x256xf32>
    %251 = vector.broadcast %247 : vector<4x1xf32> to vector<4x256xf32>
    %252 = arith.mulf %251, %250 : vector<4x256xf32>
    %253 = arith.addf %239, %252 : vector<4x256xf32>
    %c0_87 = arith.constant 0 : index
    %c25 = arith.constant 25 : index
    %254 = vector.load %arg7[%c0_87, %c25] : memref<4x169xf32, #tpu.memory_space<vmem>>, vector<4x1xf32>
    %255 = vector.extract_strided_slice %171 {offsets = [0, 12], sizes = [4, 256], strides = [1, 1]} : vector<4x268xf32> to vector<4x256xf32>
    %256 = vector.broadcast %79 : vector<1x256xf32> to vector<4x256xf32>
    %257 = arith.mulf %255, %256 : vector<4x256xf32>
    %258 = vector.broadcast %254 : vector<4x1xf32> to vector<4x256xf32>
    %259 = arith.mulf %258, %257 : vector<4x256xf32>
    %260 = arith.addf %246, %259 : vector<4x256xf32>
    %261 = arith.addf %260, %253 : vector<4x256xf32>
    %c0_88 = arith.constant 0 : index
    %c32 = arith.constant 32 : index
    %262 = vector.load %arg24[%c0_88, %c32] : memref<4x460xf32, #tpu.memory_space<vmem>>, vector<4x268xf32>
    %c0_89 = arith.constant 0 : index
    %c26 = arith.constant 26 : index
    %263 = vector.load %arg7[%c0_89, %c26] : memref<4x169xf32, #tpu.memory_space<vmem>>, vector<4x1xf32>
    %264 = vector.extract_strided_slice %262 {offsets = [0, 0], sizes = [4, 256], strides = [1, 1]} : vector<4x268xf32> to vector<4x256xf32>
    %265 = vector.broadcast %55 : vector<1x256xf32> to vector<4x256xf32>
    %266 = arith.mulf %264, %265 : vector<4x256xf32>
    %267 = vector.broadcast %263 : vector<4x1xf32> to vector<4x256xf32>
    %268 = arith.mulf %267, %266 : vector<4x256xf32>
    %c0_90 = arith.constant 0 : index
    %c27 = arith.constant 27 : index
    %269 = vector.load %arg7[%c0_90, %c27] : memref<4x169xf32, #tpu.memory_space<vmem>>, vector<4x1xf32>
    %270 = vector.extract_strided_slice %262 {offsets = [0, 1], sizes = [4, 256], strides = [1, 1]} : vector<4x268xf32> to vector<4x256xf32>
    %271 = vector.broadcast %57 : vector<1x256xf32> to vector<4x256xf32>
    %272 = arith.mulf %270, %271 : vector<4x256xf32>
    %273 = vector.broadcast %269 : vector<4x1xf32> to vector<4x256xf32>
    %274 = arith.mulf %273, %272 : vector<4x256xf32>
    %c0_91 = arith.constant 0 : index
    %c28 = arith.constant 28 : index
    %275 = vector.load %arg7[%c0_91, %c28] : memref<4x169xf32, #tpu.memory_space<vmem>>, vector<4x1xf32>
    %276 = vector.extract_strided_slice %262 {offsets = [0, 2], sizes = [4, 256], strides = [1, 1]} : vector<4x268xf32> to vector<4x256xf32>
    %277 = vector.broadcast %59 : vector<1x256xf32> to vector<4x256xf32>
    %278 = arith.mulf %276, %277 : vector<4x256xf32>
    %279 = vector.broadcast %275 : vector<4x1xf32> to vector<4x256xf32>
    %280 = arith.mulf %279, %278 : vector<4x256xf32>
    %281 = arith.addf %268, %280 : vector<4x256xf32>
    %c0_92 = arith.constant 0 : index
    %c29 = arith.constant 29 : index
    %282 = vector.load %arg7[%c0_92, %c29] : memref<4x169xf32, #tpu.memory_space<vmem>>, vector<4x1xf32>
    %283 = vector.extract_strided_slice %262 {offsets = [0, 3], sizes = [4, 256], strides = [1, 1]} : vector<4x268xf32> to vector<4x256xf32>
    %284 = vector.broadcast %61 : vector<1x256xf32> to vector<4x256xf32>
    %285 = arith.mulf %283, %284 : vector<4x256xf32>
    %286 = vector.broadcast %282 : vector<4x1xf32> to vector<4x256xf32>
    %287 = arith.mulf %286, %285 : vector<4x256xf32>
    %288 = arith.addf %274, %287 : vector<4x256xf32>
    %c0_93 = arith.constant 0 : index
    %c30 = arith.constant 30 : index
    %289 = vector.load %arg7[%c0_93, %c30] : memref<4x169xf32, #tpu.memory_space<vmem>>, vector<4x1xf32>
    %290 = vector.extract_strided_slice %262 {offsets = [0, 4], sizes = [4, 256], strides = [1, 1]} : vector<4x268xf32> to vector<4x256xf32>
    %291 = vector.broadcast %63 : vector<1x256xf32> to vector<4x256xf32>
    %292 = arith.mulf %290, %291 : vector<4x256xf32>
    %293 = vector.broadcast %289 : vector<4x1xf32> to vector<4x256xf32>
    %294 = arith.mulf %293, %292 : vector<4x256xf32>
    %295 = arith.addf %281, %294 : vector<4x256xf32>
    %c0_94 = arith.constant 0 : index
    %c31 = arith.constant 31 : index
    %296 = vector.load %arg7[%c0_94, %c31] : memref<4x169xf32, #tpu.memory_space<vmem>>, vector<4x1xf32>
    %297 = vector.extract_strided_slice %262 {offsets = [0, 5], sizes = [4, 256], strides = [1, 1]} : vector<4x268xf32> to vector<4x256xf32>
    %298 = vector.broadcast %65 : vector<1x256xf32> to vector<4x256xf32>
    %299 = arith.mulf %297, %298 : vector<4x256xf32>
    %300 = vector.broadcast %296 : vector<4x1xf32> to vector<4x256xf32>
    %301 = arith.mulf %300, %299 : vector<4x256xf32>
    %302 = arith.addf %288, %301 : vector<4x256xf32>
    %c0_95 = arith.constant 0 : index
    %c32_96 = arith.constant 32 : index
    %303 = vector.load %arg7[%c0_95, %c32_96] : memref<4x169xf32, #tpu.memory_space<vmem>>, vector<4x1xf32>
    %304 = vector.extract_strided_slice %262 {offsets = [0, 6], sizes = [4, 256], strides = [1, 1]} : vector<4x268xf32> to vector<4x256xf32>
    %305 = vector.broadcast %67 : vector<1x256xf32> to vector<4x256xf32>
    %306 = arith.mulf %304, %305 : vector<4x256xf32>
    %307 = vector.broadcast %303 : vector<4x1xf32> to vector<4x256xf32>
    %308 = arith.mulf %307, %306 : vector<4x256xf32>
    %309 = arith.addf %295, %308 : vector<4x256xf32>
    %c0_97 = arith.constant 0 : index
    %c33 = arith.constant 33 : index
    %310 = vector.load %arg7[%c0_97, %c33] : memref<4x169xf32, #tpu.memory_space<vmem>>, vector<4x1xf32>
    %311 = vector.extract_strided_slice %262 {offsets = [0, 7], sizes = [4, 256], strides = [1, 1]} : vector<4x268xf32> to vector<4x256xf32>
    %312 = vector.broadcast %69 : vector<1x256xf32> to vector<4x256xf32>
    %313 = arith.mulf %311, %312 : vector<4x256xf32>
    %314 = vector.broadcast %310 : vector<4x1xf32> to vector<4x256xf32>
    %315 = arith.mulf %314, %313 : vector<4x256xf32>
    %316 = arith.addf %302, %315 : vector<4x256xf32>
    %c0_98 = arith.constant 0 : index
    %c34 = arith.constant 34 : index
    %317 = vector.load %arg7[%c0_98, %c34] : memref<4x169xf32, #tpu.memory_space<vmem>>, vector<4x1xf32>
    %318 = vector.extract_strided_slice %262 {offsets = [0, 8], sizes = [4, 256], strides = [1, 1]} : vector<4x268xf32> to vector<4x256xf32>
    %319 = vector.broadcast %71 : vector<1x256xf32> to vector<4x256xf32>
    %320 = arith.mulf %318, %319 : vector<4x256xf32>
    %321 = vector.broadcast %317 : vector<4x1xf32> to vector<4x256xf32>
    %322 = arith.mulf %321, %320 : vector<4x256xf32>
    %323 = arith.addf %309, %322 : vector<4x256xf32>
    %c0_99 = arith.constant 0 : index
    %c35 = arith.constant 35 : index
    %324 = vector.load %arg7[%c0_99, %c35] : memref<4x169xf32, #tpu.memory_space<vmem>>, vector<4x1xf32>
    %325 = vector.extract_strided_slice %262 {offsets = [0, 9], sizes = [4, 256], strides = [1, 1]} : vector<4x268xf32> to vector<4x256xf32>
    %326 = vector.broadcast %73 : vector<1x256xf32> to vector<4x256xf32>
    %327 = arith.mulf %325, %326 : vector<4x256xf32>
    %328 = vector.broadcast %324 : vector<4x1xf32> to vector<4x256xf32>
    %329 = arith.mulf %328, %327 : vector<4x256xf32>
    %330 = arith.addf %316, %329 : vector<4x256xf32>
    %c0_100 = arith.constant 0 : index
    %c36 = arith.constant 36 : index
    %331 = vector.load %arg7[%c0_100, %c36] : memref<4x169xf32, #tpu.memory_space<vmem>>, vector<4x1xf32>
    %332 = vector.extract_strided_slice %262 {offsets = [0, 10], sizes = [4, 256], strides = [1, 1]} : vector<4x268xf32> to vector<4x256xf32>
    %333 = vector.broadcast %75 : vector<1x256xf32> to vector<4x256xf32>
    %334 = arith.mulf %332, %333 : vector<4x256xf32>
    %335 = vector.broadcast %331 : vector<4x1xf32> to vector<4x256xf32>
    %336 = arith.mulf %335, %334 : vector<4x256xf32>
    %337 = arith.addf %323, %336 : vector<4x256xf32>
    %c0_101 = arith.constant 0 : index
    %c37 = arith.constant 37 : index
    %338 = vector.load %arg7[%c0_101, %c37] : memref<4x169xf32, #tpu.memory_space<vmem>>, vector<4x1xf32>
    %339 = vector.extract_strided_slice %262 {offsets = [0, 11], sizes = [4, 256], strides = [1, 1]} : vector<4x268xf32> to vector<4x256xf32>
    %340 = vector.broadcast %77 : vector<1x256xf32> to vector<4x256xf32>
    %341 = arith.mulf %339, %340 : vector<4x256xf32>
    %342 = vector.broadcast %338 : vector<4x1xf32> to vector<4x256xf32>
    %343 = arith.mulf %342, %341 : vector<4x256xf32>
    %344 = arith.addf %330, %343 : vector<4x256xf32>
    %c0_102 = arith.constant 0 : index
    %c38 = arith.constant 38 : index
    %345 = vector.load %arg7[%c0_102, %c38] : memref<4x169xf32, #tpu.memory_space<vmem>>, vector<4x1xf32>
    %346 = vector.extract_strided_slice %262 {offsets = [0, 12], sizes = [4, 256], strides = [1, 1]} : vector<4x268xf32> to vector<4x256xf32>
    %347 = vector.broadcast %79 : vector<1x256xf32> to vector<4x256xf32>
    %348 = arith.mulf %346, %347 : vector<4x256xf32>
    %349 = vector.broadcast %345 : vector<4x1xf32> to vector<4x256xf32>
    %350 = arith.mulf %349, %348 : vector<4x256xf32>
    %351 = arith.addf %337, %350 : vector<4x256xf32>
    %352 = arith.addf %351, %344 : vector<4x256xf32>
    %353 = arith.addf %170, %352 : vector<4x256xf32>
    %c0_103 = arith.constant 0 : index
    %c48 = arith.constant 48 : index
    %354 = vector.load %arg24[%c0_103, %c48] : memref<4x460xf32, #tpu.memory_space<vmem>>, vector<4x268xf32>
    %c0_104 = arith.constant 0 : index
    %c39 = arith.constant 39 : index
    %355 = vector.load %arg7[%c0_104, %c39] : memref<4x169xf32, #tpu.memory_space<vmem>>, vector<4x1xf32>
    %356 = vector.extract_strided_slice %354 {offsets = [0, 0], sizes = [4, 256], strides = [1, 1]} : vector<4x268xf32> to vector<4x256xf32>
    %357 = vector.broadcast %55 : vector<1x256xf32> to vector<4x256xf32>
    %358 = arith.mulf %356, %357 : vector<4x256xf32>
    %359 = vector.broadcast %355 : vector<4x1xf32> to vector<4x256xf32>
    %360 = arith.mulf %359, %358 : vector<4x256xf32>
    %c0_105 = arith.constant 0 : index
    %c40 = arith.constant 40 : index
    %361 = vector.load %arg7[%c0_105, %c40] : memref<4x169xf32, #tpu.memory_space<vmem>>, vector<4x1xf32>
    %362 = vector.extract_strided_slice %354 {offsets = [0, 1], sizes = [4, 256], strides = [1, 1]} : vector<4x268xf32> to vector<4x256xf32>
    %363 = vector.broadcast %57 : vector<1x256xf32> to vector<4x256xf32>
    %364 = arith.mulf %362, %363 : vector<4x256xf32>
    %365 = vector.broadcast %361 : vector<4x1xf32> to vector<4x256xf32>
    %366 = arith.mulf %365, %364 : vector<4x256xf32>
    %c0_106 = arith.constant 0 : index
    %c41 = arith.constant 41 : index
    %367 = vector.load %arg7[%c0_106, %c41] : memref<4x169xf32, #tpu.memory_space<vmem>>, vector<4x1xf32>
    %368 = vector.extract_strided_slice %354 {offsets = [0, 2], sizes = [4, 256], strides = [1, 1]} : vector<4x268xf32> to vector<4x256xf32>
    %369 = vector.broadcast %59 : vector<1x256xf32> to vector<4x256xf32>
    %370 = arith.mulf %368, %369 : vector<4x256xf32>
    %371 = vector.broadcast %367 : vector<4x1xf32> to vector<4x256xf32>
    %372 = arith.mulf %371, %370 : vector<4x256xf32>
    %373 = arith.addf %360, %372 : vector<4x256xf32>
    %c0_107 = arith.constant 0 : index
    %c42 = arith.constant 42 : index
    %374 = vector.load %arg7[%c0_107, %c42] : memref<4x169xf32, #tpu.memory_space<vmem>>, vector<4x1xf32>
    %375 = vector.extract_strided_slice %354 {offsets = [0, 3], sizes = [4, 256], strides = [1, 1]} : vector<4x268xf32> to vector<4x256xf32>
    %376 = vector.broadcast %61 : vector<1x256xf32> to vector<4x256xf32>
    %377 = arith.mulf %375, %376 : vector<4x256xf32>
    %378 = vector.broadcast %374 : vector<4x1xf32> to vector<4x256xf32>
    %379 = arith.mulf %378, %377 : vector<4x256xf32>
    %380 = arith.addf %366, %379 : vector<4x256xf32>
    %c0_108 = arith.constant 0 : index
    %c43 = arith.constant 43 : index
    %381 = vector.load %arg7[%c0_108, %c43] : memref<4x169xf32, #tpu.memory_space<vmem>>, vector<4x1xf32>
    %382 = vector.extract_strided_slice %354 {offsets = [0, 4], sizes = [4, 256], strides = [1, 1]} : vector<4x268xf32> to vector<4x256xf32>
    %383 = vector.broadcast %63 : vector<1x256xf32> to vector<4x256xf32>
    %384 = arith.mulf %382, %383 : vector<4x256xf32>
    %385 = vector.broadcast %381 : vector<4x1xf32> to vector<4x256xf32>
    %386 = arith.mulf %385, %384 : vector<4x256xf32>
    %387 = arith.addf %373, %386 : vector<4x256xf32>
    %c0_109 = arith.constant 0 : index
    %c44 = arith.constant 44 : index
    %388 = vector.load %arg7[%c0_109, %c44] : memref<4x169xf32, #tpu.memory_space<vmem>>, vector<4x1xf32>
    %389 = vector.extract_strided_slice %354 {offsets = [0, 5], sizes = [4, 256], strides = [1, 1]} : vector<4x268xf32> to vector<4x256xf32>
    %390 = vector.broadcast %65 : vector<1x256xf32> to vector<4x256xf32>
    %391 = arith.mulf %389, %390 : vector<4x256xf32>
    %392 = vector.broadcast %388 : vector<4x1xf32> to vector<4x256xf32>
    %393 = arith.mulf %392, %391 : vector<4x256xf32>
    %394 = arith.addf %380, %393 : vector<4x256xf32>
    %c0_110 = arith.constant 0 : index
    %c45 = arith.constant 45 : index
    %395 = vector.load %arg7[%c0_110, %c45] : memref<4x169xf32, #tpu.memory_space<vmem>>, vector<4x1xf32>
    %396 = vector.extract_strided_slice %354 {offsets = [0, 6], sizes = [4, 256], strides = [1, 1]} : vector<4x268xf32> to vector<4x256xf32>
    %397 = vector.broadcast %67 : vector<1x256xf32> to vector<4x256xf32>
    %398 = arith.mulf %396, %397 : vector<4x256xf32>
    %399 = vector.broadcast %395 : vector<4x1xf32> to vector<4x256xf32>
    %400 = arith.mulf %399, %398 : vector<4x256xf32>
    %401 = arith.addf %387, %400 : vector<4x256xf32>
    %c0_111 = arith.constant 0 : index
    %c46 = arith.constant 46 : index
    %402 = vector.load %arg7[%c0_111, %c46] : memref<4x169xf32, #tpu.memory_space<vmem>>, vector<4x1xf32>
    %403 = vector.extract_strided_slice %354 {offsets = [0, 7], sizes = [4, 256], strides = [1, 1]} : vector<4x268xf32> to vector<4x256xf32>
    %404 = vector.broadcast %69 : vector<1x256xf32> to vector<4x256xf32>
    %405 = arith.mulf %403, %404 : vector<4x256xf32>
    %406 = vector.broadcast %402 : vector<4x1xf32> to vector<4x256xf32>
    %407 = arith.mulf %406, %405 : vector<4x256xf32>
    %408 = arith.addf %394, %407 : vector<4x256xf32>
    %c0_112 = arith.constant 0 : index
    %c47 = arith.constant 47 : index
    %409 = vector.load %arg7[%c0_112, %c47] : memref<4x169xf32, #tpu.memory_space<vmem>>, vector<4x1xf32>
    %410 = vector.extract_strided_slice %354 {offsets = [0, 8], sizes = [4, 256], strides = [1, 1]} : vector<4x268xf32> to vector<4x256xf32>
    %411 = vector.broadcast %71 : vector<1x256xf32> to vector<4x256xf32>
    %412 = arith.mulf %410, %411 : vector<4x256xf32>
    %413 = vector.broadcast %409 : vector<4x1xf32> to vector<4x256xf32>
    %414 = arith.mulf %413, %412 : vector<4x256xf32>
    %415 = arith.addf %401, %414 : vector<4x256xf32>
    %c0_113 = arith.constant 0 : index
    %c48_114 = arith.constant 48 : index
    %416 = vector.load %arg7[%c0_113, %c48_114] : memref<4x169xf32, #tpu.memory_space<vmem>>, vector<4x1xf32>
    %417 = vector.extract_strided_slice %354 {offsets = [0, 9], sizes = [4, 256], strides = [1, 1]} : vector<4x268xf32> to vector<4x256xf32>
    %418 = vector.broadcast %73 : vector<1x256xf32> to vector<4x256xf32>
    %419 = arith.mulf %417, %418 : vector<4x256xf32>
    %420 = vector.broadcast %416 : vector<4x1xf32> to vector<4x256xf32>
    %421 = arith.mulf %420, %419 : vector<4x256xf32>
    %422 = arith.addf %408, %421 : vector<4x256xf32>
    %c0_115 = arith.constant 0 : index
    %c49 = arith.constant 49 : index
    %423 = vector.load %arg7[%c0_115, %c49] : memref<4x169xf32, #tpu.memory_space<vmem>>, vector<4x1xf32>
    %424 = vector.extract_strided_slice %354 {offsets = [0, 10], sizes = [4, 256], strides = [1, 1]} : vector<4x268xf32> to vector<4x256xf32>
    %425 = vector.broadcast %75 : vector<1x256xf32> to vector<4x256xf32>
    %426 = arith.mulf %424, %425 : vector<4x256xf32>
    %427 = vector.broadcast %423 : vector<4x1xf32> to vector<4x256xf32>
    %428 = arith.mulf %427, %426 : vector<4x256xf32>
    %429 = arith.addf %415, %428 : vector<4x256xf32>
    %c0_116 = arith.constant 0 : index
    %c50 = arith.constant 50 : index
    %430 = vector.load %arg7[%c0_116, %c50] : memref<4x169xf32, #tpu.memory_space<vmem>>, vector<4x1xf32>
    %431 = vector.extract_strided_slice %354 {offsets = [0, 11], sizes = [4, 256], strides = [1, 1]} : vector<4x268xf32> to vector<4x256xf32>
    %432 = vector.broadcast %77 : vector<1x256xf32> to vector<4x256xf32>
    %433 = arith.mulf %431, %432 : vector<4x256xf32>
    %434 = vector.broadcast %430 : vector<4x1xf32> to vector<4x256xf32>
    %435 = arith.mulf %434, %433 : vector<4x256xf32>
    %436 = arith.addf %422, %435 : vector<4x256xf32>
    %c0_117 = arith.constant 0 : index
    %c51 = arith.constant 51 : index
    %437 = vector.load %arg7[%c0_117, %c51] : memref<4x169xf32, #tpu.memory_space<vmem>>, vector<4x1xf32>
    %438 = vector.extract_strided_slice %354 {offsets = [0, 12], sizes = [4, 256], strides = [1, 1]} : vector<4x268xf32> to vector<4x256xf32>
    %439 = vector.broadcast %79 : vector<1x256xf32> to vector<4x256xf32>
    %440 = arith.mulf %438, %439 : vector<4x256xf32>
    %441 = vector.broadcast %437 : vector<4x1xf32> to vector<4x256xf32>
    %442 = arith.mulf %441, %440 : vector<4x256xf32>
    %443 = arith.addf %429, %442 : vector<4x256xf32>
    %444 = arith.addf %443, %436 : vector<4x256xf32>
    %445 = arith.addf %261, %444 : vector<4x256xf32>
    %c0_118 = arith.constant 0 : index
    %c64 = arith.constant 64 : index
    %446 = vector.load %arg24[%c0_118, %c64] : memref<4x460xf32, #tpu.memory_space<vmem>>, vector<4x268xf32>
    %c0_119 = arith.constant 0 : index
    %c52 = arith.constant 52 : index
    %447 = vector.load %arg7[%c0_119, %c52] : memref<4x169xf32, #tpu.memory_space<vmem>>, vector<4x1xf32>
    %448 = vector.extract_strided_slice %446 {offsets = [0, 0], sizes = [4, 256], strides = [1, 1]} : vector<4x268xf32> to vector<4x256xf32>
    %449 = vector.broadcast %55 : vector<1x256xf32> to vector<4x256xf32>
    %450 = arith.mulf %448, %449 : vector<4x256xf32>
    %451 = vector.broadcast %447 : vector<4x1xf32> to vector<4x256xf32>
    %452 = arith.mulf %451, %450 : vector<4x256xf32>
    %c0_120 = arith.constant 0 : index
    %c53 = arith.constant 53 : index
    %453 = vector.load %arg7[%c0_120, %c53] : memref<4x169xf32, #tpu.memory_space<vmem>>, vector<4x1xf32>
    %454 = vector.extract_strided_slice %446 {offsets = [0, 1], sizes = [4, 256], strides = [1, 1]} : vector<4x268xf32> to vector<4x256xf32>
    %455 = vector.broadcast %57 : vector<1x256xf32> to vector<4x256xf32>
    %456 = arith.mulf %454, %455 : vector<4x256xf32>
    %457 = vector.broadcast %453 : vector<4x1xf32> to vector<4x256xf32>
    %458 = arith.mulf %457, %456 : vector<4x256xf32>
    %c0_121 = arith.constant 0 : index
    %c54 = arith.constant 54 : index
    %459 = vector.load %arg7[%c0_121, %c54] : memref<4x169xf32, #tpu.memory_space<vmem>>, vector<4x1xf32>
    %460 = vector.extract_strided_slice %446 {offsets = [0, 2], sizes = [4, 256], strides = [1, 1]} : vector<4x268xf32> to vector<4x256xf32>
    %461 = vector.broadcast %59 : vector<1x256xf32> to vector<4x256xf32>
    %462 = arith.mulf %460, %461 : vector<4x256xf32>
    %463 = vector.broadcast %459 : vector<4x1xf32> to vector<4x256xf32>
    %464 = arith.mulf %463, %462 : vector<4x256xf32>
    %465 = arith.addf %452, %464 : vector<4x256xf32>
    %c0_122 = arith.constant 0 : index
    %c55 = arith.constant 55 : index
    %466 = vector.load %arg7[%c0_122, %c55] : memref<4x169xf32, #tpu.memory_space<vmem>>, vector<4x1xf32>
    %467 = vector.extract_strided_slice %446 {offsets = [0, 3], sizes = [4, 256], strides = [1, 1]} : vector<4x268xf32> to vector<4x256xf32>
    %468 = vector.broadcast %61 : vector<1x256xf32> to vector<4x256xf32>
    %469 = arith.mulf %467, %468 : vector<4x256xf32>
    %470 = vector.broadcast %466 : vector<4x1xf32> to vector<4x256xf32>
    %471 = arith.mulf %470, %469 : vector<4x256xf32>
    %472 = arith.addf %458, %471 : vector<4x256xf32>
    %c0_123 = arith.constant 0 : index
    %c56 = arith.constant 56 : index
    %473 = vector.load %arg7[%c0_123, %c56] : memref<4x169xf32, #tpu.memory_space<vmem>>, vector<4x1xf32>
    %474 = vector.extract_strided_slice %446 {offsets = [0, 4], sizes = [4, 256], strides = [1, 1]} : vector<4x268xf32> to vector<4x256xf32>
    %475 = vector.broadcast %63 : vector<1x256xf32> to vector<4x256xf32>
    %476 = arith.mulf %474, %475 : vector<4x256xf32>
    %477 = vector.broadcast %473 : vector<4x1xf32> to vector<4x256xf32>
    %478 = arith.mulf %477, %476 : vector<4x256xf32>
    %479 = arith.addf %465, %478 : vector<4x256xf32>
    %c0_124 = arith.constant 0 : index
    %c57 = arith.constant 57 : index
    %480 = vector.load %arg7[%c0_124, %c57] : memref<4x169xf32, #tpu.memory_space<vmem>>, vector<4x1xf32>
    %481 = vector.extract_strided_slice %446 {offsets = [0, 5], sizes = [4, 256], strides = [1, 1]} : vector<4x268xf32> to vector<4x256xf32>
    %482 = vector.broadcast %65 : vector<1x256xf32> to vector<4x256xf32>
    %483 = arith.mulf %481, %482 : vector<4x256xf32>
    %484 = vector.broadcast %480 : vector<4x1xf32> to vector<4x256xf32>
    %485 = arith.mulf %484, %483 : vector<4x256xf32>
    %486 = arith.addf %472, %485 : vector<4x256xf32>
    %c0_125 = arith.constant 0 : index
    %c58 = arith.constant 58 : index
    %487 = vector.load %arg7[%c0_125, %c58] : memref<4x169xf32, #tpu.memory_space<vmem>>, vector<4x1xf32>
    %488 = vector.extract_strided_slice %446 {offsets = [0, 6], sizes = [4, 256], strides = [1, 1]} : vector<4x268xf32> to vector<4x256xf32>
    %489 = vector.broadcast %67 : vector<1x256xf32> to vector<4x256xf32>
    %490 = arith.mulf %488, %489 : vector<4x256xf32>
    %491 = vector.broadcast %487 : vector<4x1xf32> to vector<4x256xf32>
    %492 = arith.mulf %491, %490 : vector<4x256xf32>
    %493 = arith.addf %479, %492 : vector<4x256xf32>
    %c0_126 = arith.constant 0 : index
    %c59 = arith.constant 59 : index
    %494 = vector.load %arg7[%c0_126, %c59] : memref<4x169xf32, #tpu.memory_space<vmem>>, vector<4x1xf32>
    %495 = vector.extract_strided_slice %446 {offsets = [0, 7], sizes = [4, 256], strides = [1, 1]} : vector<4x268xf32> to vector<4x256xf32>
    %496 = vector.broadcast %69 : vector<1x256xf32> to vector<4x256xf32>
    %497 = arith.mulf %495, %496 : vector<4x256xf32>
    %498 = vector.broadcast %494 : vector<4x1xf32> to vector<4x256xf32>
    %499 = arith.mulf %498, %497 : vector<4x256xf32>
    %500 = arith.addf %486, %499 : vector<4x256xf32>
    %c0_127 = arith.constant 0 : index
    %c60 = arith.constant 60 : index
    %501 = vector.load %arg7[%c0_127, %c60] : memref<4x169xf32, #tpu.memory_space<vmem>>, vector<4x1xf32>
    %502 = vector.extract_strided_slice %446 {offsets = [0, 8], sizes = [4, 256], strides = [1, 1]} : vector<4x268xf32> to vector<4x256xf32>
    %503 = vector.broadcast %71 : vector<1x256xf32> to vector<4x256xf32>
    %504 = arith.mulf %502, %503 : vector<4x256xf32>
    %505 = vector.broadcast %501 : vector<4x1xf32> to vector<4x256xf32>
    %506 = arith.mulf %505, %504 : vector<4x256xf32>
    %507 = arith.addf %493, %506 : vector<4x256xf32>
    %c0_128 = arith.constant 0 : index
    %c61 = arith.constant 61 : index
    %508 = vector.load %arg7[%c0_128, %c61] : memref<4x169xf32, #tpu.memory_space<vmem>>, vector<4x1xf32>
    %509 = vector.extract_strided_slice %446 {offsets = [0, 9], sizes = [4, 256], strides = [1, 1]} : vector<4x268xf32> to vector<4x256xf32>
    %510 = vector.broadcast %73 : vector<1x256xf32> to vector<4x256xf32>
    %511 = arith.mulf %509, %510 : vector<4x256xf32>
    %512 = vector.broadcast %508 : vector<4x1xf32> to vector<4x256xf32>
    %513 = arith.mulf %512, %511 : vector<4x256xf32>
    %514 = arith.addf %500, %513 : vector<4x256xf32>
    %c0_129 = arith.constant 0 : index
    %c62 = arith.constant 62 : index
    %515 = vector.load %arg7[%c0_129, %c62] : memref<4x169xf32, #tpu.memory_space<vmem>>, vector<4x1xf32>
    %516 = vector.extract_strided_slice %446 {offsets = [0, 10], sizes = [4, 256], strides = [1, 1]} : vector<4x268xf32> to vector<4x256xf32>
    %517 = vector.broadcast %75 : vector<1x256xf32> to vector<4x256xf32>
    %518 = arith.mulf %516, %517 : vector<4x256xf32>
    %519 = vector.broadcast %515 : vector<4x1xf32> to vector<4x256xf32>
    %520 = arith.mulf %519, %518 : vector<4x256xf32>
    %521 = arith.addf %507, %520 : vector<4x256xf32>
    %c0_130 = arith.constant 0 : index
    %c63 = arith.constant 63 : index
    %522 = vector.load %arg7[%c0_130, %c63] : memref<4x169xf32, #tpu.memory_space<vmem>>, vector<4x1xf32>
    %523 = vector.extract_strided_slice %446 {offsets = [0, 11], sizes = [4, 256], strides = [1, 1]} : vector<4x268xf32> to vector<4x256xf32>
    %524 = vector.broadcast %77 : vector<1x256xf32> to vector<4x256xf32>
    %525 = arith.mulf %523, %524 : vector<4x256xf32>
    %526 = vector.broadcast %522 : vector<4x1xf32> to vector<4x256xf32>
    %527 = arith.mulf %526, %525 : vector<4x256xf32>
    %528 = arith.addf %514, %527 : vector<4x256xf32>
    %c0_131 = arith.constant 0 : index
    %c64_132 = arith.constant 64 : index
    %529 = vector.load %arg7[%c0_131, %c64_132] : memref<4x169xf32, #tpu.memory_space<vmem>>, vector<4x1xf32>
    %530 = vector.extract_strided_slice %446 {offsets = [0, 12], sizes = [4, 256], strides = [1, 1]} : vector<4x268xf32> to vector<4x256xf32>
    %531 = vector.broadcast %79 : vector<1x256xf32> to vector<4x256xf32>
    %532 = arith.mulf %530, %531 : vector<4x256xf32>
    %533 = vector.broadcast %529 : vector<4x1xf32> to vector<4x256xf32>
    %534 = arith.mulf %533, %532 : vector<4x256xf32>
    %535 = arith.addf %521, %534 : vector<4x256xf32>
    %536 = arith.addf %535, %528 : vector<4x256xf32>
    %537 = arith.addf %353, %536 : vector<4x256xf32>
    %c0_133 = arith.constant 0 : index
    %c80 = arith.constant 80 : index
    %538 = vector.load %arg24[%c0_133, %c80] : memref<4x460xf32, #tpu.memory_space<vmem>>, vector<4x268xf32>
    %c0_134 = arith.constant 0 : index
    %c65 = arith.constant 65 : index
    %539 = vector.load %arg7[%c0_134, %c65] : memref<4x169xf32, #tpu.memory_space<vmem>>, vector<4x1xf32>
    %540 = vector.extract_strided_slice %538 {offsets = [0, 0], sizes = [4, 256], strides = [1, 1]} : vector<4x268xf32> to vector<4x256xf32>
    %541 = vector.broadcast %55 : vector<1x256xf32> to vector<4x256xf32>
    %542 = arith.mulf %540, %541 : vector<4x256xf32>
    %543 = vector.broadcast %539 : vector<4x1xf32> to vector<4x256xf32>
    %544 = arith.mulf %543, %542 : vector<4x256xf32>
    %c0_135 = arith.constant 0 : index
    %c66 = arith.constant 66 : index
    %545 = vector.load %arg7[%c0_135, %c66] : memref<4x169xf32, #tpu.memory_space<vmem>>, vector<4x1xf32>
    %546 = vector.extract_strided_slice %538 {offsets = [0, 1], sizes = [4, 256], strides = [1, 1]} : vector<4x268xf32> to vector<4x256xf32>
    %547 = vector.broadcast %57 : vector<1x256xf32> to vector<4x256xf32>
    %548 = arith.mulf %546, %547 : vector<4x256xf32>
    %549 = vector.broadcast %545 : vector<4x1xf32> to vector<4x256xf32>
    %550 = arith.mulf %549, %548 : vector<4x256xf32>
    %c0_136 = arith.constant 0 : index
    %c67 = arith.constant 67 : index
    %551 = vector.load %arg7[%c0_136, %c67] : memref<4x169xf32, #tpu.memory_space<vmem>>, vector<4x1xf32>
    %552 = vector.extract_strided_slice %538 {offsets = [0, 2], sizes = [4, 256], strides = [1, 1]} : vector<4x268xf32> to vector<4x256xf32>
    %553 = vector.broadcast %59 : vector<1x256xf32> to vector<4x256xf32>
    %554 = arith.mulf %552, %553 : vector<4x256xf32>
    %555 = vector.broadcast %551 : vector<4x1xf32> to vector<4x256xf32>
    %556 = arith.mulf %555, %554 : vector<4x256xf32>
    %557 = arith.addf %544, %556 : vector<4x256xf32>
    %c0_137 = arith.constant 0 : index
    %c68 = arith.constant 68 : index
    %558 = vector.load %arg7[%c0_137, %c68] : memref<4x169xf32, #tpu.memory_space<vmem>>, vector<4x1xf32>
    %559 = vector.extract_strided_slice %538 {offsets = [0, 3], sizes = [4, 256], strides = [1, 1]} : vector<4x268xf32> to vector<4x256xf32>
    %560 = vector.broadcast %61 : vector<1x256xf32> to vector<4x256xf32>
    %561 = arith.mulf %559, %560 : vector<4x256xf32>
    %562 = vector.broadcast %558 : vector<4x1xf32> to vector<4x256xf32>
    %563 = arith.mulf %562, %561 : vector<4x256xf32>
    %564 = arith.addf %550, %563 : vector<4x256xf32>
    %c0_138 = arith.constant 0 : index
    %c69 = arith.constant 69 : index
    %565 = vector.load %arg7[%c0_138, %c69] : memref<4x169xf32, #tpu.memory_space<vmem>>, vector<4x1xf32>
    %566 = vector.extract_strided_slice %538 {offsets = [0, 4], sizes = [4, 256], strides = [1, 1]} : vector<4x268xf32> to vector<4x256xf32>
    %567 = vector.broadcast %63 : vector<1x256xf32> to vector<4x256xf32>
    %568 = arith.mulf %566, %567 : vector<4x256xf32>
    %569 = vector.broadcast %565 : vector<4x1xf32> to vector<4x256xf32>
    %570 = arith.mulf %569, %568 : vector<4x256xf32>
    %571 = arith.addf %557, %570 : vector<4x256xf32>
    %c0_139 = arith.constant 0 : index
    %c70 = arith.constant 70 : index
    %572 = vector.load %arg7[%c0_139, %c70] : memref<4x169xf32, #tpu.memory_space<vmem>>, vector<4x1xf32>
    %573 = vector.extract_strided_slice %538 {offsets = [0, 5], sizes = [4, 256], strides = [1, 1]} : vector<4x268xf32> to vector<4x256xf32>
    %574 = vector.broadcast %65 : vector<1x256xf32> to vector<4x256xf32>
    %575 = arith.mulf %573, %574 : vector<4x256xf32>
    %576 = vector.broadcast %572 : vector<4x1xf32> to vector<4x256xf32>
    %577 = arith.mulf %576, %575 : vector<4x256xf32>
    %578 = arith.addf %564, %577 : vector<4x256xf32>
    %c0_140 = arith.constant 0 : index
    %c71 = arith.constant 71 : index
    %579 = vector.load %arg7[%c0_140, %c71] : memref<4x169xf32, #tpu.memory_space<vmem>>, vector<4x1xf32>
    %580 = vector.extract_strided_slice %538 {offsets = [0, 6], sizes = [4, 256], strides = [1, 1]} : vector<4x268xf32> to vector<4x256xf32>
    %581 = vector.broadcast %67 : vector<1x256xf32> to vector<4x256xf32>
    %582 = arith.mulf %580, %581 : vector<4x256xf32>
    %583 = vector.broadcast %579 : vector<4x1xf32> to vector<4x256xf32>
    %584 = arith.mulf %583, %582 : vector<4x256xf32>
    %585 = arith.addf %571, %584 : vector<4x256xf32>
    %c0_141 = arith.constant 0 : index
    %c72 = arith.constant 72 : index
    %586 = vector.load %arg7[%c0_141, %c72] : memref<4x169xf32, #tpu.memory_space<vmem>>, vector<4x1xf32>
    %587 = vector.extract_strided_slice %538 {offsets = [0, 7], sizes = [4, 256], strides = [1, 1]} : vector<4x268xf32> to vector<4x256xf32>
    %588 = vector.broadcast %69 : vector<1x256xf32> to vector<4x256xf32>
    %589 = arith.mulf %587, %588 : vector<4x256xf32>
    %590 = vector.broadcast %586 : vector<4x1xf32> to vector<4x256xf32>
    %591 = arith.mulf %590, %589 : vector<4x256xf32>
    %592 = arith.addf %578, %591 : vector<4x256xf32>
    %c0_142 = arith.constant 0 : index
    %c73 = arith.constant 73 : index
    %593 = vector.load %arg7[%c0_142, %c73] : memref<4x169xf32, #tpu.memory_space<vmem>>, vector<4x1xf32>
    %594 = vector.extract_strided_slice %538 {offsets = [0, 8], sizes = [4, 256], strides = [1, 1]} : vector<4x268xf32> to vector<4x256xf32>
    %595 = vector.broadcast %71 : vector<1x256xf32> to vector<4x256xf32>
    %596 = arith.mulf %594, %595 : vector<4x256xf32>
    %597 = vector.broadcast %593 : vector<4x1xf32> to vector<4x256xf32>
    %598 = arith.mulf %597, %596 : vector<4x256xf32>
    %599 = arith.addf %585, %598 : vector<4x256xf32>
    %c0_143 = arith.constant 0 : index
    %c74 = arith.constant 74 : index
    %600 = vector.load %arg7[%c0_143, %c74] : memref<4x169xf32, #tpu.memory_space<vmem>>, vector<4x1xf32>
    %601 = vector.extract_strided_slice %538 {offsets = [0, 9], sizes = [4, 256], strides = [1, 1]} : vector<4x268xf32> to vector<4x256xf32>
    %602 = vector.broadcast %73 : vector<1x256xf32> to vector<4x256xf32>
    %603 = arith.mulf %601, %602 : vector<4x256xf32>
    %604 = vector.broadcast %600 : vector<4x1xf32> to vector<4x256xf32>
    %605 = arith.mulf %604, %603 : vector<4x256xf32>
    %606 = arith.addf %592, %605 : vector<4x256xf32>
    %c0_144 = arith.constant 0 : index
    %c75 = arith.constant 75 : index
    %607 = vector.load %arg7[%c0_144, %c75] : memref<4x169xf32, #tpu.memory_space<vmem>>, vector<4x1xf32>
    %608 = vector.extract_strided_slice %538 {offsets = [0, 10], sizes = [4, 256], strides = [1, 1]} : vector<4x268xf32> to vector<4x256xf32>
    %609 = vector.broadcast %75 : vector<1x256xf32> to vector<4x256xf32>
    %610 = arith.mulf %608, %609 : vector<4x256xf32>
    %611 = vector.broadcast %607 : vector<4x1xf32> to vector<4x256xf32>
    %612 = arith.mulf %611, %610 : vector<4x256xf32>
    %613 = arith.addf %599, %612 : vector<4x256xf32>
    %c0_145 = arith.constant 0 : index
    %c76 = arith.constant 76 : index
    %614 = vector.load %arg7[%c0_145, %c76] : memref<4x169xf32, #tpu.memory_space<vmem>>, vector<4x1xf32>
    %615 = vector.extract_strided_slice %538 {offsets = [0, 11], sizes = [4, 256], strides = [1, 1]} : vector<4x268xf32> to vector<4x256xf32>
    %616 = vector.broadcast %77 : vector<1x256xf32> to vector<4x256xf32>
    %617 = arith.mulf %615, %616 : vector<4x256xf32>
    %618 = vector.broadcast %614 : vector<4x1xf32> to vector<4x256xf32>
    %619 = arith.mulf %618, %617 : vector<4x256xf32>
    %620 = arith.addf %606, %619 : vector<4x256xf32>
    %c0_146 = arith.constant 0 : index
    %c77 = arith.constant 77 : index
    %621 = vector.load %arg7[%c0_146, %c77] : memref<4x169xf32, #tpu.memory_space<vmem>>, vector<4x1xf32>
    %622 = vector.extract_strided_slice %538 {offsets = [0, 12], sizes = [4, 256], strides = [1, 1]} : vector<4x268xf32> to vector<4x256xf32>
    %623 = vector.broadcast %79 : vector<1x256xf32> to vector<4x256xf32>
    %624 = arith.mulf %622, %623 : vector<4x256xf32>
    %625 = vector.broadcast %621 : vector<4x1xf32> to vector<4x256xf32>
    %626 = arith.mulf %625, %624 : vector<4x256xf32>
    %627 = arith.addf %613, %626 : vector<4x256xf32>
    %628 = arith.addf %627, %620 : vector<4x256xf32>
    %629 = arith.addf %445, %628 : vector<4x256xf32>
    %c0_147 = arith.constant 0 : index
    %c96 = arith.constant 96 : index
    %630 = vector.load %arg24[%c0_147, %c96] : memref<4x460xf32, #tpu.memory_space<vmem>>, vector<4x268xf32>
    %c0_148 = arith.constant 0 : index
    %c78 = arith.constant 78 : index
    %631 = vector.load %arg7[%c0_148, %c78] : memref<4x169xf32, #tpu.memory_space<vmem>>, vector<4x1xf32>
    %632 = vector.extract_strided_slice %630 {offsets = [0, 0], sizes = [4, 256], strides = [1, 1]} : vector<4x268xf32> to vector<4x256xf32>
    %633 = vector.broadcast %55 : vector<1x256xf32> to vector<4x256xf32>
    %634 = arith.mulf %632, %633 : vector<4x256xf32>
    %635 = vector.broadcast %631 : vector<4x1xf32> to vector<4x256xf32>
    %636 = arith.mulf %635, %634 : vector<4x256xf32>
    %c0_149 = arith.constant 0 : index
    %c79 = arith.constant 79 : index
    %637 = vector.load %arg7[%c0_149, %c79] : memref<4x169xf32, #tpu.memory_space<vmem>>, vector<4x1xf32>
    %638 = vector.extract_strided_slice %630 {offsets = [0, 1], sizes = [4, 256], strides = [1, 1]} : vector<4x268xf32> to vector<4x256xf32>
    %639 = vector.broadcast %57 : vector<1x256xf32> to vector<4x256xf32>
    %640 = arith.mulf %638, %639 : vector<4x256xf32>
    %641 = vector.broadcast %637 : vector<4x1xf32> to vector<4x256xf32>
    %642 = arith.mulf %641, %640 : vector<4x256xf32>
    %c0_150 = arith.constant 0 : index
    %c80_151 = arith.constant 80 : index
    %643 = vector.load %arg7[%c0_150, %c80_151] : memref<4x169xf32, #tpu.memory_space<vmem>>, vector<4x1xf32>
    %644 = vector.extract_strided_slice %630 {offsets = [0, 2], sizes = [4, 256], strides = [1, 1]} : vector<4x268xf32> to vector<4x256xf32>
    %645 = vector.broadcast %59 : vector<1x256xf32> to vector<4x256xf32>
    %646 = arith.mulf %644, %645 : vector<4x256xf32>
    %647 = vector.broadcast %643 : vector<4x1xf32> to vector<4x256xf32>
    %648 = arith.mulf %647, %646 : vector<4x256xf32>
    %649 = arith.addf %636, %648 : vector<4x256xf32>
    %c0_152 = arith.constant 0 : index
    %c81 = arith.constant 81 : index
    %650 = vector.load %arg7[%c0_152, %c81] : memref<4x169xf32, #tpu.memory_space<vmem>>, vector<4x1xf32>
    %651 = vector.extract_strided_slice %630 {offsets = [0, 3], sizes = [4, 256], strides = [1, 1]} : vector<4x268xf32> to vector<4x256xf32>
    %652 = vector.broadcast %61 : vector<1x256xf32> to vector<4x256xf32>
    %653 = arith.mulf %651, %652 : vector<4x256xf32>
    %654 = vector.broadcast %650 : vector<4x1xf32> to vector<4x256xf32>
    %655 = arith.mulf %654, %653 : vector<4x256xf32>
    %656 = arith.addf %642, %655 : vector<4x256xf32>
    %c0_153 = arith.constant 0 : index
    %c82 = arith.constant 82 : index
    %657 = vector.load %arg7[%c0_153, %c82] : memref<4x169xf32, #tpu.memory_space<vmem>>, vector<4x1xf32>
    %658 = vector.extract_strided_slice %630 {offsets = [0, 4], sizes = [4, 256], strides = [1, 1]} : vector<4x268xf32> to vector<4x256xf32>
    %659 = vector.broadcast %63 : vector<1x256xf32> to vector<4x256xf32>
    %660 = arith.mulf %658, %659 : vector<4x256xf32>
    %661 = vector.broadcast %657 : vector<4x1xf32> to vector<4x256xf32>
    %662 = arith.mulf %661, %660 : vector<4x256xf32>
    %663 = arith.addf %649, %662 : vector<4x256xf32>
    %c0_154 = arith.constant 0 : index
    %c83 = arith.constant 83 : index
    %664 = vector.load %arg7[%c0_154, %c83] : memref<4x169xf32, #tpu.memory_space<vmem>>, vector<4x1xf32>
    %665 = vector.extract_strided_slice %630 {offsets = [0, 5], sizes = [4, 256], strides = [1, 1]} : vector<4x268xf32> to vector<4x256xf32>
    %666 = vector.broadcast %65 : vector<1x256xf32> to vector<4x256xf32>
    %667 = arith.mulf %665, %666 : vector<4x256xf32>
    %668 = vector.broadcast %664 : vector<4x1xf32> to vector<4x256xf32>
    %669 = arith.mulf %668, %667 : vector<4x256xf32>
    %670 = arith.addf %656, %669 : vector<4x256xf32>
    %c0_155 = arith.constant 0 : index
    %c84 = arith.constant 84 : index
    %671 = vector.load %arg7[%c0_155, %c84] : memref<4x169xf32, #tpu.memory_space<vmem>>, vector<4x1xf32>
    %672 = vector.extract_strided_slice %630 {offsets = [0, 6], sizes = [4, 256], strides = [1, 1]} : vector<4x268xf32> to vector<4x256xf32>
    %673 = vector.broadcast %67 : vector<1x256xf32> to vector<4x256xf32>
    %674 = arith.mulf %672, %673 : vector<4x256xf32>
    %675 = vector.broadcast %671 : vector<4x1xf32> to vector<4x256xf32>
    %676 = arith.mulf %675, %674 : vector<4x256xf32>
    %677 = arith.addf %663, %676 : vector<4x256xf32>
    %c0_156 = arith.constant 0 : index
    %c85 = arith.constant 85 : index
    %678 = vector.load %arg7[%c0_156, %c85] : memref<4x169xf32, #tpu.memory_space<vmem>>, vector<4x1xf32>
    %679 = vector.extract_strided_slice %630 {offsets = [0, 7], sizes = [4, 256], strides = [1, 1]} : vector<4x268xf32> to vector<4x256xf32>
    %680 = vector.broadcast %69 : vector<1x256xf32> to vector<4x256xf32>
    %681 = arith.mulf %679, %680 : vector<4x256xf32>
    %682 = vector.broadcast %678 : vector<4x1xf32> to vector<4x256xf32>
    %683 = arith.mulf %682, %681 : vector<4x256xf32>
    %684 = arith.addf %670, %683 : vector<4x256xf32>
    %c0_157 = arith.constant 0 : index
    %c86 = arith.constant 86 : index
    %685 = vector.load %arg7[%c0_157, %c86] : memref<4x169xf32, #tpu.memory_space<vmem>>, vector<4x1xf32>
    %686 = vector.extract_strided_slice %630 {offsets = [0, 8], sizes = [4, 256], strides = [1, 1]} : vector<4x268xf32> to vector<4x256xf32>
    %687 = vector.broadcast %71 : vector<1x256xf32> to vector<4x256xf32>
    %688 = arith.mulf %686, %687 : vector<4x256xf32>
    %689 = vector.broadcast %685 : vector<4x1xf32> to vector<4x256xf32>
    %690 = arith.mulf %689, %688 : vector<4x256xf32>
    %691 = arith.addf %677, %690 : vector<4x256xf32>
    %c0_158 = arith.constant 0 : index
    %c87 = arith.constant 87 : index
    %692 = vector.load %arg7[%c0_158, %c87] : memref<4x169xf32, #tpu.memory_space<vmem>>, vector<4x1xf32>
    %693 = vector.extract_strided_slice %630 {offsets = [0, 9], sizes = [4, 256], strides = [1, 1]} : vector<4x268xf32> to vector<4x256xf32>
    %694 = vector.broadcast %73 : vector<1x256xf32> to vector<4x256xf32>
    %695 = arith.mulf %693, %694 : vector<4x256xf32>
    %696 = vector.broadcast %692 : vector<4x1xf32> to vector<4x256xf32>
    %697 = arith.mulf %696, %695 : vector<4x256xf32>
    %698 = arith.addf %684, %697 : vector<4x256xf32>
    %c0_159 = arith.constant 0 : index
    %c88 = arith.constant 88 : index
    %699 = vector.load %arg7[%c0_159, %c88] : memref<4x169xf32, #tpu.memory_space<vmem>>, vector<4x1xf32>
    %700 = vector.extract_strided_slice %630 {offsets = [0, 10], sizes = [4, 256], strides = [1, 1]} : vector<4x268xf32> to vector<4x256xf32>
    %701 = vector.broadcast %75 : vector<1x256xf32> to vector<4x256xf32>
    %702 = arith.mulf %700, %701 : vector<4x256xf32>
    %703 = vector.broadcast %699 : vector<4x1xf32> to vector<4x256xf32>
    %704 = arith.mulf %703, %702 : vector<4x256xf32>
    %705 = arith.addf %691, %704 : vector<4x256xf32>
    %c0_160 = arith.constant 0 : index
    %c89 = arith.constant 89 : index
    %706 = vector.load %arg7[%c0_160, %c89] : memref<4x169xf32, #tpu.memory_space<vmem>>, vector<4x1xf32>
    %707 = vector.extract_strided_slice %630 {offsets = [0, 11], sizes = [4, 256], strides = [1, 1]} : vector<4x268xf32> to vector<4x256xf32>
    %708 = vector.broadcast %77 : vector<1x256xf32> to vector<4x256xf32>
    %709 = arith.mulf %707, %708 : vector<4x256xf32>
    %710 = vector.broadcast %706 : vector<4x1xf32> to vector<4x256xf32>
    %711 = arith.mulf %710, %709 : vector<4x256xf32>
    %712 = arith.addf %698, %711 : vector<4x256xf32>
    %c0_161 = arith.constant 0 : index
    %c90 = arith.constant 90 : index
    %713 = vector.load %arg7[%c0_161, %c90] : memref<4x169xf32, #tpu.memory_space<vmem>>, vector<4x1xf32>
    %714 = vector.extract_strided_slice %630 {offsets = [0, 12], sizes = [4, 256], strides = [1, 1]} : vector<4x268xf32> to vector<4x256xf32>
    %715 = vector.broadcast %79 : vector<1x256xf32> to vector<4x256xf32>
    %716 = arith.mulf %714, %715 : vector<4x256xf32>
    %717 = vector.broadcast %713 : vector<4x1xf32> to vector<4x256xf32>
    %718 = arith.mulf %717, %716 : vector<4x256xf32>
    %719 = arith.addf %705, %718 : vector<4x256xf32>
    %720 = arith.addf %719, %712 : vector<4x256xf32>
    %721 = arith.addf %537, %720 : vector<4x256xf32>
    %c0_162 = arith.constant 0 : index
    %c112 = arith.constant 112 : index
    %722 = vector.load %arg24[%c0_162, %c112] : memref<4x460xf32, #tpu.memory_space<vmem>>, vector<4x268xf32>
    %c0_163 = arith.constant 0 : index
    %c91 = arith.constant 91 : index
    %723 = vector.load %arg7[%c0_163, %c91] : memref<4x169xf32, #tpu.memory_space<vmem>>, vector<4x1xf32>
    %724 = vector.extract_strided_slice %722 {offsets = [0, 0], sizes = [4, 256], strides = [1, 1]} : vector<4x268xf32> to vector<4x256xf32>
    %725 = vector.broadcast %55 : vector<1x256xf32> to vector<4x256xf32>
    %726 = arith.mulf %724, %725 : vector<4x256xf32>
    %727 = vector.broadcast %723 : vector<4x1xf32> to vector<4x256xf32>
    %728 = arith.mulf %727, %726 : vector<4x256xf32>
    %c0_164 = arith.constant 0 : index
    %c92 = arith.constant 92 : index
    %729 = vector.load %arg7[%c0_164, %c92] : memref<4x169xf32, #tpu.memory_space<vmem>>, vector<4x1xf32>
    %730 = vector.extract_strided_slice %722 {offsets = [0, 1], sizes = [4, 256], strides = [1, 1]} : vector<4x268xf32> to vector<4x256xf32>
    %731 = vector.broadcast %57 : vector<1x256xf32> to vector<4x256xf32>
    %732 = arith.mulf %730, %731 : vector<4x256xf32>
    %733 = vector.broadcast %729 : vector<4x1xf32> to vector<4x256xf32>
    %734 = arith.mulf %733, %732 : vector<4x256xf32>
    %c0_165 = arith.constant 0 : index
    %c93 = arith.constant 93 : index
    %735 = vector.load %arg7[%c0_165, %c93] : memref<4x169xf32, #tpu.memory_space<vmem>>, vector<4x1xf32>
    %736 = vector.extract_strided_slice %722 {offsets = [0, 2], sizes = [4, 256], strides = [1, 1]} : vector<4x268xf32> to vector<4x256xf32>
    %737 = vector.broadcast %59 : vector<1x256xf32> to vector<4x256xf32>
    %738 = arith.mulf %736, %737 : vector<4x256xf32>
    %739 = vector.broadcast %735 : vector<4x1xf32> to vector<4x256xf32>
    %740 = arith.mulf %739, %738 : vector<4x256xf32>
    %741 = arith.addf %728, %740 : vector<4x256xf32>
    %c0_166 = arith.constant 0 : index
    %c94 = arith.constant 94 : index
    %742 = vector.load %arg7[%c0_166, %c94] : memref<4x169xf32, #tpu.memory_space<vmem>>, vector<4x1xf32>
    %743 = vector.extract_strided_slice %722 {offsets = [0, 3], sizes = [4, 256], strides = [1, 1]} : vector<4x268xf32> to vector<4x256xf32>
    %744 = vector.broadcast %61 : vector<1x256xf32> to vector<4x256xf32>
    %745 = arith.mulf %743, %744 : vector<4x256xf32>
    %746 = vector.broadcast %742 : vector<4x1xf32> to vector<4x256xf32>
    %747 = arith.mulf %746, %745 : vector<4x256xf32>
    %748 = arith.addf %734, %747 : vector<4x256xf32>
    %c0_167 = arith.constant 0 : index
    %c95 = arith.constant 95 : index
    %749 = vector.load %arg7[%c0_167, %c95] : memref<4x169xf32, #tpu.memory_space<vmem>>, vector<4x1xf32>
    %750 = vector.extract_strided_slice %722 {offsets = [0, 4], sizes = [4, 256], strides = [1, 1]} : vector<4x268xf32> to vector<4x256xf32>
    %751 = vector.broadcast %63 : vector<1x256xf32> to vector<4x256xf32>
    %752 = arith.mulf %750, %751 : vector<4x256xf32>
    %753 = vector.broadcast %749 : vector<4x1xf32> to vector<4x256xf32>
    %754 = arith.mulf %753, %752 : vector<4x256xf32>
    %755 = arith.addf %741, %754 : vector<4x256xf32>
    %c0_168 = arith.constant 0 : index
    %c96_169 = arith.constant 96 : index
    %756 = vector.load %arg7[%c0_168, %c96_169] : memref<4x169xf32, #tpu.memory_space<vmem>>, vector<4x1xf32>
    %757 = vector.extract_strided_slice %722 {offsets = [0, 5], sizes = [4, 256], strides = [1, 1]} : vector<4x268xf32> to vector<4x256xf32>
    %758 = vector.broadcast %65 : vector<1x256xf32> to vector<4x256xf32>
    %759 = arith.mulf %757, %758 : vector<4x256xf32>
    %760 = vector.broadcast %756 : vector<4x1xf32> to vector<4x256xf32>
    %761 = arith.mulf %760, %759 : vector<4x256xf32>
    %762 = arith.addf %748, %761 : vector<4x256xf32>
    %c0_170 = arith.constant 0 : index
    %c97 = arith.constant 97 : index
    %763 = vector.load %arg7[%c0_170, %c97] : memref<4x169xf32, #tpu.memory_space<vmem>>, vector<4x1xf32>
    %764 = vector.extract_strided_slice %722 {offsets = [0, 6], sizes = [4, 256], strides = [1, 1]} : vector<4x268xf32> to vector<4x256xf32>
    %765 = vector.broadcast %67 : vector<1x256xf32> to vector<4x256xf32>
    %766 = arith.mulf %764, %765 : vector<4x256xf32>
    %767 = vector.broadcast %763 : vector<4x1xf32> to vector<4x256xf32>
    %768 = arith.mulf %767, %766 : vector<4x256xf32>
    %769 = arith.addf %755, %768 : vector<4x256xf32>
    %c0_171 = arith.constant 0 : index
    %c98 = arith.constant 98 : index
    %770 = vector.load %arg7[%c0_171, %c98] : memref<4x169xf32, #tpu.memory_space<vmem>>, vector<4x1xf32>
    %771 = vector.extract_strided_slice %722 {offsets = [0, 7], sizes = [4, 256], strides = [1, 1]} : vector<4x268xf32> to vector<4x256xf32>
    %772 = vector.broadcast %69 : vector<1x256xf32> to vector<4x256xf32>
    %773 = arith.mulf %771, %772 : vector<4x256xf32>
    %774 = vector.broadcast %770 : vector<4x1xf32> to vector<4x256xf32>
    %775 = arith.mulf %774, %773 : vector<4x256xf32>
    %776 = arith.addf %762, %775 : vector<4x256xf32>
    %c0_172 = arith.constant 0 : index
    %c99 = arith.constant 99 : index
    %777 = vector.load %arg7[%c0_172, %c99] : memref<4x169xf32, #tpu.memory_space<vmem>>, vector<4x1xf32>
    %778 = vector.extract_strided_slice %722 {offsets = [0, 8], sizes = [4, 256], strides = [1, 1]} : vector<4x268xf32> to vector<4x256xf32>
    %779 = vector.broadcast %71 : vector<1x256xf32> to vector<4x256xf32>
    %780 = arith.mulf %778, %779 : vector<4x256xf32>
    %781 = vector.broadcast %777 : vector<4x1xf32> to vector<4x256xf32>
    %782 = arith.mulf %781, %780 : vector<4x256xf32>
    %783 = arith.addf %769, %782 : vector<4x256xf32>
    %c0_173 = arith.constant 0 : index
    %c100 = arith.constant 100 : index
    %784 = vector.load %arg7[%c0_173, %c100] : memref<4x169xf32, #tpu.memory_space<vmem>>, vector<4x1xf32>
    %785 = vector.extract_strided_slice %722 {offsets = [0, 9], sizes = [4, 256], strides = [1, 1]} : vector<4x268xf32> to vector<4x256xf32>
    %786 = vector.broadcast %73 : vector<1x256xf32> to vector<4x256xf32>
    %787 = arith.mulf %785, %786 : vector<4x256xf32>
    %788 = vector.broadcast %784 : vector<4x1xf32> to vector<4x256xf32>
    %789 = arith.mulf %788, %787 : vector<4x256xf32>
    %790 = arith.addf %776, %789 : vector<4x256xf32>
    %c0_174 = arith.constant 0 : index
    %c101 = arith.constant 101 : index
    %791 = vector.load %arg7[%c0_174, %c101] : memref<4x169xf32, #tpu.memory_space<vmem>>, vector<4x1xf32>
    %792 = vector.extract_strided_slice %722 {offsets = [0, 10], sizes = [4, 256], strides = [1, 1]} : vector<4x268xf32> to vector<4x256xf32>
    %793 = vector.broadcast %75 : vector<1x256xf32> to vector<4x256xf32>
    %794 = arith.mulf %792, %793 : vector<4x256xf32>
    %795 = vector.broadcast %791 : vector<4x1xf32> to vector<4x256xf32>
    %796 = arith.mulf %795, %794 : vector<4x256xf32>
    %797 = arith.addf %783, %796 : vector<4x256xf32>
    %c0_175 = arith.constant 0 : index
    %c102_176 = arith.constant 102 : index
    %798 = vector.load %arg7[%c0_175, %c102_176] : memref<4x169xf32, #tpu.memory_space<vmem>>, vector<4x1xf32>
    %799 = vector.extract_strided_slice %722 {offsets = [0, 11], sizes = [4, 256], strides = [1, 1]} : vector<4x268xf32> to vector<4x256xf32>
    %800 = vector.broadcast %77 : vector<1x256xf32> to vector<4x256xf32>
    %801 = arith.mulf %799, %800 : vector<4x256xf32>
    %802 = vector.broadcast %798 : vector<4x1xf32> to vector<4x256xf32>
    %803 = arith.mulf %802, %801 : vector<4x256xf32>
    %804 = arith.addf %790, %803 : vector<4x256xf32>
    %c0_177 = arith.constant 0 : index
    %c103 = arith.constant 103 : index
    %805 = vector.load %arg7[%c0_177, %c103] : memref<4x169xf32, #tpu.memory_space<vmem>>, vector<4x1xf32>
    %806 = vector.extract_strided_slice %722 {offsets = [0, 12], sizes = [4, 256], strides = [1, 1]} : vector<4x268xf32> to vector<4x256xf32>
    %807 = vector.broadcast %79 : vector<1x256xf32> to vector<4x256xf32>
    %808 = arith.mulf %806, %807 : vector<4x256xf32>
    %809 = vector.broadcast %805 : vector<4x1xf32> to vector<4x256xf32>
    %810 = arith.mulf %809, %808 : vector<4x256xf32>
    %811 = arith.addf %797, %810 : vector<4x256xf32>
    %812 = arith.addf %811, %804 : vector<4x256xf32>
    %813 = arith.addf %629, %812 : vector<4x256xf32>
    %c0_178 = arith.constant 0 : index
    %c128 = arith.constant 128 : index
    %814 = vector.load %arg24[%c0_178, %c128] : memref<4x460xf32, #tpu.memory_space<vmem>>, vector<4x268xf32>
    %c0_179 = arith.constant 0 : index
    %c104 = arith.constant 104 : index
    %815 = vector.load %arg7[%c0_179, %c104] : memref<4x169xf32, #tpu.memory_space<vmem>>, vector<4x1xf32>
    %816 = vector.extract_strided_slice %814 {offsets = [0, 0], sizes = [4, 256], strides = [1, 1]} : vector<4x268xf32> to vector<4x256xf32>
    %817 = vector.broadcast %55 : vector<1x256xf32> to vector<4x256xf32>
    %818 = arith.mulf %816, %817 : vector<4x256xf32>
    %819 = vector.broadcast %815 : vector<4x1xf32> to vector<4x256xf32>
    %820 = arith.mulf %819, %818 : vector<4x256xf32>
    %c0_180 = arith.constant 0 : index
    %c105 = arith.constant 105 : index
    %821 = vector.load %arg7[%c0_180, %c105] : memref<4x169xf32, #tpu.memory_space<vmem>>, vector<4x1xf32>
    %822 = vector.extract_strided_slice %814 {offsets = [0, 1], sizes = [4, 256], strides = [1, 1]} : vector<4x268xf32> to vector<4x256xf32>
    %823 = vector.broadcast %57 : vector<1x256xf32> to vector<4x256xf32>
    %824 = arith.mulf %822, %823 : vector<4x256xf32>
    %825 = vector.broadcast %821 : vector<4x1xf32> to vector<4x256xf32>
    %826 = arith.mulf %825, %824 : vector<4x256xf32>
    %c0_181 = arith.constant 0 : index
    %c106 = arith.constant 106 : index
    %827 = vector.load %arg7[%c0_181, %c106] : memref<4x169xf32, #tpu.memory_space<vmem>>, vector<4x1xf32>
    %828 = vector.extract_strided_slice %814 {offsets = [0, 2], sizes = [4, 256], strides = [1, 1]} : vector<4x268xf32> to vector<4x256xf32>
    %829 = vector.broadcast %59 : vector<1x256xf32> to vector<4x256xf32>
    %830 = arith.mulf %828, %829 : vector<4x256xf32>
    %831 = vector.broadcast %827 : vector<4x1xf32> to vector<4x256xf32>
    %832 = arith.mulf %831, %830 : vector<4x256xf32>
    %833 = arith.addf %820, %832 : vector<4x256xf32>
    %c0_182 = arith.constant 0 : index
    %c107 = arith.constant 107 : index
    %834 = vector.load %arg7[%c0_182, %c107] : memref<4x169xf32, #tpu.memory_space<vmem>>, vector<4x1xf32>
    %835 = vector.extract_strided_slice %814 {offsets = [0, 3], sizes = [4, 256], strides = [1, 1]} : vector<4x268xf32> to vector<4x256xf32>
    %836 = vector.broadcast %61 : vector<1x256xf32> to vector<4x256xf32>
    %837 = arith.mulf %835, %836 : vector<4x256xf32>
    %838 = vector.broadcast %834 : vector<4x1xf32> to vector<4x256xf32>
    %839 = arith.mulf %838, %837 : vector<4x256xf32>
    %840 = arith.addf %826, %839 : vector<4x256xf32>
    %c0_183 = arith.constant 0 : index
    %c108 = arith.constant 108 : index
    %841 = vector.load %arg7[%c0_183, %c108] : memref<4x169xf32, #tpu.memory_space<vmem>>, vector<4x1xf32>
    %842 = vector.extract_strided_slice %814 {offsets = [0, 4], sizes = [4, 256], strides = [1, 1]} : vector<4x268xf32> to vector<4x256xf32>
    %843 = vector.broadcast %63 : vector<1x256xf32> to vector<4x256xf32>
    %844 = arith.mulf %842, %843 : vector<4x256xf32>
    %845 = vector.broadcast %841 : vector<4x1xf32> to vector<4x256xf32>
    %846 = arith.mulf %845, %844 : vector<4x256xf32>
    %847 = arith.addf %833, %846 : vector<4x256xf32>
    %c0_184 = arith.constant 0 : index
    %c109 = arith.constant 109 : index
    %848 = vector.load %arg7[%c0_184, %c109] : memref<4x169xf32, #tpu.memory_space<vmem>>, vector<4x1xf32>
    %849 = vector.extract_strided_slice %814 {offsets = [0, 5], sizes = [4, 256], strides = [1, 1]} : vector<4x268xf32> to vector<4x256xf32>
    %850 = vector.broadcast %65 : vector<1x256xf32> to vector<4x256xf32>
    %851 = arith.mulf %849, %850 : vector<4x256xf32>
    %852 = vector.broadcast %848 : vector<4x1xf32> to vector<4x256xf32>
    %853 = arith.mulf %852, %851 : vector<4x256xf32>
    %854 = arith.addf %840, %853 : vector<4x256xf32>
    %c0_185 = arith.constant 0 : index
    %c110 = arith.constant 110 : index
    %855 = vector.load %arg7[%c0_185, %c110] : memref<4x169xf32, #tpu.memory_space<vmem>>, vector<4x1xf32>
    %856 = vector.extract_strided_slice %814 {offsets = [0, 6], sizes = [4, 256], strides = [1, 1]} : vector<4x268xf32> to vector<4x256xf32>
    %857 = vector.broadcast %67 : vector<1x256xf32> to vector<4x256xf32>
    %858 = arith.mulf %856, %857 : vector<4x256xf32>
    %859 = vector.broadcast %855 : vector<4x1xf32> to vector<4x256xf32>
    %860 = arith.mulf %859, %858 : vector<4x256xf32>
    %861 = arith.addf %847, %860 : vector<4x256xf32>
    %c0_186 = arith.constant 0 : index
    %c111 = arith.constant 111 : index
    %862 = vector.load %arg7[%c0_186, %c111] : memref<4x169xf32, #tpu.memory_space<vmem>>, vector<4x1xf32>
    %863 = vector.extract_strided_slice %814 {offsets = [0, 7], sizes = [4, 256], strides = [1, 1]} : vector<4x268xf32> to vector<4x256xf32>
    %864 = vector.broadcast %69 : vector<1x256xf32> to vector<4x256xf32>
    %865 = arith.mulf %863, %864 : vector<4x256xf32>
    %866 = vector.broadcast %862 : vector<4x1xf32> to vector<4x256xf32>
    %867 = arith.mulf %866, %865 : vector<4x256xf32>
    %868 = arith.addf %854, %867 : vector<4x256xf32>
    %c0_187 = arith.constant 0 : index
    %c112_188 = arith.constant 112 : index
    %869 = vector.load %arg7[%c0_187, %c112_188] : memref<4x169xf32, #tpu.memory_space<vmem>>, vector<4x1xf32>
    %870 = vector.extract_strided_slice %814 {offsets = [0, 8], sizes = [4, 256], strides = [1, 1]} : vector<4x268xf32> to vector<4x256xf32>
    %871 = vector.broadcast %71 : vector<1x256xf32> to vector<4x256xf32>
    %872 = arith.mulf %870, %871 : vector<4x256xf32>
    %873 = vector.broadcast %869 : vector<4x1xf32> to vector<4x256xf32>
    %874 = arith.mulf %873, %872 : vector<4x256xf32>
    %875 = arith.addf %861, %874 : vector<4x256xf32>
    %c0_189 = arith.constant 0 : index
    %c113 = arith.constant 113 : index
    %876 = vector.load %arg7[%c0_189, %c113] : memref<4x169xf32, #tpu.memory_space<vmem>>, vector<4x1xf32>
    %877 = vector.extract_strided_slice %814 {offsets = [0, 9], sizes = [4, 256], strides = [1, 1]} : vector<4x268xf32> to vector<4x256xf32>
    %878 = vector.broadcast %73 : vector<1x256xf32> to vector<4x256xf32>
    %879 = arith.mulf %877, %878 : vector<4x256xf32>
    %880 = vector.broadcast %876 : vector<4x1xf32> to vector<4x256xf32>
    %881 = arith.mulf %880, %879 : vector<4x256xf32>
    %882 = arith.addf %868, %881 : vector<4x256xf32>
    %c0_190 = arith.constant 0 : index
    %c114 = arith.constant 114 : index
    %883 = vector.load %arg7[%c0_190, %c114] : memref<4x169xf32, #tpu.memory_space<vmem>>, vector<4x1xf32>
    %884 = vector.extract_strided_slice %814 {offsets = [0, 10], sizes = [4, 256], strides = [1, 1]} : vector<4x268xf32> to vector<4x256xf32>
    %885 = vector.broadcast %75 : vector<1x256xf32> to vector<4x256xf32>
    %886 = arith.mulf %884, %885 : vector<4x256xf32>
    %887 = vector.broadcast %883 : vector<4x1xf32> to vector<4x256xf32>
    %888 = arith.mulf %887, %886 : vector<4x256xf32>
    %889 = arith.addf %875, %888 : vector<4x256xf32>
    %c0_191 = arith.constant 0 : index
    %c115 = arith.constant 115 : index
    %890 = vector.load %arg7[%c0_191, %c115] : memref<4x169xf32, #tpu.memory_space<vmem>>, vector<4x1xf32>
    %891 = vector.extract_strided_slice %814 {offsets = [0, 11], sizes = [4, 256], strides = [1, 1]} : vector<4x268xf32> to vector<4x256xf32>
    %892 = vector.broadcast %77 : vector<1x256xf32> to vector<4x256xf32>
    %893 = arith.mulf %891, %892 : vector<4x256xf32>
    %894 = vector.broadcast %890 : vector<4x1xf32> to vector<4x256xf32>
    %895 = arith.mulf %894, %893 : vector<4x256xf32>
    %896 = arith.addf %882, %895 : vector<4x256xf32>
    %c0_192 = arith.constant 0 : index
    %c116 = arith.constant 116 : index
    %897 = vector.load %arg7[%c0_192, %c116] : memref<4x169xf32, #tpu.memory_space<vmem>>, vector<4x1xf32>
    %898 = vector.extract_strided_slice %814 {offsets = [0, 12], sizes = [4, 256], strides = [1, 1]} : vector<4x268xf32> to vector<4x256xf32>
    %899 = vector.broadcast %79 : vector<1x256xf32> to vector<4x256xf32>
    %900 = arith.mulf %898, %899 : vector<4x256xf32>
    %901 = vector.broadcast %897 : vector<4x1xf32> to vector<4x256xf32>
    %902 = arith.mulf %901, %900 : vector<4x256xf32>
    %903 = arith.addf %889, %902 : vector<4x256xf32>
    %904 = arith.addf %903, %896 : vector<4x256xf32>
    %905 = arith.addf %721, %904 : vector<4x256xf32>
    %c0_193 = arith.constant 0 : index
    %c144 = arith.constant 144 : index
    %906 = vector.load %arg24[%c0_193, %c144] : memref<4x460xf32, #tpu.memory_space<vmem>>, vector<4x268xf32>
    %c0_194 = arith.constant 0 : index
    %c117 = arith.constant 117 : index
    %907 = vector.load %arg7[%c0_194, %c117] : memref<4x169xf32, #tpu.memory_space<vmem>>, vector<4x1xf32>
    %908 = vector.extract_strided_slice %906 {offsets = [0, 0], sizes = [4, 256], strides = [1, 1]} : vector<4x268xf32> to vector<4x256xf32>
    %909 = vector.broadcast %55 : vector<1x256xf32> to vector<4x256xf32>
    %910 = arith.mulf %908, %909 : vector<4x256xf32>
    %911 = vector.broadcast %907 : vector<4x1xf32> to vector<4x256xf32>
    %912 = arith.mulf %911, %910 : vector<4x256xf32>
    %c0_195 = arith.constant 0 : index
    %c118 = arith.constant 118 : index
    %913 = vector.load %arg7[%c0_195, %c118] : memref<4x169xf32, #tpu.memory_space<vmem>>, vector<4x1xf32>
    %914 = vector.extract_strided_slice %906 {offsets = [0, 1], sizes = [4, 256], strides = [1, 1]} : vector<4x268xf32> to vector<4x256xf32>
    %915 = vector.broadcast %57 : vector<1x256xf32> to vector<4x256xf32>
    %916 = arith.mulf %914, %915 : vector<4x256xf32>
    %917 = vector.broadcast %913 : vector<4x1xf32> to vector<4x256xf32>
    %918 = arith.mulf %917, %916 : vector<4x256xf32>
    %c0_196 = arith.constant 0 : index
    %c119 = arith.constant 119 : index
    %919 = vector.load %arg7[%c0_196, %c119] : memref<4x169xf32, #tpu.memory_space<vmem>>, vector<4x1xf32>
    %920 = vector.extract_strided_slice %906 {offsets = [0, 2], sizes = [4, 256], strides = [1, 1]} : vector<4x268xf32> to vector<4x256xf32>
    %921 = vector.broadcast %59 : vector<1x256xf32> to vector<4x256xf32>
    %922 = arith.mulf %920, %921 : vector<4x256xf32>
    %923 = vector.broadcast %919 : vector<4x1xf32> to vector<4x256xf32>
    %924 = arith.mulf %923, %922 : vector<4x256xf32>
    %925 = arith.addf %912, %924 : vector<4x256xf32>
    %c0_197 = arith.constant 0 : index
    %c120 = arith.constant 120 : index
    %926 = vector.load %arg7[%c0_197, %c120] : memref<4x169xf32, #tpu.memory_space<vmem>>, vector<4x1xf32>
    %927 = vector.extract_strided_slice %906 {offsets = [0, 3], sizes = [4, 256], strides = [1, 1]} : vector<4x268xf32> to vector<4x256xf32>
    %928 = vector.broadcast %61 : vector<1x256xf32> to vector<4x256xf32>
    %929 = arith.mulf %927, %928 : vector<4x256xf32>
    %930 = vector.broadcast %926 : vector<4x1xf32> to vector<4x256xf32>
    %931 = arith.mulf %930, %929 : vector<4x256xf32>
    %932 = arith.addf %918, %931 : vector<4x256xf32>
    %c0_198 = arith.constant 0 : index
    %c121 = arith.constant 121 : index
    %933 = vector.load %arg7[%c0_198, %c121] : memref<4x169xf32, #tpu.memory_space<vmem>>, vector<4x1xf32>
    %934 = vector.extract_strided_slice %906 {offsets = [0, 4], sizes = [4, 256], strides = [1, 1]} : vector<4x268xf32> to vector<4x256xf32>
    %935 = vector.broadcast %63 : vector<1x256xf32> to vector<4x256xf32>
    %936 = arith.mulf %934, %935 : vector<4x256xf32>
    %937 = vector.broadcast %933 : vector<4x1xf32> to vector<4x256xf32>
    %938 = arith.mulf %937, %936 : vector<4x256xf32>
    %939 = arith.addf %925, %938 : vector<4x256xf32>
    %c0_199 = arith.constant 0 : index
    %c122 = arith.constant 122 : index
    %940 = vector.load %arg7[%c0_199, %c122] : memref<4x169xf32, #tpu.memory_space<vmem>>, vector<4x1xf32>
    %941 = vector.extract_strided_slice %906 {offsets = [0, 5], sizes = [4, 256], strides = [1, 1]} : vector<4x268xf32> to vector<4x256xf32>
    %942 = vector.broadcast %65 : vector<1x256xf32> to vector<4x256xf32>
    %943 = arith.mulf %941, %942 : vector<4x256xf32>
    %944 = vector.broadcast %940 : vector<4x1xf32> to vector<4x256xf32>
    %945 = arith.mulf %944, %943 : vector<4x256xf32>
    %946 = arith.addf %932, %945 : vector<4x256xf32>
    %c0_200 = arith.constant 0 : index
    %c123 = arith.constant 123 : index
    %947 = vector.load %arg7[%c0_200, %c123] : memref<4x169xf32, #tpu.memory_space<vmem>>, vector<4x1xf32>
    %948 = vector.extract_strided_slice %906 {offsets = [0, 6], sizes = [4, 256], strides = [1, 1]} : vector<4x268xf32> to vector<4x256xf32>
    %949 = vector.broadcast %67 : vector<1x256xf32> to vector<4x256xf32>
    %950 = arith.mulf %948, %949 : vector<4x256xf32>
    %951 = vector.broadcast %947 : vector<4x1xf32> to vector<4x256xf32>
    %952 = arith.mulf %951, %950 : vector<4x256xf32>
    %953 = arith.addf %939, %952 : vector<4x256xf32>
    %c0_201 = arith.constant 0 : index
    %c124 = arith.constant 124 : index
    %954 = vector.load %arg7[%c0_201, %c124] : memref<4x169xf32, #tpu.memory_space<vmem>>, vector<4x1xf32>
    %955 = vector.extract_strided_slice %906 {offsets = [0, 7], sizes = [4, 256], strides = [1, 1]} : vector<4x268xf32> to vector<4x256xf32>
    %956 = vector.broadcast %69 : vector<1x256xf32> to vector<4x256xf32>
    %957 = arith.mulf %955, %956 : vector<4x256xf32>
    %958 = vector.broadcast %954 : vector<4x1xf32> to vector<4x256xf32>
    %959 = arith.mulf %958, %957 : vector<4x256xf32>
    %960 = arith.addf %946, %959 : vector<4x256xf32>
    %c0_202 = arith.constant 0 : index
    %c125 = arith.constant 125 : index
    %961 = vector.load %arg7[%c0_202, %c125] : memref<4x169xf32, #tpu.memory_space<vmem>>, vector<4x1xf32>
    %962 = vector.extract_strided_slice %906 {offsets = [0, 8], sizes = [4, 256], strides = [1, 1]} : vector<4x268xf32> to vector<4x256xf32>
    %963 = vector.broadcast %71 : vector<1x256xf32> to vector<4x256xf32>
    %964 = arith.mulf %962, %963 : vector<4x256xf32>
    %965 = vector.broadcast %961 : vector<4x1xf32> to vector<4x256xf32>
    %966 = arith.mulf %965, %964 : vector<4x256xf32>
    %967 = arith.addf %953, %966 : vector<4x256xf32>
    %c0_203 = arith.constant 0 : index
    %c126 = arith.constant 126 : index
    %968 = vector.load %arg7[%c0_203, %c126] : memref<4x169xf32, #tpu.memory_space<vmem>>, vector<4x1xf32>
    %969 = vector.extract_strided_slice %906 {offsets = [0, 9], sizes = [4, 256], strides = [1, 1]} : vector<4x268xf32> to vector<4x256xf32>
    %970 = vector.broadcast %73 : vector<1x256xf32> to vector<4x256xf32>
    %971 = arith.mulf %969, %970 : vector<4x256xf32>
    %972 = vector.broadcast %968 : vector<4x1xf32> to vector<4x256xf32>
    %973 = arith.mulf %972, %971 : vector<4x256xf32>
    %974 = arith.addf %960, %973 : vector<4x256xf32>
    %c0_204 = arith.constant 0 : index
    %c127 = arith.constant 127 : index
    %975 = vector.load %arg7[%c0_204, %c127] : memref<4x169xf32, #tpu.memory_space<vmem>>, vector<4x1xf32>
    %976 = vector.extract_strided_slice %906 {offsets = [0, 10], sizes = [4, 256], strides = [1, 1]} : vector<4x268xf32> to vector<4x256xf32>
    %977 = vector.broadcast %75 : vector<1x256xf32> to vector<4x256xf32>
    %978 = arith.mulf %976, %977 : vector<4x256xf32>
    %979 = vector.broadcast %975 : vector<4x1xf32> to vector<4x256xf32>
    %980 = arith.mulf %979, %978 : vector<4x256xf32>
    %981 = arith.addf %967, %980 : vector<4x256xf32>
    %c0_205 = arith.constant 0 : index
    %c128_206 = arith.constant 128 : index
    %982 = vector.load %arg7[%c0_205, %c128_206] : memref<4x169xf32, #tpu.memory_space<vmem>>, vector<4x1xf32>
    %983 = vector.extract_strided_slice %906 {offsets = [0, 11], sizes = [4, 256], strides = [1, 1]} : vector<4x268xf32> to vector<4x256xf32>
    %984 = vector.broadcast %77 : vector<1x256xf32> to vector<4x256xf32>
    %985 = arith.mulf %983, %984 : vector<4x256xf32>
    %986 = vector.broadcast %982 : vector<4x1xf32> to vector<4x256xf32>
    %987 = arith.mulf %986, %985 : vector<4x256xf32>
    %988 = arith.addf %974, %987 : vector<4x256xf32>
    %c0_207 = arith.constant 0 : index
    %c129 = arith.constant 129 : index
    %989 = vector.load %arg7[%c0_207, %c129] : memref<4x169xf32, #tpu.memory_space<vmem>>, vector<4x1xf32>
    %990 = vector.extract_strided_slice %906 {offsets = [0, 12], sizes = [4, 256], strides = [1, 1]} : vector<4x268xf32> to vector<4x256xf32>
    %991 = vector.broadcast %79 : vector<1x256xf32> to vector<4x256xf32>
    %992 = arith.mulf %990, %991 : vector<4x256xf32>
    %993 = vector.broadcast %989 : vector<4x1xf32> to vector<4x256xf32>
    %994 = arith.mulf %993, %992 : vector<4x256xf32>
    %995 = arith.addf %981, %994 : vector<4x256xf32>
    %996 = arith.addf %995, %988 : vector<4x256xf32>
    %997 = arith.addf %813, %996 : vector<4x256xf32>
    %c0_208 = arith.constant 0 : index
    %c160 = arith.constant 160 : index
    %998 = vector.load %arg24[%c0_208, %c160] : memref<4x460xf32, #tpu.memory_space<vmem>>, vector<4x268xf32>
    %c0_209 = arith.constant 0 : index
    %c130 = arith.constant 130 : index
    %999 = vector.load %arg7[%c0_209, %c130] : memref<4x169xf32, #tpu.memory_space<vmem>>, vector<4x1xf32>
    %1000 = vector.extract_strided_slice %998 {offsets = [0, 0], sizes = [4, 256], strides = [1, 1]} : vector<4x268xf32> to vector<4x256xf32>
    %1001 = vector.broadcast %55 : vector<1x256xf32> to vector<4x256xf32>
    %1002 = arith.mulf %1000, %1001 : vector<4x256xf32>
    %1003 = vector.broadcast %999 : vector<4x1xf32> to vector<4x256xf32>
    %1004 = arith.mulf %1003, %1002 : vector<4x256xf32>
    %c0_210 = arith.constant 0 : index
    %c131 = arith.constant 131 : index
    %1005 = vector.load %arg7[%c0_210, %c131] : memref<4x169xf32, #tpu.memory_space<vmem>>, vector<4x1xf32>
    %1006 = vector.extract_strided_slice %998 {offsets = [0, 1], sizes = [4, 256], strides = [1, 1]} : vector<4x268xf32> to vector<4x256xf32>
    %1007 = vector.broadcast %57 : vector<1x256xf32> to vector<4x256xf32>
    %1008 = arith.mulf %1006, %1007 : vector<4x256xf32>
    %1009 = vector.broadcast %1005 : vector<4x1xf32> to vector<4x256xf32>
    %1010 = arith.mulf %1009, %1008 : vector<4x256xf32>
    %c0_211 = arith.constant 0 : index
    %c132 = arith.constant 132 : index
    %1011 = vector.load %arg7[%c0_211, %c132] : memref<4x169xf32, #tpu.memory_space<vmem>>, vector<4x1xf32>
    %1012 = vector.extract_strided_slice %998 {offsets = [0, 2], sizes = [4, 256], strides = [1, 1]} : vector<4x268xf32> to vector<4x256xf32>
    %1013 = vector.broadcast %59 : vector<1x256xf32> to vector<4x256xf32>
    %1014 = arith.mulf %1012, %1013 : vector<4x256xf32>
    %1015 = vector.broadcast %1011 : vector<4x1xf32> to vector<4x256xf32>
    %1016 = arith.mulf %1015, %1014 : vector<4x256xf32>
    %1017 = arith.addf %1004, %1016 : vector<4x256xf32>
    %c0_212 = arith.constant 0 : index
    %c133 = arith.constant 133 : index
    %1018 = vector.load %arg7[%c0_212, %c133] : memref<4x169xf32, #tpu.memory_space<vmem>>, vector<4x1xf32>
    %1019 = vector.extract_strided_slice %998 {offsets = [0, 3], sizes = [4, 256], strides = [1, 1]} : vector<4x268xf32> to vector<4x256xf32>
    %1020 = vector.broadcast %61 : vector<1x256xf32> to vector<4x256xf32>
    %1021 = arith.mulf %1019, %1020 : vector<4x256xf32>
    %1022 = vector.broadcast %1018 : vector<4x1xf32> to vector<4x256xf32>
    %1023 = arith.mulf %1022, %1021 : vector<4x256xf32>
    %1024 = arith.addf %1010, %1023 : vector<4x256xf32>
    %c0_213 = arith.constant 0 : index
    %c134 = arith.constant 134 : index
    %1025 = vector.load %arg7[%c0_213, %c134] : memref<4x169xf32, #tpu.memory_space<vmem>>, vector<4x1xf32>
    %1026 = vector.extract_strided_slice %998 {offsets = [0, 4], sizes = [4, 256], strides = [1, 1]} : vector<4x268xf32> to vector<4x256xf32>
    %1027 = vector.broadcast %63 : vector<1x256xf32> to vector<4x256xf32>
    %1028 = arith.mulf %1026, %1027 : vector<4x256xf32>
    %1029 = vector.broadcast %1025 : vector<4x1xf32> to vector<4x256xf32>
    %1030 = arith.mulf %1029, %1028 : vector<4x256xf32>
    %1031 = arith.addf %1017, %1030 : vector<4x256xf32>
    %c0_214 = arith.constant 0 : index
    %c135 = arith.constant 135 : index
    %1032 = vector.load %arg7[%c0_214, %c135] : memref<4x169xf32, #tpu.memory_space<vmem>>, vector<4x1xf32>
    %1033 = vector.extract_strided_slice %998 {offsets = [0, 5], sizes = [4, 256], strides = [1, 1]} : vector<4x268xf32> to vector<4x256xf32>
    %1034 = vector.broadcast %65 : vector<1x256xf32> to vector<4x256xf32>
    %1035 = arith.mulf %1033, %1034 : vector<4x256xf32>
    %1036 = vector.broadcast %1032 : vector<4x1xf32> to vector<4x256xf32>
    %1037 = arith.mulf %1036, %1035 : vector<4x256xf32>
    %1038 = arith.addf %1024, %1037 : vector<4x256xf32>
    %c0_215 = arith.constant 0 : index
    %c136 = arith.constant 136 : index
    %1039 = vector.load %arg7[%c0_215, %c136] : memref<4x169xf32, #tpu.memory_space<vmem>>, vector<4x1xf32>
    %1040 = vector.extract_strided_slice %998 {offsets = [0, 6], sizes = [4, 256], strides = [1, 1]} : vector<4x268xf32> to vector<4x256xf32>
    %1041 = vector.broadcast %67 : vector<1x256xf32> to vector<4x256xf32>
    %1042 = arith.mulf %1040, %1041 : vector<4x256xf32>
    %1043 = vector.broadcast %1039 : vector<4x1xf32> to vector<4x256xf32>
    %1044 = arith.mulf %1043, %1042 : vector<4x256xf32>
    %1045 = arith.addf %1031, %1044 : vector<4x256xf32>
    %c0_216 = arith.constant 0 : index
    %c137 = arith.constant 137 : index
    %1046 = vector.load %arg7[%c0_216, %c137] : memref<4x169xf32, #tpu.memory_space<vmem>>, vector<4x1xf32>
    %1047 = vector.extract_strided_slice %998 {offsets = [0, 7], sizes = [4, 256], strides = [1, 1]} : vector<4x268xf32> to vector<4x256xf32>
    %1048 = vector.broadcast %69 : vector<1x256xf32> to vector<4x256xf32>
    %1049 = arith.mulf %1047, %1048 : vector<4x256xf32>
    %1050 = vector.broadcast %1046 : vector<4x1xf32> to vector<4x256xf32>
    %1051 = arith.mulf %1050, %1049 : vector<4x256xf32>
    %1052 = arith.addf %1038, %1051 : vector<4x256xf32>
    %c0_217 = arith.constant 0 : index
    %c138 = arith.constant 138 : index
    %1053 = vector.load %arg7[%c0_217, %c138] : memref<4x169xf32, #tpu.memory_space<vmem>>, vector<4x1xf32>
    %1054 = vector.extract_strided_slice %998 {offsets = [0, 8], sizes = [4, 256], strides = [1, 1]} : vector<4x268xf32> to vector<4x256xf32>
    %1055 = vector.broadcast %71 : vector<1x256xf32> to vector<4x256xf32>
    %1056 = arith.mulf %1054, %1055 : vector<4x256xf32>
    %1057 = vector.broadcast %1053 : vector<4x1xf32> to vector<4x256xf32>
    %1058 = arith.mulf %1057, %1056 : vector<4x256xf32>
    %1059 = arith.addf %1045, %1058 : vector<4x256xf32>
    %c0_218 = arith.constant 0 : index
    %c139 = arith.constant 139 : index
    %1060 = vector.load %arg7[%c0_218, %c139] : memref<4x169xf32, #tpu.memory_space<vmem>>, vector<4x1xf32>
    %1061 = vector.extract_strided_slice %998 {offsets = [0, 9], sizes = [4, 256], strides = [1, 1]} : vector<4x268xf32> to vector<4x256xf32>
    %1062 = vector.broadcast %73 : vector<1x256xf32> to vector<4x256xf32>
    %1063 = arith.mulf %1061, %1062 : vector<4x256xf32>
    %1064 = vector.broadcast %1060 : vector<4x1xf32> to vector<4x256xf32>
    %1065 = arith.mulf %1064, %1063 : vector<4x256xf32>
    %1066 = arith.addf %1052, %1065 : vector<4x256xf32>
    %c0_219 = arith.constant 0 : index
    %c140 = arith.constant 140 : index
    %1067 = vector.load %arg7[%c0_219, %c140] : memref<4x169xf32, #tpu.memory_space<vmem>>, vector<4x1xf32>
    %1068 = vector.extract_strided_slice %998 {offsets = [0, 10], sizes = [4, 256], strides = [1, 1]} : vector<4x268xf32> to vector<4x256xf32>
    %1069 = vector.broadcast %75 : vector<1x256xf32> to vector<4x256xf32>
    %1070 = arith.mulf %1068, %1069 : vector<4x256xf32>
    %1071 = vector.broadcast %1067 : vector<4x1xf32> to vector<4x256xf32>
    %1072 = arith.mulf %1071, %1070 : vector<4x256xf32>
    %1073 = arith.addf %1059, %1072 : vector<4x256xf32>
    %c0_220 = arith.constant 0 : index
    %c141 = arith.constant 141 : index
    %1074 = vector.load %arg7[%c0_220, %c141] : memref<4x169xf32, #tpu.memory_space<vmem>>, vector<4x1xf32>
    %1075 = vector.extract_strided_slice %998 {offsets = [0, 11], sizes = [4, 256], strides = [1, 1]} : vector<4x268xf32> to vector<4x256xf32>
    %1076 = vector.broadcast %77 : vector<1x256xf32> to vector<4x256xf32>
    %1077 = arith.mulf %1075, %1076 : vector<4x256xf32>
    %1078 = vector.broadcast %1074 : vector<4x1xf32> to vector<4x256xf32>
    %1079 = arith.mulf %1078, %1077 : vector<4x256xf32>
    %1080 = arith.addf %1066, %1079 : vector<4x256xf32>
    %c0_221 = arith.constant 0 : index
    %c142 = arith.constant 142 : index
    %1081 = vector.load %arg7[%c0_221, %c142] : memref<4x169xf32, #tpu.memory_space<vmem>>, vector<4x1xf32>
    %1082 = vector.extract_strided_slice %998 {offsets = [0, 12], sizes = [4, 256], strides = [1, 1]} : vector<4x268xf32> to vector<4x256xf32>
    %1083 = vector.broadcast %79 : vector<1x256xf32> to vector<4x256xf32>
    %1084 = arith.mulf %1082, %1083 : vector<4x256xf32>
    %1085 = vector.broadcast %1081 : vector<4x1xf32> to vector<4x256xf32>
    %1086 = arith.mulf %1085, %1084 : vector<4x256xf32>
    %1087 = arith.addf %1073, %1086 : vector<4x256xf32>
    %1088 = arith.addf %1087, %1080 : vector<4x256xf32>
    %1089 = arith.addf %905, %1088 : vector<4x256xf32>
    %c0_222 = arith.constant 0 : index
    %c176 = arith.constant 176 : index
    %1090 = vector.load %arg24[%c0_222, %c176] : memref<4x460xf32, #tpu.memory_space<vmem>>, vector<4x268xf32>
    %c0_223 = arith.constant 0 : index
    %c143 = arith.constant 143 : index
    %1091 = vector.load %arg7[%c0_223, %c143] : memref<4x169xf32, #tpu.memory_space<vmem>>, vector<4x1xf32>
    %1092 = vector.extract_strided_slice %1090 {offsets = [0, 0], sizes = [4, 256], strides = [1, 1]} : vector<4x268xf32> to vector<4x256xf32>
    %1093 = vector.broadcast %55 : vector<1x256xf32> to vector<4x256xf32>
    %1094 = arith.mulf %1092, %1093 : vector<4x256xf32>
    %1095 = vector.broadcast %1091 : vector<4x1xf32> to vector<4x256xf32>
    %1096 = arith.mulf %1095, %1094 : vector<4x256xf32>
    %c0_224 = arith.constant 0 : index
    %c144_225 = arith.constant 144 : index
    %1097 = vector.load %arg7[%c0_224, %c144_225] : memref<4x169xf32, #tpu.memory_space<vmem>>, vector<4x1xf32>
    %1098 = vector.extract_strided_slice %1090 {offsets = [0, 1], sizes = [4, 256], strides = [1, 1]} : vector<4x268xf32> to vector<4x256xf32>
    %1099 = vector.broadcast %57 : vector<1x256xf32> to vector<4x256xf32>
    %1100 = arith.mulf %1098, %1099 : vector<4x256xf32>
    %1101 = vector.broadcast %1097 : vector<4x1xf32> to vector<4x256xf32>
    %1102 = arith.mulf %1101, %1100 : vector<4x256xf32>
    %c0_226 = arith.constant 0 : index
    %c145 = arith.constant 145 : index
    %1103 = vector.load %arg7[%c0_226, %c145] : memref<4x169xf32, #tpu.memory_space<vmem>>, vector<4x1xf32>
    %1104 = vector.extract_strided_slice %1090 {offsets = [0, 2], sizes = [4, 256], strides = [1, 1]} : vector<4x268xf32> to vector<4x256xf32>
    %1105 = vector.broadcast %59 : vector<1x256xf32> to vector<4x256xf32>
    %1106 = arith.mulf %1104, %1105 : vector<4x256xf32>
    %1107 = vector.broadcast %1103 : vector<4x1xf32> to vector<4x256xf32>
    %1108 = arith.mulf %1107, %1106 : vector<4x256xf32>
    %1109 = arith.addf %1096, %1108 : vector<4x256xf32>
    %c0_227 = arith.constant 0 : index
    %c146 = arith.constant 146 : index
    %1110 = vector.load %arg7[%c0_227, %c146] : memref<4x169xf32, #tpu.memory_space<vmem>>, vector<4x1xf32>
    %1111 = vector.extract_strided_slice %1090 {offsets = [0, 3], sizes = [4, 256], strides = [1, 1]} : vector<4x268xf32> to vector<4x256xf32>
    %1112 = vector.broadcast %61 : vector<1x256xf32> to vector<4x256xf32>
    %1113 = arith.mulf %1111, %1112 : vector<4x256xf32>
    %1114 = vector.broadcast %1110 : vector<4x1xf32> to vector<4x256xf32>
    %1115 = arith.mulf %1114, %1113 : vector<4x256xf32>
    %1116 = arith.addf %1102, %1115 : vector<4x256xf32>
    %c0_228 = arith.constant 0 : index
    %c147 = arith.constant 147 : index
    %1117 = vector.load %arg7[%c0_228, %c147] : memref<4x169xf32, #tpu.memory_space<vmem>>, vector<4x1xf32>
    %1118 = vector.extract_strided_slice %1090 {offsets = [0, 4], sizes = [4, 256], strides = [1, 1]} : vector<4x268xf32> to vector<4x256xf32>
    %1119 = vector.broadcast %63 : vector<1x256xf32> to vector<4x256xf32>
    %1120 = arith.mulf %1118, %1119 : vector<4x256xf32>
    %1121 = vector.broadcast %1117 : vector<4x1xf32> to vector<4x256xf32>
    %1122 = arith.mulf %1121, %1120 : vector<4x256xf32>
    %1123 = arith.addf %1109, %1122 : vector<4x256xf32>
    %c0_229 = arith.constant 0 : index
    %c148 = arith.constant 148 : index
    %1124 = vector.load %arg7[%c0_229, %c148] : memref<4x169xf32, #tpu.memory_space<vmem>>, vector<4x1xf32>
    %1125 = vector.extract_strided_slice %1090 {offsets = [0, 5], sizes = [4, 256], strides = [1, 1]} : vector<4x268xf32> to vector<4x256xf32>
    %1126 = vector.broadcast %65 : vector<1x256xf32> to vector<4x256xf32>
    %1127 = arith.mulf %1125, %1126 : vector<4x256xf32>
    %1128 = vector.broadcast %1124 : vector<4x1xf32> to vector<4x256xf32>
    %1129 = arith.mulf %1128, %1127 : vector<4x256xf32>
    %1130 = arith.addf %1116, %1129 : vector<4x256xf32>
    %c0_230 = arith.constant 0 : index
    %c149 = arith.constant 149 : index
    %1131 = vector.load %arg7[%c0_230, %c149] : memref<4x169xf32, #tpu.memory_space<vmem>>, vector<4x1xf32>
    %1132 = vector.extract_strided_slice %1090 {offsets = [0, 6], sizes = [4, 256], strides = [1, 1]} : vector<4x268xf32> to vector<4x256xf32>
    %1133 = vector.broadcast %67 : vector<1x256xf32> to vector<4x256xf32>
    %1134 = arith.mulf %1132, %1133 : vector<4x256xf32>
    %1135 = vector.broadcast %1131 : vector<4x1xf32> to vector<4x256xf32>
    %1136 = arith.mulf %1135, %1134 : vector<4x256xf32>
    %1137 = arith.addf %1123, %1136 : vector<4x256xf32>
    %c0_231 = arith.constant 0 : index
    %c150 = arith.constant 150 : index
    %1138 = vector.load %arg7[%c0_231, %c150] : memref<4x169xf32, #tpu.memory_space<vmem>>, vector<4x1xf32>
    %1139 = vector.extract_strided_slice %1090 {offsets = [0, 7], sizes = [4, 256], strides = [1, 1]} : vector<4x268xf32> to vector<4x256xf32>
    %1140 = vector.broadcast %69 : vector<1x256xf32> to vector<4x256xf32>
    %1141 = arith.mulf %1139, %1140 : vector<4x256xf32>
    %1142 = vector.broadcast %1138 : vector<4x1xf32> to vector<4x256xf32>
    %1143 = arith.mulf %1142, %1141 : vector<4x256xf32>
    %1144 = arith.addf %1130, %1143 : vector<4x256xf32>
    %c0_232 = arith.constant 0 : index
    %c151 = arith.constant 151 : index
    %1145 = vector.load %arg7[%c0_232, %c151] : memref<4x169xf32, #tpu.memory_space<vmem>>, vector<4x1xf32>
    %1146 = vector.extract_strided_slice %1090 {offsets = [0, 8], sizes = [4, 256], strides = [1, 1]} : vector<4x268xf32> to vector<4x256xf32>
    %1147 = vector.broadcast %71 : vector<1x256xf32> to vector<4x256xf32>
    %1148 = arith.mulf %1146, %1147 : vector<4x256xf32>
    %1149 = vector.broadcast %1145 : vector<4x1xf32> to vector<4x256xf32>
    %1150 = arith.mulf %1149, %1148 : vector<4x256xf32>
    %1151 = arith.addf %1137, %1150 : vector<4x256xf32>
    %c0_233 = arith.constant 0 : index
    %c152 = arith.constant 152 : index
    %1152 = vector.load %arg7[%c0_233, %c152] : memref<4x169xf32, #tpu.memory_space<vmem>>, vector<4x1xf32>
    %1153 = vector.extract_strided_slice %1090 {offsets = [0, 9], sizes = [4, 256], strides = [1, 1]} : vector<4x268xf32> to vector<4x256xf32>
    %1154 = vector.broadcast %73 : vector<1x256xf32> to vector<4x256xf32>
    %1155 = arith.mulf %1153, %1154 : vector<4x256xf32>
    %1156 = vector.broadcast %1152 : vector<4x1xf32> to vector<4x256xf32>
    %1157 = arith.mulf %1156, %1155 : vector<4x256xf32>
    %1158 = arith.addf %1144, %1157 : vector<4x256xf32>
    %c0_234 = arith.constant 0 : index
    %c153 = arith.constant 153 : index
    %1159 = vector.load %arg7[%c0_234, %c153] : memref<4x169xf32, #tpu.memory_space<vmem>>, vector<4x1xf32>
    %1160 = vector.extract_strided_slice %1090 {offsets = [0, 10], sizes = [4, 256], strides = [1, 1]} : vector<4x268xf32> to vector<4x256xf32>
    %1161 = vector.broadcast %75 : vector<1x256xf32> to vector<4x256xf32>
    %1162 = arith.mulf %1160, %1161 : vector<4x256xf32>
    %1163 = vector.broadcast %1159 : vector<4x1xf32> to vector<4x256xf32>
    %1164 = arith.mulf %1163, %1162 : vector<4x256xf32>
    %1165 = arith.addf %1151, %1164 : vector<4x256xf32>
    %c0_235 = arith.constant 0 : index
    %c154 = arith.constant 154 : index
    %1166 = vector.load %arg7[%c0_235, %c154] : memref<4x169xf32, #tpu.memory_space<vmem>>, vector<4x1xf32>
    %1167 = vector.extract_strided_slice %1090 {offsets = [0, 11], sizes = [4, 256], strides = [1, 1]} : vector<4x268xf32> to vector<4x256xf32>
    %1168 = vector.broadcast %77 : vector<1x256xf32> to vector<4x256xf32>
    %1169 = arith.mulf %1167, %1168 : vector<4x256xf32>
    %1170 = vector.broadcast %1166 : vector<4x1xf32> to vector<4x256xf32>
    %1171 = arith.mulf %1170, %1169 : vector<4x256xf32>
    %1172 = arith.addf %1158, %1171 : vector<4x256xf32>
    %c0_236 = arith.constant 0 : index
    %c155 = arith.constant 155 : index
    %1173 = vector.load %arg7[%c0_236, %c155] : memref<4x169xf32, #tpu.memory_space<vmem>>, vector<4x1xf32>
    %1174 = vector.extract_strided_slice %1090 {offsets = [0, 12], sizes = [4, 256], strides = [1, 1]} : vector<4x268xf32> to vector<4x256xf32>
    %1175 = vector.broadcast %79 : vector<1x256xf32> to vector<4x256xf32>
    %1176 = arith.mulf %1174, %1175 : vector<4x256xf32>
    %1177 = vector.broadcast %1173 : vector<4x1xf32> to vector<4x256xf32>
    %1178 = arith.mulf %1177, %1176 : vector<4x256xf32>
    %1179 = arith.addf %1165, %1178 : vector<4x256xf32>
    %1180 = arith.addf %1179, %1172 : vector<4x256xf32>
    %1181 = arith.addf %997, %1180 : vector<4x256xf32>
    %c0_237 = arith.constant 0 : index
    %c192 = arith.constant 192 : index
    %1182 = vector.load %arg24[%c0_237, %c192] : memref<4x460xf32, #tpu.memory_space<vmem>>, vector<4x268xf32>
    %c0_238 = arith.constant 0 : index
    %c156 = arith.constant 156 : index
    %1183 = vector.load %arg7[%c0_238, %c156] : memref<4x169xf32, #tpu.memory_space<vmem>>, vector<4x1xf32>
    %1184 = vector.extract_strided_slice %1182 {offsets = [0, 0], sizes = [4, 256], strides = [1, 1]} : vector<4x268xf32> to vector<4x256xf32>
    %1185 = vector.broadcast %55 : vector<1x256xf32> to vector<4x256xf32>
    %1186 = arith.mulf %1184, %1185 : vector<4x256xf32>
    %1187 = vector.broadcast %1183 : vector<4x1xf32> to vector<4x256xf32>
    %1188 = arith.mulf %1187, %1186 : vector<4x256xf32>
    %c0_239 = arith.constant 0 : index
    %c157 = arith.constant 157 : index
    %1189 = vector.load %arg7[%c0_239, %c157] : memref<4x169xf32, #tpu.memory_space<vmem>>, vector<4x1xf32>
    %1190 = vector.extract_strided_slice %1182 {offsets = [0, 1], sizes = [4, 256], strides = [1, 1]} : vector<4x268xf32> to vector<4x256xf32>
    %1191 = vector.broadcast %57 : vector<1x256xf32> to vector<4x256xf32>
    %1192 = arith.mulf %1190, %1191 : vector<4x256xf32>
    %1193 = vector.broadcast %1189 : vector<4x1xf32> to vector<4x256xf32>
    %1194 = arith.mulf %1193, %1192 : vector<4x256xf32>
    %c0_240 = arith.constant 0 : index
    %c158 = arith.constant 158 : index
    %1195 = vector.load %arg7[%c0_240, %c158] : memref<4x169xf32, #tpu.memory_space<vmem>>, vector<4x1xf32>
    %1196 = vector.extract_strided_slice %1182 {offsets = [0, 2], sizes = [4, 256], strides = [1, 1]} : vector<4x268xf32> to vector<4x256xf32>
    %1197 = vector.broadcast %59 : vector<1x256xf32> to vector<4x256xf32>
    %1198 = arith.mulf %1196, %1197 : vector<4x256xf32>
    %1199 = vector.broadcast %1195 : vector<4x1xf32> to vector<4x256xf32>
    %1200 = arith.mulf %1199, %1198 : vector<4x256xf32>
    %1201 = arith.addf %1188, %1200 : vector<4x256xf32>
    %c0_241 = arith.constant 0 : index
    %c159 = arith.constant 159 : index
    %1202 = vector.load %arg7[%c0_241, %c159] : memref<4x169xf32, #tpu.memory_space<vmem>>, vector<4x1xf32>
    %1203 = vector.extract_strided_slice %1182 {offsets = [0, 3], sizes = [4, 256], strides = [1, 1]} : vector<4x268xf32> to vector<4x256xf32>
    %1204 = vector.broadcast %61 : vector<1x256xf32> to vector<4x256xf32>
    %1205 = arith.mulf %1203, %1204 : vector<4x256xf32>
    %1206 = vector.broadcast %1202 : vector<4x1xf32> to vector<4x256xf32>
    %1207 = arith.mulf %1206, %1205 : vector<4x256xf32>
    %1208 = arith.addf %1194, %1207 : vector<4x256xf32>
    %c0_242 = arith.constant 0 : index
    %c160_243 = arith.constant 160 : index
    %1209 = vector.load %arg7[%c0_242, %c160_243] : memref<4x169xf32, #tpu.memory_space<vmem>>, vector<4x1xf32>
    %1210 = vector.extract_strided_slice %1182 {offsets = [0, 4], sizes = [4, 256], strides = [1, 1]} : vector<4x268xf32> to vector<4x256xf32>
    %1211 = vector.broadcast %63 : vector<1x256xf32> to vector<4x256xf32>
    %1212 = arith.mulf %1210, %1211 : vector<4x256xf32>
    %1213 = vector.broadcast %1209 : vector<4x1xf32> to vector<4x256xf32>
    %1214 = arith.mulf %1213, %1212 : vector<4x256xf32>
    %1215 = arith.addf %1201, %1214 : vector<4x256xf32>
    %c0_244 = arith.constant 0 : index
    %c161 = arith.constant 161 : index
    %1216 = vector.load %arg7[%c0_244, %c161] : memref<4x169xf32, #tpu.memory_space<vmem>>, vector<4x1xf32>
    %1217 = vector.extract_strided_slice %1182 {offsets = [0, 5], sizes = [4, 256], strides = [1, 1]} : vector<4x268xf32> to vector<4x256xf32>
    %1218 = vector.broadcast %65 : vector<1x256xf32> to vector<4x256xf32>
    %1219 = arith.mulf %1217, %1218 : vector<4x256xf32>
    %1220 = vector.broadcast %1216 : vector<4x1xf32> to vector<4x256xf32>
    %1221 = arith.mulf %1220, %1219 : vector<4x256xf32>
    %1222 = arith.addf %1208, %1221 : vector<4x256xf32>
    %c0_245 = arith.constant 0 : index
    %c162 = arith.constant 162 : index
    %1223 = vector.load %arg7[%c0_245, %c162] : memref<4x169xf32, #tpu.memory_space<vmem>>, vector<4x1xf32>
    %1224 = vector.extract_strided_slice %1182 {offsets = [0, 6], sizes = [4, 256], strides = [1, 1]} : vector<4x268xf32> to vector<4x256xf32>
    %1225 = vector.broadcast %67 : vector<1x256xf32> to vector<4x256xf32>
    %1226 = arith.mulf %1224, %1225 : vector<4x256xf32>
    %1227 = vector.broadcast %1223 : vector<4x1xf32> to vector<4x256xf32>
    %1228 = arith.mulf %1227, %1226 : vector<4x256xf32>
    %1229 = arith.addf %1215, %1228 : vector<4x256xf32>
    %c0_246 = arith.constant 0 : index
    %c163 = arith.constant 163 : index
    %1230 = vector.load %arg7[%c0_246, %c163] : memref<4x169xf32, #tpu.memory_space<vmem>>, vector<4x1xf32>
    %1231 = vector.extract_strided_slice %1182 {offsets = [0, 7], sizes = [4, 256], strides = [1, 1]} : vector<4x268xf32> to vector<4x256xf32>
    %1232 = vector.broadcast %69 : vector<1x256xf32> to vector<4x256xf32>
    %1233 = arith.mulf %1231, %1232 : vector<4x256xf32>
    %1234 = vector.broadcast %1230 : vector<4x1xf32> to vector<4x256xf32>
    %1235 = arith.mulf %1234, %1233 : vector<4x256xf32>
    %1236 = arith.addf %1222, %1235 : vector<4x256xf32>
    %c0_247 = arith.constant 0 : index
    %c164 = arith.constant 164 : index
    %1237 = vector.load %arg7[%c0_247, %c164] : memref<4x169xf32, #tpu.memory_space<vmem>>, vector<4x1xf32>
    %1238 = vector.extract_strided_slice %1182 {offsets = [0, 8], sizes = [4, 256], strides = [1, 1]} : vector<4x268xf32> to vector<4x256xf32>
    %1239 = vector.broadcast %71 : vector<1x256xf32> to vector<4x256xf32>
    %1240 = arith.mulf %1238, %1239 : vector<4x256xf32>
    %1241 = vector.broadcast %1237 : vector<4x1xf32> to vector<4x256xf32>
    %1242 = arith.mulf %1241, %1240 : vector<4x256xf32>
    %1243 = arith.addf %1229, %1242 : vector<4x256xf32>
    %c0_248 = arith.constant 0 : index
    %c165 = arith.constant 165 : index
    %1244 = vector.load %arg7[%c0_248, %c165] : memref<4x169xf32, #tpu.memory_space<vmem>>, vector<4x1xf32>
    %1245 = vector.extract_strided_slice %1182 {offsets = [0, 9], sizes = [4, 256], strides = [1, 1]} : vector<4x268xf32> to vector<4x256xf32>
    %1246 = vector.broadcast %73 : vector<1x256xf32> to vector<4x256xf32>
    %1247 = arith.mulf %1245, %1246 : vector<4x256xf32>
    %1248 = vector.broadcast %1244 : vector<4x1xf32> to vector<4x256xf32>
    %1249 = arith.mulf %1248, %1247 : vector<4x256xf32>
    %1250 = arith.addf %1236, %1249 : vector<4x256xf32>
    %c0_249 = arith.constant 0 : index
    %c166 = arith.constant 166 : index
    %1251 = vector.load %arg7[%c0_249, %c166] : memref<4x169xf32, #tpu.memory_space<vmem>>, vector<4x1xf32>
    %1252 = vector.extract_strided_slice %1182 {offsets = [0, 10], sizes = [4, 256], strides = [1, 1]} : vector<4x268xf32> to vector<4x256xf32>
    %1253 = vector.broadcast %75 : vector<1x256xf32> to vector<4x256xf32>
    %1254 = arith.mulf %1252, %1253 : vector<4x256xf32>
    %1255 = vector.broadcast %1251 : vector<4x1xf32> to vector<4x256xf32>
    %1256 = arith.mulf %1255, %1254 : vector<4x256xf32>
    %1257 = arith.addf %1243, %1256 : vector<4x256xf32>
    %c0_250 = arith.constant 0 : index
    %c167 = arith.constant 167 : index
    %1258 = vector.load %arg7[%c0_250, %c167] : memref<4x169xf32, #tpu.memory_space<vmem>>, vector<4x1xf32>
    %1259 = vector.extract_strided_slice %1182 {offsets = [0, 11], sizes = [4, 256], strides = [1, 1]} : vector<4x268xf32> to vector<4x256xf32>
    %1260 = vector.broadcast %77 : vector<1x256xf32> to vector<4x256xf32>
    %1261 = arith.mulf %1259, %1260 : vector<4x256xf32>
    %1262 = vector.broadcast %1258 : vector<4x1xf32> to vector<4x256xf32>
    %1263 = arith.mulf %1262, %1261 : vector<4x256xf32>
    %1264 = arith.addf %1250, %1263 : vector<4x256xf32>
    %c0_251 = arith.constant 0 : index
    %c168 = arith.constant 168 : index
    %1265 = vector.load %arg7[%c0_251, %c168] : memref<4x169xf32, #tpu.memory_space<vmem>>, vector<4x1xf32>
    %1266 = vector.extract_strided_slice %1182 {offsets = [0, 12], sizes = [4, 256], strides = [1, 1]} : vector<4x268xf32> to vector<4x256xf32>
    %1267 = vector.broadcast %79 : vector<1x256xf32> to vector<4x256xf32>
    %1268 = arith.mulf %1266, %1267 : vector<4x256xf32>
    %1269 = vector.broadcast %1265 : vector<4x1xf32> to vector<4x256xf32>
    %1270 = arith.mulf %1269, %1268 : vector<4x256xf32>
    %1271 = arith.addf %1257, %1270 : vector<4x256xf32>
    %1272 = arith.addf %1271, %1264 : vector<4x256xf32>
    %1273 = arith.addf %1089, %1272 : vector<4x256xf32>
    %1274 = arith.addf %1273, %1181 : vector<4x256xf32>
    %c0_252 = arith.constant 0 : index
    %c0_253 = arith.constant 0 : index
    %1275 = vector.load %arg8[%c0_252, %c0_253] : memref<4x1xf32, #tpu.memory_space<vmem>>, vector<4x1xf32>
    %1276 = vector.broadcast %1275 : vector<4x1xf32> to vector<4x256xf32>
    %1277 = arith.addf %1274, %1276 : vector<4x256xf32>
    %cst_254 = arith.constant 5.000000e-01 : f32
    %1278 = vector.broadcast %cst_254 : f32 to vector<4x256xf32>
    %1279 = arith.mulf %1278, %1277 : vector<4x256xf32>
    %cst_255 = arith.constant 4.471500e-02 : f32
    %1280 = vector.broadcast %cst_255 : f32 to vector<4x256xf32>
    %1281 = arith.mulf %1280, %1277 : vector<4x256xf32>
    %1282 = arith.mulf %1281, %1277 : vector<4x256xf32>
    %1283 = arith.mulf %1282, %1277 : vector<4x256xf32>
    %1284 = arith.addf %1277, %1283 : vector<4x256xf32>
    %cst_256 = arith.constant 0.797884583 : f32
    %1285 = vector.broadcast %cst_256 : f32 to vector<4x256xf32>
    %1286 = arith.mulf %1285, %1284 : vector<4x256xf32>
    %1287 = math.tanh %1286 : vector<4x256xf32>
    %cst_257 = arith.constant 1.000000e+00 : f32
    %1288 = vector.broadcast %cst_257 : f32 to vector<4x256xf32>
    %1289 = arith.addf %1288, %1287 : vector<4x256xf32>
    %1290 = arith.mulf %1279, %1289 : vector<4x256xf32>
    %cst_258 = arith.constant dense<0.000000e+00> : vector<4xf32>
    %1291 = vector.multi_reduction <add>, %1290, %cst_258 [1] : vector<4x256xf32> to vector<4xf32>
    %1292 = vector.shape_cast %1291 : vector<4xf32> to vector<4x1xf32>
    %cst_259 = arith.constant 3.906250e-03 : f32
    %1293 = vector.broadcast %cst_259 : f32 to vector<4x1xf32>
    %1294 = arith.mulf %1292, %1293 : vector<4x1xf32>
    %c0_260 = arith.constant 0 : index
    %c0_261 = arith.constant 0 : index
    %1295 = vector.load %arg9[%c0_260, %c0_261] : memref<2x4xf32, #tpu.memory_space<vmem>>, vector<2x4xf32>
    %1296 = vector.extract_strided_slice %1295 {offsets = [0, 0], sizes = [2, 1], strides = [1, 1]} : vector<2x4xf32> to vector<2x1xf32>
    %1297 = vector.extract_strided_slice %1294 {offsets = [0, 0], sizes = [1, 1], strides = [1, 1]} : vector<4x1xf32> to vector<1x1xf32>
    %1298 = vector.broadcast %1297 : vector<1x1xf32> to vector<2x1xf32>
    %1299 = arith.mulf %1296, %1298 : vector<2x1xf32>
    %1300 = vector.extract_strided_slice %1295 {offsets = [0, 1], sizes = [2, 1], strides = [1, 1]} : vector<2x4xf32> to vector<2x1xf32>
    %1301 = vector.extract_strided_slice %1294 {offsets = [1, 0], sizes = [1, 1], strides = [1, 1]} : vector<4x1xf32> to vector<1x1xf32>
    %1302 = vector.broadcast %1301 : vector<1x1xf32> to vector<2x1xf32>
    %1303 = arith.mulf %1300, %1302 : vector<2x1xf32>
    %1304 = arith.addf %1299, %1303 : vector<2x1xf32>
    %1305 = vector.extract_strided_slice %1295 {offsets = [0, 2], sizes = [2, 1], strides = [1, 1]} : vector<2x4xf32> to vector<2x1xf32>
    %1306 = vector.extract_strided_slice %1294 {offsets = [2, 0], sizes = [1, 1], strides = [1, 1]} : vector<4x1xf32> to vector<1x1xf32>
    %1307 = vector.broadcast %1306 : vector<1x1xf32> to vector<2x1xf32>
    %1308 = arith.mulf %1305, %1307 : vector<2x1xf32>
    %1309 = arith.addf %1304, %1308 : vector<2x1xf32>
    %1310 = vector.extract_strided_slice %1295 {offsets = [0, 3], sizes = [2, 1], strides = [1, 1]} : vector<2x4xf32> to vector<2x1xf32>
    %1311 = vector.extract_strided_slice %1294 {offsets = [3, 0], sizes = [1, 1], strides = [1, 1]} : vector<4x1xf32> to vector<1x1xf32>
    %1312 = vector.broadcast %1311 : vector<1x1xf32> to vector<2x1xf32>
    %1313 = arith.mulf %1310, %1312 : vector<2x1xf32>
    %1314 = arith.addf %1309, %1313 : vector<2x1xf32>
    %c0_262 = arith.constant 0 : index
    %c0_263 = arith.constant 0 : index
    %1315 = vector.load %arg10[%c0_262, %c0_263] : memref<2x1xf32, #tpu.memory_space<vmem>>, vector<2x1xf32>
    %1316 = arith.addf %1314, %1315 : vector<2x1xf32>
    %cst_264 = arith.constant 0.000000e+00 : f32
    %1317 = vector.broadcast %cst_264 : f32 to vector<2x1xf32>
    %1318 = arith.maximumf %1316, %1317 : vector<2x1xf32>
    %c0_265 = arith.constant 0 : index
    %c0_266 = arith.constant 0 : index
    %1319 = vector.load %arg11[%c0_265, %c0_266] : memref<4x2xf32, #tpu.memory_space<vmem>>, vector<4x2xf32>
    %1320 = vector.extract_strided_slice %1319 {offsets = [0, 0], sizes = [4, 1], strides = [1, 1]} : vector<4x2xf32> to vector<4x1xf32>
    %1321 = vector.extract_strided_slice %1318 {offsets = [0, 0], sizes = [1, 1], strides = [1, 1]} : vector<2x1xf32> to vector<1x1xf32>
    %1322 = vector.broadcast %1321 : vector<1x1xf32> to vector<4x1xf32>
    %1323 = arith.mulf %1320, %1322 : vector<4x1xf32>
    %1324 = vector.extract_strided_slice %1319 {offsets = [0, 1], sizes = [4, 1], strides = [1, 1]} : vector<4x2xf32> to vector<4x1xf32>
    %1325 = vector.extract_strided_slice %1318 {offsets = [1, 0], sizes = [1, 1], strides = [1, 1]} : vector<2x1xf32> to vector<1x1xf32>
    %1326 = vector.broadcast %1325 : vector<1x1xf32> to vector<4x1xf32>
    %1327 = arith.mulf %1324, %1326 : vector<4x1xf32>
    %1328 = arith.addf %1323, %1327 : vector<4x1xf32>
    %c0_267 = arith.constant 0 : index
    %c0_268 = arith.constant 0 : index
    %1329 = vector.load %arg12[%c0_267, %c0_268] : memref<4x1xf32, #tpu.memory_space<vmem>>, vector<4x1xf32>
    %1330 = arith.addf %1328, %1329 : vector<4x1xf32>
    %cst_269 = arith.constant 0.000000e+00 : f32
    %1331 = vector.broadcast %cst_269 : f32 to vector<4x1xf32>
    %1332 = arith.subf %1331, %1330 : vector<4x1xf32>
    %1333 = math.exp %1332 : vector<4x1xf32>
    %cst_270 = arith.constant 1.000000e+00 : f32
    %1334 = vector.broadcast %cst_270 : f32 to vector<4x1xf32>
    %1335 = arith.addf %1334, %1333 : vector<4x1xf32>
    %cst_271 = arith.constant 1.000000e+00 : f32
    %1336 = vector.broadcast %cst_271 : f32 to vector<4x1xf32>
    %1337 = arith.divf %1336, %1335 : vector<4x1xf32>
    %1338 = vector.broadcast %1337 : vector<4x1xf32> to vector<4x256xf32>
    %1339 = arith.mulf %1290, %1338 : vector<4x256xf32>
    %c0_272 = arith.constant 0 : index
    %c0_273 = arith.constant 0 : index
    %1340 = vector.load %arg13[%c0_272, %c0_273] : memref<4x4xf32, #tpu.memory_space<vmem>>, vector<4x4xf32>
    %1341 = vector.extract_strided_slice %1340 {offsets = [0, 0], sizes = [4, 1], strides = [1, 1]} : vector<4x4xf32> to vector<4x1xf32>
    %1342 = vector.extract_strided_slice %1339 {offsets = [0, 0], sizes = [1, 256], strides = [1, 1]} : vector<4x256xf32> to vector<1x256xf32>
    %1343 = vector.broadcast %1341 : vector<4x1xf32> to vector<4x256xf32>
    %1344 = vector.broadcast %1342 : vector<1x256xf32> to vector<4x256xf32>
    %1345 = arith.mulf %1343, %1344 : vector<4x256xf32>
    %1346 = vector.extract_strided_slice %1340 {offsets = [0, 1], sizes = [4, 1], strides = [1, 1]} : vector<4x4xf32> to vector<4x1xf32>
    %1347 = vector.extract_strided_slice %1339 {offsets = [1, 0], sizes = [1, 256], strides = [1, 1]} : vector<4x256xf32> to vector<1x256xf32>
    %1348 = vector.broadcast %1346 : vector<4x1xf32> to vector<4x256xf32>
    %1349 = vector.broadcast %1347 : vector<1x256xf32> to vector<4x256xf32>
    %1350 = arith.mulf %1348, %1349 : vector<4x256xf32>
    %1351 = arith.addf %1345, %1350 : vector<4x256xf32>
    %1352 = vector.extract_strided_slice %1340 {offsets = [0, 2], sizes = [4, 1], strides = [1, 1]} : vector<4x4xf32> to vector<4x1xf32>
    %1353 = vector.extract_strided_slice %1339 {offsets = [2, 0], sizes = [1, 256], strides = [1, 1]} : vector<4x256xf32> to vector<1x256xf32>
    %1354 = vector.broadcast %1352 : vector<4x1xf32> to vector<4x256xf32>
    %1355 = vector.broadcast %1353 : vector<1x256xf32> to vector<4x256xf32>
    %1356 = arith.mulf %1354, %1355 : vector<4x256xf32>
    %1357 = arith.addf %1351, %1356 : vector<4x256xf32>
    %1358 = vector.extract_strided_slice %1340 {offsets = [0, 3], sizes = [4, 1], strides = [1, 1]} : vector<4x4xf32> to vector<4x1xf32>
    %1359 = vector.extract_strided_slice %1339 {offsets = [3, 0], sizes = [1, 256], strides = [1, 1]} : vector<4x256xf32> to vector<1x256xf32>
    %1360 = vector.broadcast %1358 : vector<4x1xf32> to vector<4x256xf32>
    %1361 = vector.broadcast %1359 : vector<1x256xf32> to vector<4x256xf32>
    %1362 = arith.mulf %1360, %1361 : vector<4x256xf32>
    %1363 = arith.addf %1357, %1362 : vector<4x256xf32>
    %c0_274 = arith.constant 0 : index
    %c0_275 = arith.constant 0 : index
    %1364 = vector.load %arg14[%c0_274, %c0_275] : memref<4x1xf32, #tpu.memory_space<vmem>>, vector<4x1xf32>
    %1365 = vector.broadcast %1364 : vector<4x1xf32> to vector<4x256xf32>
    %1366 = arith.addf %1363, %1365 : vector<4x256xf32>
    %c0_276 = arith.constant 0 : index
    %c0_277 = arith.constant 0 : index
    %1367 = vector.load %arg21[%c0_276, %c0_277] : memref<4x1xf32, #tpu.memory_space<vmem>>, vector<4x1xf32>
    %1368 = vector.broadcast %1367 : vector<4x1xf32> to vector<4x256xf32>
    %1369 = arith.mulf %1366, %1368 : vector<4x256xf32>
    %1370 = arith.addf %1, %1369 : vector<4x256xf32>
    %cst_278 = arith.constant dense<0.000000e+00> : vector<256xf32>
    %1371 = vector.multi_reduction <add>, %1370, %cst_278 [0] : vector<4x256xf32> to vector<256xf32>
    %1372 = vector.shape_cast %1371 : vector<256xf32> to vector<1x256xf32>
    %cst_279 = arith.constant 2.500000e-01 : f32
    %1373 = vector.broadcast %cst_279 : f32 to vector<1x256xf32>
    %1374 = arith.mulf %1372, %1373 : vector<1x256xf32>
    %1375 = vector.broadcast %1374 : vector<1x256xf32> to vector<4x256xf32>
    %1376 = arith.subf %1370, %1375 : vector<4x256xf32>
    %1377 = arith.mulf %1376, %1376 : vector<4x256xf32>
    %cst_280 = arith.constant dense<0.000000e+00> : vector<256xf32>
    %1378 = vector.multi_reduction <add>, %1377, %cst_280 [0] : vector<4x256xf32> to vector<256xf32>
    %1379 = vector.shape_cast %1378 : vector<256xf32> to vector<1x256xf32>
    %cst_281 = arith.constant 2.500000e-01 : f32
    %1380 = vector.broadcast %cst_281 : f32 to vector<1x256xf32>
    %1381 = arith.mulf %1379, %1380 : vector<1x256xf32>
    %c0_282 = arith.constant 0 : index
    %c0_283 = arith.constant 0 : index
    %1382 = vector.load %arg15[%c0_282, %c0_283] : memref<4x1xf32, #tpu.memory_space<vmem>>, vector<4x1xf32>
    %cst_284 = arith.constant 9.99999997E-7 : f32
    %1383 = vector.broadcast %cst_284 : f32 to vector<1x256xf32>
    %1384 = arith.addf %1381, %1383 : vector<1x256xf32>
    %1385 = math.rsqrt %1384 : vector<1x256xf32>
    %1386 = vector.broadcast %1385 : vector<1x256xf32> to vector<4x256xf32>
    %1387 = arith.mulf %1376, %1386 : vector<4x256xf32>
    %1388 = vector.broadcast %1382 : vector<4x1xf32> to vector<4x256xf32>
    %1389 = arith.mulf %1388, %1387 : vector<4x256xf32>
    %c0_285 = arith.constant 0 : index
    %c0_286 = arith.constant 0 : index
    %1390 = vector.load %arg16[%c0_285, %c0_286] : memref<4x1xf32, #tpu.memory_space<vmem>>, vector<4x1xf32>
    %1391 = vector.broadcast %1390 : vector<4x1xf32> to vector<4x256xf32>
    %1392 = arith.addf %1389, %1391 : vector<4x256xf32>
    %c0_287 = arith.constant 0 : index
    %c0_288 = arith.constant 0 : index
    %1393 = vector.load %arg17[%c0_287, %c0_288] : memref<8x4xf32, #tpu.memory_space<vmem>>, vector<8x4xf32>
    %1394 = vector.extract_strided_slice %1393 {offsets = [0, 0], sizes = [8, 1], strides = [1, 1]} : vector<8x4xf32> to vector<8x1xf32>
    %1395 = vector.extract_strided_slice %1392 {offsets = [0, 0], sizes = [1, 256], strides = [1, 1]} : vector<4x256xf32> to vector<1x256xf32>
    %1396 = vector.broadcast %1394 : vector<8x1xf32> to vector<8x256xf32>
    %1397 = vector.broadcast %1395 : vector<1x256xf32> to vector<8x256xf32>
    %1398 = arith.mulf %1396, %1397 : vector<8x256xf32>
    %1399 = vector.extract_strided_slice %1393 {offsets = [0, 1], sizes = [8, 1], strides = [1, 1]} : vector<8x4xf32> to vector<8x1xf32>
    %1400 = vector.extract_strided_slice %1392 {offsets = [1, 0], sizes = [1, 256], strides = [1, 1]} : vector<4x256xf32> to vector<1x256xf32>
    %1401 = vector.broadcast %1399 : vector<8x1xf32> to vector<8x256xf32>
    %1402 = vector.broadcast %1400 : vector<1x256xf32> to vector<8x256xf32>
    %1403 = arith.mulf %1401, %1402 : vector<8x256xf32>
    %1404 = arith.addf %1398, %1403 : vector<8x256xf32>
    %1405 = vector.extract_strided_slice %1393 {offsets = [0, 2], sizes = [8, 1], strides = [1, 1]} : vector<8x4xf32> to vector<8x1xf32>
    %1406 = vector.extract_strided_slice %1392 {offsets = [2, 0], sizes = [1, 256], strides = [1, 1]} : vector<4x256xf32> to vector<1x256xf32>
    %1407 = vector.broadcast %1405 : vector<8x1xf32> to vector<8x256xf32>
    %1408 = vector.broadcast %1406 : vector<1x256xf32> to vector<8x256xf32>
    %1409 = arith.mulf %1407, %1408 : vector<8x256xf32>
    %1410 = arith.addf %1404, %1409 : vector<8x256xf32>
    %1411 = vector.extract_strided_slice %1393 {offsets = [0, 3], sizes = [8, 1], strides = [1, 1]} : vector<8x4xf32> to vector<8x1xf32>
    %1412 = vector.extract_strided_slice %1392 {offsets = [3, 0], sizes = [1, 256], strides = [1, 1]} : vector<4x256xf32> to vector<1x256xf32>
    %1413 = vector.broadcast %1411 : vector<8x1xf32> to vector<8x256xf32>
    %1414 = vector.broadcast %1412 : vector<1x256xf32> to vector<8x256xf32>
    %1415 = arith.mulf %1413, %1414 : vector<8x256xf32>
    %1416 = arith.addf %1410, %1415 : vector<8x256xf32>
    %c0_289 = arith.constant 0 : index
    %c0_290 = arith.constant 0 : index
    %1417 = vector.load %arg18[%c0_289, %c0_290] : memref<8x1xf32, #tpu.memory_space<vmem>>, vector<8x1xf32>
    %1418 = vector.broadcast %1417 : vector<8x1xf32> to vector<8x256xf32>
    %1419 = arith.addf %1416, %1418 : vector<8x256xf32>
    %cst_291 = arith.constant 5.000000e-01 : f32
    %1420 = vector.broadcast %cst_291 : f32 to vector<8x256xf32>
    %1421 = arith.mulf %1420, %1419 : vector<8x256xf32>
    %cst_292 = arith.constant 4.471500e-02 : f32
    %1422 = vector.broadcast %cst_292 : f32 to vector<8x256xf32>
    %1423 = arith.mulf %1422, %1419 : vector<8x256xf32>
    %1424 = arith.mulf %1423, %1419 : vector<8x256xf32>
    %1425 = arith.mulf %1424, %1419 : vector<8x256xf32>
    %1426 = arith.addf %1419, %1425 : vector<8x256xf32>
    %cst_293 = arith.constant 0.797884583 : f32
    %1427 = vector.broadcast %cst_293 : f32 to vector<8x256xf32>
    %1428 = arith.mulf %1427, %1426 : vector<8x256xf32>
    %1429 = math.tanh %1428 : vector<8x256xf32>
    %cst_294 = arith.constant 1.000000e+00 : f32
    %1430 = vector.broadcast %cst_294 : f32 to vector<8x256xf32>
    %1431 = arith.addf %1430, %1429 : vector<8x256xf32>
    %1432 = arith.mulf %1421, %1431 : vector<8x256xf32>
    %c0_295 = arith.constant 0 : index
    %c0_296 = arith.constant 0 : index
    %1433 = vector.load %arg19[%c0_295, %c0_296] : memref<4x8xf32, #tpu.memory_space<vmem>>, vector<4x8xf32>
    %1434 = vector.extract_strided_slice %1433 {offsets = [0, 0], sizes = [4, 1], strides = [1, 1]} : vector<4x8xf32> to vector<4x1xf32>
    %1435 = vector.extract_strided_slice %1432 {offsets = [0, 0], sizes = [1, 256], strides = [1, 1]} : vector<8x256xf32> to vector<1x256xf32>
    %1436 = vector.broadcast %1434 : vector<4x1xf32> to vector<4x256xf32>
    %1437 = vector.broadcast %1435 : vector<1x256xf32> to vector<4x256xf32>
    %1438 = arith.mulf %1436, %1437 : vector<4x256xf32>
    %1439 = vector.extract_strided_slice %1433 {offsets = [0, 1], sizes = [4, 1], strides = [1, 1]} : vector<4x8xf32> to vector<4x1xf32>
    %1440 = vector.extract_strided_slice %1432 {offsets = [1, 0], sizes = [1, 256], strides = [1, 1]} : vector<8x256xf32> to vector<1x256xf32>
    %1441 = vector.broadcast %1439 : vector<4x1xf32> to vector<4x256xf32>
    %1442 = vector.broadcast %1440 : vector<1x256xf32> to vector<4x256xf32>
    %1443 = arith.mulf %1441, %1442 : vector<4x256xf32>
    %1444 = arith.addf %1438, %1443 : vector<4x256xf32>
    %1445 = vector.extract_strided_slice %1433 {offsets = [0, 2], sizes = [4, 1], strides = [1, 1]} : vector<4x8xf32> to vector<4x1xf32>
    %1446 = vector.extract_strided_slice %1432 {offsets = [2, 0], sizes = [1, 256], strides = [1, 1]} : vector<8x256xf32> to vector<1x256xf32>
    %1447 = vector.broadcast %1445 : vector<4x1xf32> to vector<4x256xf32>
    %1448 = vector.broadcast %1446 : vector<1x256xf32> to vector<4x256xf32>
    %1449 = arith.mulf %1447, %1448 : vector<4x256xf32>
    %1450 = arith.addf %1444, %1449 : vector<4x256xf32>
    %1451 = vector.extract_strided_slice %1433 {offsets = [0, 3], sizes = [4, 1], strides = [1, 1]} : vector<4x8xf32> to vector<4x1xf32>
    %1452 = vector.extract_strided_slice %1432 {offsets = [3, 0], sizes = [1, 256], strides = [1, 1]} : vector<8x256xf32> to vector<1x256xf32>
    %1453 = vector.broadcast %1451 : vector<4x1xf32> to vector<4x256xf32>
    %1454 = vector.broadcast %1452 : vector<1x256xf32> to vector<4x256xf32>
    %1455 = arith.mulf %1453, %1454 : vector<4x256xf32>
    %1456 = arith.addf %1450, %1455 : vector<4x256xf32>
    %1457 = vector.extract_strided_slice %1433 {offsets = [0, 4], sizes = [4, 1], strides = [1, 1]} : vector<4x8xf32> to vector<4x1xf32>
    %1458 = vector.extract_strided_slice %1432 {offsets = [4, 0], sizes = [1, 256], strides = [1, 1]} : vector<8x256xf32> to vector<1x256xf32>
    %1459 = vector.broadcast %1457 : vector<4x1xf32> to vector<4x256xf32>
    %1460 = vector.broadcast %1458 : vector<1x256xf32> to vector<4x256xf32>
    %1461 = arith.mulf %1459, %1460 : vector<4x256xf32>
    %1462 = arith.addf %1456, %1461 : vector<4x256xf32>
    %1463 = vector.extract_strided_slice %1433 {offsets = [0, 5], sizes = [4, 1], strides = [1, 1]} : vector<4x8xf32> to vector<4x1xf32>
    %1464 = vector.extract_strided_slice %1432 {offsets = [5, 0], sizes = [1, 256], strides = [1, 1]} : vector<8x256xf32> to vector<1x256xf32>
    %1465 = vector.broadcast %1463 : vector<4x1xf32> to vector<4x256xf32>
    %1466 = vector.broadcast %1464 : vector<1x256xf32> to vector<4x256xf32>
    %1467 = arith.mulf %1465, %1466 : vector<4x256xf32>
    %1468 = arith.addf %1462, %1467 : vector<4x256xf32>
    %1469 = vector.extract_strided_slice %1433 {offsets = [0, 6], sizes = [4, 1], strides = [1, 1]} : vector<4x8xf32> to vector<4x1xf32>
    %1470 = vector.extract_strided_slice %1432 {offsets = [6, 0], sizes = [1, 256], strides = [1, 1]} : vector<8x256xf32> to vector<1x256xf32>
    %1471 = vector.broadcast %1469 : vector<4x1xf32> to vector<4x256xf32>
    %1472 = vector.broadcast %1470 : vector<1x256xf32> to vector<4x256xf32>
    %1473 = arith.mulf %1471, %1472 : vector<4x256xf32>
    %1474 = arith.addf %1468, %1473 : vector<4x256xf32>
    %1475 = vector.extract_strided_slice %1433 {offsets = [0, 7], sizes = [4, 1], strides = [1, 1]} : vector<4x8xf32> to vector<4x1xf32>
    %1476 = vector.extract_strided_slice %1432 {offsets = [7, 0], sizes = [1, 256], strides = [1, 1]} : vector<8x256xf32> to vector<1x256xf32>
    %1477 = vector.broadcast %1475 : vector<4x1xf32> to vector<4x256xf32>
    %1478 = vector.broadcast %1476 : vector<1x256xf32> to vector<4x256xf32>
    %1479 = arith.mulf %1477, %1478 : vector<4x256xf32>
    %1480 = arith.addf %1474, %1479 : vector<4x256xf32>
    %c0_297 = arith.constant 0 : index
    %c0_298 = arith.constant 0 : index
    %1481 = vector.load %arg20[%c0_297, %c0_298] : memref<4x1xf32, #tpu.memory_space<vmem>>, vector<4x1xf32>
    %1482 = vector.broadcast %1481 : vector<4x1xf32> to vector<4x256xf32>
    %1483 = arith.addf %1480, %1482 : vector<4x256xf32>
    %c0_299 = arith.constant 0 : index
    %c0_300 = arith.constant 0 : index
    %1484 = vector.load %arg22[%c0_299, %c0_300] : memref<4x1xf32, #tpu.memory_space<vmem>>, vector<4x1xf32>
    %1485 = vector.broadcast %1484 : vector<4x1xf32> to vector<4x256xf32>
    %1486 = arith.mulf %1483, %1485 : vector<4x256xf32>
    %1487 = arith.addf %1370, %1486 : vector<4x256xf32>
    %c0_301 = arith.constant 0 : index
    %c0_302 = arith.constant 0 : index
    %c0_303 = arith.constant 0 : index
    %1488 = vector.load %arg23[%c0_301, %c0_302, %c0_303] : memref<1x4x256xf32, #tpu.memory_space<vmem>>, vector<1x4x256xf32>
    %1489 = vector.shape_cast %1488 : vector<1x4x256xf32> to vector<4x256xf32>
    %1490 = vector.shape_cast %1487 : vector<4x256xf32> to vector<1x4x256xf32>
    tpu.vector_store %arg23[%c0_301, %c0_302, %c0_303], %1490 {strides = array<i32>} : memref<1x4x256xf32, #tpu.memory_space<vmem>>, vector<1x4x256xf32>,
    return
  }
  func.func @transform_0(%arg0: i32) -> (i32, i32, i32) {
    %c0_i32 = arith.constant 0 : i32
    %c0_i32_0 = arith.constant 0 : i32
    %c0_i32_1 = arith.constant 0 : i32
    return %arg0, %c0_i32, %c0_i32_0 : i32, i32, i32
  }
  func.func @transform_1(%arg0: i32) -> (i32, i32, i32) {
    %c0_i32 = arith.constant 0 : i32
    %c0_i32_0 = arith.constant 0 : i32
    %c0_i32_1 = arith.constant 0 : i32
    %c0_i32_2 = arith.constant 0 : i32
    return %c0_i32, %c0_i32_0, %c0_i32_1 : i32, i32, i32
  }
  func.func @transform_2(%arg0: i32) -> (i32, i32) {
    %c0_i32 = arith.constant 0 : i32
    %c0_i32_0 = arith.constant 0 : i32
    %c0_i32_1 = arith.constant 0 : i32
    return %c0_i32, %c0_i32_0 : i32, i32
  }
  func.func @transform_3(%arg0: i32) -> (i32, i32) {
    %c0_i32 = arith.constant 0 : i32
    %c0_i32_0 = arith.constant 0 : i32
    %c0_i32_1 = arith.constant 0 : i32
    return %c0_i32, %c0_i32_0 : i32, i32
  }
  func.func @transform_4(%arg0: i32) -> (i32, i32) {
    %c0_i32 = arith.constant 0 : i32
    %c0_i32_0 = arith.constant 0 : i32
    %c0_i32_1 = arith.constant 0 : i32
    return %c0_i32, %c0_i32_0 : i32, i32
  }
  func.func @transform_5(%arg0: i32) -> (i32, i32) {
    %c0_i32 = arith.constant 0 : i32
    %c0_i32_0 = arith.constant 0 : i32
    %c0_i32_1 = arith.constant 0 : i32
    return %c0_i32, %c0_i32_0 : i32, i32
  }
  func.func @transform_6(%arg0: i32) -> (i32, i32) {
    %c0_i32 = arith.constant 0 : i32
    %c0_i32_0 = arith.constant 0 : i32
    %c0_i32_1 = arith.constant 0 : i32
    return %c0_i32, %c0_i32_0 : i32, i32
  }
  func.func @transform_7(%arg0: i32) -> (i32, i32) {
    %c0_i32 = arith.constant 0 : i32
    %c0_i32_0 = arith.constant 0 : i32
    %c0_i32_1 = arith.constant 0 : i32
    return %c0_i32, %c0_i32_0 : i32, i32
  }
  func.func @transform_8(%arg0: i32) -> (i32, i32) {
    %c0_i32 = arith.constant 0 : i32
    %c0_i32_0 = arith.constant 0 : i32
    %c0_i32_1 = arith.constant 0 : i32
    return %c0_i32, %c0_i32_0 : i32, i32
  }
  func.func @transform_9(%arg0: i32) -> (i32, i32) {
    %c0_i32 = arith.constant 0 : i32
    %c0_i32_0 = arith.constant 0 : i32
    %c0_i32_1 = arith.constant 0 : i32
    return %c0_i32, %c0_i32_0 : i32, i32
  }
  func.func @transform_10(%arg0: i32) -> (i32, i32) {
    %c0_i32 = arith.constant 0 : i32
    %c0_i32_0 = arith.constant 0 : i32
    %c0_i32_1 = arith.constant 0 : i32
    return %c0_i32, %c0_i32_0 : i32, i32
  }
  func.func @transform_11(%arg0: i32) -> (i32, i32) {
    %c0_i32 = arith.constant 0 : i32
    %c0_i32_0 = arith.constant 0 : i32
    %c0_i32_1 = arith.constant 0 : i32
    return %c0_i32, %c0_i32_0 : i32, i32
  }
  func.func @transform_12(%arg0: i32) -> (i32, i32) {
    %c0_i32 = arith.constant 0 : i32
    %c0_i32_0 = arith.constant 0 : i32
    %c0_i32_1 = arith.constant 0 : i32
    return %c0_i32, %c0_i32_0 : i32, i32
  }
  func.func @transform_13(%arg0: i32) -> (i32, i32) {
    %c0_i32 = arith.constant 0 : i32
    %c0_i32_0 = arith.constant 0 : i32
    %c0_i32_1 = arith.constant 0 : i32
    return %c0_i32, %c0_i32_0 : i32, i32
  }
  func.func @transform_14(%arg0: i32) -> (i32, i32) {
    %c0_i32 = arith.constant 0 : i32
    %c0_i32_0 = arith.constant 0 : i32
    %c0_i32_1 = arith.constant 0 : i32
    return %c0_i32, %c0_i32_0 : i32, i32
  }
  func.func @transform_15(%arg0: i32) -> (i32, i32) {
    %c0_i32 = arith.constant 0 : i32
    %c0_i32_0 = arith.constant 0 : i32
    %c0_i32_1 = arith.constant 0 : i32
    return %c0_i32, %c0_i32_0 : i32, i32
  }
  func.func @transform_16(%arg0: i32) -> (i32, i32) {
    %c0_i32 = arith.constant 0 : i32
    %c0_i32_0 = arith.constant 0 : i32
    %c0_i32_1 = arith.constant 0 : i32
    return %c0_i32, %c0_i32_0 : i32, i32
  }
  func.func @transform_17(%arg0: i32) -> (i32, i32) {
    %c0_i32 = arith.constant 0 : i32
    %c0_i32_0 = arith.constant 0 : i32
    %c0_i32_1 = arith.constant 0 : i32
    return %c0_i32, %c0_i32_0 : i32, i32
  }
  func.func @transform_18(%arg0: i32) -> (i32, i32) {
    %c0_i32 = arith.constant 0 : i32
    %c0_i32_0 = arith.constant 0 : i32
    %c0_i32_1 = arith.constant 0 : i32
    return %c0_i32, %c0_i32_0 : i32, i32
  }
  func.func @transform_19(%arg0: i32) -> (i32, i32) {
    %c0_i32 = arith.constant 0 : i32
    %c0_i32_0 = arith.constant 0 : i32
    %c0_i32_1 = arith.constant 0 : i32
    return %c0_i32, %c0_i32_0 : i32, i32
  }
  func.func @transform_20(%arg0: i32) -> (i32, i32) {
    %c0_i32 = arith.constant 0 : i32
    %c0_i32_0 = arith.constant 0 : i32
    %c0_i32_1 = arith.constant 0 : i32
    return %c0_i32, %c0_i32_0 : i32, i32
  }
  func.func @transform_21(%arg0: i32) -> (i32, i32) {
    %c0_i32 = arith.constant 0 : i32
    %c0_i32_0 = arith.constant 0 : i32
    %c0_i32_1 = arith.constant 0 : i32
    return %c0_i32, %c0_i32_0 : i32, i32
  }
  func.func @transform_22(%arg0: i32) -> (i32, i32, i32) {
    %c0_i32 = arith.constant 0 : i32
    %c0_i32_0 = arith.constant 0 : i32
    %c0_i32_1 = arith.constant 0 : i32
    return %arg0, %c0_i32, %c0_i32_0 : i32, i32, i32
  }
}

</mosaic_0001>

<bundles_post_ra>
// kernel: tpu_custom_call.1
= control target key start
LH: loop header
LB: loop body
LE: loop exit
PB: predicated region body
PF: predicated region fallthrough
CT: control target
= control target key end

     0   :  { %s13503_s0 = inlined_call_operand.vmem [shape: f32[2,4,256], index: 0, kind: input, shape index: {}]   ;;  %s13504_s1 = inlined_call_operand.vmem [shape: f32[13,1,256], index: 1, kind: input, shape index: {}]   ;;  %s13505_s2 = inlined_call_operand.vmem [shape: f32[4,1], index: 2, kind: input, shape index: {}]   ;;  %s13506_s3 = inlined_call_operand.vmem [shape: f32[4,1], index: 3, kind: input, shape index: {}]   ;;  %s13507_s4 = inlined_call_operand.vmem [shape: f32[4,4], index: 4, kind: input, shape index: {}]   ;;  %s13508_s5 = inlined_call_operand.vmem [shape: f32[4,1], index: 5, kind: input, shape index: {}]   ;;  %s13509_s6 = inlined_call_operand.vmem [shape: f32[4,169], index: 6, kind: input, shape index: {}]   ;;  %s13510_s7 = inlined_call_operand.vmem [shape: f32[4,1], index: 7, kind: input, shape index: {}]   ;;  %s13511_s8 = inlined_call_operand.vmem [shape: f32[2,4], index: 8, kind: input, shape index: {}]   ;;  %s13512_s9 = inlined_call_operand.vmem [shape: f32[2,1], index: 9, kind: input, shape index: {}]   ;;  %s13513_s10 = inlined_call_operand.vmem [shape: f32[4,2], index: 10, kind: input, shape index: {}]   ;;  %s13514_s11 = inlined_call_operand.vmem [shape: f32[4,1], index: 11, kind: input, shape index: {}]   ;;  %s13515_s12 = inlined_call_operand.vmem [shape: f32[4,4], index: 12, kind: input, shape index: {}]   ;;  %s13516_s13 = inlined_call_operand.vmem [shape: f32[4,1], index: 13, kind: input, shape index: {}]   ;;  %s13517_s14 = inlined_call_operand.vmem [shape: f32[4,1], index: 14, kind: input, shape index: {}]   ;;  %s13518_s15 = inlined_call_operand.vmem [shape: f32[4,1], index: 15, kind: input, shape index: {}]   ;;  %s13519_s16 = inlined_call_operand.vmem [shape: f32[8,4], index: 16, kind: input, shape index: {}]   ;;  %s13520_s17 = inlined_call_operand.vmem [shape: f32[8,1], index: 17, kind: input, shape index: {}]   ;;  %s13521_s18 = inlined_call_operand.vmem [shape: f32[4,8], index: 18, kind: input, shape index: {}]   ;;  %s13522_s19 = inlined_call_operand.vmem [shape: f32[4,1], index: 19, kind: input, shape index: {}]   ;;  %s13523_s20 = inlined_call_operand.vmem [shape: f32[4,1], index: 20, kind: input, shape index: {}]   ;;  %s13524_s21 = inlined_call_operand.vmem [shape: f32[4,1], index: 21, kind: input, shape index: {}]   ;;  %s13525_s22 = inlined_call_operand.hbm [shape: f32[2,4,256], index: 22, kind: output, shape index: {}]  }
   0x1   :  { %13921 = sst [smem:[#allocation213_spill]] %s13503_s0 }
   0x2   :  { %13922 = sst [smem:[#allocation214_spill]] %s13504_s1 }
   0x3   :  { %13923 = sst [smem:[#allocation215_spill]] %s13505_s2 }
   0x4   :  { %13924 = sst [smem:[#allocation216_spill]] %s13506_s3 }
   0x5   :  { %13925 = sst [smem:[#allocation217_spill]] %s13507_s4 }
   0x6   :  { %13926 = sst [smem:[#allocation218_spill]] %s13508_s5 }
   0x7   :  { %13927 = sst [smem:[#allocation219_spill]] %s13509_s6 }
   0x8   :  { %13928 = sst [smem:[#allocation220_spill]] %s13522_s19 }
   0x9   :  { %13929 = sst [smem:[#allocation221_spill]] %s13524_s21 }
   0xa   :  { %13930 = sst [smem:[#allocation222_spill]] %s13525_s22 }
   0xb   :  { %27 = vsyncpa [#allocation4], 0 }
   0xc   :  { %29 = vsyncpa [#allocation4 + $0x1], 0  ;;  %s8486_s3 = smov 0   ;;  %s8488_s28 = smov 0  }
   0xd   :  { %s8490_s29 = smov 0   ;;  %s8492_s30 = smov 0  }
   0xe LB: > { %13931 = sst [smem:[#allocation6_spill]] %s8120_s3  ;;  %s8507_s4 = sadd.s32 4294967295, %s8132_s30   ;;  %s8132_s30 = sphi %s8492_s30, %s14715_s30   ;;  %s8128_s29 = sphi %s8490_s29, %s14718_s29   ;;  %s8124_s28 = sphi %s8488_s28, %s14717_s28   ;;  %s8120_s3 = sphi %s8486_s3, %s14716_s3  }
   0xf   : > { %13932 = sst [smem:[#allocation7_spill]] %s8124_s28  ;;  %s7532_s0 = sadd.s32 4294967294, %s8132_s30  }
  0x10   : > { %13933 = sst [smem:[#allocation8_spill]] %s8128_s29  ;;  %s8511_s23 = sadd.s32 1, %s8132_s30  }
  0x11   : > { %13934 = sst [smem:[#allocation9_spill]] %s8132_s30  ;;  %s509_s1 = sadd.s32 1, %s8128_s29 }
  0x12   : > { %13935 = sst [smem:[#allocation10_spill]] %s8507_s4  ;;  %s506_s5 = ssub.s32 %s8132_s30, %s8511_s23 }
  0x13   : > { %13936 = sst [smem:[#allocation11_spill]] %s8511_s23  ;;  %p519_p0 = scmp.ne.s32.totalorder %s8128_s29, %s8124_s28 }
  0x14   : > { %p507_p1 = scmp.eq.s32.totalorder %s506_s5, 0  ;;  %p520_p2 = scmp.eq.s32.totalorder %s8507_s4, 1 }
  0x15   : > { %p525_p3 = scmp.ne.s32.totalorder %s8124_s28, %s8120_s3  ;;  %p526_p4 = scmp.eq.s32.totalorder %s7532_s0, 1 }
  0x16   : > { %s8522_s24 = scalar_select %p507_p1, %s8128_s29, %s509_s1  }
  0x17   : > { %p8524_p5 = por %p520_p2, %p519_p0  ;;  %p8528_p6 = por %p526_p4, %p525_p3 }
  0x18   : > { %13937 = sst [smem:[#allocation12_spill]] %s8522_s24  ;;  %p7535_p7 = scmp.ge.s32.totalorder %s8132_s30, 1 }
  0x19   : > { %s13938_s6 = scalar_select %p8524_p5, 1, 0 }
  0x1a   : > { %s13940_s25 = scalar_select %p8528_p6, 1, 0 }
  0x1b   : > { %13939 = sst [smem:[#allocation13_spill]] %s13938_s6  ;;  %p615_p8 = scmp.lt.s32.totalorder %s8132_s30, 3 }
  0x1c   : > { %13941 = sst [smem:[#allocation14_spill]] %s13940_s25 }
  0x1d   : > { %p616_p9 = pnand %p7535_p7, %p615_p8 }
  0x1f   : > { %619 = sbr.rel (%p616_p9) target bundleno = 7642 (0x1dda), region = 108 }
  0x26   : > { %s13942_s27 = sld [smem:[#allocation217_spill]]  ;;  %s13943_s1 = sld [smem:[#allocation215_spill]]  ;;  %v762_v2 = vlaneseq  ;;  %v13557_v3 = vmov 0   ;;  %v13538_v9 = vmov 1   ;;  %v13535_v13 = vmov 2  }
  0x27   : > { %7834 = vset.pattern.permute.xlu1 %v13557_v3  ;;  %7833 = vset.pattern.permute.xlu0 %v13557_v3  ;;  %s13945_s23 = sld [smem:[#allocation216_spill]]  ;;  %v13545_v14 = vmov 3   ;;  %s13950_s26 = sld [smem:[#allocation218_spill]]  ;;  %vm686_vm0 = vcmask 1043456   ;;  %v8142_v40 = vmov 0.0   ;;  %vm829_vm1 = vcmask 621572  }
  0x28   : > { %v8542_v4 = vshrl.u32 %v762_v2, 7  ;;  %s13531_s2 = smov 1   ;;  %s13952_s0 = sld [smem:[#allocation219_spill]]  ;;  %828 = vst [vmem:[#allocation2] sm:$0xff] %v8142_v40  ;;  %vm830_vm2 = vmor %vm829_vm1, %vm686_vm0  ;;  %v13549_v63 = vmov 4   ;;  %vm842_vm3 = vcmask 1044272  }
  0x29   : > { %p677_p10 = scmp.lt.s32.totalorder %s8507_s4, 1  ;;  %s8140_s24 = smov 3   ;;  %831 = vst.msk [vmem:[#allocation2 + $0x8] sm:$0xff] %vm830_vm2, %v8142_v40  ;;  %vm843_vm4 = vcmask 1047556   ;;  %vm838_vm5 = vcmask 834560   ;;  %vm846_vm6 = vcmask 830464  }
  0x2a   : > { %13944 = vst [vmem:[#allocation15_spill] sm:$0xff] %v8542_v4  ;;  %v8548_v6 = vsub.s32 0, %v8542_v4  ;;  %v8551_v7 = vsub.s32 1, %v8542_v4  ;;  %s8141_s29 = smov 4   ;;  %s13956_s25 = sld [smem:[#allocation213_spill]]  ;;  %vm844_vm7 = vmor %vm843_vm4, %vm842_vm3  ;;  %vm949_vm8 = vcmask 15360  }
  0x2b   : > { %s8143_s30 = smov 5   ;;  %s8147_s5 = smov 8   ;;  %vm996_vm9 = vcmask 23552   ;;  %vm1044_vm10 = vcmask 31744   ;;  %vm1091_vm11 = vcmask 39936   ;;  %vm1139_vm12 = vcmask 48128  }
  0x2c   : > { %v756_v0 = vld [vmem:[%s13942_s27] sm:$0xf]  ;;  %13946 = vst [vmem:[#allocation16_spill] sm:$0xff] %v8548_v6  ;;  %13947 = vst [vmem:[#allocation17_spill] sm:$0xff] %v8551_v7  ;;  %s13948_s27 = sld [smem:[#allocation214_spill]]  ;;  %vm1186_vm13 = vcmask 56320  }
  0x2d   : > { %v728_v1 = vld [vmem:[%s13943_s1] sm:$0xf]  ;;  %759 = vperm.xlu1 %7834, %v756_v0   ;;  %s8139_s1 = smov 2   ;;  %vm1234_vm14 = vcmask 64512   ;;  %vm1281_vm15 = vcmask 72704   ;;  %vm1329_vm1 = vcmask 80896  }
  0x2e   : > { %740 = vperm.xlu0 %7833, %v728_v1   ;;  %v748_v5 = vld [vmem:[%s13945_s23] sm:$0xf]  ;;  %s8154_s23 = smov 12   ;;  %vm1376_vm2 = vcmask 89088   ;;  %vm1424_vm3 = vcmask 97280   ;;  %vm1524_vm4 = vcmask 146432  }
  0x2f   : > { %v820_v19 = vld [vmem:[%s13950_s26] sm:$0xf]  ;;  %s8250_s6 = smov 65   ;;  %s14152_s22 = smov 126  }
  0x30   : > { %v875_v24 = vld [vmem:[%s13952_s0] sm:$0xf]  ;;  %s8285_s28 = smov 85   ;;  %s8316_s21 = smov 121  }
  0x31   : > { %7835 = vset.pattern.permute.xlu1 %v13538_v9  ;;  %v901_v29 = vld [vmem:[%s13952_s0] sm:$0xf]  ;;  %s14533_s19 = smov 32  }
  0x32   : > { %v7539_v8 = vld [vmem:[%s13948_s27 + $0x2] sm:$0x3]  ;;  %751 = vperm.xlu0 %7833, %v748_v5   ;;  %773 = vperm.xlu1 %7835, %v756_v0   ;;  %v7540_v12 = vld [vmem:[%s13948_s27 + $0x4] sm:$0x3]  ;;  %v7541_v18 = vld [vmem:[%s13948_s27 + $0x6] sm:$0x3] }
  0x33   : > { %v906_v10 = vrot.slane %v7539_v8, %v8548_v6  ;;  %v910_v11 = vrot.slane %v7539_v8, %v8551_v7  ;;  %v940_v16 = vrot.slane %v7540_v12, %v8548_v6  ;;  %v944_v17 = vrot.slane %v7540_v12, %v8551_v7  ;;  %v7542_v23 = vld [vmem:[%s13948_s27 + $0x8] sm:$0x3]  ;;  %v7543_v28 = vld [vmem:[%s13948_s27 + $0xa] sm:$0x3]  ;;  %v7544_v33 = vld [vmem:[%s13948_s27 + $0xc] sm:$0x3] }
  0x34   : > { %v987_v21 = vrot.slane %v7541_v18, %v8548_v6  ;;  %v991_v22 = vrot.slane %v7541_v18, %v8551_v7  ;;  %v1035_v26 = vrot.slane %v7542_v23, %v8548_v6  ;;  %v1039_v27 = vrot.slane %v7542_v23, %v8551_v7  ;;  %v935_v34 = vld [vmem:[%s13952_s0] sm:$0xf]  ;;  %v7545_v38 = vld [vmem:[%s13948_s27 + $0xe] sm:$0x3]  ;;  %v7546_v48 = vld [vmem:[%s13948_s27 + $0x10] sm:$0x3] }
  0x35   : > { %v8564_v15 = vcombine.low %v906_v10, %v910_v11  ;;  %v8576_v20 = vcombine.low %v940_v16, %v944_v17  ;;  %v1082_v31 = vrot.slane %v7543_v28, %v8548_v6  ;;  %v1086_v32 = vrot.slane %v7543_v28, %v8551_v7  ;;  %v982_v51 = vld [vmem:[%s13952_s0] sm:$0xf]  ;;  %v7547_v56 = vld [vmem:[%s13948_s27 + $0x12] sm:$0x3]  ;;  %v7549_v12 = vld [vmem:[%s13948_s27 + $0x16] sm:$0x3] }
  0x36   : > { %7836 = vset.pattern.permute.xlu0 %v13535_v13  ;;  %7837 = vset.pattern.permute.xlu1 %v13545_v14  ;;  %v8588_v25 = vcombine.low %v987_v21, %v991_v22  ;;  %v8600_v30 = vcombine.low %v1035_v26, %v1039_v27  ;;  %v1130_v36 = vrot.slane %v7544_v33, %v8548_v6  ;;  %v1030_v59 = vld [vmem:[%s13952_s0] sm:$0xf]  ;;  %v13571_v18 = vmov 5  }
  0x37   : > { %789 = vperm.xlu0 %7836, %v756_v0   ;;  %13949 = vst [vmem:[#allocation18_spill] sm:$0xff] %v8564_v15  ;;  %805 = vperm.xlu1 %7837, %v756_v0   ;;  %13951 = vst [vmem:[#allocation19_spill] sm:$0xff] %v8576_v20  ;;  %v8613_v35 = vcombine.low %v1082_v31, %v1086_v32  ;;  %v1134_v37 = vrot.slane %v7544_v33, %v8551_v7  ;;  %v7548_v0 = vld [vmem:[%s13948_s27 + $0x14] sm:$0x3]  ;;  %v1077_v5 = vld [vmem:[%s13952_s0] sm:$0xf] }
  0x38   : > { %13953 = vst [vmem:[#allocation20_spill] sm:$0xff] %v8588_v25  ;;  %13954 = vst [vmem:[#allocation21_spill] sm:$0xff] %v8600_v30  ;;  %v1177_v45 = vrot.slane %v7545_v38, %v8548_v6  ;;  %v1181_v46 = vrot.slane %v7545_v38, %v8551_v7  ;;  %v1225_v54 = vrot.slane %v7546_v48, %v8548_v6  ;;  %v1125_v23 = vld [vmem:[%s13952_s0] sm:$0xf]  ;;  %v13554_v28 = vmov 6  }
  0x39   : > { %13955 = vst [vmem:[#allocation22_spill] sm:$0xff] %v8613_v35  ;;  %v8635_v44 = vcombine.low %v1130_v36, %v1134_v37  ;;  %v1229_v55 = vrot.slane %v7546_v48, %v8551_v7  ;;  %v1272_v61 = vrot.slane %v7547_v56, %v8548_v6  ;;  %v1276_v62 = vrot.slane %v7547_v56, %v8551_v7  ;;  %v848_v33 = vld [vmem:[%s13948_s27] sm:$0x3] }
  0x3a   : > { %v8648_v53 = vcombine.low %v1177_v45, %v1181_v46  ;;  %v1320_v10 = vrot.slane %v7548_v0, %v8548_v6  ;;  %v1324_v11 = vrot.slane %v7548_v0, %v8551_v7  ;;  %v1367_v21 = vrot.slane %v7549_v12, %v8548_v6  ;;  %v1172_v37 = vld [vmem:[%s13952_s0] sm:$0xf] }
  0x3b   : > { %912 = vrot.lane.b32.xlu0 %v8564_v15, %s13531_s2  ;;  %7838 = vset.pattern.permute.xlu1 %v13557_v3  ;;  %s678_s2 = scalar_select %p677_p10, %s8507_s4, 1  ;;  %13958 = vst [vmem:[#allocation24_spill] sm:$0xff] %v8635_v44  ;;  %v8659_v60 = vcombine.low %v1225_v54, %v1229_v55  ;;  %v8671_v8 = vcombine.low %v1272_v61, %v1276_v62  ;;  %v13568_v38 = vmov 7   ;;  %v1220_v45 = vld [vmem:[%s13952_s0] sm:$0xf]  ;;  %v13551_v54 = vmov 10  }
  0x3c   : > { %823 = vperm.xlu1 %7838, %v820_v19   ;;  %13959 = vst [vmem:[#allocation25_spill] sm:$0xff] %v8648_v53  ;;  %v8680_v19 = vcombine.low %v1320_v10, %v1324_v11  ;;  %v1371_v22 = vrot.slane %v7549_v12, %v8551_v7  ;;  %v1410_v62 = vld [vmem:[%s13952_s0] sm:$0xf]  ;;  %v13563_v12 = vmov 13   ;;  %s13821_s4 = smov 96  }
  0x3d   : > { %s7556_s26 = sshll.u32 %s678_s2, 3  ;;  %13960 = vst [vmem:[#allocation26_spill] sm:$0xff] %v8659_v60  ;;  %13961 = vst [vmem:[#allocation27_spill] sm:$0xff] %v8671_v8  ;;  %s8158_s2 = smov 17   ;;  %v1472_v10 = vld [vmem:[%s13952_s0] sm:$0xf] }
  0x3e   : > { %s8620_s3 = scalar_lea.vmem %s13956_s25, %s7556_s26  ;;  %s8145_s25 = smov 7   ;;  %13962 = vst [vmem:[#allocation28_spill] sm:$0xff] %v8680_v19 }
  0x3f   : > { %946 = vrot.lane.b32.xlu0 %v8576_v20, %s8139_s1  ;;  %13957 = sst [smem:[#allocation23_spill]] %s8620_s3  ;;  %v8626_v39 = vld [vmem:[%s8620_s3] sm:$0xff]  ;;  %s8156_s1 = smov 16  }
  0x40   : > { %890 = vperm.xlu1 %7838, %v875_v24   ;;  %v684_v41 = vcombine.high %v8626_v39, %v8626_v39  ;;  %v687_v42 = vsel %vm686_vm0, %v8626_v39, 0.0  ;;  %v7550_v24 = vld [vmem:[%s13948_s27 + $0x18] sm:$0x3]  ;;  %s8160_s26 = smov 18   ;;  %s8254_s27 = smov 67  }
  0x41   : > { %v688_v43 = vrot.slane %v687_v42, 4  ;;  %v1415_v31 = vrot.slane %v7550_v24, %v8548_v6  ;;  %v1419_v32 = vrot.slane %v7550_v24, %v8551_v7  ;;  %s8289_s3 = smov 87  }
  0x42   : > { %v694_v47 = vsel %vm686_vm0, %v684_v41, 0.0  ;;  %v880_v41 = vrot.slane %v848_v33, %v8548_v6 }
  0x43   : > { %993 = vrot.lane.b32.xlu0 %v8588_v25, %s8140_s24  ;;  %v689_v49 = vadd.f32 %v688_v43, %v687_v42  ;;  %v695_v50 = vrot.slane %v694_v47, 4  ;;  %s8144_s24 = smov 6   ;;  %v8704_v40 = vcombine.low %v1415_v31, %v1419_v32  ;;  %v884_v42 = vrot.slane %v848_v33, %v8551_v7  ;;  %v1558_v33 = vld [vmem:[%s13952_s0] sm:$0xf] }
  0x44   : > { %7839 = vset.pattern.permute.xlu1 %v13538_v9  ;;  %v13544_v31 = vmov 15   ;;  %v2230_v9 = vld [vmem:[%s13952_s0] sm:$0xf] }
  0x45   : > { %923 = vperm.xlu1 %7839, %v901_v29   ;;  %v696_v52 = vadd.f32 %v695_v50, %v694_v47  ;;  %v690_v57 = vrot.slane %v689_v49, 2  ;;  %v8692_v29 = vcombine.low %v1367_v21, %v1371_v22  ;;  %13964 = vst [vmem:[#allocation30_spill] sm:$0xff] %v8704_v40  ;;  %v8712_v46 = vcombine.low %v880_v41, %v884_v42  ;;  %v1496_v21 = vld [vmem:[%s13952_s0] sm:$0xf] }
  0x46   : > { %v13542_v47 = vmov 8   ;;  %v13548_v22 = vmov 14   ;;  %v1596_v42 = vld [vmem:[%s13952_s0] sm:$0xf] }
  0x47   : > { %1041 = vrot.lane.b32.xlu0 %v8600_v30, %s8141_s29  ;;  %v697_v58 = vrot.slane %v696_v52, 2  ;;  %v691_v1 = vadd.f32 %v690_v57, %v689_v49  ;;  %13963 = vst [vmem:[#allocation29_spill] sm:$0xff] %v8692_v29  ;;  %13965 = vst [vmem:[#allocation31_spill] sm:$0xff] %v8712_v46  ;;  %v1267_v49 = vld [vmem:[%s13952_s0] sm:$0xf]  ;;  %s8167_s29 = smov 22  }
  0x48   : > { %v1362_v57 = vld [vmem:[%s13952_s0] sm:$0xf] }
  0x49   : > { %7840 = vset.pattern.permute.xlu1 %v13535_v13  ;;  %v698_v2 = vadd.f32 %v697_v58, %v696_v52  ;;  %v692_v16 = vrot.slane %v691_v1, 1  ;;  %v2192_v13 = vld [vmem:[%s13952_s0] sm:$0xf] }
  0x4a   : > { %957 = vperm.xlu1 %7840, %v935_v34  }
  0x4b   : > { %1088 = vrot.lane.b32.xlu0 %v8613_v35, %s8143_s30  ;;  %v699_v17 = vrot.slane %v698_v2, 1  ;;  %s8149_s30 = smov 9   ;;  %v693_v26 = vadd.f32 %v692_v16, %v691_v1 }
  0x4d   : > { %v700_v27 = vadd.f32 %v699_v17, %v698_v2  ;;  %v701_v34 = vmul.f32 0.25, %v693_v26  ;;  %v13540_v2 = vmov 12   ;;  %v1520_v26 = vld [vmem:[%s13952_s0] sm:$0xf] }
  0x4e   : > { %7841 = vset.pattern.permute.xlu1 %v13545_v14 }
  0x4f   : > { %1136 = vrot.lane.b32.xlu0 %v8635_v44, %s8144_s24  ;;  %1004 = vperm.xlu1 %7841, %v982_v51   ;;  %s8151_s24 = smov 10   ;;  %v702_v36 = vmul.f32 0.25, %v700_v27  ;;  %v13562_v51 = vmov 9  }
  0x51   : > { %v705_v43 = vcombine.low %v701_v34, %v702_v36 }
  0x53   : > { %1183 = vrot.lane.b32.xlu0 %v8648_v53, %s8145_s25  ;;  %7842 = vset.pattern.permute.xlu1 %v13549_v63  ;;  %s8153_s25 = smov 11   ;;  %v8716_v48 = vsub.f32 %v8626_v39, %v705_v43  ;;  %v1315_v39 = vld [vmem:[%s13952_s0] sm:$0xf] }
  0x54   : > { %1052 = vperm.xlu1 %7842, %v1030_v59   ;;  %v13560_v59 = vmov 11  }
  0x55   : > { %v708_v50 = vmul.f32 %v8716_v48, %v8716_v48 }
  0x57   : > { %1231 = vrot.lane.b32.xlu0 %v8659_v60, %s8147_s5  ;;  %v710_v52 = vcombine.high %v708_v50, %v708_v50  ;;  %v712_v55 = vsel %vm686_vm0, %v708_v50, 0.0  ;;  %s8169_s5 = smov 23   ;;  %v13578_v50 = vmov 18  }
  0x58   : > { %7843 = vset.pattern.permute.xlu1 %v13571_v18  ;;  %v713_v58 = vrot.slane %v712_v55, 4 }
  0x59   : > { %1099 = vperm.xlu1 %7843, %v1077_v5   ;;  %v719_v56 = vsel %vm686_vm0, %v710_v52, 0.0  ;;  %v13566_v52 = vmov 19  }
  0x5a   : > { %v720_v61 = vrot.slane %v719_v56, 4  ;;  %v714_v0 = vadd.f32 %v713_v58, %v712_v55  ;;  %v13577_v58 = vmov 20  }
  0x5b   : > { %1278 = vrot.lane.b32.xlu0 %v8671_v8, %s8149_s30  ;;  %s8171_s30 = smov 24  }
  0x5c   : > { %v721_v1 = vadd.f32 %v720_v61, %v719_v56  ;;  %v715_v5 = vrot.slane %v714_v0, 2 }
  0x5d   : > { %7844 = vset.pattern.permute.xlu1 %v13554_v28 }
  0x5e   : > { %1147 = vperm.xlu1 %7844, %v1125_v23   ;;  %v722_v11 = vrot.slane %v721_v1, 2  ;;  %v716_v16 = vadd.f32 %v715_v5, %v714_v0 }
  0x5f   : > { %1326 = vrot.lane.b32.xlu0 %v8680_v19, %s8151_s24  ;;  %s8162_s24 = smov 19  }
  0x60   : > { %v723_v17 = vadd.f32 %v722_v11, %v721_v1  ;;  %v717_v23 = vrot.slane %v716_v16, 1  ;;  %v13561_v1 = vmov 21  }
  0x62   : > { %7845 = vset.pattern.permute.xlu1 %v13568_v38  ;;  %v724_v24 = vrot.slane %v723_v17, 1  ;;  %v718_v27 = vadd.f32 %v717_v23, %v716_v16 }
  0x63   : > { %1373 = vrot.lane.b32.xlu0 %v8692_v29, %s8153_s25  ;;  %1194 = vperm.xlu1 %7845, %v1172_v37   ;;  %v13570_v37 = vmov 16   ;;  %s8178_s25 = smov 28  }
  0x64   : > { %v725_v32 = vadd.f32 %v724_v24, %v723_v17  ;;  %v726_v34 = vmul.f32 0.25, %v718_v27  ;;  %v13575_v17 = vmov 22   ;;  %v1824_v24 = vld [vmem:[%s13952_s0] sm:$0xf] }
  0x66   : > { %v727_v36 = vmul.f32 0.25, %v725_v32  ;;  %v729_v41 = vadd.f32 1e-06, %v726_v34  ;;  %v13564_v34 = vmov 23  }
  0x67   : > { %1421 = vrot.lane.b32.xlu0 %v8704_v40, %s8154_s23  ;;  %7846 = vset.pattern.permute.xlu1 %v13542_v47  ;;  %s13625_s23 = smov 32   ;;  %v2268_v47 = vld [vmem:[%s13952_s0] sm:$0xf] }
  0x68   : > { %1242 = vperm.xlu1 %7846, %v1220_v45   ;;  %v730_v43 = vadd.f32 1e-06, %v727_v36  ;;  %v13573_v45 = vmov 17   ;;  %8027 = vrsqrt.f32 %v729_v41  ;;  %v8807_v36 = vsub.s32 3, %v8542_v4 }
  0x6a   : > { %8029 = vrsqrt.f32 %v730_v43  ;;  %13967 = vst [vmem:[#allocation33_spill] sm:$0xff] %v8807_v36 }
  0x6b   : > { %1473 = vrot.lane.b32.xlu0 %v8712_v46, %s8156_s1  ;;  %s8176_s1 = smov 27  }
  0x6c   : > { %7847 = vset.pattern.permute.xlu1 %v13562_v51 }
  0x6d   : > { %1289 = vperm.xlu1 %7847, %v1267_v49   ;;  %v1634_v49 = vld [vmem:[%s13952_s0] sm:$0xf] }
  0x6f   : > { %1497 = vrot.lane.b32.xlu0 %v8564_v15, %s8158_s2  ;;  %s8163_s2 = smov 20  }
  0x71   : > { %7848 = vset.pattern.permute.xlu1 %v13551_v54 }
  0x72   : > { %1337 = vperm.xlu1 %7848, %v1315_v39   ;;  %v1672_v39 = vld [vmem:[%s13952_s0] sm:$0xf]  ;;  %v8028_v55 = vpop.eup %8027 }
  0x73   : > { %1521 = vrot.lane.b32.xlu0 %v8576_v20, %s8160_s26  ;;  %s8165_s26 = smov 21  }
  0x74   : > { %v8030_v56 = vpop.eup %8029 }
  0x75   : > { %v735_v61 = vcombine.low %v8028_v55, %v8030_v56 }
  0x76   : > { %7849 = vset.pattern.permute.xlu1 %v13560_v59 }
  0x77   : > { %1559 = vrot.lane.b32.xlu0 %v8588_v25, %s8162_s24  ;;  %1384 = vperm.xlu1 %7849, %v1362_v57   ;;  %v1710_v57 = vld [vmem:[%s13952_s0] sm:$0xf]  ;;  %v737_v0 = vmul.f32 %v735_v61, %v8716_v48  ;;  %s8196_s24 = smov 40  }
  0x79   : > { %v744_v5 = vcombine.high %v737_v0, %v737_v0 }
  0x7b   : > { %1597 = vrot.lane.b32.xlu0 %v8600_v30, %s8163_s2  ;;  %7850 = vset.pattern.permute.xlu1 %v13540_v2  ;;  %s8198_s2 = smov 41   ;;  %v13547_v2 = vmov 34  }
  0x7c   : > { %1432 = vperm.xlu1 %7850, %v1410_v62   ;;  %v1748_v62 = vld [vmem:[%s13952_s0] sm:$0xf] }
  0x7f   : > { %1635 = vrot.lane.b32.xlu0 %v8613_v35, %s8165_s26  ;;  %s8185_s26 = smov 35  }
  0x80   : > { %7851 = vset.pattern.permute.xlu1 %v13563_v12 }
  0x81   : > { %1484 = vperm.xlu1 %7851, %v1472_v10   ;;  %v1786_v10 = vld [vmem:[%s13952_s0] sm:$0xf] }
  0x83   : > { %1673 = vrot.lane.b32.xlu0 %v8635_v44, %s8167_s29  ;;  %s8172_s29 = smov 25  }
  0x85   : > { %7852 = vset.pattern.permute.xlu1 %v13548_v22 }
  0x86   : > { %1508 = vperm.xlu1 %7852, %v1496_v21  }
  0x87   : > { %1711 = vrot.lane.b32.xlu0 %v8648_v53, %s8169_s5  ;;  %s8174_s5 = smov 26  }
  0x8a   : > { %7853 = vset.pattern.permute.xlu1 %v13544_v31 }
  0x8b   : > { %1749 = vrot.lane.b32.xlu0 %v8659_v60, %s8171_s30  ;;  %1532 = vperm.xlu1 %7853, %v1520_v26   ;;  %v8802_v26 = vsub.s32 2, %v8542_v4  ;;  %s8189_s30 = smov 37  }
  0x8d   : > { %13966 = vst [vmem:[#allocation32_spill] sm:$0xff] %v8802_v26 }
  0x8f   : > { %1787 = vrot.lane.b32.xlu0 %v8671_v8, %s8172_s29  ;;  %7854 = vset.pattern.permute.xlu1 %v13570_v37  ;;  %s8190_s29 = smov 38  }
  0x90   : > { %1570 = vperm.xlu1 %7854, %v1558_v33  }
  0x93   : > { %1825 = vrot.lane.b32.xlu0 %v8680_v19, %s8174_s5  ;;  %s8187_s5 = smov 36  }
  0x94   : > { %7855 = vset.pattern.permute.xlu1 %v13573_v45 }
  0x95   : > { %1608 = vperm.xlu1 %7855, %v1596_v42  }
  0x97   : > { %1863 = vrot.lane.b32.xlu0 %v8692_v29, %s8176_s1  ;;  %s8181_s1 = smov 33  }
  0x99   : > { %7856 = vset.pattern.permute.xlu1 %v13578_v50 }
  0x9a   : > { %1646 = vperm.xlu1 %7856, %v1634_v49  }
  0x9b   : > { %1901 = vrot.lane.b32.xlu0 %v8704_v40, %s8178_s25  ;;  %s8183_s25 = smov 34  }
  0x9e   : > { %7857 = vset.pattern.permute.xlu1 %v13566_v52  ;;  %v5293_v52 = vld [vmem:[#allocation2 + $0xc] sm:$0xf] }
  0x9f   : > { %1955 = vrot.lane.b32.xlu0 %v8712_v46, %s13625_s23  ;;  %1684 = vperm.xlu1 %7857, %v1672_v39   ;;  %s8224_s23 = smov 50  }
  0xa3   : > { %1979 = vrot.lane.b32.xlu0 %v8564_v15, %s8181_s1  ;;  %7858 = vset.pattern.permute.xlu1 %v13577_v58  ;;  %s8192_s1 = smov 39  }
  0xa4   : > { %1722 = vperm.xlu1 %7858, %v1710_v57  }
  0xa7   : > { %2003 = vrot.lane.b32.xlu0 %v8576_v20, %s8183_s25  ;;  %s13627_s25 = smov 102  }
  0xa8   : > { %7859 = vset.pattern.permute.xlu1 %v13561_v1 }
  0xa9   : > { %1760 = vperm.xlu1 %7859, %v1748_v62  }
  0xab   : > { %2041 = vrot.lane.b32.xlu0 %v8588_v25, %s8185_s26  ;;  %s13699_s26 = smov 124  }
  0xac   : > { %v760_v16 = vpop.permute.xlu1 %759 }
  0xad   : > { %v741_v11 = vpop.permute.xlu0 %740  ;;  %7860 = vset.pattern.permute.xlu1 %v13575_v17 }
  0xae   : > { %1798 = vperm.xlu1 %7860, %v1786_v10   ;;  %v746_v48 = vmul.f32 %v741_v11, %v737_v0  ;;  %v747_v21 = vmul.f32 %v744_v5, %v741_v11  ;;  %v1862_v5 = vld [vmem:[%s13952_s0] sm:$0xf] }
  0xaf   : > { %2079 = vrot.lane.b32.xlu0 %v8600_v30, %s8187_s5  ;;  %s13689_s5 = smov 118  }
  0xb1   : > { %v752_v23 = vpop.permute.xlu0 %751  ;;  %v774_v33 = vpop.permute.xlu1 %773 }
  0xb2   : > { %v754_v27 = vadd.f32 %v752_v23, %v746_v48  ;;  %v755_v32 = vadd.f32 %v752_v23, %v747_v21  ;;  %7861 = vset.pattern.permute.xlu1 %v13564_v34 }
  0xb3   : > { %2117 = vrot.lane.b32.xlu0 %v8613_v35, %s8189_s30  ;;  %1836 = vperm.xlu1 %7861, %v1824_v24   ;;  %s13768_s30 = smov 126  }
  0xb4   : > { %v765_v41 = vrot.slane %v754_v27, %v8548_v6  ;;  %v769_v42 = vrot.slane %v755_v32, %v8548_v6  ;;  %v779_v43 = vrot.slane %v754_v27, %v8551_v7  ;;  %v783_v49 = vrot.slane %v755_v32, %v8551_v7 }
  0xb5   : > { %v795_v39 = vrot.slane %v754_v27, %v8802_v26  ;;  %v799_v55 = vrot.slane %v755_v32, %v8802_v26  ;;  %v811_v24 = vrot.slane %v754_v27, %v8807_v36 }
  0xb6   : > { %v770_v56 = vmul.f32 %v765_v41, %v760_v16  ;;  %v771_v57 = vmul.f32 %v769_v42, %v760_v16  ;;  %v784_v61 = vmul.f32 %v779_v43, %v774_v33  ;;  %v785_v62 = vmul.f32 %v783_v49, %v774_v33  ;;  %v790_v0 = vpop.permute.xlu0 %789  ;;  %v806_v48 = vpop.permute.xlu1 %805 }
  0xb7   : > { %v800_v10 = vmul.f32 %v795_v39, %v790_v0  ;;  %v801_v11 = vmul.f32 %v799_v55, %v790_v0  ;;  %2155 = vrot.lane.b32.xlu0 %v8635_v44, %s8190_s29  ;;  %v815_v41 = vrot.slane %v755_v32, %v8807_v36  ;;  %v13576_v16 = vmov 24   ;;  %v1900_v55 = vld [vmem:[%s13952_s0] sm:$0xf]  ;;  %s13695_s29 = smov 122  }
  0xb8   : > { %v786_v21 = vadd.f32 %v784_v61, %v770_v56  ;;  %v787_v23 = vadd.f32 %v785_v62, %v771_v57  ;;  %7862 = vset.pattern.permute.xlu1 %v13576_v16  ;;  %v816_v43 = vmul.f32 %v811_v24, %v806_v48  ;;  %v13556_v57 = vmov 25  }
  0xb9   : > { %1874 = vperm.xlu1 %7862, %v1862_v5   ;;  %v817_v49 = vmul.f32 %v815_v41, %v806_v48  ;;  %v13553_v24 = vmov 27  }
  0xba   : > { %v802_v33 = vadd.f32 %v800_v10, %v786_v21  ;;  %v803_v42 = vadd.f32 %v801_v11, %v787_v23  ;;  %v8822_v39 = vpop.permute.xlu0 %912  ;;  %v1954_v10 = vld [vmem:[%s13952_s0] sm:$0xf]  ;;  %v13574_v11 = vmov 26  }
  0xbb   : > { %13968 = vst [vmem:[#allocation34_spill] sm:$0xff] %v8822_v39  ;;  %2193 = vrot.lane.b32.xlu0 %v8648_v53, %s8192_s1  ;;  %v824_v27 = vpop.permute.xlu1 %823  ;;  %v1978_v21 = vld [vmem:[%s13952_s0] sm:$0xf]  ;;  %s13697_s1 = smov 116  }
  0xbc   : > { %v818_v56 = vadd.f32 %v816_v43, %v802_v33  ;;  %v819_v32 = vadd.f32 %v817_v49, %v803_v42  ;;  %v2002_v33 = vld [vmem:[%s13952_s0] sm:$0xf]  ;;  %v13537_v42 = vmov 28  }
  0xbd   : > { %7863 = vset.pattern.permute.xlu1 %v13556_v57  ;;  %v2040_v49 = vld [vmem:[%s13952_s0] sm:$0xf] }
  0xbe   : > { %v826_v61 = vadd.f32 %v824_v27, %v818_v56  ;;  %v827_v62 = vadd.f32 %v824_v27, %v819_v32  ;;  %1912 = vperm.xlu1 %7863, %v1900_v55   ;;  %v8829_v0 = vpop.permute.xlu0 %946  ;;  %v13552_v55 = vmov 29   ;;  %v2078_v56 = vld [vmem:[%s13952_s0] sm:$0xf]  ;;  %v13543_v32 = vmov 30  }
  0xc0   : > { %v834_v5 = vcombine.low %v826_v61, %v827_v62  ;;  %v2116_v62 = vld [vmem:[%s13952_s0] sm:$0xf] }
  0xc2   : > { %7864 = vset.pattern.permute.xlu1 %v13574_v11  ;;  %v8835_v48 = vpop.permute.xlu0 %993  ;;  %835 = vrot.lane.b32.xlu0 %v834_v5, %s13627_s25  ;;  %s8215_s25 = smov 42  }
  0xc3   : > { %1966 = vperm.xlu1 %7864, %v1954_v10   ;;  %v13565_v10 = vmov 31   ;;  %v8977_v39 = vrot.slane %v8835_v48, 4 }
  0xc5   : > { %13979 = vst [vmem:[#allocation45_spill] sm:$0xff] %v8977_v39  ;;  %v8999_v53 = vsel %vm996_vm9, %v8977_v39, %v8835_v48  ;;  %vm1676_vm9 = vcmask 179200  }
  0xc6   : > { %v8841_v23 = vpop.permute.xlu0 %1041  ;;  %2231 = vrot.lane.b32.xlu0 %v8659_v60, %s8196_s24  ;;  %13981 = vst [vmem:[#allocation47_spill] sm:$0xff] %v8999_v53  ;;  %s13691_s24 = smov 120  }
  0xc7   : > { %7865 = vset.pattern.permute.xlu1 %v13553_v24 }
  0xc8   : > { %1990 = vperm.xlu1 %7865, %v1978_v21  }
  0xca   : > { %v8845_v41 = vpop.permute.xlu0 %1088  ;;  %2269 = vrot.lane.b32.xlu0 %v8671_v8, %s8198_s2  ;;  %s8217_s2 = smov 43  }
  0xcc   : > { %7866 = vset.pattern.permute.xlu1 %v13537_v42  ;;  %v13567_v42 = vmov 33  }
  0xcd   : > { %2014 = vperm.xlu1 %7866, %v2002_v33   ;;  %v2154_v33 = vld [vmem:[%s13952_s0] sm:$0xf] }
  0xce   : > { %v8852_v43 = vpop.permute.xlu0 %1136 }
  0xd1   : > { %7867 = vset.pattern.permute.xlu1 %v13552_v55 }
  0xd2   : > { %2052 = vperm.xlu1 %7867, %v2040_v49   ;;  %v8858_v27 = vpop.permute.xlu0 %1183  ;;  %v13541_v49 = vmov 32  }
  0xd6   : > { %7868 = vset.pattern.permute.xlu1 %v13543_v32  ;;  %v8864_v61 = vpop.permute.xlu0 %1231 }
  0xd7   : > { %2090 = vperm.xlu1 %7868, %v2078_v56  }
  0xda   : > { %v8869_v5 = vpop.permute.xlu0 %1278 }
  0xdb   : > { %7869 = vset.pattern.permute.xlu1 %v13565_v10 }
  0xdc   : > { %2128 = vperm.xlu1 %7869, %v2116_v62  }
  0xde   : > { %v8872_v21 = vpop.permute.xlu0 %1326 }
  0xe0   : > { %7870 = vset.pattern.permute.xlu1 %v13541_v49  ;;  %v8892_v49 = vpop.permute.xlu1 %890 }
  0xe1   : > { %2166 = vperm.xlu1 %7870, %v2154_v33   ;;  %13970 = vst [vmem:[#allocation36_spill] sm:$0xff] %v8892_v49 }
  0xe2   : > { %v8878_v56 = vpop.permute.xlu0 %1373 }
  0xe4   : > { %v8900_v31 = vpop.permute.xlu1 %923 }
  0xe5   : > { %7871 = vset.pattern.permute.xlu1 %v13567_v42  ;;  %13972 = vst [vmem:[#allocation38_spill] sm:$0xff] %v8900_v31 }
  0xe6   : > { %2204 = vperm.xlu1 %7871, %v2192_v13   ;;  %v8884_v62 = vpop.permute.xlu0 %1421  ;;  %v13559_v13 = vmov 35  }
  0xe8   : > { %v958_v22 = vpop.permute.xlu1 %957 }
  0xea   : > { %7872 = vset.pattern.permute.xlu1 %v13547_v2  ;;  %v8890_v33 = vpop.permute.xlu0 %1473 }
  0xeb   : > { %13969 = vst [vmem:[#allocation35_spill] sm:$0xff] %v8890_v33  ;;  %2242 = vperm.xlu1 %7872, %v2230_v9  }
  0xec   : > { %v8908_v63 = vpop.permute.xlu1 %1004 }
  0xee   : > { %v8897_v32 = vpop.permute.xlu0 %1497 }
  0xef   : > { %13971 = vst [vmem:[#allocation37_spill] sm:$0xff] %v8897_v32  ;;  %7873 = vset.pattern.permute.xlu1 %v13559_v13  ;;  %v8974_v32 = vrot.slane %v8829_v0, 4 }
  0xf0   : > { %2280 = vperm.xlu1 %7873, %v2268_v47   ;;  %v8914_v24 = vpop.permute.xlu1 %1052 }
  0xf1   : > { %13978 = vst [vmem:[#allocation44_spill] sm:$0xff] %v8974_v32 }
  0xf2   : > { %v8902_v14 = vpop.permute.xlu0 %1521 }
  0xf4   : > { %v8918_v47 = vpop.permute.xlu1 %1099 }
  0xf6   : > { %v8904_v2 = vpop.permute.xlu0 %1559 }
  0xf8   : > { %v8924_v13 = vpop.permute.xlu1 %1147 }
  0xfa   : > { %v8906_v9 = vpop.permute.xlu0 %1597 }
  0xfc   : > { %v8928_v1 = vpop.permute.xlu1 %1194 }
  0xfe   : > { %v8910_v54 = vpop.permute.xlu0 %1635 }
 0x100   : > { %v8934_v34 = vpop.permute.xlu1 %1242 }
 0x102   : > { %v8912_v55 = vpop.permute.xlu0 %1673 }
 0x104   : > { %v8944_v37 = vpop.permute.xlu1 %1289 }
 0x106   : > { %v8916_v28 = vpop.permute.xlu0 %1711 }
 0x108   : > { %v8950_v11 = vpop.permute.xlu1 %1337 }
 0x10a   : > { %v8920_v57 = vpop.permute.xlu0 %1749 }
 0x10c   : > { %v8954_v16 = vpop.permute.xlu1 %1384 }
 0x10e   : > { %v8922_v3 = vpop.permute.xlu0 %1787 }
 0x112   : > { %v8926_v59 = vpop.permute.xlu0 %1825 }
 0x116   : > { %v8930_v51 = vpop.permute.xlu0 %1863 }
 0x11a   : > { %v8932_v12 = vpop.permute.xlu0 %1901 }
 0x11b   : > { %v8937_v10 = vrot.slane %v8932_v12, 4 }
 0x11d   : > { %v8940_v42 = vmul.f32 %v5293_v52, %v8937_v10  ;;  %v8960_v52 = vpop.permute.xlu1 %1432 }
 0x11e   : > { %v8942_v38 = vpop.permute.xlu0 %1955 }
 0x11f   : > { %13973 = vst [vmem:[#allocation39_spill] sm:$0xff] %v8940_v42  ;;  %13974 = vst [vmem:[#allocation40_spill] sm:$0xff] %v8942_v38  ;;  %v8207_v38 = vmov 839922192  }
 0x120   : > { %v894_v31 = vunpack.c.l.s4 %v8207_v38  ;;  %v8990_v38 = vsel %vm949_vm8, %v8974_v32, %v8829_v0  ;;  %vm1638_vm8 = vcmask 171008  }
 0x121   : > { %v8964_v26 = vpop.permute.xlu1 %1484  ;;  %13980 = vst [vmem:[#allocation46_spill] sm:$0xff] %v8990_v38 }
 0x122   : > { %v8946_v18 = vpop.permute.xlu0 %1979  ;;  %13976 = vst [vmem:[#allocation42_spill] sm:$0xff] %v8964_v26  ;;  %v895_v26 = vunpack.c.0.s8 %v894_v31 }
 0x123   : > { %13975 = vst [vmem:[#allocation41_spill] sm:$0xff] %v8946_v18 }
 0x125   : > { %v8968_v49 = vpop.permute.xlu1 %1508 }
 0x126   : > { %v8948_v45 = vpop.permute.xlu0 %2003  ;;  %13977 = vst [vmem:[#allocation43_spill] sm:$0xff] %v8968_v49 }
 0x129   : > { %v8971_v18 = vpop.permute.xlu1 %1532 }
 0x12a   : > { %v8952_v17 = vpop.permute.xlu0 %2041 }
 0x12d   : > { %v8979_v8 = vpop.permute.xlu1 %1570 }
 0x12e   : > { %v8956_v58 = vpop.permute.xlu0 %2079 }
 0x132   : > { %v8958_v50 = vpop.permute.xlu0 %2117 }
 0x136   : > { %v8962_v36 = vpop.permute.xlu0 %2155 }
 0x13a   : > { %v8966_v6 = vpop.permute.xlu0 %2193 }
 0x13e   : > { %v836_v7 = vpop.permute.xlu0 %835 }
 0x13f   : > { %v837_v33 = vrot.slane %v836_v7, 4 }
 0x141   : > { %v839_v42 = vsel %vm838_vm5, %v837_v33, %v836_v7  ;;  %847 = vst.msk [vmem:[#allocation2 + $0x8] sm:$0xf] %vm846_vm6, %v837_v33  ;;  %v8986_v7 = vsub.s32 %v895_v26, %v8542_v4  ;;  %v9002_v26 = vrot.slane %v8841_v23, 4  ;;  %vm1562_vm6 = vcmask 154624  }
 0x142   : > { %845 = vst.msk [vmem:[#allocation2] sm:$0xff] %vm844_vm7, %v839_v42  ;;  %vm1600_vm7 = vcmask 162816  }
 0x143   : > { %v966_v31 = vrot.slane %v958_v22, %v8986_v7  ;;  %13982 = vst [vmem:[#allocation48_spill] sm:$0xff] %v9002_v26  ;;  %v9016_v48 = vsel %vm1044_vm10, %v9002_v26, %v8841_v23  ;;  %vm1714_vm10 = vcmask 187392  }
 0x144   : > { %13983 = vst [vmem:[#allocation49_spill] sm:$0xff] %v9016_v48 }
 0x148   : > { %v8983_v60 = vld [vmem:[#allocation2 + $0x8] sm:$0xf] }
 0x149   : > { %v8981_v49 = vld [vmem:[#allocation2] sm:$0xff]  ;;  %v954_v42 = vmul.f32 %v8974_v32, %v8983_v60  ;;  %v1001_v0 = vmul.f32 %v8977_v39, %v8983_v60  ;;  %v9008_v32 = vpop.permute.xlu1 %1608 }
 0x14a   : > { %v953_v33 = vmul.f32 %v8990_v38, %v8981_v49  ;;  %v1000_v22 = vmul.f32 %v8999_v53, %v8981_v49  ;;  %v1013_v38 = vrot.slane %v8908_v63, %v8986_v7  ;;  %v1049_v63 = vmul.f32 %v9002_v26, %v8983_v60 }
 0x14b   : > { %v968_v4 = vmul.f32 %v966_v31, %v954_v42  ;;  %v13605_v42 = vmov 36  }
 0x14c   : > { %v967_v44 = vmul.f32 %v966_v31, %v953_v33  ;;  %v9019_v31 = vrot.slane %v8845_v41, 4  ;;  %7874 = vset.pattern.permute.xlu1 %v13605_v42  ;;  %v1015_v33 = vmul.f32 %v1013_v38, %v1001_v0  ;;  %v1014_v39 = vmul.f32 %v1013_v38, %v1000_v22 }
 0x14d   : > { %973 = vrot.lane.b32.xlu1 %v968_v4, %s13768_s30  ;;  %v1048_v4 = vmul.f32 %v9016_v48, %v8981_v49  ;;  %v9035_v38 = vrot.slane %v8852_v43, 4  ;;  %v9037_v0 = vpop.permute.xlu1 %1646 }
 0x14e   : > { %971 = vrot.lane.b32.xlu0 %v967_v44, %s13768_s30  ;;  %13984 = vst [vmem:[#allocation50_spill] sm:$0xff] %v9019_v31  ;;  %v1061_v44 = vrot.slane %v8914_v24, %v8986_v7  ;;  %v9032_v23 = vsel %vm1091_vm11, %v9019_v31, %v8845_v41  ;;  %v1096_v26 = vmul.f32 %v9019_v31, %v8983_v60  ;;  %vm1752_vm11 = vcmask 195584  }
 0x14f   : > { %13985 = vst [vmem:[#allocation51_spill] sm:$0xff] %v9032_v23  ;;  %13986 = vst [vmem:[#allocation52_spill] sm:$0xff] %v9035_v38  ;;  %v1095_v24 = vmul.f32 %v9032_v23, %v8981_v49  ;;  %v9049_v41 = vsel %vm1139_vm12, %v9035_v38, %v8852_v43  ;;  %vm1790_vm12 = vcmask 203776  }
 0x150   : > { %v1063_v22 = vmul.f32 %v1061_v44, %v1049_v63  ;;  %v1062_v42 = vmul.f32 %v1061_v44, %v1048_v4  ;;  %13987 = vst [vmem:[#allocation53_spill] sm:$0xff] %v9049_v41  ;;  %v1144_v44 = vmul.f32 %v9035_v38, %v8983_v60 }
 0x151   : > { %1020 = vrot.lane.b32.xlu1 %v1015_v33, %s13768_s30  ;;  %v9052_v33 = vrot.slane %v8858_v27, 4  ;;  %v9058_v48 = vpop.permute.xlu1 %1684 }
 0x152   : > { %1018 = vrot.lane.b32.xlu0 %v1014_v39, %s13768_s30  ;;  %v1108_v39 = vrot.slane %v8918_v47, %v8986_v7  ;;  %v1143_v47 = vmul.f32 %v9049_v41, %v8981_v49 }
 0x153   : > { %13988 = vst [vmem:[#allocation54_spill] sm:$0xff] %v9052_v33  ;;  %v9066_v43 = vsel %vm1186_vm13, %v9052_v33, %v8858_v27  ;;  %vm1828_vm13 = vcmask 211968  }
 0x154   : > { %v1110_v63 = vmul.f32 %v1108_v39, %v1096_v26  ;;  %v1109_v4 = vmul.f32 %v1108_v39, %v1095_v24  ;;  %13989 = vst [vmem:[#allocation55_spill] sm:$0xff] %v9066_v43  ;;  %v9069_v26 = vrot.slane %v8864_v61, 4  ;;  %v1191_v39 = vmul.f32 %v9052_v33, %v8983_v60 }
 0x155   : > { %1068 = vrot.lane.b32.xlu1 %v1063_v22, %s13699_s26 }
 0x156   : > { %1066 = vrot.lane.b32.xlu0 %v1062_v42, %s13699_s26  ;;  %v1156_v42 = vrot.slane %v8924_v13, %v8986_v7  ;;  %13990 = vst [vmem:[#allocation56_spill] sm:$0xff] %v9069_v26  ;;  %v1190_v13 = vmul.f32 %v9066_v43, %v8981_v49  ;;  %v9081_v27 = vsel %vm1234_vm14, %v9069_v26, %v8864_v61  ;;  %vm1866_vm14 = vcmask 220160  }
 0x157   : > { %13991 = vst [vmem:[#allocation57_spill] sm:$0xff] %v9081_v27 }
 0x158   : > { %v1158_v22 = vmul.f32 %v1156_v42, %v1144_v44  ;;  %v1157_v24 = vmul.f32 %v1156_v42, %v1143_v47  ;;  %v9086_v44 = vpop.permute.xlu1 %1722 }
 0x159   : > { %1115 = vrot.lane.b32.xlu1 %v1110_v63, %s13699_s26  ;;  %v1203_v63 = vrot.slane %v8928_v1, %v8986_v7  ;;  %v1239_v1 = vmul.f32 %v9069_v26, %v8983_v60 }
 0x15a   : > { %1113 = vrot.lane.b32.xlu0 %v1109_v4, %s13699_s26  ;;  %v9084_v4 = vrot.slane %v8869_v5, 4 }
 0x15b   : > { %v1205_v47 = vmul.f32 %v1203_v63, %v1191_v39  ;;  %v1204_v42 = vmul.f32 %v1203_v63, %v1190_v13  ;;  %v9101_v39 = vrot.slane %v8872_v21, 4 }
 0x15c   : > { %13992 = vst [vmem:[#allocation58_spill] sm:$0xff] %v9084_v4  ;;  %v9098_v61 = vsel %vm1281_vm15, %v9084_v4, %v8869_v5  ;;  %v1286_v26 = vmul.f32 %v9084_v4, %v8983_v60  ;;  %v9107_v38 = vpop.permute.xlu1 %1760  ;;  %vm1904_vm15 = vcmask 228352  }
 0x15d   : > { %1163 = vrot.lane.b32.xlu1 %v1158_v22, %s13695_s29  ;;  %v1238_v22 = vmul.f32 %v9081_v27, %v8981_v49  ;;  %13993 = vst [vmem:[#allocation59_spill] sm:$0xff] %v9098_v61  ;;  %13994 = vst [vmem:[#allocation60_spill] sm:$0xff] %v9101_v39  ;;  %v9115_v5 = vsel %vm1329_vm1, %v9101_v39, %v8872_v21  ;;  %vm2006_vm1 = vcmask 277504  }
 0x15e   : > { %1161 = vrot.lane.b32.xlu0 %v1157_v24, %s13695_s29  ;;  %v1251_v24 = vrot.slane %v8934_v34, %v8986_v7  ;;  %v1285_v34 = vmul.f32 %v9098_v61, %v8981_v49  ;;  %13995 = vst [vmem:[#allocation61_spill] sm:$0xff] %v9115_v5 }
 0x160   : > { %v1253_v13 = vmul.f32 %v1251_v24, %v1239_v1  ;;  %v1252_v63 = vmul.f32 %v1251_v24, %v1238_v22  ;;  %v1334_v24 = vmul.f32 %v9101_v39, %v8983_v60 }
 0x161   : > { %1210 = vrot.lane.b32.xlu1 %v1205_v47, %s13695_s29  ;;  %v1298_v47 = vrot.slane %v8944_v37, %v8986_v7  ;;  %v1333_v37 = vmul.f32 %v9115_v5, %v8981_v49  ;;  %v9160_v5 = vld [vmem:[#allocation2 + $0x8] sm:$0xf] }
 0x162   : > { %1208 = vrot.lane.b32.xlu0 %v1204_v42, %s13695_s29  ;;  %v9118_v42 = vrot.slane %v8878_v56, 4 }
 0x163   : > { %v1300_v1 = vmul.f32 %v1298_v47, %v1286_v26  ;;  %v1299_v22 = vmul.f32 %v1298_v47, %v1285_v34  ;;  %v9133_v26 = vrot.slane %v8884_v62, 4 }
 0x164   : > { %13996 = vst [vmem:[#allocation62_spill] sm:$0xff] %v9118_v42  ;;  %v9130_v21 = vsel %vm1376_vm2, %v9118_v42, %v8878_v56  ;;  %v1381_v39 = vmul.f32 %v9118_v42, %v8983_v60  ;;  %vm2044_vm2 = vcmask 285696  }
 0x165   : > { %1258 = vrot.lane.b32.xlu1 %v1253_v13, %s13691_s24  ;;  %v1346_v13 = vrot.slane %v8950_v11, %v8986_v7  ;;  %13997 = vst [vmem:[#allocation63_spill] sm:$0xff] %v9130_v21  ;;  %13998 = vst [vmem:[#allocation64_spill] sm:$0xff] %v9133_v26  ;;  %v1380_v11 = vmul.f32 %v9130_v21, %v8981_v49  ;;  %v9147_v56 = vsel %vm1424_vm3, %v9133_v26, %v8884_v62  ;;  %vm2082_vm3 = vcmask 293888  }
 0x166   : > { %1256 = vrot.lane.b32.xlu0 %v1252_v63, %s13691_s24  ;;  %v9135_v63 = vpop.permute.xlu1 %1798  ;;  %13999 = vst [vmem:[#allocation65_spill] sm:$0xff] %v9147_v56 }
 0x167   : > { %v1348_v34 = vmul.f32 %v1346_v13, %v1334_v24  ;;  %v1347_v47 = vmul.f32 %v1346_v13, %v1333_v37  ;;  %v1441_v24 = vrot.slane %v8960_v52, %v8986_v7  ;;  %v9169_v52 = vrot.slane %v8904_v2, 4 }
 0x169   : > { %1305 = vrot.lane.b32.xlu1 %v1300_v1, %s13691_s24  ;;  %v1393_v1 = vrot.slane %v8954_v16, %v8986_v7  ;;  %v1429_v16 = vmul.f32 %v9133_v26, %v8983_v60  ;;  %14002 = vst [vmem:[#allocation68_spill] sm:$0xff] %v9169_v52  ;;  %v1541_v60 = vrot.slane %v8971_v18, %v8986_v7  ;;  %v9184_v18 = vrot.slane %v8906_v9, 4 }
 0x16a   : > { %1303 = vrot.lane.b32.xlu0 %v1299_v22, %s13691_s24  ;;  %v9150_v22 = vrot.slane %v8902_v14, 4 }
 0x16b   : > { %v1395_v37 = vmul.f32 %v1393_v1, %v1381_v39  ;;  %v1394_v13 = vmul.f32 %v1393_v1, %v1380_v11  ;;  %v1443_v39 = vmul.f32 %v1441_v24, %v1429_v16  ;;  %14004 = vst [vmem:[#allocation70_spill] sm:$0xff] %v9184_v18  ;;  %v1605_v26 = vmul.f32 %v9184_v18, %v9160_v5 }
 0x16c   : > { %14000 = vst [vmem:[#allocation66_spill] sm:$0xff] %v9150_v22  ;;  %v9166_v62 = vsel %vm1524_vm4, %v9150_v22, %v8902_v14  ;;  %v1529_v1 = vmul.f32 %v9150_v22, %v9160_v5  ;;  %v9181_v14 = vsel %vm1562_vm6, %v9169_v52, %v8904_v2  ;;  %v9198_v2 = vsel %vm1600_vm7, %v9184_v18, %v8906_v9 }
 0x16d   : > { %1353 = vrot.lane.b32.xlu1 %v1348_v34, %s13689_s5  ;;  %v1428_v34 = vmul.f32 %v9147_v56, %v8981_v49  ;;  %14001 = vst [vmem:[#allocation67_spill] sm:$0xff] %v9166_v62  ;;  %14003 = vst [vmem:[#allocation69_spill] sm:$0xff] %v9181_v14  ;;  %vm2120_vm4 = vcmask 302080   ;;  %vm2158_vm6 = vcmask 310272   ;;  %vm2196_vm7 = vcmask 318464  }
 0x16e   : > { %1351 = vrot.lane.b32.xlu0 %v1347_v47, %s13689_s5  ;;  %v9158_v47 = vpop.permute.xlu1 %1836  ;;  %v1543_v16 = vmul.f32 %v1541_v60, %v1529_v1  ;;  %14005 = vst [vmem:[#allocation71_spill] sm:$0xff] %v9198_v2 }
 0x16f   : > { %v1442_v11 = vmul.f32 %v1441_v24, %v1428_v34  ;;  %v1579_v24 = vrot.slane %v8979_v8, %v8986_v7  ;;  %v9201_v8 = vrot.slane %v8910_v54, 4 }
 0x171   : > { %1400 = vrot.lane.b32.xlu1 %v1395_v37, %s13689_s5  ;;  %v1528_v37 = vmul.f32 %v9166_v62, %v8981_v49  ;;  %14006 = vst [vmem:[#allocation72_spill] sm:$0xff] %v9201_v8  ;;  %v9215_v9 = vsel %vm1638_vm8, %v9201_v8, %v8910_v54  ;;  %v1643_v56 = vmul.f32 %v9201_v8, %v9160_v5  ;;  %vm2234_vm8 = vcmask 326656  }
 0x172   : > { %1398 = vrot.lane.b32.xlu0 %v1394_v13, %s13689_s5  ;;  %v9188_v13 = vpop.permute.xlu1 %1874  ;;  %14007 = vst [vmem:[#allocation73_spill] sm:$0xff] %v9215_v9 }
 0x173   : > { %v1542_v34 = vmul.f32 %v1541_v60, %v1528_v37  ;;  %v1617_v60 = vrot.slane %v9008_v32, %v8986_v7  ;;  %v9218_v32 = vrot.slane %v8912_v55, 4 }
 0x175   : > { %1448 = vrot.lane.b32.xlu1 %v1443_v39, %s13697_s1  ;;  %v1567_v39 = vmul.f32 %v9169_v52, %v9160_v5  ;;  %14008 = vst [vmem:[#allocation74_spill] sm:$0xff] %v9218_v32  ;;  %v9230_v54 = vsel %vm1676_vm9, %v9218_v32, %v8912_v55  ;;  %vm2272_vm9 = vcmask 334848  }
 0x176   : > { %1446 = vrot.lane.b32.xlu0 %v1442_v11, %s13697_s1  ;;  %v1566_v11 = vmul.f32 %v9181_v14, %v8981_v49  ;;  %14009 = vst [vmem:[#allocation75_spill] sm:$0xff] %v9230_v54 }
 0x177   : > { %v1581_v1 = vmul.f32 %v1579_v24, %v1567_v39  ;;  %v1619_v39 = vmul.f32 %v1617_v60, %v1605_v26 }
 0x178   : > { %v1580_v37 = vmul.f32 %v1579_v24, %v1566_v11  ;;  %v1655_v24 = vrot.slane %v9037_v0, %v8986_v7  ;;  %v1693_v0 = vrot.slane %v9058_v48, %v8986_v7  ;;  %v9250_v48 = vrot.slane %v8920_v57, 4 }
 0x179   : > { %1548 = vrot.lane.b32.xlu1 %v1543_v16, %s13768_s30  ;;  %v1604_v16 = vmul.f32 %v9198_v2, %v8981_v49 }
 0x17a   : > { %1546 = vrot.lane.b32.xlu0 %v1542_v34, %s13768_s30  ;;  %v9209_v34 = vpop.permute.xlu1 %1912  ;;  %14013 = vst [vmem:[#allocation79_spill] sm:$0xff] %v9250_v48  ;;  %v1757_v41 = vmul.f32 %v9250_v48, %v9160_v5 }
 0x17b   : > { %v1618_v11 = vmul.f32 %v1617_v60, %v1604_v16  ;;  %v1657_v60 = vmul.f32 %v1655_v24, %v1643_v56  ;;  %v1731_v56 = vrot.slane %v9086_v44, %v8986_v7  ;;  %v9267_v44 = vrot.slane %v8922_v3, 4 }
 0x17d   : > { %1586 = vrot.lane.b32.xlu1 %v1581_v1, %s13768_s30  ;;  %v1642_v1 = vmul.f32 %v9215_v9, %v8981_v49  ;;  %14015 = vst [vmem:[#allocation81_spill] sm:$0xff] %v9267_v44  ;;  %v1795_v42 = vmul.f32 %v9267_v44, %v9160_v5 }
 0x17e   : > { %1584 = vrot.lane.b32.xlu0 %v1580_v37, %s13768_s30  ;;  %v9233_v37 = vrot.slane %v8916_v28, 4  ;;  %v9237_v26 = vpop.permute.xlu1 %1966 }
 0x17f   : > { %14011 = vst [vmem:[#allocation77_spill] sm:$0xff] %v9237_v26  ;;  %v1656_v16 = vmul.f32 %v1655_v24, %v1642_v1 }
 0x180   : > { %14010 = vst [vmem:[#allocation76_spill] sm:$0xff] %v9233_v37  ;;  %v9247_v55 = vsel %vm1714_vm10, %v9233_v37, %v8916_v28  ;;  %v1719_v27 = vmul.f32 %v9233_v37, %v9160_v5  ;;  %v9264_v28 = vsel %vm1752_vm11, %v9250_v48, %v8920_v57  ;;  %v9279_v57 = vsel %vm1790_vm12, %v9267_v44, %v8922_v3 }
 0x181   : > { %1624 = vrot.lane.b32.xlu1 %v1619_v39, %s13699_s26  ;;  %v1681_v39 = vmul.f32 %v9218_v32, %v9160_v5  ;;  %14012 = vst [vmem:[#allocation78_spill] sm:$0xff] %v9247_v55  ;;  %14014 = vst [vmem:[#allocation80_spill] sm:$0xff] %v9264_v28  ;;  %vm2310_vm10 = vcmask 343040   ;;  %vm2348_vm11 = vcmask 351232   ;;  %vm2386_vm12 = vcmask 359424  }
 0x182   : > { %1622 = vrot.lane.b32.xlu0 %v1618_v11, %s13699_s26  ;;  %v1680_v11 = vmul.f32 %v9230_v54, %v8981_v49  ;;  %14016 = vst [vmem:[#allocation82_spill] sm:$0xff] %v9279_v57 }
 0x183   : > { %v1695_v24 = vmul.f32 %v1693_v0, %v1681_v39  ;;  %v1733_v39 = vmul.f32 %v1731_v56, %v1719_v27 }
 0x184   : > { %v1694_v1 = vmul.f32 %v1693_v0, %v1680_v11  ;;  %v1769_v0 = vrot.slane %v9107_v38, %v8986_v7  ;;  %v1807_v38 = vrot.slane %v9135_v63, %v8986_v7  ;;  %v9297_v63 = vrot.slane %v8930_v51, 4 }
 0x185   : > { %1662 = vrot.lane.b32.xlu1 %v1657_v60, %s13699_s26  ;;  %v1718_v60 = vmul.f32 %v9247_v55, %v8981_v49 }
 0x186   : > { %1660 = vrot.lane.b32.xlu0 %v1656_v16, %s13699_s26  ;;  %v9258_v16 = vpop.permute.xlu1 %1990  ;;  %14019 = vst [vmem:[#allocation85_spill] sm:$0xff] %v9297_v63 }
 0x187   : > { %v1732_v11 = vmul.f32 %v1731_v56, %v1718_v60  ;;  %v1771_v56 = vmul.f32 %v1769_v0, %v1757_v41  ;;  %v1845_v41 = vrot.slane %v9158_v47, %v8986_v7 }
 0x189   : > { %1700 = vrot.lane.b32.xlu1 %v1695_v24, %s13695_s29  ;;  %v1756_v24 = vmul.f32 %v9264_v28, %v8981_v49 }
 0x18a   : > { %1698 = vrot.lane.b32.xlu0 %v1694_v1, %s13695_s29  ;;  %v9282_v1 = vrot.slane %v8926_v59, 4  ;;  %v2015_v27 = vpop.permute.xlu1 %2014 }
 0x18b   : > { %v1770_v60 = vmul.f32 %v1769_v0, %v1756_v24  ;;  %v1809_v0 = vmul.f32 %v1807_v38, %v1795_v42  ;;  %v1883_v42 = vrot.slane %v9188_v13, %v8986_v7  ;;  %v2023_v4 = vrot.slane %v2015_v27, %v8986_v7 }
 0x18c   : > { %14017 = vst [vmem:[#allocation83_spill] sm:$0xff] %v9282_v1  ;;  %v9294_v3 = vsel %vm1828_vm13, %v9282_v1, %v8926_v59  ;;  %v1833_v24 = vmul.f32 %v9282_v1, %v9160_v5  ;;  %v9309_v59 = vsel %vm1866_vm14, %v9297_v63, %v8930_v51  ;;  %v9321_v51 = vsel %vm1904_vm15, %v8937_v10, %v8932_v12  ;;  %v9334_v12 = vld [vmem:[#allocation2 + $0x8] sm:$0xf] }
 0x18d   : > { %1738 = vrot.lane.b32.xlu1 %v1733_v39, %s13695_s29  ;;  %v1794_v39 = vmul.f32 %v9279_v57, %v8981_v49  ;;  %14018 = vst [vmem:[#allocation84_spill] sm:$0xff] %v9294_v3  ;;  %14020 = vst [vmem:[#allocation86_spill] sm:$0xff] %v9309_v59  ;;  %v1870_v1 = vmul.f32 %v9309_v59, %v8981_v49  ;;  %vm2501_vm13 = vcmask 408576   ;;  %vm2539_vm14 = vcmask 416768  }
 0x18e   : > { %1736 = vrot.lane.b32.xlu0 %v1732_v11, %s13695_s29  ;;  %v1847_v47 = vmul.f32 %v1845_v41, %v1833_v24  ;;  %14021 = vst [vmem:[#allocation87_spill] sm:$0xff] %v9321_v51  ;;  %vm2577_vm15 = vcmask 424960  }
 0x18f   : > { %v1808_v11 = vmul.f32 %v1807_v38, %v1794_v39  ;;  %v1871_v39 = vmul.f32 %v9297_v63, %v9160_v5 }
 0x191   : > { %1776 = vrot.lane.b32.xlu1 %v1771_v56, %s13691_s24  ;;  %v1832_v56 = vmul.f32 %v9294_v3, %v8981_v49  ;;  %v1885_v24 = vmul.f32 %v1883_v42, %v1871_v39 }
 0x192   : > { %1774 = vrot.lane.b32.xlu0 %v1770_v60, %s13691_s24  ;;  %v2053_v60 = vpop.permute.xlu1 %2052 }
 0x193   : > { %v1846_v38 = vmul.f32 %v1845_v41, %v1832_v56  ;;  %v1908_v41 = vmul.f32 %v9321_v51, %v8981_v49  ;;  %v1884_v56 = vmul.f32 %v1883_v42, %v1870_v1 }
 0x195   : > { %1814 = vrot.lane.b32.xlu1 %v1809_v0, %s13691_s24  ;;  %v1921_v0 = vrot.slane %v9209_v34, %v8986_v7 }
 0x196   : > { %1812 = vrot.lane.b32.xlu0 %v1808_v11, %s13691_s24  ;;  %v2091_v13 = vpop.permute.xlu1 %2090  ;;  %v1909_v11 = vmul.f32 %v8937_v10, %v9160_v5  ;;  %v9342_v10 = vrot.slane %v8952_v17, 4 }
 0x197   : > { %v1922_v34 = vmul.f32 %v1921_v0, %v1908_v41  ;;  %v9356_v41 = vrot.slane %v8956_v58, 4 }
 0x198   : > { %14024 = vst [vmem:[#allocation90_spill] sm:$0xff] %v9342_v10 }
 0x199   : > { %1852 = vrot.lane.b32.xlu1 %v1847_v47, %s13689_s5  ;;  %v9330_v47 = vrot.slane %v8948_v45, 4  ;;  %14026 = vst [vmem:[#allocation92_spill] sm:$0xff] %v9356_v41 }
 0x19a   : > { %1850 = vrot.lane.b32.xlu0 %v1846_v38, %s13689_s5  ;;  %v1923_v38 = vmul.f32 %v1921_v0, %v1909_v11  ;;  %v2129_v5 = vpop.permute.xlu1 %2128  ;;  %v9353_v0 = vsel %vm2044_vm2, %v9342_v10, %v8952_v17  ;;  %v2099_v17 = vrot.slane %v2091_v13, %v8986_v7  ;;  %vm2653_vm2 = vcmask 441344  }
 0x19b   : > { %14022 = vst [vmem:[#allocation88_spill] sm:$0xff] %v9330_v47  ;;  %v9339_v51 = vsel %vm2006_vm1, %v9330_v47, %v8948_v45  ;;  %v2011_v42 = vmul.f32 %v9330_v47, %v9334_v12  ;;  %v2061_v45 = vrot.slane %v2053_v60, %v8986_v7  ;;  %14025 = vst [vmem:[#allocation91_spill] sm:$0xff] %v9353_v0  ;;  %vm2615_vm1 = vcmask 433152  }
 0x19c   : > { %14023 = vst [vmem:[#allocation89_spill] sm:$0xff] %v9339_v51  ;;  %v2010_v1 = vmul.f32 %v9339_v51, %v8981_v49  ;;  %v2048_v11 = vmul.f32 %v9353_v0, %v8981_v49 }
 0x19d   : > { %1890 = vrot.lane.b32.xlu1 %v1885_v24, %s13689_s5  ;;  %v2025_v39 = vmul.f32 %v2023_v4, %v2011_v42  ;;  %v2049_v24 = vmul.f32 %v9342_v10, %v9334_v12  ;;  %v2087_v42 = vmul.f32 %v9356_v41, %v9334_v12 }
 0x19e   : > { %1888 = vrot.lane.b32.xlu0 %v1884_v56, %s13689_s5  ;;  %v2024_v27 = vmul.f32 %v2023_v4, %v2010_v1  ;;  %v2167_v4 = vpop.permute.xlu1 %2166  ;;  %v2062_v60 = vmul.f32 %v2061_v45, %v2048_v11 }
 0x19f   : > { %v2063_v56 = vmul.f32 %v2061_v45, %v2049_v24  ;;  %v2101_v13 = vmul.f32 %v2099_v17, %v2087_v42  ;;  %v9384_v45 = vrot.slane %v8962_v36, 4  ;;  %v2232_v24 = vpop.permute.xlu0 %2231 }
 0x1a1   : > { %1928 = vrot.lane.b32.xlu1 %v1923_v38, %s13697_s1  ;;  %v9370_v38 = vrot.slane %v8958_v50, 4  ;;  %14030 = vst [vmem:[#allocation96_spill] sm:$0xff] %v9384_v45 }
 0x1a2   : > { %1926 = vrot.lane.b32.xlu0 %v1922_v34, %s13697_s1  ;;  %v9367_v34 = vsel %vm2082_vm3, %v9356_v41, %v8956_v58  ;;  %v2205_v11 = vpop.permute.xlu1 %2204  ;;  %vm2691_vm3 = vcmask 449536  }
 0x1a3   : > { %14027 = vst [vmem:[#allocation93_spill] sm:$0xff] %v9367_v34  ;;  %14028 = vst [vmem:[#allocation94_spill] sm:$0xff] %v9370_v38  ;;  %v2086_v1 = vmul.f32 %v9367_v34, %v8981_v49  ;;  %v9381_v58 = vsel %vm2120_vm4, %v9370_v38, %v8958_v50  ;;  %v2175_v50 = vrot.slane %v2167_v4, %v8986_v7  ;;  %vm2729_vm4 = vcmask 457728  }
 0x1a4   : > { %14029 = vst [vmem:[#allocation95_spill] sm:$0xff] %v9381_v58  ;;  %v2124_v33 = vmul.f32 %v9381_v58, %v8981_v49 }
 0x1a5   : > { %2030 = vrot.lane.b32.xlu1 %v2025_v39, %s13768_s30  ;;  %v2137_v39 = vrot.slane %v2129_v5, %v8986_v7 }
 0x1a6   : > { %2028 = vrot.lane.b32.xlu0 %v2024_v27, %s13768_s30  ;;  %v2100_v27 = vmul.f32 %v2099_v17, %v2086_v1  ;;  %v9395_v17 = vsel %vm2158_vm6, %v9384_v45, %v8962_v36  ;;  %v9398_v1 = vrot.slane %v8966_v6, 4  ;;  %v2243_v4 = vpop.permute.xlu1 %2242  ;;  %v2270_v36 = vpop.permute.xlu0 %2269  ;;  %vm2767_vm6 = vcmask 465920  }
 0x1a7   : > { %v2138_v5 = vmul.f32 %v2137_v39, %v2124_v33  ;;  %14031 = vst [vmem:[#allocation97_spill] sm:$0xff] %v9395_v17  ;;  %v2162_v42 = vmul.f32 %v9395_v17, %v8981_v49  ;;  %v9406_v33 = vrot.slane %v2232_v24, 4 }
 0x1a8   : > { %14032 = vst [vmem:[#allocation98_spill] sm:$0xff] %v9398_v1  ;;  %v9411_v3 = vsel %vm2196_vm7, %v9398_v1, %v8966_v6  ;;  %v2251_v6 = vrot.slane %v2243_v4, %v8986_v7  ;;  %vm2805_vm7 = vcmask 474112  }
 0x1a9   : > { %2068 = vrot.lane.b32.xlu1 %v2063_v56, %s13768_s30  ;;  %14033 = vst [vmem:[#allocation99_spill] sm:$0xff] %v9406_v33  ;;  %14034 = vst [vmem:[#allocation100_spill] sm:$0xff] %v9411_v3  ;;  %v2200_v21 = vmul.f32 %v9411_v3, %v8981_v49  ;;  %v2239_v28 = vmul.f32 %v9406_v33, %v9334_v12 }
 0x1aa   : > { %2066 = vrot.lane.b32.xlu0 %v2062_v60, %s13768_s30  ;;  %v2125_v60 = vmul.f32 %v9370_v38, %v9334_v12 }
 0x1ac   : > { %v2139_v56 = vmul.f32 %v2137_v39, %v2125_v60  ;;  %v2213_v60 = vrot.slane %v2205_v11, %v8986_v7 }
 0x1ad   : > { %2106 = vrot.lane.b32.xlu1 %v2101_v13, %s13699_s26  ;;  %v2163_v13 = vmul.f32 %v9384_v45, %v9334_v12 }
 0x1ae   : > { %2104 = vrot.lane.b32.xlu0 %v2100_v27, %s13699_s26  ;;  %v2176_v27 = vmul.f32 %v2175_v50, %v2162_v42  ;;  %v2214_v11 = vmul.f32 %v2213_v60, %v2200_v21 }
 0x1af   : > { %v2177_v39 = vmul.f32 %v2175_v50, %v2163_v13  ;;  %v9422_v50 = vrot.slane %v2270_v36, 4  ;;  %v2281_v13 = vpop.permute.xlu1 %2280 }
 0x1b0   : > { %v2289_v21 = vrot.slane %v2281_v13, %v8986_v7 }
 0x1b1   : > { %2144 = vrot.lane.b32.xlu1 %v2139_v56, %s13699_s26  ;;  %v2201_v56 = vmul.f32 %v9398_v1, %v9334_v12  ;;  %14036 = vst [vmem:[#allocation102_spill] sm:$0xff] %v9422_v50 }
 0x1b2   : > { %2142 = vrot.lane.b32.xlu0 %v2138_v5, %s13699_s26  ;;  %v9420_v5 = vsel %vm2234_vm8, %v9406_v33, %v2232_v24  ;;  %v9432_v24 = vsel %vm2272_vm9, %v9422_v50, %v2270_v36  ;;  %s8241_s26 = smov 58   ;;  %vm915_vm8 = vcmask 7168   ;;  %vm1500_vm9 = vcmask 138240  }
 0x1b3   : > { %14035 = vst [vmem:[#allocation101_spill] sm:$0xff] %v9420_v5  ;;  %v2215_v42 = vmul.f32 %v2213_v60, %v2201_v56  ;;  %v2238_v31 = vmul.f32 %v9420_v5, %v8981_v49  ;;  %14037 = vst [vmem:[#allocation103_spill] sm:$0xff] %v9432_v24  ;;  %v2276_v4 = vmul.f32 %v9432_v24, %v8981_v49 }
 0x1b4   : > { %v2277_v60 = vmul.f32 %v9422_v50, %v9334_v12 }
 0x1b5   : > { %2182 = vrot.lane.b32.xlu1 %v2177_v39, %s13695_s29  ;;  %v2253_v39 = vmul.f32 %v2251_v6, %v2239_v28  ;;  %v2290_v56 = vmul.f32 %v2289_v21, %v2276_v4 }
 0x1b6   : > { %2180 = vrot.lane.b32.xlu0 %v2176_v27, %s13695_s29  ;;  %v2252_v27 = vmul.f32 %v2251_v6, %v2238_v31  ;;  %v2306_v31 = vld [vmem:[%s13952_s0] sm:$0xf] }
 0x1b9   : > { %2220 = vrot.lane.b32.xlu1 %v2215_v42, %s13695_s29  ;;  %v2291_v42 = vmul.f32 %v2289_v21, %v2277_v60 }
 0x1ba   : > { %2218 = vrot.lane.b32.xlu0 %v2214_v11, %s13695_s29  ;;  %s8223_s29 = smov 49  }
 0x1bd   : > { %2258 = vrot.lane.b32.xlu1 %v2253_v39, %s13691_s24  ;;  %v13630_v39 = vmov 37  }
 0x1be   : > { %2256 = vrot.lane.b32.xlu0 %v2252_v27, %s13691_s24 }
 0x1bf   : > { %v9441_v11 = vpop.permute.xlu1 %973 }
 0x1c0   : > { %14038 = vst [vmem:[#allocation104_spill] sm:$0xff] %v9441_v11  ;;  %v9443_v36 = vpop.permute.xlu0 %971 }
 0x1c1   : > { %14039 = vst [vmem:[#allocation105_spill] sm:$0xff] %v9443_v36  ;;  %2296 = vrot.lane.b32.xlu1 %v2291_v42, %s13691_s24 }
 0x1c2   : > { %2294 = vrot.lane.b32.xlu0 %v2290_v56, %s13691_s24  ;;  %s8227_s24 = smov 51  }
 0x1c3   : > { %v9450_v28 = vpop.permute.xlu1 %1020 }
 0x1c4   : > { %v9452_v6 = vpop.permute.xlu0 %1018 }
 0x1c5   : > { %2318 = vperm.xlu1 %7874, %v2306_v31  }
 0x1c6   : > { %2307 = vrot.lane.b32.xlu0 %v8680_v19, %s8215_s25  ;;  %s8229_s25 = smov 52  }
 0x1c7   : > { %v9455_v13 = vpop.permute.xlu1 %1068 }
 0x1c8   : > { %14040 = vst [vmem:[#allocation106_spill] sm:$0xff] %v9455_v13  ;;  %v9457_v27 = vpop.permute.xlu0 %1066 }
 0x1c9   : > { %14041 = vst [vmem:[#allocation107_spill] sm:$0xff] %v9457_v27  ;;  %7875 = vset.pattern.permute.xlu1 %v13630_v39 }
 0x1cb   : > { %v9460_v21 = vpop.permute.xlu1 %1115 }
 0x1cc   : > { %v9462_v4 = vpop.permute.xlu0 %1113 }
 0x1cf   : > { %v9464_v60 = vpop.permute.xlu1 %1163 }
 0x1d0   : > { %14042 = vst [vmem:[#allocation108_spill] sm:$0xff] %v9464_v60  ;;  %v9466_v56 = vpop.permute.xlu0 %1161 }
 0x1d1   : > { %14043 = vst [vmem:[#allocation109_spill] sm:$0xff] %v9466_v56 }
 0x1d3   : > { %v9468_v42 = vpop.permute.xlu1 %1210 }
 0x1d4   : > { %v9470_v31 = vpop.permute.xlu0 %1208 }
 0x1d7   : > { %v9472_v36 = vpop.permute.xlu1 %1258 }
 0x1d8   : > { %14044 = vst [vmem:[#allocation110_spill] sm:$0xff] %v9472_v36  ;;  %v9474_v13 = vpop.permute.xlu0 %1256 }
 0x1d9   : > { %14045 = vst [vmem:[#allocation111_spill] sm:$0xff] %v9474_v13 }
 0x1db   : > { %v9476_v27 = vpop.permute.xlu1 %1305 }
 0x1dc   : > { %v9478_v11 = vpop.permute.xlu0 %1303 }
 0x1df   : > { %v9480_v39 = vpop.permute.xlu1 %1353 }
 0x1e0   : > { %14046 = vst [vmem:[#allocation112_spill] sm:$0xff] %v9480_v39  ;;  %v9482_v5 = vpop.permute.xlu0 %1351 }
 0x1e1   : > { %14047 = vst [vmem:[#allocation113_spill] sm:$0xff] %v9482_v5 }
 0x1e3   : > { %v9484_v61 = vpop.permute.xlu1 %1400 }
 0x1e4   : > { %v9486_v60 = vpop.permute.xlu0 %1398 }
 0x1e7   : > { %v9488_v56 = vpop.permute.xlu1 %1448 }
 0x1e8   : > { %14048 = vst [vmem:[#allocation114_spill] sm:$0xff] %v9488_v56  ;;  %v9490_v17 = vpop.permute.xlu0 %1446 }
 0x1e9   : > { %14049 = vst [vmem:[#allocation115_spill] sm:$0xff] %v9490_v17 }
 0x1eb   : > { %v9492_v54 = vpop.permute.xlu1 %1548 }
 0x1ec   : > { %14050 = vst [vmem:[#allocation116_spill] sm:$0xff] %v9492_v54  ;;  %v9494_v36 = vpop.permute.xlu0 %1546 }
 0x1ed   : > { %14051 = vst [vmem:[#allocation117_spill] sm:$0xff] %v9494_v36 }
 0x1ef   : > { %v9496_v13 = vpop.permute.xlu1 %1586 }
 0x1f0   : > { %v9498_v43 = vpop.permute.xlu0 %1584 }
 0x1f3   : > { %v9500_v48 = vpop.permute.xlu1 %1624 }
 0x1f4   : > { %14052 = vst [vmem:[#allocation118_spill] sm:$0xff] %v9500_v48  ;;  %v9502_v39 = vpop.permute.xlu0 %1622 }
 0x1f5   : > { %14053 = vst [vmem:[#allocation119_spill] sm:$0xff] %v9502_v39 }
 0x1f7   : > { %v9504_v5 = vpop.permute.xlu1 %1662 }
 0x1f8   : > { %v9506_v34 = vpop.permute.xlu0 %1660 }
 0x1fb   : > { %v9508_v2 = vpop.permute.xlu1 %1700 }
 0x1fc   : > { %14054 = vst [vmem:[#allocation120_spill] sm:$0xff] %v9508_v2  ;;  %v9510_v56 = vpop.permute.xlu0 %1698 }
 0x1fd   : > { %14055 = vst [vmem:[#allocation121_spill] sm:$0xff] %v9510_v56 }
 0x1ff   : > { %v9512_v17 = vpop.permute.xlu1 %1738 }
 0x200   : > { %v9514_v54 = vpop.permute.xlu0 %1736 }
 0x203   : > { %v9516_v36 = vpop.permute.xlu1 %1776 }
 0x204   : > { %14056 = vst [vmem:[#allocation122_spill] sm:$0xff] %v9516_v36  ;;  %v9518_v23 = vpop.permute.xlu0 %1774 }
 0x205   : > { %14057 = vst [vmem:[#allocation123_spill] sm:$0xff] %v9518_v23 }
 0x207   : > { %v9520_v45 = vpop.permute.xlu1 %1814 }
 0x208   : > { %v9522_v48 = vpop.permute.xlu0 %1812 }
 0x20b   : > { %v9524_v39 = vpop.permute.xlu1 %1852 }
 0x20c   : > { %14058 = vst [vmem:[#allocation124_spill] sm:$0xff] %v9524_v39  ;;  %v9526_v51 = vpop.permute.xlu0 %1850 }
 0x20d   : > { %14059 = vst [vmem:[#allocation125_spill] sm:$0xff] %v9526_v51 }
 0x20f   : > { %v9528_v32 = vpop.permute.xlu1 %1890 }
 0x210   : > { %v9530_v2 = vpop.permute.xlu0 %1888 }
 0x213   : > { %v9532_v56 = vpop.permute.xlu1 %1928 }
 0x214   : > { %14060 = vst [vmem:[#allocation126_spill] sm:$0xff] %v9532_v56  ;;  %v9534_v62 = vpop.permute.xlu0 %1926 }
 0x215   : > { %14061 = vst [vmem:[#allocation127_spill] sm:$0xff] %v9534_v62 }
 0x217   : > { %v9536_v53 = vpop.permute.xlu1 %2030 }
 0x218   : > { %14062 = vst [vmem:[#allocation128_spill] sm:$0xff] %v9536_v53  ;;  %v9538_v36 = vpop.permute.xlu0 %2028 }
 0x219   : > { %14063 = vst [vmem:[#allocation129_spill] sm:$0xff] %v9538_v36 }
 0x21b   : > { %v9542_v18 = vpop.permute.xlu1 %2068 }
 0x21c   : > { %v9540_v23 = vpop.permute.xlu0 %2066 }
 0x21f   : > { %v9546_v39 = vpop.permute.xlu1 %2106 }
 0x220   : > { %v9544_v47 = vpop.permute.xlu0 %2104  ;;  %14065 = vst [vmem:[#allocation131_spill] sm:$0xff] %v9546_v39  ;;  %v14099_v39 = vld [vmem:[#allocation25_spill] sm:$0xff] }
 0x221   : > { %14064 = vst [vmem:[#allocation130_spill] sm:$0xff] %v9544_v47 }
 0x223   : > { %v9552_v33 = vpop.permute.xlu1 %2144 }
 0x224   : > { %v9548_v51 = vpop.permute.xlu0 %2142 }
 0x227   : > { %v9556_v62 = vpop.permute.xlu1 %2182 }
 0x228   : > { %v9550_v59 = vpop.permute.xlu0 %2180  ;;  %14067 = vst [vmem:[#allocation133_spill] sm:$0xff] %v9556_v62 }
 0x229   : > { %14066 = vst [vmem:[#allocation132_spill] sm:$0xff] %v9550_v59 }
 0x22b   : > { %v9560_v24 = vpop.permute.xlu1 %2220 }
 0x22c   : > { %v9554_v56 = vpop.permute.xlu0 %2218 }
 0x22f   : > { %v9564_v41 = vpop.permute.xlu1 %2258 }
 0x230   : > { %v9558_v52 = vpop.permute.xlu0 %2256  ;;  %14069 = vst [vmem:[#allocation135_spill] sm:$0xff] %v9564_v41 }
 0x231   : > { %14068 = vst [vmem:[#allocation134_spill] sm:$0xff] %v9558_v52 }
 0x233   : > { %v9568_v22 = vpop.permute.xlu1 %2296 }
 0x234   : > { %v9562_v57 = vpop.permute.xlu0 %2294 }
 0x238   : > { %v2308_v3 = vpop.permute.xlu0 %2307 }
 0x239   : > { %v9566_v55 = vrot.slane %v2308_v3, 4 }
 0x23b   : > { %14070 = vst [vmem:[#allocation136_spill] sm:$0xff] %v9566_v55  ;;  %v9571_v63 = vsel %vm2310_vm10, %v9566_v55, %v2308_v3  ;;  %v2315_v8 = vmul.f32 %v9566_v55, %v9334_v12  ;;  %v2344_v3 = vld [vmem:[%s13952_s0] sm:$0xf]  ;;  %vm1982_vm10 = vcmask 269312  }
 0x23c   : > { %14071 = vst [vmem:[#allocation137_spill] sm:$0xff] %v9571_v63  ;;  %v2314_v50 = vmul.f32 %v9571_v63, %v8981_v49  ;;  %v13681_v63 = vmov 38  }
 0x244   : > { %v2319_v38 = vpop.permute.xlu1 %2318 }
 0x245   : > { %v2327_v44 = vrot.slane %v2319_v38, %v8986_v7 }
 0x247   : > { %v2328_v1 = vmul.f32 %v2327_v44, %v2314_v50  ;;  %v2329_v0 = vmul.f32 %v2327_v44, %v2315_v8 }
 0x249   : > { %2334 = vrot.lane.b32.xlu1 %v2329_v0, %s13689_s5  ;;  %2332 = vrot.lane.b32.xlu0 %v2328_v1, %s13689_s5 }
 0x24d   : > { %2356 = vperm.xlu1 %7875, %v2344_v3   ;;  %2345 = vrot.lane.b32.xlu0 %v8692_v29, %s8217_s2  ;;  %s8219_s2 = smov 44  }
 0x251   : > { %7876 = vset.pattern.permute.xlu1 %v13681_v63 }
 0x2bb   : > { %v9585_v55 = vpop.permute.xlu0 %2332  ;;  %v9589_v8 = vpop.permute.xlu1 %2334 }
 0x2bc   : > { %14072 = vst [vmem:[#allocation138_spill] sm:$0xff] %v9585_v55  ;;  %14074 = vst [vmem:[#allocation140_spill] sm:$0xff] %v9589_v8 }
 0x2bf   : > { %v2346_v38 = vpop.permute.xlu0 %2345 }
 0x2c0   : > { %v9587_v50 = vrot.slane %v2346_v38, 4 }
 0x2c2   : > { %14073 = vst [vmem:[#allocation139_spill] sm:$0xff] %v9587_v50  ;;  %v9592_v44 = vsel %vm2348_vm11, %v9587_v50, %v2346_v38  ;;  %v2353_v3 = vmul.f32 %v9587_v50, %v9334_v12  ;;  %v2382_v38 = vld [vmem:[%s13952_s0] sm:$0xf]  ;;  %vm978_vm11 = vcmask 1031168  }
 0x2c3   : > { %14075 = vst [vmem:[#allocation141_spill] sm:$0xff] %v9592_v44  ;;  %v2352_v1 = vmul.f32 %v9592_v44, %v8981_v49  ;;  %v13686_v44 = vmov 39  }
 0x2cc   : > { %v2357_v0 = vpop.permute.xlu1 %2356 }
 0x2cd   : > { %v2365_v63 = vrot.slane %v2357_v0, %v8986_v7 }
 0x2cf   : > { %v2366_v14 = vmul.f32 %v2365_v63, %v2352_v1  ;;  %v2367_v58 = vmul.f32 %v2365_v63, %v2353_v3 }
 0x2d1   : > { %2372 = vrot.lane.b32.xlu1 %v2367_v58, %s13689_s5  ;;  %2370 = vrot.lane.b32.xlu0 %v2366_v14, %s13689_s5  ;;  %s8251_s5 = smov 66  }
 0x2d5   : > { %2394 = vperm.xlu1 %7876, %v2382_v38   ;;  %2383 = vrot.lane.b32.xlu0 %v8704_v40, %s8219_s2  ;;  %s8221_s2 = smov 48  }
 0x2d9   : > { %7877 = vset.pattern.permute.xlu1 %v13686_v44 }
 0x343   : > { %v9606_v50 = vpop.permute.xlu0 %2370  ;;  %v9610_v63 = vpop.permute.xlu1 %2372 }
 0x347   : > { %v2384_v0 = vpop.permute.xlu0 %2383 }
 0x348   : > { %v9608_v1 = vrot.slane %v2384_v0, 4 }
 0x34a   : > { %14076 = vst [vmem:[#allocation142_spill] sm:$0xff] %v9608_v1  ;;  %v9613_v14 = vsel %vm2386_vm12, %v9608_v1, %v2384_v0  ;;  %v2391_v38 = vmul.f32 %v9608_v1, %v9334_v12  ;;  %v2449_v0 = vld [vmem:[%s13952_s0] sm:$0xf]  ;;  %vm1073_vm12 = vcmask 1014784  }
 0x34b   : > { %14077 = vst [vmem:[#allocation143_spill] sm:$0xff] %v9613_v14  ;;  %v2390_v3 = vmul.f32 %v9613_v14, %v8981_v49  ;;  %v2473_v1 = vld [vmem:[%s13952_s0] sm:$0xf]  ;;  %v13701_v14 = vmov 40  }
 0x354   : > { %v2395_v58 = vpop.permute.xlu1 %2394 }
 0x355   : > { %v2403_v44 = vrot.slane %v2395_v58, %v8986_v7 }
 0x357   : > { %v2404_v37 = vmul.f32 %v2403_v44, %v2390_v3  ;;  %v2405_v9 = vmul.f32 %v2403_v44, %v2391_v38  ;;  %v8226_v44 = vmov 42  }
 0x359   : > { %2410 = vrot.lane.b32.xlu1 %v2405_v9, %s13697_s1  ;;  %2408 = vrot.lane.b32.xlu0 %v2404_v37, %s13697_s1  ;;  %v2497_v9 = vld [vmem:[%s13952_s0] sm:$0xf]  ;;  %v8225_v37 = vmov 41   ;;  %s8233_s1 = smov 54  }
 0x35d   : > { %2461 = vperm.xlu1 %7877, %v2449_v0   ;;  %2450 = vrot.lane.b32.xlu0 %v8712_v46, %s8221_s2  ;;  %s14090_s2 = smov 124  }
 0x361   : > { %7878 = vset.pattern.permute.xlu1 %v13701_v14  ;;  %2474 = vrot.lane.b32.xlu0 %v8564_v15, %s8223_s29  ;;  %s8231_s29 = smov 53   ;;  %v14128_v15 = vld [vmem:[#allocation38_spill] sm:$0xff] }
 0x362   : > { %2485 = vperm.xlu1 %7878, %v2473_v1   ;;  %v932_v46 = vrot.slane %v14128_v15, %v8986_v7 }
 0x365   : > { %2498 = vrot.lane.b32.xlu0 %v8576_v20, %s8224_s23  ;;  %s14109_s23 = smov 120  }
 0x366   : > { %7879 = vset.pattern.permute.xlu1 %v8225_v37  ;;  %v9652_v37 = vld [vmem:[#allocation2 + $0x8] sm:$0xf] }
 0x367   : > { %2509 = vperm.xlu1 %7879, %v2497_v9  }
 0x36b   : > { %7880 = vset.pattern.permute.xlu1 %v8226_v44 }
 0x3cb   : > { %v9635_v58 = vpop.permute.xlu0 %2408  ;;  %v9641_v0 = vpop.permute.xlu1 %2410 }
 0x3cc   : > { %14078 = vst [vmem:[#allocation144_spill] sm:$0xff] %v9635_v58  ;;  %14080 = vst [vmem:[#allocation146_spill] sm:$0xff] %v9641_v0 }
 0x3cf   : > { %v9637_v3 = vpop.permute.xlu0 %2450 }
 0x3d0   : > { %14079 = vst [vmem:[#allocation145_spill] sm:$0xff] %v9637_v3 }
 0x3d3   : > { %v9639_v38 = vpop.permute.xlu0 %2474 }
 0x3d7   : > { %v2499_v14 = vpop.permute.xlu0 %2498 }
 0x3d8   : > { %v9645_v10 = vrot.slane %v2499_v14, 4 }
 0x3da   : > { %14082 = vst [vmem:[#allocation148_spill] sm:$0xff] %v9645_v10  ;;  %v9650_v9 = vsel %vm2501_vm13, %v9645_v10, %v2499_v14  ;;  %v2506_v0 = vmul.f32 %v9645_v10, %v9652_v37  ;;  %v2535_v14 = vld [vmem:[%s13952_s0] sm:$0xf]  ;;  %vm1168_vm13 = vcmask 998400  }
 0x3db   : > { %14083 = vst [vmem:[#allocation149_spill] sm:$0xff] %v9650_v9  ;;  %v2505_v58 = vmul.f32 %v9650_v9, %v8981_v49  ;;  %v8228_v9 = vmov 43  }
 0x3dc   : > { %v9643_v1 = vpop.permute.xlu1 %2461 }
 0x3dd   : > { %14081 = vst [vmem:[#allocation147_spill] sm:$0xff] %v9643_v1 }
 0x3e1   : > { %v9647_v55 = vpop.permute.xlu1 %2485 }
 0x3e6   : > { %v2510_v44 = vpop.permute.xlu1 %2509 }
 0x3e7   : > { %v2518_v1 = vrot.slane %v2510_v44, %v8986_v7 }
 0x3e9   : > { %v2519_v3 = vmul.f32 %v2518_v1, %v2505_v58  ;;  %v2520_v8 = vmul.f32 %v2518_v1, %v2506_v0 }
 0x3eb   : > { %2525 = vrot.lane.b32.xlu1 %v2520_v8, %s13768_s30  ;;  %2523 = vrot.lane.b32.xlu0 %v2519_v3, %s13768_s30 }
 0x3ef   : > { %2547 = vperm.xlu1 %7880, %v2535_v14   ;;  %2536 = vrot.lane.b32.xlu0 %v8588_v25, %s8227_s24  ;;  %s8239_s24 = smov 57  }
 0x3f3   : > { %7881 = vset.pattern.permute.xlu1 %v8228_v9 }
 0x45d   : > { %v9665_v52 = vpop.permute.xlu0 %2523  ;;  %v9669_v58 = vpop.permute.xlu1 %2525 }
 0x45e   : > { %14084 = vst [vmem:[#allocation150_spill] sm:$0xff] %v9665_v52  ;;  %14086 = vst [vmem:[#allocation152_spill] sm:$0xff] %v9669_v58 }
 0x461   : > { %v2537_v10 = vpop.permute.xlu0 %2536 }
 0x462   : > { %v9667_v44 = vrot.slane %v2537_v10, 4 }
 0x464   : > { %14085 = vst [vmem:[#allocation151_spill] sm:$0xff] %v9667_v44  ;;  %v9672_v8 = vsel %vm2539_vm14, %v9667_v44, %v2537_v10  ;;  %v2544_v1 = vmul.f32 %v9667_v44, %v9652_v37  ;;  %v2573_v10 = vld [vmem:[%s13952_s0] sm:$0xf]  ;;  %vm1263_vm14 = vcmask 982016  }
 0x465   : > { %14087 = vst [vmem:[#allocation153_spill] sm:$0xff] %v9672_v8  ;;  %v2543_v0 = vmul.f32 %v9672_v8, %v8981_v49  ;;  %v8230_v49 = vmov 44  }
 0x46e   : > { %v2548_v3 = vpop.permute.xlu1 %2547 }
 0x46f   : > { %v2556_v9 = vrot.slane %v2548_v3, %v8986_v7 }
 0x471   : > { %v2557_v14 = vmul.f32 %v2556_v9, %v2543_v0  ;;  %v2558_v52 = vmul.f32 %v2556_v9, %v2544_v1  ;;  %v9694_v9 = vld [vmem:[#allocation2] sm:$0xff] }
 0x473   : > { %2563 = vrot.lane.b32.xlu1 %v2558_v52, %s13768_s30  ;;  %2561 = vrot.lane.b32.xlu0 %v2557_v14, %s13768_s30  ;;  %s13829_s30 = smov 64  }
 0x477   : > { %2585 = vperm.xlu1 %7881, %v2573_v10   ;;  %2574 = vrot.lane.b32.xlu0 %v8600_v30, %s8229_s25  ;;  %s14098_s25 = smov 122  }
 0x47b   : > { %7882 = vset.pattern.permute.xlu1 %v8230_v49 }
 0x4e5   : > { %v9685_v8 = vpop.permute.xlu0 %2561  ;;  %v9689_v0 = vpop.permute.xlu1 %2563 }
 0x4e9   : > { %v2575_v44 = vpop.permute.xlu0 %2574 }
 0x4ea   : > { %v9687_v3 = vrot.slane %v2575_v44, 4 }
 0x4ec   : > { %14088 = vst [vmem:[#allocation154_spill] sm:$0xff] %v9687_v3  ;;  %v9692_v52 = vsel %vm2577_vm15, %v9687_v3, %v2575_v44  ;;  %v2582_v10 = vmul.f32 %v9687_v3, %v9652_v37  ;;  %v2611_v44 = vld [vmem:[%s13952_s0] sm:$0xf]  ;;  %vm2843_vm15 = vcmask 482304  }
 0x4ed   : > { %14089 = vst [vmem:[#allocation155_spill] sm:$0xff] %v9692_v52  ;;  %v2581_v14 = vmul.f32 %v9694_v9, %v9692_v52  ;;  %v8232_v52 = vmov 45  }
 0x4f6   : > { %v2586_v1 = vpop.permute.xlu1 %2585 }
 0x4f7   : > { %v2594_v49 = vrot.slane %v2586_v1, %v8986_v7 }
 0x4f9   : > { %v2595_v58 = vmul.f32 %v2594_v49, %v2581_v14  ;;  %v2596_v41 = vmul.f32 %v2594_v49, %v2582_v10 }
 0x4fb   : > { %2601 = vrot.lane.b32.xlu1 %v2596_v41, %s14090_s2  ;;  %2599 = vrot.lane.b32.xlu0 %v2595_v58, %s14090_s2 }
 0x4ff   : > { %2623 = vperm.xlu1 %7882, %v2611_v44   ;;  %2612 = vrot.lane.b32.xlu0 %v8613_v35, %s8231_s29  ;;  %s8235_s29 = smov 55  }
 0x503   : > { %7883 = vset.pattern.permute.xlu1 %v8232_v52 }
 0x56d   : > { %v9707_v59 = vpop.permute.xlu0 %2599  ;;  %v9711_v14 = vpop.permute.xlu1 %2601 }
 0x56e   : > { %14091 = vst [vmem:[#allocation156_spill] sm:$0xff] %v9707_v59  ;;  %14093 = vst [vmem:[#allocation158_spill] sm:$0xff] %v9711_v14  ;;  %v14095_v14 = vld [vmem:[#allocation24_spill] sm:$0xff] }
 0x571   : > { %v2613_v3 = vpop.permute.xlu0 %2612 }
 0x572   : > { %v9709_v1 = vrot.slane %v2613_v3, 4 }
 0x574   : > { %14092 = vst [vmem:[#allocation157_spill] sm:$0xff] %v9709_v1  ;;  %v9714_v41 = vsel %vm2615_vm1, %v9709_v1, %v2613_v3  ;;  %v2620_v49 = vmul.f32 %v9709_v1, %v9652_v37  ;;  %v2649_v3 = vld [vmem:[%s13952_s0] sm:$0xf]  ;;  %vm1358_vm1 = vcmask 965632  }
 0x575   : > { %14094 = vst [vmem:[#allocation159_spill] sm:$0xff] %v9714_v41  ;;  %v2619_v10 = vmul.f32 %v9694_v9, %v9714_v41  ;;  %v8234_v41 = vmov 46  }
 0x57e   : > { %v2624_v58 = vpop.permute.xlu1 %2623 }
 0x57f   : > { %v2632_v52 = vrot.slane %v2624_v58, %v8986_v7 }
 0x581   : > { %v2633_v44 = vmul.f32 %v2632_v52, %v2619_v10  ;;  %v2634_v59 = vmul.f32 %v2632_v52, %v2620_v49 }
 0x583   : > { %2639 = vrot.lane.b32.xlu1 %v2634_v59, %s14090_s2  ;;  %2637 = vrot.lane.b32.xlu0 %v2633_v44, %s14090_s2 }
 0x587   : > { %2661 = vperm.xlu1 %7883, %v2649_v3   ;;  %2650 = vrot.lane.b32.xlu0 %v14095_v14, %s8233_s1  ;;  %s8237_s1 = smov 56   ;;  %v8046_v14 = vld [vmem:[#allocation2 + $0x8] sm:$0xf] }
 0x58b   : > { %7884 = vset.pattern.permute.xlu1 %v8234_v41 }
 0x5f5   : > { %v9727_v62 = vpop.permute.xlu0 %2637  ;;  %v9731_v10 = vpop.permute.xlu1 %2639 }
 0x5f9   : > { %v2651_v1 = vpop.permute.xlu0 %2650 }
 0x5fa   : > { %v9729_v58 = vrot.slane %v2651_v1, 4 }
 0x5fc   : > { %14096 = vst [vmem:[#allocation160_spill] sm:$0xff] %v9729_v58  ;;  %v9734_v59 = vsel %vm2653_vm2, %v9729_v58, %v2651_v1  ;;  %v2658_v44 = vmul.f32 %v9729_v58, %v9652_v37  ;;  %v2687_v1 = vld [vmem:[%s13952_s0] sm:$0xf]  ;;  %vm2477_vm2 = vcmask 400384  }
 0x5fd   : > { %14097 = vst [vmem:[#allocation161_spill] sm:$0xff] %v9734_v59  ;;  %v2657_v52 = vmul.f32 %v9694_v9, %v9734_v59  ;;  %v8236_v59 = vmov 47  }
 0x606   : > { %v2662_v49 = vpop.permute.xlu1 %2661 }
 0x607   : > { %v2670_v41 = vrot.slane %v2662_v49, %v8986_v7 }
 0x609   : > { %v2671_v3 = vmul.f32 %v2670_v41, %v2657_v52  ;;  %v2672_v47 = vmul.f32 %v2670_v41, %v2658_v44 }
 0x60b   : > { %2677 = vrot.lane.b32.xlu1 %v2672_v47, %s14098_s25  ;;  %2675 = vrot.lane.b32.xlu0 %v2671_v3, %s14098_s25 }
 0x60f   : > { %2699 = vperm.xlu1 %7884, %v2687_v1   ;;  %2688 = vrot.lane.b32.xlu0 %v14099_v39, %s8235_s29  ;;  %s14119_s29 = smov 118  }
 0x613   : > { %7885 = vset.pattern.permute.xlu1 %v8236_v59 }
 0x67d   : > { %v9747_v26 = vpop.permute.xlu0 %2675  ;;  %v9751_v52 = vpop.permute.xlu1 %2677 }
 0x67e   : > { %14100 = vst [vmem:[#allocation162_spill] sm:$0xff] %v9747_v26  ;;  %14102 = vst [vmem:[#allocation164_spill] sm:$0xff] %v9751_v52  ;;  %v14104_v52 = vld [vmem:[#allocation26_spill] sm:$0xff] }
 0x681   : > { %v2689_v58 = vpop.permute.xlu0 %2688 }
 0x682   : > { %v9749_v49 = vrot.slane %v2689_v58, 4 }
 0x684   : > { %14101 = vst [vmem:[#allocation163_spill] sm:$0xff] %v9749_v49  ;;  %v9754_v47 = vsel %vm2691_vm3, %v9749_v49, %v2689_v58  ;;  %v2696_v3 = vmul.f32 %v9749_v49, %v9652_v37  ;;  %v2725_v58 = vld [vmem:[%s13952_s0] sm:$0xf]  ;;  %vm2881_vm3 = vcmask 490496  }
 0x685   : > { %14103 = vst [vmem:[#allocation165_spill] sm:$0xff] %v9754_v47  ;;  %v2695_v41 = vmul.f32 %v9694_v9, %v9754_v47  ;;  %v8238_v47 = vmov 48  }
 0x68e   : > { %v2700_v44 = vpop.permute.xlu1 %2699 }
 0x68f   : > { %v2708_v59 = vrot.slane %v2700_v44, %v8986_v7 }
 0x691   : > { %v2709_v1 = vmul.f32 %v2708_v59, %v2695_v41  ;;  %v2710_v26 = vmul.f32 %v2708_v59, %v2696_v3 }
 0x693   : > { %2715 = vrot.lane.b32.xlu1 %v2710_v26, %s14098_s25  ;;  %2713 = vrot.lane.b32.xlu0 %v2709_v1, %s14098_s25 }
 0x697   : > { %2737 = vperm.xlu1 %7885, %v2725_v58   ;;  %2726 = vrot.lane.b32.xlu0 %v14104_v52, %s8237_s1  ;;  %v14110_v52 = vld [vmem:[#allocation27_spill] sm:$0xff]  ;;  %s8243_s1 = smov 59  }
 0x69b   : > { %7886 = vset.pattern.permute.xlu1 %v8238_v47 }
 0x705   : > { %v9767_v36 = vpop.permute.xlu0 %2713  ;;  %v9771_v41 = vpop.permute.xlu1 %2715 }
 0x706   : > { %14105 = vst [vmem:[#allocation166_spill] sm:$0xff] %v9767_v36  ;;  %14107 = vst [vmem:[#allocation168_spill] sm:$0xff] %v9771_v41 }
 0x709   : > { %v2727_v49 = vpop.permute.xlu0 %2726 }
 0x70a   : > { %v9769_v44 = vrot.slane %v2727_v49, 4 }
 0x70c   : > { %14106 = vst [vmem:[#allocation167_spill] sm:$0xff] %v9769_v44  ;;  %v9774_v26 = vsel %vm2729_vm4, %v9769_v44, %v2727_v49  ;;  %v2734_v1 = vmul.f32 %v9769_v44, %v9652_v37  ;;  %v2763_v49 = vld [vmem:[%s13952_s0] sm:$0xf]  ;;  %vm2997_vm4 = vcmask 539648  }
 0x70d   : > { %14108 = vst [vmem:[#allocation169_spill] sm:$0xff] %v9774_v26  ;;  %v2733_v59 = vmul.f32 %v9694_v9, %v9774_v26  ;;  %v8240_v26 = vmov 49  }
 0x716   : > { %v2738_v3 = vpop.permute.xlu1 %2737 }
 0x717   : > { %v2746_v47 = vrot.slane %v2738_v3, %v8986_v7 }
 0x719   : > { %v2747_v58 = vmul.f32 %v2746_v47, %v2733_v59  ;;  %v2748_v53 = vmul.f32 %v2746_v47, %v2734_v1 }
 0x71b   : > { %2753 = vrot.lane.b32.xlu1 %v2748_v53, %s14109_s23  ;;  %2751 = vrot.lane.b32.xlu0 %v2747_v58, %s14109_s23 }
 0x71f   : > { %2775 = vperm.xlu1 %7886, %v2763_v49   ;;  %2764 = vrot.lane.b32.xlu0 %v14110_v52, %s8239_s24  ;;  %v14120_v52 = vld [vmem:[#allocation34_spill] sm:$0xff]  ;;  %s8246_s24 = smov 60  }
 0x723   : > { %7887 = vset.pattern.permute.xlu1 %v8240_v26 }
 0x78d   : > { %v9787_v39 = vpop.permute.xlu0 %2751  ;;  %v9791_v59 = vpop.permute.xlu1 %2753 }
 0x78e   : > { %14111 = vst [vmem:[#allocation170_spill] sm:$0xff] %v9787_v39  ;;  %14113 = vst [vmem:[#allocation172_spill] sm:$0xff] %v9791_v59 }
 0x791   : > { %v2765_v44 = vpop.permute.xlu0 %2764 }
 0x792   : > { %v9789_v3 = vrot.slane %v2765_v44, 4 }
 0x794   : > { %14112 = vst [vmem:[#allocation171_spill] sm:$0xff] %v9789_v3  ;;  %v9794_v53 = vsel %vm2767_vm6, %v9789_v3, %v2765_v44  ;;  %v2772_v58 = vmul.f32 %v9789_v3, %v9652_v37  ;;  %v2801_v44 = vld [vmem:[%s13952_s0] sm:$0xf]  ;;  %vm3035_vm6 = vcmask 547840  }
 0x795   : > { %14114 = vst [vmem:[#allocation173_spill] sm:$0xff] %v9794_v53  ;;  %v2771_v47 = vmul.f32 %v9694_v9, %v9794_v53  ;;  %v8242_v53 = vmov 50  }
 0x79e   : > { %v2776_v1 = vpop.permute.xlu1 %2775 }
 0x79f   : > { %v2784_v26 = vrot.slane %v2776_v1, %v8986_v7 }
 0x7a1   : > { %v2785_v49 = vmul.f32 %v2784_v26, %v2771_v47  ;;  %v2786_v39 = vmul.f32 %v2784_v26, %v2772_v58 }
 0x7a3   : > { %2791 = vrot.lane.b32.xlu1 %v2786_v39, %s14109_s23  ;;  %2789 = vrot.lane.b32.xlu0 %v2785_v49, %s14109_s23 }
 0x7a7   : > { %2813 = vperm.xlu1 %7887, %v2801_v44   ;;  %2802 = vrot.lane.b32.xlu0 %v8680_v19, %s8241_s26  ;;  %s13774_s26 = smov 127  }
 0x7ab   : > { %7888 = vset.pattern.permute.xlu1 %v8242_v53 }
 0x815   : > { %v9807_v59 = vpop.permute.xlu0 %2789  ;;  %v9811_v47 = vpop.permute.xlu1 %2791 }
 0x816   : > { %14115 = vst [vmem:[#allocation174_spill] sm:$0xff] %v9807_v59  ;;  %14117 = vst [vmem:[#allocation176_spill] sm:$0xff] %v9811_v47  ;;  %v1212_v47 = vrot.slane %v9470_v31, 4 }
 0x819   : > { %v2803_v3 = vpop.permute.xlu0 %2802 }
 0x81a   : > { %v9809_v1 = vrot.slane %v2803_v3, 4 }
 0x81c   : > { %14116 = vst [vmem:[#allocation175_spill] sm:$0xff] %v9809_v1  ;;  %v9814_v39 = vsel %vm2805_vm7, %v9809_v1, %v2803_v3  ;;  %v2810_v49 = vmul.f32 %v9809_v1, %v9652_v37  ;;  %v2839_v3 = vld [vmem:[%s13952_s0] sm:$0xf]  ;;  %v9828_v1 = vrot.slane %v14120_v52, 4  ;;  %vm3073_vm7 = vcmask 556032  }
 0x81d   : > { %14118 = vst [vmem:[#allocation177_spill] sm:$0xff] %v9814_v39  ;;  %v2809_v26 = vmul.f32 %v9694_v9, %v9814_v39  ;;  %v8244_v39 = vmov 51  }
 0x81e   : > { %14121 = vst [vmem:[#allocation34_spill] sm:$0xff] %v9828_v1  ;;  %v920_v35 = vmul.f32 %v8046_v14, %v9828_v1  ;;  %v14130_v14 = vld [vmem:[#allocation43_spill] sm:$0xff] }
 0x826   : > { %v2814_v58 = vpop.permute.xlu1 %2813 }
 0x827   : > { %v2822_v53 = vrot.slane %v2814_v58, %v8986_v7  ;;  %v1023_v58 = vrot.slane %v9450_v28, 4 }
 0x829   : > { %v2823_v44 = vmul.f32 %v2822_v53, %v2809_v26  ;;  %v2824_v19 = vmul.f32 %v2822_v53, %v2810_v49  ;;  %v14122_v26 = vld [vmem:[#allocation37_spill] sm:$0xff] }
 0x82a   : > { %v9833_v49 = vrot.slane %v14122_v26, 4  ;;  %v14124_v53 = vld [vmem:[#allocation41_spill] sm:$0xff] }
 0x82b   : > { %2829 = vrot.lane.b32.xlu1 %v2824_v19, %s14119_s29  ;;  %2827 = vrot.lane.b32.xlu0 %v2823_v44, %s14119_s29  ;;  %v1022_v19 = vrot.slane %v9452_v6, 4  ;;  %v9836_v44 = vrot.slane %v14124_v53, 4 }
 0x82c   : > { %14123 = vst [vmem:[#allocation37_spill] sm:$0xff] %v9833_v49  ;;  %v9854_v59 = vsel %vm1500_vm9, %v9833_v49, %v14122_v26  ;;  %v1308_v26 = vrot.slane %v9476_v27, 4  ;;  %vm3149_vm9 = vcmask 572416  }
 0x82d   : > { %14125 = vst [vmem:[#allocation41_spill] sm:$0xff] %v9836_v44  ;;  %v1024_v20 = vsel %vm686_vm0, %v1022_v19, %v1023_v58  ;;  %14129 = vst [vmem:[#allocation38_spill] sm:$0xff] %v9854_v59  ;;  %v934_v19 = vmul.f32 %v932_v46, %v920_v35  ;;  %v1987_v36 = vmul.f32 %v9836_v44, %v9334_v12  ;;  %v8047_v12 = vld [vmem:[#allocation2 + $0x8] sm:$0xf] }
 0x82e   : > { %v1025_v15 = vsel %vm978_vm11, %v9452_v6, %v1024_v20 }
 0x82f   : > { %2851 = vperm.xlu1 %7888, %v2839_v3   ;;  %2840 = vrot.lane.b32.xlu0 %v8692_v29, %s8243_s1  ;;  %v1118_v3 = vrot.slane %v9460_v21, 4  ;;  %v1117_v29 = vrot.slane %v9462_v4, 4  ;;  %v1029_v35 = vadd.f32 %v9450_v28, %v934_v19  ;;  %v1588_v28 = vrot.slane %v9498_v43, 4  ;;  %s8291_s1 = smov 88  }
 0x831   : > { %v1119_v58 = vsel %vm686_vm0, %v1117_v29, %v1118_v3 }
 0x832   : > { %v1120_v20 = vsel %vm1073_vm12, %v9462_v4, %v1119_v58  ;;  %v1665_v58 = vrot.slane %v9504_v5, 4 }
 0x833   : > { %7889 = vset.pattern.permute.xlu1 %v8244_v39  ;;  %v9842_v39 = vsel %vm915_vm8, %v9828_v1, %v14120_v52  ;;  %v1213_v52 = vrot.slane %v9468_v42, 4  ;;  %v1517_v1 = vrot.slane %v14130_v14, %v8986_v7  ;;  %v1999_v14 = vrot.slane %v9258_v16, %v8986_v7 }
 0x834   : > { %14126 = vst [vmem:[#allocation178_spill] sm:$0xff] %v9842_v39  ;;  %v919_v25 = vmul.f32 %v9694_v9, %v9842_v39  ;;  %v1307_v39 = vrot.slane %v9478_v11, 4  ;;  %v1589_v16 = vrot.slane %v9496_v13, 4  ;;  %vm3111_vm8 = vcmask 564224  }
 0x835   : > { %v1214_v29 = vsel %vm686_vm0, %v1212_v47, %v1213_v52 }
 0x836   : > { %v933_v41 = vmul.f32 %v932_v46, %v919_v25  ;;  %v1124_v25 = vadd.f32 %v9460_v21, %v1029_v35  ;;  %v1309_v46 = vsel %vm686_vm0, %v1307_v39, %v1308_v26  ;;  %v1215_v4 = vsel %vm1168_vm13, %v9470_v31, %v1214_v29 }
 0x837   : > { %v1664_v21 = vrot.slane %v9506_v34, 4  ;;  %v1310_v26 = vsel %vm1263_vm14, %v9478_v11, %v1309_v46 }
 0x838   : > { %v1028_v3 = vadd.f32 %v1025_v15, %v933_v41  ;;  %v1504_v41 = vmul.f32 %v9694_v9, %v9854_v59  ;;  %v1219_v52 = vadd.f32 %v9468_v42, %v1124_v25  ;;  %v2001_v15 = vmul.f32 %v1999_v14, %v1987_v36  ;;  %v14174_v59 = vld [vmem:[#allocation27_spill] sm:$0xff] }
 0x839   : > { %v1403_v42 = vrot.slane %v9484_v61, 4  ;;  %v1740_v36 = vrot.slane %v9514_v54, 4 }
 0x83a   : > { %v1123_v19 = vadd.f32 %v1120_v20, %v1028_v3  ;;  %v1314_v29 = vadd.f32 %v9476_v27, %v1219_v52  ;;  %v1590_v3 = vsel %vm686_vm0, %v1588_v28, %v1589_v16  ;;  %v1518_v25 = vmul.f32 %v1517_v1, %v1504_v41 }
 0x83b   : > { %v1666_v27 = vsel %vm686_vm0, %v1664_v21, %v1665_v58  ;;  %v1591_v46 = vsel %vm978_vm11, %v9498_v43, %v1590_v3  ;;  %v1817_v16 = vrot.slane %v9520_v45, 4  ;;  %v1816_v28 = vrot.slane %v9522_v48, 4 }
 0x83c   : > { %v1218_v20 = vadd.f32 %v1215_v4, %v1123_v19  ;;  %v2071_v19 = vrot.slane %v9542_v18, 4  ;;  %v2070_v52 = vrot.slane %v9540_v23, 4  ;;  %v1667_v58 = vsel %vm1073_vm12, %v9506_v34, %v1666_v27 }
 0x83d   : > { %v2223_v34 = vrot.slane %v9560_v24, 4  ;;  %v2077_v27 = vadd.f32 %v9542_v18, %v2001_v15 }
 0x83e   : > { %v1313_v11 = vadd.f32 %v1310_v26, %v1218_v20  ;;  %v2147_v26 = vrot.slane %v9552_v33, 4  ;;  %v2146_v20 = vrot.slane %v9548_v51, 4 }
 0x89d   : > { %v9845_v30 = vpop.permute.xlu0 %2827  ;;  %v9897_v31 = vpop.permute.xlu1 %2829 }
 0x89e   : > { %14127 = vst [vmem:[#allocation179_spill] sm:$0xff] %v9845_v30  ;;  %v9862_v30 = vsel %vm1982_vm10, %v9836_v44, %v14124_v53  ;;  %v1505_v44 = vmul.f32 %v8047_v12, %v9833_v49  ;;  %v1402_v12 = vrot.slane %v9486_v60, 4  ;;  %v1594_v49 = vadd.f32 %v1591_v46, %v1518_v25 }
 0x89f   : > { %14131 = vst [vmem:[#allocation43_spill] sm:$0xff] %v9862_v30  ;;  %v1986_v53 = vmul.f32 %v9694_v9, %v9862_v30  ;;  %v2148_v46 = vsel %vm686_vm0, %v2146_v20, %v2147_v26  ;;  %vm3187_vm10 = vcmask 580608  }
 0x8a0   : > { %v1519_v35 = vmul.f32 %v1517_v1, %v1505_v44  ;;  %v1409_v44 = vadd.f32 %v9484_v61, %v1314_v29  ;;  %v1404_v41 = vsel %vm686_vm0, %v1402_v12, %v1403_v42  ;;  %v1892_v42 = vrot.slane %v9530_v2, 4 }
 0x8a1   : > { %v2841_v6 = vpop.permute.xlu0 %2840  ;;  %v9893_v39 = vmul.f32 %v1999_v14, %v1986_v53  ;;  %v1741_v53 = vrot.slane %v9512_v17, 4  ;;  %v2222_v12 = vrot.slane %v9554_v56, 4  ;;  %v2149_v15 = vsel %vm1073_vm12, %v9548_v51, %v2148_v46 }
 0x8a2   : > { %v9888_v47 = vrot.slane %v2841_v6, 4  ;;  %v1595_v43 = vadd.f32 %v9496_v13, %v1519_v35  ;;  %v1818_v13 = vsel %vm686_vm0, %v1816_v28, %v1817_v16  ;;  %v2072_v35 = vsel %vm686_vm0, %v2070_v52, %v2071_v19 }
 0x8a3   : > { %v1742_v21 = vsel %vm686_vm0, %v1740_v36, %v1741_v53  ;;  %v1405_v53 = vsel %vm1358_vm1, %v9486_v60, %v1404_v41  ;;  %v2299_v16 = vrot.slane %v9568_v22, 4  ;;  %v2298_v28 = vrot.slane %v9562_v57, 4 }
 0x8a4   : > { %14132 = vst [vmem:[#allocation180_spill] sm:$0xff] %v9888_v47  ;;  %v9906_v14 = vsel %vm2843_vm15, %v9888_v47, %v2841_v6  ;;  %v2848_v61 = vmul.f32 %v9888_v47, %v9652_v37  ;;  %v1671_v30 = vadd.f32 %v9504_v5, %v1595_v43  ;;  %v1670_v5 = vadd.f32 %v1667_v58, %v1594_v49 }
 0x8a5   : > { %14133 = vst [vmem:[#allocation181_spill] sm:$0xff] %v9906_v14  ;;  %v2847_v6 = vmul.f32 %v9694_v9, %v9906_v14  ;;  %v1743_v25 = vsel %vm1168_vm13, %v9514_v54, %v1742_v21  ;;  %v1819_v52 = vsel %vm1263_vm14, %v9522_v48, %v1818_v13  ;;  %v2153_v54 = vadd.f32 %v9552_v33, %v2077_v27 }
 0x8a6   : > { %v1747_v36 = vadd.f32 %v9512_v17, %v1671_v30  ;;  %v2073_v30 = vsel %vm978_vm11, %v9540_v23, %v2072_v35  ;;  %v2224_v18 = vsel %vm686_vm0, %v2222_v12, %v2223_v34  ;;  %v2375_v17 = vrot.slane %v9610_v63, 4 }
 0x8a7   : > { %v2374_v49 = vrot.slane %v9606_v50, 4  ;;  %v1408_v48 = vadd.f32 %v1405_v53, %v1313_v11  ;;  %v2076_v33 = vadd.f32 %v2073_v30, %v9893_v39  ;;  %v2225_v41 = vsel %vm1168_vm13, %v9554_v56, %v2224_v18 }
 0x8a8   : > { %v1823_v19 = vadd.f32 %v9520_v45, %v1747_v36  ;;  %v1746_v45 = vadd.f32 %v1743_v25, %v1670_v5  ;;  %v2494_v12 = vrot.slane %v9647_v55, %v8986_v7  ;;  %v14138_v5 = vld [vmem:[#allocation168_spill] sm:$0xff]  ;;  %v14139_v25 = vld [vmem:[#allocation166_spill] sm:$0xff]  ;;  %vm3225_vm15 = vcmask 588800  }
 0x8a9   : > { %v2152_v11 = vadd.f32 %v2149_v15, %v2076_v33  ;;  %v2376_v51 = vsel %vm686_vm0, %v2374_v49, %v2375_v17  ;;  %v2718_v36 = vrot.slane %v14138_v5, 4  ;;  %v2717_v27 = vrot.slane %v14139_v25, 4  ;;  %v14141_v55 = vld [vmem:[#allocation176_spill] sm:$0xff] }
 0x8aa   : > { %v1899_v23 = vadd.f32 %v9528_v32, %v1823_v19 }
 0x8ab   : > { %v2228_v39 = vadd.f32 %v2225_v41, %v2152_v11 }
 0x8ae   : > { %v2852_v4 = vpop.permute.xlu1 %2851 }
 0x8af   : > { %v2860_v1 = vrot.slane %v2852_v4, %v8986_v7  ;;  %v1893_v4 = vrot.slane %v9528_v32, 4 }
 0x8b1   : > { %v2861_v29 = vmul.f32 %v2860_v1, %v2847_v6  ;;  %v2862_v3 = vmul.f32 %v2860_v1, %v2848_v61  ;;  %v1894_v60 = vsel %vm686_vm0, %v1892_v42, %v1893_v4  ;;  %v2229_v6 = vadd.f32 %v9560_v24, %v2153_v54 }
 0x8b2   : > { %v2300_v61 = vsel %vm686_vm0, %v2298_v28, %v2299_v16  ;;  %v1822_v1 = vadd.f32 %v1819_v52, %v1746_v45  ;;  %v2642_v4 = vrot.slane %v9731_v10, 4  ;;  %v2641_v42 = vrot.slane %v9727_v62, 4 }
 0x8b3   : > { %2867 = vrot.lane.b32.xlu1 %v2862_v3, %s14119_s29  ;;  %2865 = vrot.lane.b32.xlu0 %v2861_v29, %s14119_s29  ;;  %v2305_v43 = vadd.f32 %v9568_v22, %v2229_v6  ;;  %v2301_v32 = vsel %vm1263_vm14, %v9562_v57, %v2300_v61  ;;  %v2877_v22 = vld [vmem:[%s13952_s0] sm:$0xf]  ;;  %v8247_v57 = vmov 52   ;;  %v2566_v29 = vrot.slane %v9689_v0, 4 }
 0x8b4   : > { %v2304_v56 = vadd.f32 %v2301_v32, %v2228_v39  ;;  %v2565_v3 = vrot.slane %v9685_v8, 4  ;;  %v2643_v28 = vsel %vm686_vm0, %v2641_v42, %v2642_v4  ;;  %v2794_v52 = vrot.slane %v14141_v55, 4  ;;  %v14147_v4 = vld [vmem:[#allocation19_spill] sm:$0xff] }
 0x8b5   : > { %v2381_v58 = vadd.f32 %v9610_v63, %v2305_v43  ;;  %v2644_v49 = vsel %vm1073_vm12, %v9727_v62, %v2643_v28  ;;  %v8252_v42 = vmov 54  }
 0x8b6   : > { %v2567_v53 = vsel %vm686_vm0, %v2565_v3, %v2566_v29  ;;  %v8249_v29 = vmov 53   ;;  %v2993_v3 = vld [vmem:[%s13952_s0] sm:$0xf] }
 0x8b7   : > { %1461 = vrot.lane.b32.xlu1 %v1409_v44, %s13774_s26  ;;  %2878 = vrot.lane.b32.xlu0 %v8704_v40, %s8246_s24  ;;  %v1895_v44 = vsel %vm1358_vm1, %v9530_v2, %v1894_v60  ;;  %v2377_v2 = vsel %vm1358_vm1, %v9606_v50, %v2376_v51  ;;  %v9986_v50 = vrot.slane %v9639_v38, 4  ;;  %v2568_v19 = vsel %vm978_vm11, %v9685_v8, %v2567_v53  ;;  %v14142_v60 = vld [vmem:[#allocation174_spill] sm:$0xff]  ;;  %s14144_s24 = smov 116  }
 0x8b8   : > { %v1898_v24 = vadd.f32 %v1895_v44, %v1822_v1  ;;  %v2380_v21 = vadd.f32 %v2377_v2, %v2304_v56  ;;  %v2793_v30 = vrot.slane %v14142_v60, 4 }
 0x8b9   : > { %14135 = vst [vmem:[#allocation183_spill] sm:$0xff] %v9986_v50  ;;  %v9996_v35 = vsel %vm2477_vm2, %v9986_v50, %v9639_v38  ;;  %v2482_v16 = vmul.f32 %v9986_v50, %v9652_v37  ;;  %vm3263_vm2 = vcmask 596992   ;;  %v14195_v50 = vld [vmem:[#allocation133_spill] sm:$0xff] }
 0x8ba   : > { %14137 = vst [vmem:[#allocation185_spill] sm:$0xff] %v9996_v35  ;;  %v2481_v46 = vmul.f32 %v9694_v9, %v9996_v35  ;;  %v2795_v6 = vsel %vm686_vm0, %v2793_v30, %v2794_v52  ;;  %v14182_v35 = vld [vmem:[#allocation29_spill] sm:$0xff]  ;;  %v2185_v14 = vrot.slane %v14195_v50, 4 }
 0x8bb   : > { %1942 = vrot.lane.b32.xlu1 %v1899_v23, %s13774_s26  ;;  %1459 = vrot.lane.b32.xlu0 %v1408_v48, %s13774_s26  ;;  %v2496_v18 = vmul.f32 %v2494_v12, %v2482_v16  ;;  %v2719_v48 = vsel %vm686_vm0, %v2717_v27, %v2718_v36  ;;  %v2796_v51 = vsel %vm1263_vm14, %v14142_v60, %v2795_v6  ;;  %v14153_v6 = vld [vmem:[#allocation20_spill] sm:$0xff] }
 0x8bc   : > { %v2495_v54 = vmul.f32 %v2494_v12, %v2481_v46  ;;  %v2720_v44 = vsel %vm1168_vm13, %v14139_v25, %v2719_v48 }
 0x8bd   : > { %v2572_v23 = vadd.f32 %v9689_v0, %v2496_v18 }
 0x8be   : > { %v2571_v33 = vadd.f32 %v2568_v19, %v2495_v54  ;;  %v10082_v54 = vld [vmem:[#allocation2 + $0x8] sm:$0xf] }
 0x8bf   : > { %2424 = vrot.lane.b32.xlu1 %v2381_v58, %s13774_s26  ;;  %1940 = vrot.lane.b32.xlu0 %v1898_v24, %s13774_s26  ;;  %v2648_v61 = vadd.f32 %v9731_v10, %v2572_v23 }
 0x8c0   : > { %v2647_v1 = vadd.f32 %v2644_v49, %v2571_v33  ;;  %v3031_v33 = vld [vmem:[%s13952_s0] sm:$0xf] }
 0x8c1   : > { %v2724_v10 = vadd.f32 %v14138_v5, %v2648_v61  ;;  %v8255_v61 = vmov 56  }
 0x8c2   : > { %v2723_v32 = vadd.f32 %v2720_v44, %v2647_v1 }
 0x8c3   : > { %2889 = vperm.xlu1 %7889, %v2877_v22   ;;  %2422 = vrot.lane.b32.xlu0 %v2380_v21, %s13774_s26  ;;  %v2800_v2 = vadd.f32 %v14141_v55, %v2724_v10  ;;  %v2945_v21 = vld [vmem:[%s13952_s0] sm:$0xf] }
 0x8c4   : > { %v2799_v56 = vadd.f32 %v2796_v51, %v2723_v32 }
 0x8c7   : > { %7890 = vset.pattern.permute.xlu1 %v8247_v57  ;;  %v14145_v57 = vld [vmem:[#allocation31_spill] sm:$0xff] }
 0x925   : > { %v2868_v26 = vpop.permute.xlu1 %2867  ;;  %v2866_v20 = vpop.permute.xlu0 %2865 }
 0x926   : > { %v2870_v45 = vrot.slane %v2868_v26, 4  ;;  %v2869_v15 = vrot.slane %v2866_v20, 4 }
 0x928   : > { %v2871_v62 = vsel %vm686_vm0, %v2869_v15, %v2870_v45 }
 0x929   : > { %v9983_v63 = vpop.permute.xlu1 %1461  ;;  %v2879_v34 = vpop.permute.xlu0 %2878  ;;  %v2872_v58 = vsel %vm1358_vm1, %v2866_v20, %v2871_v62  ;;  %v2969_v20 = vld [vmem:[%s13952_s0] sm:$0xf] }
 0x92a   : > { %14134 = vst [vmem:[#allocation182_spill] sm:$0xff] %v9983_v63  ;;  %v10008_v38 = vrot.slane %v2879_v34, 4  ;;  %v2875_v22 = vadd.f32 %v2872_v58, %v2799_v56  ;;  %v14156_v58 = vld [vmem:[#allocation21_spill] sm:$0xff]  ;;  %v8265_v63 = vmov 61  }
 0x92c   : > { %14140 = vst [vmem:[#allocation168_spill] sm:$0xff] %v10008_v38  ;;  %v10021_v8 = vsel %vm2881_vm3, %v10008_v38, %v2879_v34  ;;  %v2886_v0 = vmul.f32 %v10008_v38, %v9652_v37  ;;  %v2876_v37 = vadd.f32 %v2868_v26, %v2800_v2  ;;  %v14146_v26 = vld [vmem:[#allocation18_spill] sm:$0xff]  ;;  %v8253_v34 = vmov 55  }
 0x92d   : > { %v9992_v13 = vpop.permute.xlu1 %1942  ;;  %14143 = vst [vmem:[#allocation166_spill] sm:$0xff] %v10021_v8  ;;  %v2885_v11 = vmul.f32 %v9694_v9, %v10021_v8  ;;  %v10055_v12 = vpop.permute.xlu0 %1459  ;;  %v8257_v2 = vmov 57   ;;  %vm3301_vm3 = vcmask 605184  }
 0x92e   : > { %14136 = vst [vmem:[#allocation184_spill] sm:$0xff] %v9992_v13  ;;  %14148 = vst [vmem:[#allocation176_spill] sm:$0xff] %v10055_v12 }
 0x931   : > { %v10014_v17 = vpop.permute.xlu1 %2424  ;;  %v10057_v53 = vpop.permute.xlu0 %1940 }
 0x932   : > { %14149 = vst [vmem:[#allocation174_spill] sm:$0xff] %v10057_v53 }
 0x935   : > { %v10059_v5 = vpop.permute.xlu0 %2422 }
 0x942   : > { %v2890_v41 = vpop.permute.xlu1 %2889 }
 0x943   : > { %v2898_v43 = vrot.slane %v2890_v41, %v8986_v7 }
 0x945   : > { %v2899_v24 = vmul.f32 %v2898_v43, %v2885_v11  ;;  %v2900_v39 = vmul.f32 %v2898_v43, %v2886_v0 }
 0x947   : > { %2905 = vrot.lane.b32.xlu1 %v2900_v39, %s14144_s24  ;;  %2903 = vrot.lane.b32.xlu0 %v2899_v24, %s14144_s24  ;;  %v3069_v39 = vld [vmem:[%s13952_s0] sm:$0xf] }
 0x94b   : > { %2919 = vrot.lane.b32.xlu1 %v2876_v37, %s13774_s26  ;;  %2917 = vrot.lane.b32.xlu0 %v2875_v22, %s13774_s26  ;;  %s8278_s26 = smov 82  }
 0x94f   : > { %2957 = vperm.xlu1 %7890, %v2945_v21   ;;  %2946 = vrot.lane.b32.xlu0 %v14145_v57, %s13829_s30 }
 0x953   : > { %7891 = vset.pattern.permute.xlu1 %v8249_v29  ;;  %2970 = vrot.lane.b32.xlu0 %v14146_v26, %s8250_s6  ;;  %s14220_s6 = smov 127  }
 0x954   : > { %2981 = vperm.xlu1 %7891, %v2969_v20  }
 0x957   : > { %2994 = vrot.lane.b32.xlu0 %v14147_v4, %s8251_s5  ;;  %s8256_s5 = smov 68  }
 0x958   : > { %7892 = vset.pattern.permute.xlu1 %v8252_v42 }
 0x959   : > { %3005 = vperm.xlu1 %7892, %v2993_v3  }
 0x95d   : > { %7893 = vset.pattern.permute.xlu1 %v8253_v34 }
 0x9b9   : > { %v10061_v36 = vpop.permute.xlu0 %2903  ;;  %v10067_v46 = vpop.permute.xlu1 %2905 }
 0x9bd   : > { %v10063_v25 = vpop.permute.xlu0 %2917  ;;  %v10071_v28 = vpop.permute.xlu1 %2919 }
 0x9c1   : > { %v10065_v27 = vpop.permute.xlu0 %2946 }
 0x9c5   : > { %v10069_v16 = vpop.permute.xlu0 %2970 }
 0x9c9   : > { %v2995_v55 = vpop.permute.xlu0 %2994 }
 0x9ca   : > { %v10075_v52 = vrot.slane %v2995_v55, 4 }
 0x9cc   : > { %14150 = vst [vmem:[#allocation186_spill] sm:$0xff] %v10075_v52  ;;  %v10080_v30 = vsel %vm2997_vm4, %v10075_v52, %v2995_v55  ;;  %v3002_v48 = vmul.f32 %v10075_v52, %v10082_v54  ;;  %vm3339_vm4 = vcmask 613376  }
 0x9cd   : > { %14151 = vst [vmem:[#allocation187_spill] sm:$0xff] %v10080_v30  ;;  %v3001_v49 = vmul.f32 %v9694_v9, %v10080_v30 }
 0x9ce   : > { %v10073_v19 = vpop.permute.xlu1 %2957 }
 0x9d3   : > { %v10077_v60 = vpop.permute.xlu1 %2981 }
 0x9d4   : > { %v2990_v4 = vrot.slane %v10077_v60, %v8986_v7 }
 0x9d8   : > { %v3006_v18 = vpop.permute.xlu1 %3005 }
 0x9d9   : > { %v3014_v45 = vrot.slane %v3006_v18, %v8986_v7 }
 0x9db   : > { %v3015_v15 = vmul.f32 %v3014_v45, %v3001_v49  ;;  %v3016_v23 = vmul.f32 %v3014_v45, %v3002_v48  ;;  %v3107_v49 = vld [vmem:[%s13952_s0] sm:$0xf]  ;;  %v14159_v48 = vld [vmem:[#allocation22_spill] sm:$0xff]  ;;  %v8259_v45 = vmov 58  }
 0x9dd   : > { %3021 = vrot.lane.b32.xlu1 %v3016_v23, %s14152_s22  ;;  %3019 = vrot.lane.b32.xlu0 %v3015_v15, %s14152_s22 }
 0x9e1   : > { %3043 = vperm.xlu1 %7893, %v3031_v33   ;;  %3032 = vrot.lane.b32.xlu0 %v14153_v6, %s8254_s27  ;;  %s8258_s27 = smov 69  }
 0x9e5   : > { %7894 = vset.pattern.permute.xlu1 %v8255_v61 }
 0xa4f   : > { %v10095_v1 = vpop.permute.xlu0 %3019  ;;  %v10099_v62 = vpop.permute.xlu1 %3021 }
 0xa53   : > { %v3033_v44 = vpop.permute.xlu0 %3032 }
 0xa54   : > { %v10097_v41 = vrot.slane %v3033_v44, 4 }
 0xa56   : > { %14154 = vst [vmem:[#allocation188_spill] sm:$0xff] %v10097_v41  ;;  %v10102_v11 = vsel %vm3035_vm6, %v10097_v41, %v3033_v44  ;;  %v3040_v51 = vmul.f32 %v10097_v41, %v10082_v54  ;;  %vm1958_vm6 = vcmask 261120   ;;  %v14192_v41 = vld [vmem:[#allocation131_spill] sm:$0xff] }
 0xa57   : > { %14155 = vst [vmem:[#allocation189_spill] sm:$0xff] %v10102_v11  ;;  %v3039_v43 = vmul.f32 %v9694_v9, %v10102_v11 }
 0xa60   : > { %v3044_v0 = vpop.permute.xlu1 %3043 }
 0xa61   : > { %v3052_v10 = vrot.slane %v3044_v0, %v8986_v7 }
 0xa63   : > { %v3053_v32 = vmul.f32 %v3052_v10, %v3039_v43  ;;  %v3054_v24 = vmul.f32 %v3052_v10, %v3040_v51 }
 0xa65   : > { %3059 = vrot.lane.b32.xlu1 %v3054_v24, %s14152_s22  ;;  %3057 = vrot.lane.b32.xlu0 %v3053_v32, %s14152_s22 }
 0xa69   : > { %3081 = vperm.xlu1 %7894, %v3069_v39   ;;  %3070 = vrot.lane.b32.xlu0 %v14156_v58, %s8256_s5  ;;  %v3145_v39 = vld [vmem:[%s13952_s0] sm:$0xf]  ;;  %s8260_s5 = smov 70  }
 0xa6d   : > { %7895 = vset.pattern.permute.xlu1 %v8257_v2  ;;  %v14163_v2 = vld [vmem:[#allocation24_spill] sm:$0xff] }
 0xad7   : > { %v10115_v56 = vpop.permute.xlu0 %3057  ;;  %v10119_v21 = vpop.permute.xlu1 %3059 }
 0xadb   : > { %v3071_v37 = vpop.permute.xlu0 %3070 }
 0xadc   : > { %v10117_v22 = vrot.slane %v3071_v37, 4 }
 0xade   : > { %14157 = vst [vmem:[#allocation190_spill] sm:$0xff] %v10117_v22  ;;  %v10122_v20 = vsel %vm3073_vm7, %v10117_v22, %v3071_v37  ;;  %v3078_v42 = vmul.f32 %v10117_v22, %v10082_v54  ;;  %v8261_v37 = vmov 59   ;;  %vm2453_vm7 = vcmask 392192  }
 0xadf   : > { %14158 = vst [vmem:[#allocation191_spill] sm:$0xff] %v10122_v20  ;;  %v3077_v3 = vmul.f32 %v9694_v9, %v10122_v20 }
 0xae8   : > { %v3082_v29 = vpop.permute.xlu1 %3081 }
 0xae9   : > { %v3090_v34 = vrot.slane %v3082_v29, %v8986_v7 }
 0xaeb   : > { %v3091_v55 = vmul.f32 %v3090_v34, %v3077_v3  ;;  %v3092_v18 = vmul.f32 %v3090_v34, %v3078_v42 }
 0xaed   : > { %3097 = vrot.lane.b32.xlu1 %v3092_v18, %s14090_s2  ;;  %3095 = vrot.lane.b32.xlu0 %v3091_v55, %s14090_s2 }
 0xaf1   : > { %3119 = vperm.xlu1 %7895, %v3107_v49   ;;  %3108 = vrot.lane.b32.xlu0 %v14159_v48, %s8258_s27  ;;  %s8262_s27 = smov 71   ;;  %v14199_v48 = vld [vmem:[#allocation140_spill] sm:$0xff] }
 0xaf5   : > { %7896 = vset.pattern.permute.xlu1 %v8259_v45 }
 0xb5f   : > { %v10135_v15 = vpop.permute.xlu0 %3095  ;;  %v10139_v61 = vpop.permute.xlu1 %3097 }
 0xb60   : > { %14160 = vst [vmem:[#allocation192_spill] sm:$0xff] %v10135_v15 }
 0xb63   : > { %v3109_v23 = vpop.permute.xlu0 %3108 }
 0xb64   : > { %v10137_v33 = vrot.slane %v3109_v23, 4 }
 0xb66   : > { %14161 = vst [vmem:[#allocation193_spill] sm:$0xff] %v10137_v33  ;;  %v10142_v44 = vsel %vm3111_vm8, %v10137_v33, %v3109_v23  ;;  %v3116_v51 = vmul.f32 %v10137_v33, %v10082_v54  ;;  %vm2973_vm8 = vcmask 531456  }
 0xb67   : > { %14162 = vst [vmem:[#allocation194_spill] sm:$0xff] %v10142_v44  ;;  %v3115_v43 = vmul.f32 %v9694_v9, %v10142_v44  ;;  %v14189_v44 = vld [vmem:[#allocation128_spill] sm:$0xff] }
 0xb70   : > { %v3120_v0 = vpop.permute.xlu1 %3119 }
 0xb71   : > { %v3128_v10 = vrot.slane %v3120_v0, %v8986_v7 }
 0xb73   : > { %v3129_v32 = vmul.f32 %v3128_v10, %v3115_v43  ;;  %v3130_v24 = vmul.f32 %v3128_v10, %v3116_v51  ;;  %v3183_v51 = vld [vmem:[%s13952_s0] sm:$0xf]  ;;  %v14166_v10 = vld [vmem:[#allocation25_spill] sm:$0xff] }
 0xb75   : > { %3135 = vrot.lane.b32.xlu1 %v3130_v24, %s14090_s2  ;;  %3133 = vrot.lane.b32.xlu0 %v3129_v32, %s14090_s2  ;;  %v8263_v32 = vmov 60  }
 0xb79   : > { %3157 = vperm.xlu1 %7896, %v3145_v39   ;;  %3146 = vrot.lane.b32.xlu0 %v14163_v2, %s8260_s5  ;;  %s8264_s5 = smov 72  }
 0xb7d   : > { %7897 = vset.pattern.permute.xlu1 %v8261_v37 }
 0xbe7   : > { %v10155_v29 = vpop.permute.xlu0 %3133  ;;  %v10159_v34 = vpop.permute.xlu1 %3135 }
 0xbeb   : > { %v3147_v3 = vpop.permute.xlu0 %3146 }
 0xbec   : > { %v10157_v42 = vrot.slane %v3147_v3, 4 }
 0xbee   : > { %14164 = vst [vmem:[#allocation195_spill] sm:$0xff] %v10157_v42  ;;  %v10162_v55 = vsel %vm3149_vm9, %v10157_v42, %v3147_v3  ;;  %v3154_v45 = vmul.f32 %v10157_v42, %v10082_v54  ;;  %v14179_v42 = vld [vmem:[#allocation28_spill] sm:$0xff]  ;;  %vm3377_vm9 = vcmask 621568  }
 0xbef   : > { %14165 = vst [vmem:[#allocation196_spill] sm:$0xff] %v10162_v55  ;;  %v3153_v49 = vmul.f32 %v9694_v9, %v10162_v55 }
 0xbf8   : > { %v3158_v18 = vpop.permute.xlu1 %3157 }
 0xbf9   : > { %v3166_v23 = vrot.slane %v3158_v18, %v8986_v7 }
 0xbfb   : > { %v3167_v0 = vmul.f32 %v3166_v23, %v3153_v49  ;;  %v3168_v43 = vmul.f32 %v3166_v23, %v3154_v45 }
 0xbfd   : > { %3173 = vrot.lane.b32.xlu1 %v3168_v43, %s14098_s25  ;;  %3171 = vrot.lane.b32.xlu0 %v3167_v0, %s14098_s25 }
 0xc01   : > { %3195 = vperm.xlu1 %7897, %v3183_v51   ;;  %3184 = vrot.lane.b32.xlu0 %v14166_v10, %s8262_s27  ;;  %s8266_s27 = smov 73   ;;  %v14198_v10 = vld [vmem:[#allocation134_spill] sm:$0xff] }
 0xc05   : > { %7898 = vset.pattern.permute.xlu1 %v8263_v32  ;;  %v3221_v32 = vld [vmem:[%s13952_s0] sm:$0xf] }
 0xc6f   : > { %v10175_v24 = vpop.permute.xlu0 %3171  ;;  %v10179_v3 = vpop.permute.xlu1 %3173 }
 0xc70   : > { %14167 = vst [vmem:[#allocation197_spill] sm:$0xff] %v10175_v24  ;;  %14169 = vst [vmem:[#allocation199_spill] sm:$0xff] %v10179_v3 }
 0xc73   : > { %v3185_v39 = vpop.permute.xlu0 %3184 }
 0xc74   : > { %v10177_v37 = vrot.slane %v3185_v39, 4 }
 0xc76   : > { %14168 = vst [vmem:[#allocation198_spill] sm:$0xff] %v10177_v37  ;;  %v10182_v18 = vsel %vm3187_vm10, %v10177_v37, %v3185_v39  ;;  %v3192_v23 = vmul.f32 %v10177_v37, %v10082_v54  ;;  %v14171_v39 = vld [vmem:[#allocation26_spill] sm:$0xff]  ;;  %v2109_v37 = vrot.slane %v14192_v41, 4  ;;  %vm1453_vm10 = vcmask 949248  }
 0xc77   : > { %14170 = vst [vmem:[#allocation200_spill] sm:$0xff] %v10182_v18  ;;  %v3191_v45 = vmul.f32 %v9694_v9, %v10182_v18 }
 0xc80   : > { %v3196_v49 = vpop.permute.xlu1 %3195 }
 0xc81   : > { %v3204_v0 = vrot.slane %v3196_v49, %v8986_v7 }
 0xc83   : > { %v3205_v43 = vmul.f32 %v3204_v0, %v3191_v45  ;;  %v3206_v51 = vmul.f32 %v3204_v0, %v3192_v23 }
 0xc85   : > { %3211 = vrot.lane.b32.xlu1 %v3206_v51, %s14098_s25  ;;  %3209 = vrot.lane.b32.xlu0 %v3205_v43, %s14098_s25 }
 0xc89   : > { %3233 = vperm.xlu1 %7898, %v3221_v32   ;;  %3222 = vrot.lane.b32.xlu0 %v14171_v39, %s8264_s5  ;;  %s8268_s5 = smov 74  }
 0xc8d   : > { %7899 = vset.pattern.permute.xlu1 %v8265_v63 }
 0xcf7   : > { %v10195_v12 = vpop.permute.xlu0 %3209  ;;  %v10199_v45 = vpop.permute.xlu1 %3211 }
 0xcfb   : > { %v3223_v13 = vpop.permute.xlu0 %3222 }
 0xcfc   : > { %v10197_v49 = vrot.slane %v3223_v13, 4 }
 0xcfe   : > { %14172 = vst [vmem:[#allocation201_spill] sm:$0xff] %v10197_v49  ;;  %v10202_v23 = vsel %vm3225_vm15, %v10197_v49, %v3223_v13  ;;  %v3230_v51 = vmul.f32 %v10197_v49, %v10082_v54  ;;  %v3259_v13 = vld [vmem:[%s13952_s0] sm:$0xf]  ;;  %vm1466_vm15 = vcmask 1039360  }
 0xcff   : > { %14173 = vst [vmem:[#allocation202_spill] sm:$0xff] %v10202_v23  ;;  %v3229_v43 = vmul.f32 %v9694_v9, %v10202_v23  ;;  %v8267_v23 = vmov 62  }
 0xd08   : > { %v3234_v0 = vpop.permute.xlu1 %3233 }
 0xd09   : > { %v3242_v63 = vrot.slane %v3234_v0, %v8986_v7 }
 0xd0b   : > { %v3243_v32 = vmul.f32 %v3242_v63, %v3229_v43  ;;  %v3244_v53 = vmul.f32 %v3242_v63, %v3230_v51 }
 0xd0d   : > { %3249 = vrot.lane.b32.xlu1 %v3244_v53, %s14109_s23  ;;  %3247 = vrot.lane.b32.xlu0 %v3243_v32, %s14109_s23 }
 0xd11   : > { %3271 = vperm.xlu1 %7899, %v3259_v13   ;;  %3260 = vrot.lane.b32.xlu0 %v14174_v59, %s8266_s27  ;;  %s8270_s27 = smov 75   ;;  %v14197_v59 = vld [vmem:[#allocation135_spill] sm:$0xff] }
 0xd12   : > { %v2261_v39 = vrot.slane %v14197_v59, 4 }
 0xd15   : > { %7900 = vset.pattern.permute.xlu1 %v8267_v23 }
 0xd7f   : > { %v10215_v55 = vpop.permute.xlu0 %3247  ;;  %v10219_v43 = vpop.permute.xlu1 %3249 }
 0xd80   : > { %14175 = vst [vmem:[#allocation203_spill] sm:$0xff] %v10215_v55  ;;  %14177 = vst [vmem:[#allocation205_spill] sm:$0xff] %v10219_v43 }
 0xd83   : > { %v3261_v49 = vpop.permute.xlu0 %3260 }
 0xd84   : > { %v10217_v0 = vrot.slane %v3261_v49, 4 }
 0xd86   : > { %14176 = vst [vmem:[#allocation204_spill] sm:$0xff] %v10217_v0  ;;  %v10222_v53 = vsel %vm3263_vm2, %v10217_v0, %v3261_v49  ;;  %v3268_v32 = vmul.f32 %v10217_v0, %v10082_v54  ;;  %v3297_v49 = vld [vmem:[%s13952_s0] sm:$0xf]  ;;  %vm2949_vm2 = vcmask 523264  }
 0xd87   : > { %14178 = vst [vmem:[#allocation206_spill] sm:$0xff] %v10222_v53  ;;  %v3267_v63 = vmul.f32 %v9694_v9, %v10222_v53  ;;  %v8269_v9 = vmov 63  }
 0xd90   : > { %v3272_v51 = vpop.permute.xlu1 %3271 }
 0xd91   : > { %v3280_v23 = vrot.slane %v3272_v51, %v8986_v7 }
 0xd93   : > { %v3281_v13 = vmul.f32 %v3280_v23, %v3267_v63  ;;  %v3282_v20 = vmul.f32 %v3280_v23, %v3268_v32  ;;  %v10244_v23 = vld [vmem:[#allocation2] sm:$0xff] }
 0xd95   : > { %3287 = vrot.lane.b32.xlu1 %v3282_v20, %s14109_s23  ;;  %3285 = vrot.lane.b32.xlu0 %v3281_v13, %s14109_s23 }
 0xd99   : > { %3309 = vperm.xlu1 %7900, %v3297_v49   ;;  %3298 = vrot.lane.b32.xlu0 %v14179_v42, %s8268_s5  ;;  %s8272_s5 = smov 76  }
 0xd9d   : > { %7901 = vset.pattern.permute.xlu1 %v8269_v9 }
 0xe07   : > { %v10235_v30 = vpop.permute.xlu0 %3285  ;;  %v10239_v63 = vpop.permute.xlu1 %3287 }
 0xe0b   : > { %v3299_v22 = vpop.permute.xlu0 %3298 }
 0xe0c   : > { %v10237_v51 = vrot.slane %v3299_v22, 4 }
 0xe0e   : > { %14180 = vst [vmem:[#allocation207_spill] sm:$0xff] %v10237_v51  ;;  %v10242_v20 = vsel %vm3301_vm3, %v10237_v51, %v3299_v22  ;;  %v3306_v49 = vmul.f32 %v10237_v51, %v10082_v54  ;;  %v3335_v22 = vld [vmem:[%s13952_s0] sm:$0xf]  ;;  %vm3491_vm3 = vcmask 670720  }
 0xe0f   : > { %14181 = vst [vmem:[#allocation208_spill] sm:$0xff] %v10242_v20  ;;  %v3305_v13 = vmul.f32 %v10244_v23, %v10242_v20  ;;  %v8271_v20 = vmov 64  }
 0xe18   : > { %v3310_v32 = vpop.permute.xlu1 %3309 }
 0xe19   : > { %v3318_v9 = vrot.slane %v3310_v32, %v8986_v7 }
 0xe1b   : > { %v3319_v52 = vmul.f32 %v3318_v9, %v3305_v13  ;;  %v3320_v8 = vmul.f32 %v3318_v9, %v3306_v49 }
 0xe1d   : > { %3325 = vrot.lane.b32.xlu1 %v3320_v8, %s14119_s29  ;;  %3323 = vrot.lane.b32.xlu0 %v3319_v52, %s14119_s29 }
 0xe21   : > { %3347 = vperm.xlu1 %7901, %v3335_v22   ;;  %3336 = vrot.lane.b32.xlu0 %v14182_v35, %s8270_s27  ;;  %s8274_s27 = smov 80  }
 0xe25   : > { %7902 = vset.pattern.permute.xlu1 %v8271_v20 }
 0xe8f   : > { %v10257_v53 = vpop.permute.xlu0 %3323  ;;  %v10261_v13 = vpop.permute.xlu1 %3325 }
 0xe90   : > { %14183 = vst [vmem:[#allocation209_spill] sm:$0xff] %v10257_v53  ;;  %14185 = vst [vmem:[#allocation211_spill] sm:$0xff] %v10261_v13 }
 0xe93   : > { %v3337_v51 = vpop.permute.xlu0 %3336 }
 0xe94   : > { %v10259_v32 = vrot.slane %v3337_v51, 4 }
 0xe96   : > { %14184 = vst [vmem:[#allocation210_spill] sm:$0xff] %v10259_v32  ;;  %v10264_v8 = vsel %vm3339_vm4, %v10259_v32, %v3337_v51  ;;  %v3344_v9 = vmul.f32 %v10259_v32, %v10082_v54  ;;  %v3373_v51 = vld [vmem:[%s13952_s0] sm:$0xf]  ;;  %vm3529_vm4 = vcmask 678912  }
 0xe97   : > { %14186 = vst [vmem:[#allocation212_spill] sm:$0xff] %v10264_v8  ;;  %v3343_v49 = vmul.f32 %v10244_v23, %v10264_v8  ;;  %v14187_v8 = vld [vmem:[#allocation40_spill] sm:$0xff] }
 0xe98   : > { %v10278_v38 = vrot.slane %v14187_v8, 4 }
 0xe9a   : > { %14188 = vst [vmem:[#allocation40_spill] sm:$0xff] %v10278_v38  ;;  %v10290_v11 = vsel %vm1958_vm6, %v10278_v38, %v14187_v8  ;;  %v2260_v8 = vrot.slane %v14198_v10, 4 }
 0xe9b   : > { %14194 = vst [vmem:[#allocation128_spill] sm:$0xff] %v10290_v11  ;;  %v1962_v33 = vmul.f32 %v10244_v23, %v10290_v11 }
 0xea0   : > { %v3348_v52 = vpop.permute.xlu1 %3347 }
 0xea1   : > { %v3356_v20 = vrot.slane %v3348_v52, %v8986_v7  ;;  %v2033_v52 = vrot.slane %v14189_v44, 4 }
 0xea3   : > { %v3357_v22 = vmul.f32 %v3356_v20, %v3343_v49  ;;  %v3358_v18 = vmul.f32 %v3356_v20, %v3344_v9  ;;  %v14190_v49 = vld [vmem:[#allocation129_spill] sm:$0xff] }
 0xea4   : > { %v2032_v9 = vrot.slane %v14190_v49, 4  ;;  %v8049_v20 = vld [vmem:[#allocation2 + $0x8] sm:$0xf] }
 0xea5   : > { %3363 = vrot.lane.b32.xlu1 %v3358_v18, %s14119_s29  ;;  %3361 = vrot.lane.b32.xlu0 %v3357_v22, %s14119_s29  ;;  %v1963_v18 = vmul.f32 %v8049_v20, %v10278_v38  ;;  %v14191_v22 = vld [vmem:[#allocation77_spill] sm:$0xff]  ;;  %v14196_v20 = vld [vmem:[#allocation132_spill] sm:$0xff] }
 0xea6   : > { %v1975_v0 = vrot.slane %v14191_v22, %v8986_v7  ;;  %v2034_v47 = vsel %vm686_vm0, %v2032_v9, %v2033_v52 }
 0xea7   : > { %v2035_v42 = vsel %vm978_vm11, %v14190_v49, %v2034_v47  ;;  %v2262_v49 = vsel %vm686_vm0, %v2260_v8, %v2261_v39 }
 0xea8   : > { %v1977_v35 = vmul.f32 %v1975_v0, %v1963_v18  ;;  %v1976_v38 = vmul.f32 %v1975_v0, %v1962_v33  ;;  %v14204_v0 = vld [vmem:[#allocation152_spill] sm:$0xff] }
 0xea9   : > { %3385 = vperm.xlu1 %7902, %v3373_v51   ;;  %3374 = vrot.lane.b32.xlu0 %v8704_v40, %s8272_s5  ;;  %v14193_v51 = vld [vmem:[#allocation130_spill] sm:$0xff]  ;;  %v2184_v40 = vrot.slane %v14196_v20, 4  ;;  %s8287_s5 = smov 86  }
 0xeaa   : > { %v2108_v32 = vrot.slane %v14193_v51, 4  ;;  %v2039_v2 = vadd.f32 %v14189_v44, %v1977_v35  ;;  %v2038_v9 = vadd.f32 %v2035_v42, %v1976_v38  ;;  %v14201_v44 = vld [vmem:[#allocation145_spill] sm:$0xff] }
 0xeab   : > { %v2186_v11 = vsel %vm686_vm0, %v2184_v40, %v2185_v14  ;;  %v10314_v40 = vrot.slane %v14201_v44, 4 }
 0xeac   : > { %v2110_v22 = vsel %vm686_vm0, %v2108_v32, %v2109_v37  ;;  %v2115_v18 = vadd.f32 %v14192_v41, %v2039_v2  ;;  %v2337_v37 = vrot.slane %v14199_v48, 4  ;;  %v14200_v32 = vld [vmem:[#allocation138_spill] sm:$0xff]  ;;  %v2187_v47 = vsel %vm1168_vm13, %v14196_v20, %v2186_v11  ;;  %v14203_v11 = vld [vmem:[#allocation147_spill] sm:$0xff] }
 0xead   : > { %v2111_v52 = vsel %vm1073_vm12, %v14193_v51, %v2110_v22  ;;  %v2336_v58 = vrot.slane %v14200_v32, 4  ;;  %14202 = vst [vmem:[#allocation129_spill] sm:$0xff] %v10314_v40  ;;  %v2263_v2 = vsel %vm1263_vm14, %v14198_v10, %v2262_v49  ;;  %v2470_v39 = vrot.slane %v14203_v11, %v8986_v7 }
 0xeae   : > { %v2114_v33 = vadd.f32 %v2111_v52, %v2038_v9  ;;  %v2191_v35 = vadd.f32 %v14195_v50, %v2115_v18  ;;  %v2528_v51 = vrot.slane %v14204_v0, 4  ;;  %v14205_v50 = vld [vmem:[#allocation150_spill] sm:$0xff]  ;;  %v10327_v22 = vrot.slane %v10069_v16, 4  ;;  %v8050_v18 = vld [vmem:[#allocation2 + $0x8] sm:$0xf] }
 0xeaf   : > { %v2338_v42 = vsel %vm686_vm0, %v2336_v58, %v2337_v37  ;;  %v2527_v20 = vrot.slane %v14205_v50, 4  ;;  %v10331_v8 = vsel %vm2453_vm7, %v10314_v40, %v14201_v44  ;;  %v3061_v10 = vrot.slane %v10115_v56, 4 }
 0xeb0   : > { %v2190_v38 = vadd.f32 %v2187_v47, %v2114_v33  ;;  %v2267_v41 = vadd.f32 %v14197_v59, %v2191_v35  ;;  %14206 = vst [vmem:[#allocation77_spill] sm:$0xff] %v10327_v22  ;;  %14207 = vst [vmem:[#allocation131_spill] sm:$0xff] %v10331_v8  ;;  %v3062_v59 = vrot.slane %v10119_v21, 4  ;;  %v10340_v9 = vsel %vm1358_vm1, %v14200_v32, %v2338_v42  ;;  %v14208_v47 = vld [vmem:[#allocation146_spill] sm:$0xff]  ;;  %v14209_v33 = vld [vmem:[#allocation144_spill] sm:$0xff] }
 0xeb1   : > { %v2458_v37 = vmul.f32 %v8050_v18, %v10314_v40  ;;  %v2413_v49 = vrot.slane %v14208_v47, 4  ;;  %v2412_v35 = vrot.slane %v14209_v33, 4  ;;  %v3138_v44 = vrot.slane %v10159_v34, 4  ;;  %v14211_v42 = vld [vmem:[#allocation158_spill] sm:$0xff]  ;;  %v14212_v40 = vld [vmem:[#allocation156_spill] sm:$0xff] }
 0xeb2   : > { %v10335_v58 = vadd.f32 %v2263_v2, %v2190_v38  ;;  %v2343_v52 = vadd.f32 %v14199_v48, %v2267_v41  ;;  %v3137_v11 = vrot.slane %v10155_v29, 4  ;;  %v2457_v38 = vmul.f32 %v10244_v23, %v10331_v8 }
 0xeb3   : > { %v2472_v2 = vmul.f32 %v2470_v39, %v2458_v37  ;;  %v2529_v48 = vsel %vm686_vm0, %v2527_v20, %v2528_v51  ;;  %v10352_v32 = vsel %vm2973_vm8, %v10327_v22, %v10069_v16  ;;  %v2604_v18 = vrot.slane %v14211_v42, 4 }
 0xeb4   : > { %14210 = vst [vmem:[#allocation130_spill] sm:$0xff] %v10352_v32  ;;  %v2603_v6 = vrot.slane %v14212_v40, 4  ;;  %v3063_v26 = vsel %vm686_vm0, %v3061_v10, %v3062_v59  ;;  %v2471_v53 = vmul.f32 %v2470_v39, %v2457_v38  ;;  %v3214_v37 = vrot.slane %v10199_v45, 4 }
 0xeb5   : > { %v2534_v8 = vadd.f32 %v14204_v0, %v2472_v2  ;;  %v3213_v51 = vrot.slane %v10195_v12, 4  ;;  %v2530_v16 = vsel %vm978_vm11, %v14205_v50, %v2529_v48  ;;  %v2977_v20 = vmul.f32 %v10244_v23, %v10352_v32  ;;  %v14214_v50 = vld [vmem:[#allocation164_spill] sm:$0xff]  ;;  %v14215_v2 = vld [vmem:[#allocation162_spill] sm:$0xff] }
 0xeb6   : > { %v3139_v13 = vsel %vm686_vm0, %v3137_v11, %v3138_v44  ;;  %v3064_v39 = vsel %vm978_vm11, %v10115_v56, %v3063_v26  ;;  %v3290_v0 = vrot.slane %v10239_v63, 4  ;;  %v3289_v59 = vrot.slane %v10235_v30, 4 }
 0xeb7   : > { %v2605_v10 = vsel %vm686_vm0, %v2603_v6, %v2604_v18  ;;  %v2680_v38 = vrot.slane %v14214_v50, 4  ;;  %v2679_v48 = vrot.slane %v14215_v2, 4  ;;  %v2991_v32 = vmul.f32 %v2990_v4, %v2977_v20 }
 0xeb8   : > { %v3140_v44 = vsel %vm1073_vm12, %v10155_v29, %v3139_v13  ;;  %v3215_v11 = vsel %vm686_vm0, %v3213_v51, %v3214_v37  ;;  %v2419_v56 = vadd.f32 %v14208_v47, %v2343_v52  ;;  %v2610_v24 = vadd.f32 %v14211_v42, %v2534_v8 }
 0xeb9   : > { %v3067_v3 = vadd.f32 %v3064_v39, %v2991_v32  ;;  %v2414_v18 = vsel %vm686_vm0, %v2412_v35, %v2413_v49  ;;  %v2533_v20 = vadd.f32 %v2530_v16, %v2471_v53  ;;  %v2606_v29 = vsel %vm1073_vm12, %v14212_v40, %v2605_v10  ;;  %v14217_v35 = vld [vmem:[#allocation172_spill] sm:$0xff] }
 0xeba   : > { %v3291_v13 = vsel %vm686_vm0, %v3289_v59, %v3290_v0  ;;  %v2686_v37 = vadd.f32 %v14214_v50, %v2610_v24  ;;  %v2681_v51 = vsel %vm686_vm0, %v2679_v48, %v2680_v38  ;;  %v3216_v8 = vsel %vm1168_vm13, %v10195_v12, %v3215_v11  ;;  %v14219_v59 = vld [vmem:[#allocation179_spill] sm:$0xff] }
 0xebb   : > { %v3143_v15 = vadd.f32 %v3140_v44, %v3067_v3  ;;  %v2756_v32 = vrot.slane %v14217_v35, 4  ;;  %v3292_v12 = vsel %vm1263_vm14, %v10235_v30, %v3291_v13  ;;  %v2832_v0 = vrot.slane %v9897_v31, 4 }
 0xebc   : > { %v2762_v24 = vadd.f32 %v14217_v35, %v2686_v37  ;;  %v2831_v10 = vrot.slane %v14219_v59, 4  ;;  %v2426_v50 = vrot.slane %v10059_v5, 4  ;;  %v2682_v48 = vsel %vm1168_vm13, %v14215_v2, %v2681_v51 }
 0xebd   : > { %v3219_v42 = vadd.f32 %v3216_v8, %v3143_v15  ;;  %v2433_v13 = vadd.f32 %v10014_v17, %v2419_v56  ;;  %v2907_v37 = vrot.slane %v10061_v36, 4  ;;  %v2415_v51 = vsel %vm1453_vm10, %v14209_v33, %v2414_v18 }
 0xebe   : > { %v2838_v11 = vadd.f32 %v9897_v31, %v2762_v24  ;;  %v2609_v8 = vadd.f32 %v2606_v29, %v2533_v20  ;;  %vm3567_vm7 = vcmask 687104   ;;  %vm3605_vm8 = vcmask 695296  }
 0xebf   : > { %v3295_v44 = vadd.f32 %v3292_v12, %v3219_v42  ;;  %v10459_v12 = vrot.slane %v10065_v27, 4 }
 0xec0   : > { %v2914_v31 = vadd.f32 %v10067_v46, %v2838_v11  ;;  %v2685_v33 = vadd.f32 %v2682_v48, %v2609_v8  ;;  %v14226_v11 = vld [vmem:[#allocation205_spill] sm:$0xff]  ;;  %v14228_v8 = vld [vmem:[#allocation211_spill] sm:$0xff] }
 0xec1   : > { %14221 = vst [vmem:[#allocation135_spill] sm:$0xff] %v10459_v12  ;;  %v10470_v42 = vsel %vm2949_vm2, %v10459_v12, %v10065_v27 }
 0xec2   : > { %v2928_v20 = vadd.f32 %v10071_v28, %v2914_v31  ;;  %14222 = vst [vmem:[#allocation134_spill] sm:$0xff] %v10470_v42 }
 0xf17   : > { %v10316_v14 = vpop.permute.xlu0 %3361  ;;  %v10367_v55 = vpop.permute.xlu1 %3363 }
 0xf18   : > { %v3366_v43 = vrot.slane %v10367_v55, 4  ;;  %v3365_v26 = vrot.slane %v10316_v14, 4 }
 0xf1a   : > { %v3367_v47 = vsel %vm686_vm0, %v3365_v26, %v3366_v43  ;;  %v2978_v43 = vmul.f32 %v10327_v22, %v10082_v54  ;;  %v2427_v26 = vrot.slane %v10014_v17, 4  ;;  %v2921_v17 = vrot.slane %v10063_v25, 4 }
 0xf1b   : > { %v3375_v41 = vpop.permute.xlu0 %3374  ;;  %v3368_v38 = vsel %vm1358_vm1, %v10316_v14, %v3367_v47  ;;  %v2908_v14 = vrot.slane %v10067_v46, 4 }
 0xf1c   : > { %v10369_v60 = vrot.slane %v3375_v41, 4  ;;  %v2992_v30 = vmul.f32 %v2990_v4, %v2978_v43  ;;  %v3371_v4 = vadd.f32 %v3368_v38, %v3295_v44  ;;  %v2428_v47 = vsel %vm686_vm0, %v2426_v50, %v2427_v26  ;;  %v14225_v38 = vld [vmem:[#allocation197_spill] sm:$0xff] }
 0xf1d   : > { %v2909_v46 = vsel %vm686_vm0, %v2907_v37, %v2908_v14  ;;  %v3023_v43 = vrot.slane %v10095_v1, 4  ;;  %v3175_v48 = vrot.slane %v14225_v38, 4  ;;  %v3252_v26 = vrot.slane %v14226_v11, 4 }
 0xf1e   : > { %14213 = vst [vmem:[#allocation133_spill] sm:$0xff] %v10369_v60  ;;  %v10386_v6 = vsel %vm3377_vm9, %v10369_v60, %v3375_v41  ;;  %v3382_v53 = vmul.f32 %v10369_v60, %v10082_v54  ;;  %v14218_v41 = vld [vmem:[#allocation170_spill] sm:$0xff]  ;;  %v3068_v2 = vadd.f32 %v10119_v21, %v2992_v30  ;;  %v2342_v21 = vadd.f32 %v10340_v9, %v10335_v58  ;;  %v14315_v60 = vld [vmem:[#allocation69_spill] sm:$0xff] }
 0xf1f   : > { %14216 = vst [vmem:[#allocation132_spill] sm:$0xff] %v10386_v6  ;;  %v3381_v49 = vmul.f32 %v10244_v23, %v10386_v6  ;;  %v2755_v3 = vrot.slane %v14218_v41, 4  ;;  %v2953_v30 = vmul.f32 %v10244_v23, %v10470_v42  ;;  %vm3643_vm9 = vcmask 703488  }
 0xf20   : > { %v3144_v56 = vadd.f32 %v10159_v34, %v3068_v2  ;;  %v2418_v34 = vadd.f32 %v2415_v51, %v2342_v21 }
 0xf21   : > { %v2757_v15 = vsel %vm686_vm0, %v2755_v3, %v2756_v32 }
 0xf22   : > { %v2758_v18 = vsel %vm1263_vm14, %v14218_v41, %v2757_v15  ;;  %v3220_v29 = vadd.f32 %v10199_v45, %v3144_v56  ;;  %v8275_v45 = vmov 65  }
 0xf23   : > { %v2761_v35 = vadd.f32 %v2758_v18, %v2685_v33  ;;  %7903 = vset.pattern.permute.xlu1 %v8275_v45 }
 0xf24   : > { %v3296_v9 = vadd.f32 %v10239_v63, %v3220_v29 }
 0xf26   : > { %v3372_v41 = vadd.f32 %v10367_v55, %v3296_v9  ;;  %v3024_v55 = vrot.slane %v10099_v62, 4 }
 0xf28   : > { %v3386_v52 = vpop.permute.xlu1 %3385 }
 0xf29   : > { %v3394_v40 = vrot.slane %v3386_v52, %v8986_v7  ;;  %v2833_v52 = vsel %vm686_vm0, %v2831_v10, %v2832_v0  ;;  %v3025_v10 = vsel %vm686_vm0, %v3023_v43, %v3024_v55  ;;  %v3439_v43 = vld [vmem:[%s13952_s0] sm:$0xf] }
 0xf2a   : > { %v3026_v27 = vsel %vm978_vm11, %v10095_v1, %v3025_v10  ;;  %v3487_v10 = vld [vmem:[%s13952_s0] sm:$0xf] }
 0xf2b   : > { %v3395_v16 = vmul.f32 %v3394_v40, %v3381_v49  ;;  %v3396_v39 = vmul.f32 %v3394_v40, %v3382_v53  ;;  %v2922_v49 = vrot.slane %v10071_v28, 4  ;;  %v2834_v53 = vsel %vm1358_vm1, %v14219_v59, %v2833_v52 }
 0xf2c   : > { %v2429_v40 = vsel %vm1466_vm15, %v10059_v5, %v2428_v47  ;;  %v2910_v28 = vsel %vm1453_vm10, %v10061_v36, %v2909_v46  ;;  %v2837_v32 = vadd.f32 %v2834_v53, %v2761_v35  ;;  %v2966_v36 = vrot.slane %v10073_v19, %v8986_v7  ;;  %v14224_v19 = vld [vmem:[#allocation199_spill] sm:$0xff]  ;;  %v14229_v47 = vld [vmem:[#allocation209_spill] sm:$0xff] }
 0xf2d   : > { %3401 = vrot.lane.b32.xlu1 %v3396_v39, %s14144_s24  ;;  %3399 = vrot.lane.b32.xlu0 %v3395_v16, %s14144_s24  ;;  %v2923_v58 = vsel %vm686_vm0, %v2921_v17, %v2922_v49  ;;  %v2432_v24 = vadd.f32 %v2429_v40, %v2418_v34  ;;  %v3100_v16 = vrot.slane %v10139_v61, 4  ;;  %v14223_v39 = vld [vmem:[#allocation192_spill] sm:$0xff]  ;;  %v3176_v50 = vrot.slane %v14224_v19, 4 }
 0xf2e   : > { %v2924_v5 = vsel %vm1466_vm15, %v10063_v25, %v2923_v58  ;;  %v2913_v3 = vadd.f32 %v2910_v28, %v2837_v32  ;;  %v2954_v25 = vmul.f32 %v10459_v12, %v10082_v54  ;;  %v3099_v0 = vrot.slane %v14223_v39, 4 }
 0xf2f   : > { %v2967_v37 = vmul.f32 %v2966_v36, %v2953_v30  ;;  %v3177_v51 = vsel %vm686_vm0, %v3175_v48, %v3176_v50  ;;  %v3328_v52 = vrot.slane %v14228_v8, 4  ;;  %v8279_v50 = vmov 67  }
 0xf30   : > { %v2927_v63 = vadd.f32 %v2924_v5, %v2913_v3  ;;  %v2968_v59 = vmul.f32 %v2966_v36, %v2954_v25  ;;  %v3101_v15 = vsel %vm686_vm0, %v3099_v0, %v3100_v16  ;;  %v8276_v0 = vmov 66  }
 0xf31   : > { %2438 = vrot.lane.b32.xlu1 %v2433_v13, %s13821_s4  ;;  %3413 = vrot.lane.b32.xlu0 %v3371_v4, %s14220_s6  ;;  %v14227_v13 = vld [vmem:[#allocation203_spill] sm:$0xff]  ;;  %v3029_v31 = vadd.f32 %v3026_v27, %v2967_v37  ;;  %v3102_v1 = vsel %vm1073_vm12, %v14223_v39, %v3101_v15  ;;  %v3463_v39 = vld [vmem:[%s13952_s0] sm:$0xf] }
 0xf32   : > { %v3030_v54 = vadd.f32 %v10099_v62, %v2968_v59  ;;  %v3251_v14 = vrot.slane %v14227_v13, 4  ;;  %v3327_v62 = vrot.slane %v14229_v47, 4  ;;  %v14232_v59 = vld [vmem:[#allocation18_spill] sm:$0xff] }
 0xf33   : > { %v3105_v18 = vadd.f32 %v3102_v1, %v3029_v31  ;;  %v3525_v31 = vld [vmem:[%s13952_s0] sm:$0xf]  ;;  %v14238_v1 = vld [vmem:[#allocation20_spill] sm:$0xff] }
 0xf34   : > { %v3106_v4 = vadd.f32 %v10139_v61, %v3030_v54  ;;  %v3253_v56 = vsel %vm686_vm0, %v3251_v14, %v3252_v26  ;;  %v3178_v61 = vsel %vm1168_vm13, %v14225_v38, %v3177_v51  ;;  %v8280_v38 = vmov 68  }
 0xf35   : > { %2933 = vrot.lane.b32.xlu1 %v2928_v20, %s13821_s4  ;;  %3440 = vrot.lane.b32.xlu0 %v14145_v57, %s8274_s27  ;;  %v3329_v20 = vsel %vm686_vm0, %v3327_v62, %v3328_v52  ;;  %v3254_v29 = vsel %vm1263_vm14, %v14227_v13, %v3253_v56  ;;  %v3181_v53 = vadd.f32 %v3178_v61, %v3105_v18  ;;  %s8283_s27 = smov 84  }
 0xf36   : > { %v3182_v17 = vadd.f32 %v14224_v19, %v3106_v4  ;;  %v3330_v58 = vsel %vm1358_vm1, %v14229_v47, %v3329_v20  ;;  %v14233_v19 = vld [vmem:[#allocation19_spill] sm:$0xff] }
 0xf37   : > { %v3257_v28 = vadd.f32 %v3254_v29, %v3181_v53 }
 0xf38   : > { %v3258_v46 = vadd.f32 %v14226_v11, %v3182_v17  ;;  %v8282_v17 = vmov 69  }
 0xf39   : > { %3415 = vrot.lane.b32.xlu1 %v3372_v41, %s14220_s6  ;;  %2436 = vrot.lane.b32.xlu0 %v2432_v24, %s13821_s4  ;;  %v3333_v41 = vadd.f32 %v3330_v58, %v3257_v28  ;;  %v3563_v58 = vld [vmem:[%s13952_s0] sm:$0xf]  ;;  %v8284_v28 = vmov 70  }
 0xf3a   : > { %v3334_v40 = vadd.f32 %v14228_v8, %v3258_v46 }
 0xf3d   : > { %2931 = vrot.lane.b32.xlu0 %v2927_v63, %s13821_s4  ;;  %s8277_s4 = smov 81  }
 0xf9f   : > { %v3402_v44 = vpop.permute.xlu1 %3401  ;;  %v3400_v2 = vpop.permute.xlu0 %3399 }
 0xfa0   : > { %v3404_v21 = vrot.slane %v3402_v44, 4  ;;  %v3403_v33 = vrot.slane %v3400_v2, 4  ;;  %v3410_v45 = vadd.f32 %v3402_v44, %v3334_v40 }
 0xfa2   : > { %v3405_v35 = vsel %vm686_vm0, %v3403_v33, %v3404_v21 }
 0xfa3   : > { %v10491_v49 = vpop.permute.xlu1 %2438  ;;  %v3414_v9 = vpop.permute.xlu0 %3413  ;;  %v3406_v32 = vsel %vm1453_vm10, %v3400_v2, %v3405_v35  ;;  %v10539_v2 = vld [vmem:[#allocation2 + $0x8] sm:$0xf] }
 0xfa4   : > { %14230 = vst [vmem:[#allocation140_spill] sm:$0xff] %v10491_v49  ;;  %v3417_v5 = vrot.slane %v3414_v9, 4  ;;  %v3409_v36 = vadd.f32 %v3406_v32, %v3333_v41 }
 0xfa7   : > { %v10501_v34 = vpop.permute.xlu1 %2933  ;;  %v10523_v48 = vpop.permute.xlu0 %3440 }
 0xfa8   : > { %14231 = vst [vmem:[#allocation138_spill] sm:$0xff] %v10501_v34 }
 0xfab   : > { %v3416_v24 = vpop.permute.xlu1 %3415  ;;  %v10525_v30 = vpop.permute.xlu0 %2436 }
 0xfac   : > { %v3418_v3 = vrot.slane %v3416_v24, 4  ;;  %v3424_v63 = vadd.f32 %v3416_v24, %v3410_v45  ;;  %14234 = vst [vmem:[#allocation145_spill] sm:$0xff] %v10525_v30 }
 0xfae   : > { %v3419_v55 = vsel %vm686_vm0, %v3417_v5, %v3418_v3  ;;  %3429 = vrot.lane.b32.xlu1 %v3424_v63, %s13829_s30 }
 0xfaf   : > { %v3420_v25 = vsel %vm1466_vm15, %v3414_v9, %v3419_v55  ;;  %v10527_v54 = vpop.permute.xlu0 %2931  ;;  %v14239_v9 = vld [vmem:[#allocation21_spill] sm:$0xff] }
 0xfb0   : > { %v3423_v16 = vadd.f32 %v3420_v25, %v3409_v36  ;;  %14235 = vst [vmem:[#allocation147_spill] sm:$0xff] %v10527_v54 }
 0xfb2   : > { %3451 = vperm.xlu1 %7903, %v3439_v43   ;;  %3427 = vrot.lane.b32.xlu0 %v3423_v16, %s13829_s30  ;;  %v3601_v16 = vld [vmem:[%s13952_s0] sm:$0xf] }
 0xfb6   : > { %7904 = vset.pattern.permute.xlu1 %v8276_v0  ;;  %3464 = vrot.lane.b32.xlu0 %v14232_v59, %s8277_s4  ;;  %s8281_s4 = smov 83   ;;  %v8286_v0 = vmov 71  }
 0xfb7   : > { %3475 = vperm.xlu1 %7904, %v3463_v39   ;;  %v14240_v39 = vld [vmem:[#allocation22_spill] sm:$0xff] }
 0xfba   : > { %3488 = vrot.lane.b32.xlu0 %v14233_v19, %s8278_s26  ;;  %s8293_s26 = smov 89  }
 0xfbb   : > { %7905 = vset.pattern.permute.xlu1 %v8279_v50 }
 0xfbc   : > { %3499 = vperm.xlu1 %7905, %v3487_v10  }
 0xfc0   : > { %7906 = vset.pattern.permute.xlu1 %v8280_v38 }
0x1020   : > { %v10533_v15 = vpop.permute.xlu1 %3429 }
0x1021   : > { %14237 = vst [vmem:[#allocation150_spill] sm:$0xff] %v10533_v15 }
0x1024   : > { %v10529_v44 = vpop.permute.xlu0 %3427 }
0x1025   : > { %14236 = vst [vmem:[#allocation152_spill] sm:$0xff] %v10529_v44 }
0x1028   : > { %v10531_v27 = vpop.permute.xlu0 %3464 }
0x102c   : > { %v3489_v26 = vpop.permute.xlu0 %3488 }
0x102d   : > { %v3490_v13 = vrot.slane %v3489_v26, 4 }
0x102f   : > { %v3492_v37 = vsel %vm3491_vm3, %v3490_v13, %v3489_v26  ;;  %v3496_v8 = vmul.f32 %v3490_v13, %v10539_v2  ;;  %vm3681_vm3 = vcmask 711680  }
0x1030   : > { %v3495_v51 = vmul.f32 %v10244_v23, %v3492_v37 }
0x1031   : > { %v10535_v11 = vpop.permute.xlu1 %3451 }
0x1036   : > { %v10537_v14 = vpop.permute.xlu1 %3475 }
0x103b   : > { %v3500_v4 = vpop.permute.xlu1 %3499 }
0x103c   : > { %v3508_v52 = vrot.slane %v3500_v4, %v8986_v7 }
0x103e   : > { %v3509_v47 = vmul.f32 %v3508_v52, %v3495_v51  ;;  %v3510_v62 = vmul.f32 %v3508_v52, %v3496_v8 }
0x1040   : > { %3515 = vrot.lane.b32.xlu1 %v3510_v62, %s14152_s22  ;;  %3513 = vrot.lane.b32.xlu0 %v3509_v47, %s14152_s22  ;;  %v3639_v62 = vld [vmem:[%s13952_s0] sm:$0xf] }
0x1044   : > { %3537 = vperm.xlu1 %7906, %v3525_v31   ;;  %3526 = vrot.lane.b32.xlu0 %v14238_v1, %s8281_s4  ;;  %v14241_v31 = vld [vmem:[#allocation24_spill] sm:$0xff]  ;;  %s8295_s4 = smov 90  }
0x1048   : > { %7907 = vset.pattern.permute.xlu1 %v8282_v17  ;;  %v8288_v17 = vmov 72  }
0x10b2   : > { %v10550_v56 = vpop.permute.xlu0 %3513  ;;  %v10552_v61 = vpop.permute.xlu1 %3515 }
0x10b6   : > { %v3527_v21 = vpop.permute.xlu0 %3526 }
0x10b7   : > { %v3528_v33 = vrot.slane %v3527_v21, 4 }
0x10b9   : > { %v3530_v18 = vsel %vm3529_vm4, %v3528_v33, %v3527_v21  ;;  %v3534_v29 = vmul.f32 %v3528_v33, %v10539_v2  ;;  %vm3719_vm4 = vcmask 719872  }
0x10ba   : > { %v3533_v20 = vmul.f32 %v10244_v23, %v3530_v18 }
0x10c3   : > { %v3538_v46 = vpop.permute.xlu1 %3537 }
0x10c4   : > { %v3546_v53 = vrot.slane %v3538_v46, %v8986_v7 }
0x10c6   : > { %v3547_v40 = vmul.f32 %v3546_v53, %v3533_v20  ;;  %v3548_v35 = vmul.f32 %v3546_v53, %v3534_v29 }
0x10c8   : > { %3553 = vrot.lane.b32.xlu1 %v3548_v35, %s14152_s22  ;;  %3551 = vrot.lane.b32.xlu0 %v3547_v40, %s14152_s22 }
0x10cc   : > { %3575 = vperm.xlu1 %7907, %v3563_v58   ;;  %3564 = vrot.lane.b32.xlu0 %v14239_v9, %s8283_s27  ;;  %s8297_s27 = smov 91  }
0x10d0   : > { %7908 = vset.pattern.permute.xlu1 %v8284_v28 }
0x113a   : > { %v10563_v45 = vpop.permute.xlu0 %3551  ;;  %v10565_v41 = vpop.permute.xlu1 %3553 }
0x113e   : > { %v3565_v32 = vpop.permute.xlu0 %3564 }
0x113f   : > { %v3566_v24 = vrot.slane %v3565_v32, 4 }
0x1141   : > { %v3568_v5 = vsel %vm3567_vm7, %v3566_v24, %v3565_v32  ;;  %v3572_v36 = vmul.f32 %v3566_v24, %v10539_v2  ;;  %v3677_v32 = vld [vmem:[%s13952_s0] sm:$0xf]  ;;  %v14242_v24 = vld [vmem:[#allocation25_spill] sm:$0xff]  ;;  %vm3757_vm7 = vcmask 728064  }
0x1142   : > { %v3571_v63 = vmul.f32 %v10244_v23, %v3568_v5  ;;  %v8290_v5 = vmov 73  }
0x114b   : > { %v3576_v3 = vpop.permute.xlu1 %3575 }
0x114c   : > { %v3584_v55 = vrot.slane %v3576_v3, %v8986_v7 }
0x114e   : > { %v3585_v43 = vmul.f32 %v3584_v55, %v3571_v63  ;;  %v3586_v25 = vmul.f32 %v3584_v55, %v3572_v36 }
0x1150   : > { %3591 = vrot.lane.b32.xlu1 %v3586_v25, %s14090_s2  ;;  %3589 = vrot.lane.b32.xlu0 %v3585_v43, %s14090_s2 }
0x1154   : > { %3613 = vperm.xlu1 %7908, %v3601_v16   ;;  %3602 = vrot.lane.b32.xlu0 %v14240_v39, %s8285_s28  ;;  %s8299_s28 = smov 92  }
0x1158   : > { %7909 = vset.pattern.permute.xlu1 %v8286_v0 }
0x11c2   : > { %v10576_v10 = vpop.permute.xlu0 %3589  ;;  %v10578_v26 = vpop.permute.xlu1 %3591 }
0x11c6   : > { %v3603_v50 = vpop.permute.xlu0 %3602 }
0x11c7   : > { %v3604_v38 = vrot.slane %v3603_v50, 4 }
0x11c9   : > { %v3606_v13 = vsel %vm3605_vm8, %v3604_v38, %v3603_v50  ;;  %v3610_v51 = vmul.f32 %v3604_v38, %v10539_v2  ;;  %vm3795_vm8 = vcmask 736256  }
0x11ca   : > { %v3609_v4 = vmul.f32 %v10244_v23, %v3606_v13 }
0x11d3   : > { %v3614_v37 = vpop.permute.xlu1 %3613 }
0x11d4   : > { %v3622_v8 = vrot.slane %v3614_v37, %v8986_v7  ;;  %v3715_v37 = vld [vmem:[%s13952_s0] sm:$0xf] }
0x11d6   : > { %v3623_v52 = vmul.f32 %v3622_v8, %v3609_v4  ;;  %v3624_v47 = vmul.f32 %v3622_v8, %v3610_v51  ;;  %v14243_v4 = vld [vmem:[#allocation26_spill] sm:$0xff]  ;;  %v8292_v51 = vmov 74  }
0x11d8   : > { %3629 = vrot.lane.b32.xlu1 %v3624_v47, %s14090_s2  ;;  %3627 = vrot.lane.b32.xlu0 %v3623_v52, %s14090_s2 }
0x11dc   : > { %3651 = vperm.xlu1 %7909, %v3639_v62   ;;  %3640 = vrot.lane.b32.xlu0 %v14241_v31, %s8287_s5  ;;  %s8310_s5 = smov 115  }
0x11e0   : > { %7910 = vset.pattern.permute.xlu1 %v8288_v17 }
0x124a   : > { %v10589_v21 = vpop.permute.xlu0 %3627  ;;  %v10591_v46 = vpop.permute.xlu1 %3629 }
0x124e   : > { %v3641_v33 = vpop.permute.xlu0 %3640 }
0x124f   : > { %v3642_v18 = vrot.slane %v3641_v33, 4 }
0x1251   : > { %v3644_v20 = vsel %vm3643_vm9, %v3642_v18, %v3641_v33  ;;  %v3648_v40 = vmul.f32 %v3642_v18, %v10539_v2  ;;  %vm3833_vm9 = vcmask 744448  }
0x1252   : > { %v3647_v53 = vmul.f32 %v10244_v23, %v3644_v20 }
0x125b   : > { %v3652_v29 = vpop.permute.xlu1 %3651 }
0x125c   : > { %v3660_v35 = vrot.slane %v3652_v29, %v8986_v7 }
0x125e   : > { %v3661_v58 = vmul.f32 %v3660_v35, %v3647_v53  ;;  %v3662_v28 = vmul.f32 %v3660_v35, %v3648_v40  ;;  %v3753_v35 = vld [vmem:[%s13952_s0] sm:$0xf] }
0x1260   : > { %3667 = vrot.lane.b32.xlu1 %v3662_v28, %s14098_s25  ;;  %3665 = vrot.lane.b32.xlu0 %v3661_v58, %s14098_s25  ;;  %v14244_v58 = vld [vmem:[#allocation27_spill] sm:$0xff]  ;;  %v8294_v28 = vmov 75  }
0x1264   : > { %3689 = vperm.xlu1 %7910, %v3677_v32   ;;  %3678 = vrot.lane.b32.xlu0 %v14242_v24, %s8289_s3  ;;  %s8307_s3 = smov 99  }
0x1268   : > { %7911 = vset.pattern.permute.xlu1 %v8290_v5 }
0x12d2   : > { %v10602_v3 = vpop.permute.xlu0 %3665  ;;  %v10604_v55 = vpop.permute.xlu1 %3667 }
0x12d6   : > { %v3679_v63 = vpop.permute.xlu0 %3678 }
0x12d7   : > { %v3680_v36 = vrot.slane %v3679_v63, 4 }
0x12d9   : > { %v3682_v43 = vsel %vm3681_vm3, %v3680_v36, %v3679_v63  ;;  %v3686_v0 = vmul.f32 %v3680_v36, %v10539_v2  ;;  %vm3467_vm3 = vcmask 662528  }
0x12da   : > { %v3685_v16 = vmul.f32 %v10244_v23, %v3682_v43 }
0x12e3   : > { %v3690_v25 = vpop.permute.xlu1 %3689 }
0x12e4   : > { %v3698_v50 = vrot.slane %v3690_v25, %v8986_v7 }
0x12e6   : > { %v3699_v38 = vmul.f32 %v3698_v50, %v3685_v16  ;;  %v3700_v13 = vmul.f32 %v3698_v50, %v3686_v0 }
0x12e8   : > { %3705 = vrot.lane.b32.xlu1 %v3700_v13, %s14098_s25  ;;  %3703 = vrot.lane.b32.xlu0 %v3699_v38, %s14098_s25 }
0x12ec   : > { %3727 = vperm.xlu1 %7911, %v3715_v37   ;;  %3716 = vrot.lane.b32.xlu0 %v14243_v4, %s8291_s1  ;;  %v3791_v37 = vld [vmem:[%s13952_s0] sm:$0xf]  ;;  %s8304_s1 = smov 98  }
0x12f0   : > { %7912 = vset.pattern.permute.xlu1 %v8292_v51  ;;  %v14245_v51 = vld [vmem:[#allocation28_spill] sm:$0xff] }
0x135a   : > { %v10615_v8 = vpop.permute.xlu0 %3703  ;;  %v10617_v62 = vpop.permute.xlu1 %3705 }
0x135e   : > { %v3717_v52 = vpop.permute.xlu0 %3716 }
0x135f   : > { %v3718_v47 = vrot.slane %v3717_v52, 4 }
0x1361   : > { %v3720_v17 = vsel %vm3719_vm4, %v3718_v47, %v3717_v52  ;;  %v3724_v20 = vmul.f32 %v3718_v47, %v10539_v2  ;;  %v8296_v52 = vmov 76   ;;  %vm3871_vm4 = vcmask 752640  }
0x1362   : > { %v3723_v18 = vmul.f32 %v10244_v23, %v3720_v17 }
0x136b   : > { %v3728_v33 = vpop.permute.xlu1 %3727 }
0x136c   : > { %v3736_v29 = vrot.slane %v3728_v33, %v8986_v7 }
0x136e   : > { %v3737_v53 = vmul.f32 %v3736_v29, %v3723_v18  ;;  %v3738_v40 = vmul.f32 %v3736_v29, %v3724_v20 }
0x1370   : > { %3743 = vrot.lane.b32.xlu1 %v3738_v40, %s14109_s23  ;;  %3741 = vrot.lane.b32.xlu0 %v3737_v53, %s14109_s23 }
0x1374   : > { %3765 = vperm.xlu1 %7912, %v3753_v35   ;;  %3754 = vrot.lane.b32.xlu0 %v14244_v58, %s8293_s26  ;;  %s14248_s26 = smov 96  }
0x1378   : > { %7913 = vset.pattern.permute.xlu1 %v8294_v28 }
0x13e2   : > { %v10628_v32 = vpop.permute.xlu0 %3741  ;;  %v10630_v36 = vpop.permute.xlu1 %3743 }
0x13e6   : > { %v3755_v5 = vpop.permute.xlu0 %3754 }
0x13e7   : > { %v3756_v63 = vrot.slane %v3755_v5, 4 }
0x13e9   : > { %v3758_v43 = vsel %vm3757_vm7, %v3756_v63, %v3755_v5  ;;  %v3762_v0 = vmul.f32 %v3756_v63, %v10539_v2  ;;  %v3829_v63 = vld [vmem:[%s13952_s0] sm:$0xf]  ;;  %vm3443_vm7 = vcmask 654336  }
0x13ea   : > { %v3761_v16 = vmul.f32 %v10244_v23, %v3758_v43  ;;  %v14246_v43 = vld [vmem:[#allocation29_spill] sm:$0xff] }
0x13f3   : > { %v3766_v25 = vpop.permute.xlu1 %3765 }
0x13f4   : > { %v3774_v50 = vrot.slane %v3766_v25, %v8986_v7  ;;  %v8298_v25 = vmov 77  }
0x13f6   : > { %v3775_v38 = vmul.f32 %v3774_v50, %v3761_v16  ;;  %v3776_v13 = vmul.f32 %v3774_v50, %v3762_v0 }
0x13f8   : > { %3781 = vrot.lane.b32.xlu1 %v3776_v13, %s14109_s23  ;;  %3779 = vrot.lane.b32.xlu0 %v3775_v38, %s14109_s23 }
0x13fc   : > { %3803 = vperm.xlu1 %7913, %v3791_v37   ;;  %3792 = vrot.lane.b32.xlu0 %v14245_v51, %s8295_s4  ;;  %s8302_s4 = smov 97  }
0x1400   : > { %7914 = vset.pattern.permute.xlu1 %v8296_v52 }
0x146a   : > { %v10641_v47 = vpop.permute.xlu0 %3779  ;;  %v10643_v18 = vpop.permute.xlu1 %3781 }
0x146b   : > { %v3784_v49 = vrot.slane %v10643_v18, 4 }
0x146e   : > { %v3793_v17 = vpop.permute.xlu0 %3792 }
0x146f   : > { %v3794_v33 = vrot.slane %v3793_v17, 4 }
0x1471   : > { %v3796_v20 = vsel %vm3795_vm8, %v3794_v33, %v3793_v17  ;;  %v3800_v40 = vmul.f32 %v3794_v33, %v10539_v2  ;;  %vm3986_vm8 = vcmask 801792  }
0x1472   : > { %v3799_v53 = vmul.f32 %v10244_v23, %v3796_v20 }
0x147b   : > { %v3804_v29 = vpop.permute.xlu1 %3803 }
0x147c   : > { %v3812_v35 = vrot.slane %v3804_v29, %v8986_v7 }
0x147e   : > { %v3813_v28 = vmul.f32 %v3812_v35, %v3799_v53  ;;  %v3814_v5 = vmul.f32 %v3812_v35, %v3800_v40  ;;  %v3867_v53 = vld [vmem:[%s13952_s0] sm:$0xf]  ;;  %v14247_v40 = vld [vmem:[#allocation30_spill] sm:$0xff] }
0x1480   : > { %3819 = vrot.lane.b32.xlu1 %v3814_v5, %s14119_s29  ;;  %3817 = vrot.lane.b32.xlu0 %v3813_v28, %s14119_s29  ;;  %v3466_v28 = vrot.slane %v10531_v27, 4  ;;  %v3556_v5 = vrot.slane %v10565_v41, 4 }
0x1484   : > { %3841 = vperm.xlu1 %7914, %v3829_v63   ;;  %3830 = vrot.lane.b32.xlu0 %v14246_v43, %s8297_s27  ;;  %v3555_v63 = vrot.slane %v10563_v45, 4  ;;  %s8329_s27 = smov 101  }
0x1488   : > { %7915 = vset.pattern.permute.xlu1 %v8298_v25  ;;  %v3632_v25 = vrot.slane %v10591_v46, 4 }
0x14f2   : > { %v10654_v16 = vpop.permute.xlu0 %3817  ;;  %v10656_v38 = vpop.permute.xlu1 %3819 }
0x14f6   : > { %v3831_v0 = vpop.permute.xlu0 %3830 }
0x14f7   : > { %v3832_v50 = vrot.slane %v3831_v0, 4 }
0x14f9   : > { %v3834_v13 = vsel %vm3833_vm9, %v3832_v50, %v3831_v0  ;;  %v3838_v17 = vmul.f32 %v3832_v50, %v10539_v2  ;;  %v3631_v0 = vrot.slane %v10589_v21, 4  ;;  %v3468_v50 = vsel %vm3467_vm3, %v3466_v28, %v10531_v27 }
0x14fa   : > { %v3837_v52 = vmul.f32 %v10244_v23, %v3834_v13  ;;  %vm4024_vm9 = vcmask 809984   ;;  %vm4667_vm3 = vcmask 973824  }
0x1503   : > { %v3842_v37 = vpop.permute.xlu1 %3841 }
0x1504   : > { %v3850_v33 = vrot.slane %v3842_v37, %v8986_v7  ;;  %v3484_v37 = vrot.slane %v10537_v14, %v8986_v7  ;;  %v3783_v14 = vrot.slane %v10641_v47, 4 }
0x1506   : > { %v3851_v20 = vmul.f32 %v3850_v33, %v3837_v52  ;;  %v3852_v29 = vmul.f32 %v3850_v33, %v3838_v17  ;;  %v3557_v52 = vsel %vm686_vm0, %v3555_v63, %v3556_v5  ;;  %v3708_v17 = vrot.slane %v10617_v62, 4 }
0x1507   : > { %v3707_v33 = vrot.slane %v10615_v8, 4  ;;  %v3558_v27 = vsel %vm978_vm11, %v10563_v45, %v3557_v52  ;;  %v3785_v45 = vsel %vm686_vm0, %v3783_v14, %v3784_v49 }
0x1508   : > { %3857 = vrot.lane.b32.xlu1 %v3852_v29, %s14119_s29  ;;  %3855 = vrot.lane.b32.xlu0 %v3851_v20, %s14119_s29  ;;  %v3471_v20 = vmul.f32 %v10244_v23, %v3468_v50  ;;  %v3472_v29 = vmul.f32 %v3466_v28, %v10539_v2  ;;  %v3786_v49 = vsel %vm1263_vm14, %v10641_v47, %v3785_v45  ;;  %v3518_v47 = vrot.slane %v10552_v61, 4 }
0x1509   : > { %v3709_v23 = vsel %vm686_vm0, %v3707_v33, %v3708_v17 }
0x150a   : > { %v3485_v5 = vmul.f32 %v3484_v37, %v3471_v20  ;;  %v3486_v63 = vmul.f32 %v3484_v37, %v3472_v29  ;;  %v3710_v20 = vsel %vm1168_vm13, %v10615_v8, %v3709_v23  ;;  %v3593_v23 = vrot.slane %v10576_v10, 4 }
0x150c   : > { %3879 = vperm.xlu1 %7915, %v3867_v53   ;;  %3868 = vrot.lane.b32.xlu0 %v14247_v40, %s8299_s28  ;;  %v3633_v53 = vsel %vm686_vm0, %v3631_v0, %v3632_v25  ;;  %v3562_v25 = vadd.f32 %v10565_v41, %v3486_v63  ;;  %v3561_v0 = vadd.f32 %v3558_v27, %v3485_v5  ;;  %s8331_s28 = smov 103  }
0x150d   : > { %v3634_v30 = vsel %vm1073_vm12, %v10589_v21, %v3633_v53  ;;  %v10694_v21 = vld [vmem:[#allocation2] sm:$0xff] }
0x150e   : > { %v3638_v52 = vadd.f32 %v10591_v46, %v3562_v25  ;;  %v3637_v34 = vadd.f32 %v3634_v30, %v3561_v0  ;;  %v3670_v25 = vrot.slane %v10604_v55, 4  ;;  %v3669_v0 = vrot.slane %v10602_v3, 4 }
0x1510   : > { %v3714_v30 = vadd.f32 %v10617_v62, %v3638_v52  ;;  %v3713_v46 = vadd.f32 %v3710_v20, %v3637_v34  ;;  %v3442_v62 = vrot.slane %v10523_v48, 4  ;;  %v3460_v34 = vrot.slane %v10535_v11, %v8986_v7 }
0x1512   : > { %v3790_v14 = vadd.f32 %v10643_v18, %v3714_v30  ;;  %v3789_v5 = vadd.f32 %v3786_v49, %v3713_v46  ;;  %v3517_v18 = vrot.slane %v10550_v56, 4  ;;  %v3448_v63 = vmul.f32 %v3442_v62, %v10539_v2 }
0x157a   : > { %v3856_v35 = vpop.permute.xlu0 %3855  ;;  %v3858_v15 = vpop.permute.xlu1 %3857 }
0x157b   : > { %v3860_v28 = vrot.slane %v3858_v15, 4  ;;  %v3859_v50 = vrot.slane %v3856_v35, 4 }
0x157d   : > { %v3861_v29 = vsel %vm686_vm0, %v3859_v50, %v3860_v28  ;;  %v3462_v28 = vmul.f32 %v3460_v34, %v3448_v63  ;;  %v3519_v50 = vsel %vm686_vm0, %v3517_v18, %v3518_v47 }
0x157e   : > { %v3869_v13 = vpop.permute.xlu0 %3868  ;;  %v3862_v27 = vsel %vm1358_vm1, %v3856_v35, %v3861_v29  ;;  %v3444_v35 = vsel %vm3443_vm7, %v3442_v62, %v10523_v48  ;;  %v3746_v48 = vrot.slane %v10630_v36, 4  ;;  %vm4817_vm7 = vcmask 1006592  }
0x157f   : > { %v3870_v44 = vrot.slane %v3869_v13, 4  ;;  %v3447_v11 = vmul.f32 %v10694_v21, %v3444_v35  ;;  %v3524_v45 = vadd.f32 %v10552_v61, %v3462_v28 }
0x1581   : > { %v3872_v12 = vsel %vm3871_vm4, %v3870_v44, %v3869_v13  ;;  %v3876_v33 = vmul.f32 %v3870_v44, %v10539_v2  ;;  %v8300_v13 = vmov 78   ;;  %v3865_v44 = vadd.f32 %v3862_v27, %v3789_v5 }
0x1582   : > { %v3875_v17 = vmul.f32 %v10694_v21, %v3872_v12  ;;  %7916 = vset.pattern.permute.xlu1 %v8300_v13  ;;  %v3866_v12 = vadd.f32 %v3858_v15, %v3790_v14  ;;  %v3594_v15 = vrot.slane %v10578_v26, 4  ;;  %v3745_v2 = vrot.slane %v10628_v32, 4 }
0x1583   : > { %v3461_v20 = vmul.f32 %v3460_v34, %v3447_v11  ;;  %v3600_v29 = vadd.f32 %v10578_v26, %v3524_v45  ;;  %v3982_v11 = vld [vmem:[%s13952_s0] sm:$0xf]  ;;  %v8303_v45 = vmov 80   ;;  %vm4517_vm4 = vcmask 941056  }
0x1584   : > { %v3595_v52 = vsel %vm686_vm0, %v3593_v23, %v3594_v15  ;;  %v3747_v30 = vsel %vm686_vm0, %v3745_v2, %v3746_v48  ;;  %v8306_v48 = vmov 94  }
0x1585   : > { %v3596_v61 = vsel %vm1073_vm12, %v10576_v10, %v3595_v52  ;;  %v3676_v49 = vadd.f32 %v10604_v55, %v3600_v29  ;;  %v8305_v52 = vmov 81   ;;  %7920 = vset.pattern.permute.xlu0 %v8306_v48 }
0x1587   : > { %v3752_v26 = vadd.f32 %v10630_v36, %v3676_v49  ;;  %v10775_v49 = vld [vmem:[#allocation2 + $0x8] sm:$0xf] }
0x1589   : > { %v3828_v10 = vadd.f32 %v10656_v38, %v3752_v26 }
0x158b   : > { %v3880_v37 = vpop.permute.xlu1 %3879 }
0x158c   : > { %v3888_v41 = vrot.slane %v3880_v37, %v8986_v7  ;;  %v3520_v37 = vsel %vm978_vm11, %v10550_v56, %v3519_v50 }
0x158d   : > { %v3523_v13 = vadd.f32 %v3520_v37, %v3461_v20 }
0x158e   : > { %v3889_v8 = vmul.f32 %v3888_v41, %v3875_v17  ;;  %v3890_v53 = vmul.f32 %v3888_v41, %v3876_v33  ;;  %v3671_v17 = vsel %vm686_vm0, %v3669_v0, %v3670_v25  ;;  %v3822_v33 = vrot.slane %v10656_v38, 4  ;;  %v3958_v25 = vld [vmem:[%s13952_s0] sm:$0xf] }
0x158f   : > { %v3821_v41 = vrot.slane %v10654_v16, 4  ;;  %v3672_v46 = vsel %vm1168_vm13, %v10602_v3, %v3671_v17  ;;  %v3599_v56 = vadd.f32 %v3596_v61, %v3523_v13  ;;  %v8301_v0 = vmov 79  }
0x1590   : > { %3895 = vrot.lane.b32.xlu1 %v3890_v53, %s14144_s24  ;;  %3893 = vrot.lane.b32.xlu0 %v3889_v8, %s14144_s24  ;;  %v3748_v53 = vsel %vm1263_vm14, %v10628_v32, %v3747_v30 }
0x1591   : > { %v3823_v8 = vsel %vm686_vm0, %v3821_v41, %v3822_v33  ;;  %v3675_v5 = vadd.f32 %v3672_v46, %v3599_v56 }
0x1593   : > { %v3751_v62 = vadd.f32 %v3748_v53, %v3675_v5  ;;  %v4588_v5 = vld [vmem:[%s13952_s0] sm:$0xf] }
0x1594   : > { %3909 = vrot.lane.b32.xlu1 %v3866_v12, %s14220_s6  ;;  %3907 = vrot.lane.b32.xlu0 %v3865_v44, %s14220_s6  ;;  %v3824_v44 = vsel %vm1358_vm1, %v10654_v16, %v3823_v8  ;;  %v3935_v16 = vld [vmem:[%s13952_s0] sm:$0xf] }
0x1595   : > { %v3827_v35 = vadd.f32 %v3824_v44, %v3751_v62  ;;  %v14255_v44 = vmov 18   ;;  %v6155_v62 = vld [vmem:[%s13952_s0 + $0x4] sm:$0xf] }
0x1602   : > { %v3896_v27 = vpop.permute.xlu1 %3895  ;;  %v3894_v14 = vpop.permute.xlu0 %3893 }
0x1603   : > { %v3898_v12 = vrot.slane %v3896_v27, 4  ;;  %v3897_v55 = vrot.slane %v3894_v14, 4  ;;  %v3904_v3 = vadd.f32 %v3896_v27, %v3828_v10  ;;  %v4020_v27 = vld [vmem:[%s13952_s0] sm:$0xf]  ;;  %v8308_v10 = vmov 96  }
0x1605   : > { %v3899_v34 = vsel %vm686_vm0, %v3897_v55, %v3898_v12  ;;  %v4663_v12 = vld [vmem:[%s13952_s0] sm:$0xf]  ;;  %v8309_v55 = vmov 98  }
0x1606   : > { %v3900_v36 = vsel %vm1453_vm10, %v3894_v14, %v3899_v34  ;;  %v3910_v47 = vpop.permute.xlu1 %3909  ;;  %v3908_v18 = vpop.permute.xlu0 %3907  ;;  %v4513_v14 = vld [vmem:[%s13952_s0] sm:$0xf]  ;;  %v8311_v34 = vmov 100  }
0x1607   : > { %v3912_v32 = vrot.slane %v3910_v47, 4  ;;  %v3918_v63 = vadd.f32 %v3910_v47, %v3904_v3  ;;  %v3911_v15 = vrot.slane %v3908_v18, 4  ;;  %v3903_v23 = vadd.f32 %v3900_v36, %v3827_v35  ;;  %v4738_v3 = vld [vmem:[%s13952_s0] sm:$0xf]  ;;  %v6341_v35 = vld [vmem:[%s13952_s0 + $0x4] sm:$0xf] }
0x1608   : > { %v4813_v36 = vld [vmem:[%s13952_s0] sm:$0xf]  ;;  %v14256_v47 = vmov 20  }
0x1609   : > { %v3913_v38 = vsel %vm686_vm0, %v3911_v15, %v3912_v32  ;;  %3923 = vrot.lane.b32.xlu1 %v3918_v63, %s13829_s30  ;;  %v14257_v32 = vmov 24   ;;  %v14258_v63 = vmov 22   ;;  %v6279_v15 = vld [vmem:[%s13952_s0 + $0x4] sm:$0xf] }
0x160a   : > { %v3914_v28 = vsel %vm1466_vm15, %v3908_v18, %v3913_v38  ;;  %v6217_v18 = vld [vmem:[%s13952_s0 + $0x4] sm:$0xf]  ;;  %v14259_v38 = vmov 26  }
0x160b   : > { %v3917_v50 = vadd.f32 %v3914_v28, %v3903_v23  ;;  %v8315_v23 = vmov 93   ;;  %v6403_v28 = vld [vmem:[%s13952_s0 + $0x4] sm:$0xf] }
0x160d   : > { %3946 = vperm.xlu1 %7916, %v3935_v16   ;;  %3921 = vrot.lane.b32.xlu0 %v3917_v50, %s13829_s30  ;;  %s8314_s30 = smov 119   ;;  %v8318_v16 = vmov 82  }
0x1611   : > { %7917 = vset.pattern.permute.xlu1 %v8301_v0  ;;  %3936 = vrot.lane.b32.xlu0 %v14145_v57, %s14248_s26 }
0x1612   : > { %3970 = vperm.xlu1 %7917, %v3958_v25  }
0x1615   : > { %3959 = vrot.lane.b32.xlu0 %v14232_v59, %s8302_s4  ;;  %s8312_s4 = smov 117  }
0x1616   : > { %7918 = vset.pattern.permute.xlu1 %v8303_v45 }
0x1617   : > { %3994 = vperm.xlu1 %7918, %v3982_v11  }
0x1619   : > { %3983 = vrot.lane.b32.xlu0 %v14233_v19, %s8304_s1  ;;  %s8352_s1 = smov 108  }
0x161b   : > { %7919 = vset.pattern.permute.xlu1 %v8305_v52 }
0x167b   : > { %v10769_v29 = vpop.permute.xlu1 %3923 }
0x167c   : > { %14252 = vst [vmem:[#allocation156_spill] sm:$0xff] %v10769_v29 }
0x167f   : > { %v10763_v2 = vpop.permute.xlu0 %3921 }
0x1680   : > { %14249 = vst [vmem:[#allocation146_spill] sm:$0xff] %v10763_v2 }
0x1683   : > { %v10765_v20 = vpop.permute.xlu0 %3936 }
0x1684   : > { %14250 = vst [vmem:[#allocation144_spill] sm:$0xff] %v10765_v20 }
0x1687   : > { %v10767_v37 = vpop.permute.xlu0 %3959 }
0x1688   : > { %14251 = vst [vmem:[#allocation158_spill] sm:$0xff] %v10767_v37  ;;  %v14324_v37 = vld [vmem:[#allocation139_spill] sm:$0xff] }
0x168b   : > { %v3984_v33 = vpop.permute.xlu0 %3983 }
0x168c   : > { %v10771_v17 = vpop.permute.xlu1 %3946  ;;  %v3985_v41 = vrot.slane %v3984_v33, 4 }
0x168d   : > { %14253 = vst [vmem:[#allocation164_spill] sm:$0xff] %v10771_v17 }
0x168e   : > { %v3987_v13 = vsel %vm3986_vm8, %v3985_v41, %v3984_v33  ;;  %v3991_v56 = vmul.f32 %v3985_v41, %v10775_v49  ;;  %vm4592_vm8 = vcmask 957440  }
0x168f   : > { %v3990_v46 = vmul.f32 %v10694_v21, %v3987_v13 }
0x1691   : > { %v10773_v61 = vpop.permute.xlu1 %3970 }
0x1692   : > { %14254 = vst [vmem:[#allocation162_spill] sm:$0xff] %v10773_v61 }
0x1696   : > { %v3995_v30 = vpop.permute.xlu1 %3994 }
0x1697   : > { %v4003_v26 = vrot.slane %v3995_v30, %v8986_v7 }
0x1699   : > { %v4004_v8 = vmul.f32 %v4003_v26, %v3990_v46  ;;  %v4005_v53 = vmul.f32 %v4003_v26, %v3991_v56  ;;  %v4058_v46 = vld [vmem:[%s13952_s0] sm:$0xf] }
0x169a   : > { %v4475_v56 = vld [vmem:[%s13952_s0] sm:$0xf] }
0x169b   : > { %4010 = vrot.lane.b32.xlu1 %v4005_v53, %s14152_s22  ;;  %4008 = vrot.lane.b32.xlu0 %v4004_v8, %s14152_s22  ;;  %v4096_v26 = vld [vmem:[%s13952_s0] sm:$0xf]  ;;  %v8320_v8 = vmov 83  }
0x169c   : > { %v4551_v53 = vld [vmem:[%s13952_s0] sm:$0xf] }
0x169f   : > { %4032 = vperm.xlu1 %7919, %v4020_v27   ;;  %4021 = vrot.lane.b32.xlu0 %v14238_v1, %s8307_s3  ;;  %v4451_v27 = vld [vmem:[%s13952_s0] sm:$0xf]  ;;  %s14292_s3 = smov 102  }
0x16a3   : > { %7921 = vset.pattern.permute.xlu1 %v8308_v10  ;;  %4525 = vperm.xlu0 %7920, %v4513_v14   ;;  %v8321_v14 = vmov 95   ;;  %v4626_v10 = vld [vmem:[%s13952_s0] sm:$0xf] }
0x16a4   : > { %4600 = vperm.xlu1 %7921, %v4588_v5   ;;  %v8322_v5 = vmov 92  }
0x16a7   : > { %7922 = vset.pattern.permute.xlu0 %v8309_v55  ;;  %v8323_v55 = vmov 97  }
0x16a8   : > { %4514 = vrot.lane.b32.xlu1 %v14238_v1, %s8310_s5  ;;  %4675 = vperm.xlu0 %7922, %v4663_v12   ;;  %v8313_v1 = vmov 102   ;;  %v4171_v12 = vld [vmem:[%s13952_s0] sm:$0xf]  ;;  %s8325_s5 = smov 114  }
0x16a9   : > { %7923 = vset.pattern.permute.xlu1 %v14255_v44  ;;  %v8324_v44 = vmov 85  }
0x16ac   : > { %6160 = vperm.xlu1 %7923, %v6155_v62   ;;  %7924 = vset.pattern.permute.xlu0 %v8311_v34  ;;  %v6124_v62 = vld [vmem:[%s13952_s0 + $0x4] sm:$0xf]  ;;  %v8326_v34 = vmov 120  }
0x16ad   : > { %4750 = vperm.xlu0 %7924, %v4738_v3   ;;  %v14262_v3 = vmov 17  }
0x16b0   : > { %4589 = vrot.lane.b32.xlu1 %v14240_v39, %s8312_s4  ;;  %s8317_s4 = smov 123  }
0x16b1   : > { %7926 = vset.pattern.permute.xlu0 %v8313_v1  ;;  %7925 = vset.pattern.permute.xlu1 %v14256_v47  ;;  %v8328_v1 = vmov 99   ;;  %v4701_v47 = vld [vmem:[%s13952_s0] sm:$0xf] }
0x16b2   : > { %4825 = vperm.xlu0 %7926, %v4813_v36   ;;  %v5359_v36 = vld [vmem:[%s13952_s0] sm:$0xf] }
0x16b4   : > { %6222 = vperm.xlu1 %7925, %v6217_v18   ;;  %v14263_v18 = vmov 5  }
0x16b6   : > { %7928 = vset.pattern.permute.xlu0 %v14257_v32  ;;  %v14264_v32 = vmov 16  }
0x16b7   : > { %6346 = vperm.xlu0 %7928, %v6341_v35   ;;  %v6107_v35 = vld [vmem:[%s13952_s0 + $0x4] sm:$0xf] }
0x16b8   : > { %4664 = vrot.lane.b32.xlu1 %v14242_v24, %s8314_s30  ;;  %s8319_s30 = smov 100  }
0x16b9   : > { %7927 = vset.pattern.permute.xlu1 %v14258_v63  ;;  %v8330_v63 = vmov 87  }
0x16bb   : > { %7931 = vset.pattern.permute.xlu0 %v8315_v23  ;;  %v8332_v23 = vmov 124  }
0x16bc   : > { %6284 = vperm.xlu1 %7927, %v6279_v15   ;;  %v4247_v15 = vld [vmem:[%s13952_s0] sm:$0xf] }
0x16c0   : > { %4739 = vrot.lane.b32.xlu1 %v14244_v58, %s8316_s21  ;;  %s8334_s21 = smov 105  }
0x16c1   : > { %7929 = vset.pattern.permute.xlu1 %v14259_v38 }
0x16c4   : > { %4814 = vrot.lane.b32.xlu1 %v14246_v43, %s8317_s4  ;;  %s8357_s4 = smov 104  }
0x16c8   : > { %6408 = vperm.xlu1 %7929, %v6403_v28   ;;  %v5421_v28 = vld [vmem:[%s13952_s0] sm:$0xf] }
0x16cc   : > { %7930 = vset.pattern.permute.xlu1 %v8318_v16 }
0x170d   : > { %v10826_v50 = vpop.permute.xlu0 %4008  ;;  %v10828_v11 = vpop.permute.xlu1 %4010 }
0x170e   : > { %14260 = vst [vmem:[#allocation172_spill] sm:$0xff] %v10826_v50  ;;  %14261 = vst [vmem:[#allocation170_spill] sm:$0xff] %v10828_v11 }
0x1711   : > { %v4022_v25 = vpop.permute.xlu0 %4021 }
0x1712   : > { %v4023_v0 = vrot.slane %v4022_v25, 4 }
0x1714   : > { %v4025_v45 = vsel %vm4024_vm9, %v4023_v0, %v4022_v25  ;;  %v4029_v33 = vmul.f32 %v4023_v0, %v10775_v49  ;;  %v6622_v25 = vld [vmem:[%s13952_s0 + $0x4] sm:$0xf]  ;;  %v14265_v0 = vmov 7   ;;  %vm4062_vm9 = vcmask 818176  }
0x1715   : > { %v4028_v48 = vmul.f32 %v10694_v21, %v4025_v45  ;;  %v14266_v45 = vmov 33  }
0x171e   : > { %v4033_v52 = vpop.permute.xlu1 %4032 }
0x171f   : > { %v4041_v41 = vrot.slane %v4033_v52, %v8986_v7 }
0x1721   : > { %v4042_v13 = vmul.f32 %v4041_v41, %v4028_v48  ;;  %v4043_v30 = vmul.f32 %v4041_v41, %v4029_v33  ;;  %v6186_v48 = vld [vmem:[%s13952_s0 + $0x4] sm:$0xf]  ;;  %v14267_v33 = vmov 19   ;;  %v8335_v41 = vmov 103  }
0x1723   : > { %4048 = vrot.lane.b32.xlu1 %v4043_v30, %s14152_s22  ;;  %4046 = vrot.lane.b32.xlu0 %v4042_v13, %s14152_s22  ;;  %v4851_v13 = vld [vmem:[%s13952_s0] sm:$0xf] }
0x1727   : > { %4070 = vperm.xlu1 %7930, %v4058_v46   ;;  %4059 = vrot.lane.b32.xlu0 %v14239_v9, %s8319_s30  ;;  %s8327_s30 = smov 113  }
0x172b   : > { %7932 = vset.pattern.permute.xlu1 %v8320_v8  ;;  %4487 = vperm.xlu0 %7931, %v4475_v56   ;;  %v6560_v56 = vld [vmem:[%s13952_s0 + $0x4] sm:$0xf]  ;;  %v10919_v8 = vld [vmem:[#allocation2 + $0x8] sm:$0xf] }
0x172c   : > { %4108 = vperm.xlu1 %7932, %v4096_v26   ;;  %v14268_v26 = vmov 31  }
0x172f   : > { %7934 = vset.pattern.permute.xlu0 %v8321_v14  ;;  %v14269_v14 = vmov 23  }
0x1730   : > { %7933 = vset.pattern.permute.xlu1 %v8322_v5  ;;  %4562 = vperm.xlu0 %7934, %v4551_v53   ;;  %v4323_v5 = vld [vmem:[%s13952_s0] sm:$0xf] }
0x1731   : > { %4463 = vperm.xlu1 %7933, %v4451_v27  }
0x1734   : > { %7936 = vset.pattern.permute.xlu0 %v8323_v55 }
0x1735   : > { %7935 = vset.pattern.permute.xlu1 %v8324_v44  ;;  %4637 = vperm.xlu0 %7936, %v4626_v10   ;;  %v4526_v44 = vpop.permute.xlu0 %4525 }
0x1736   : > { %4183 = vperm.xlu1 %7935, %v4171_v12   ;;  %v8336_v12 = vmov 89  }
0x1739   : > { %7939 = vset.pattern.permute.xlu0 %v14262_v3  ;;  %v4776_v3 = vld [vmem:[%s13952_s0] sm:$0xf] }
0x173a   : > { %4476 = vrot.lane.b32.xlu1 %v14233_v19, %s8325_s5  ;;  %6129 = vperm.xlu0 %7939, %v6124_v62   ;;  %v5752_v19 = vld [vmem:[%s13952_s0 + $0x4] sm:$0xf]  ;;  %s14695_s5 = smov 1  }
0x173b   : > { %7937 = vset.pattern.permute.xlu1 %v8326_v34  ;;  %v14270_v34 = vmov 13  }
0x173e   : > { %5364 = vperm.xlu1 %7937, %v5359_v36   ;;  %4452 = vrot.lane.b32.xlu0 %v14232_v59, %s8327_s30  ;;  %v4601_v59 = vpop.permute.xlu1 %4600  ;;  %v8337_v36 = vmov 101   ;;  %s14710_s30 = sld [smem:[#allocation222_spill]] }
0x173f   : > { %7941 = vset.pattern.permute.xlu0 %v8328_v1  ;;  %v10925_v53 = vrot.slane %v4601_v59, %v8986_v7  ;;  %v6000_v59 = vld [vmem:[%s13952_s0 + $0x4] sm:$0xf] }
0x1742   : > { %7938 = vset.pattern.permute.xlu1 %v14263_v18  ;;  %4712 = vperm.xlu0 %7941, %v4701_v47   ;;  %v10882_v38 = vpop.permute.xlu1 %4514 }
0x1743   : > { %5757 = vperm.xlu1 %7938, %v5752_v19   ;;  %v4516_v47 = vrot.slane %v10882_v38, 4 }
0x1746   : > { %7944 = vset.pattern.permute.xlu0 %v14264_v32  ;;  %v6161_v16 = vpop.permute.xlu1 %6160  ;;  %v5876_v32 = vld [vmem:[%s13952_s0 + $0x4] sm:$0xf] }
0x1747   : > { %4097 = vrot.lane.b32.xlu1 %v14240_v39, %s8329_s27  ;;  %6112 = vperm.xlu0 %7944, %v6107_v35   ;;  %v8333_v39 = vmov 122   ;;  %v4676_v35 = vpop.permute.xlu0 %4675 }
0x1748   : > { %7940 = vset.pattern.permute.xlu1 %v8330_v63  ;;  %v10956_v63 = vrot.slane %v4676_v35, %v8986_v7 }
0x174a   : > { %v10902_v52 = vpop.permute.xlu1 %4589 }
0x174b   : > { %4259 = vperm.xlu1 %7940, %v4247_v15   ;;  %4172 = vrot.lane.b32.xlu0 %v14242_v24, %s8331_s28  ;;  %v5483_v24 = vld [vmem:[%s13952_s0] sm:$0xf]  ;;  %v4591_v30 = vrot.slane %v10902_v52, 4  ;;  %s8342_s28 = smov 112  }
0x174c   : > { %7949 = vset.pattern.permute.xlu0 %v8332_v23  ;;  %v14271_v23 = vmov 9  }
0x174d   : > { %v4597_v27 = vmul.f32 %v4591_v30, %v10919_v8 }
0x174e   : > { %v10913_v46 = vpop.permute.xlu1 %6222 }
0x174f   : > { %4552 = vrot.lane.b32.xlu1 %v14239_v9, %s14144_s24  ;;  %4627 = vrot.lane.b32.xlu0 %v14241_v31, %s14119_s29  ;;  %v5814_v9 = vld [vmem:[%s13952_s0 + $0x4] sm:$0xf]  ;;  %v4611_v55 = vmul.f32 %v10925_v53, %v4597_v27 }
0x1750   : > { %7942 = vset.pattern.permute.xlu1 %v8333_v39  ;;  %v4518_v39 = vsel %vm4517_vm4, %v4516_v47, %v10882_v38  ;;  %v14272_v38 = vld [vmem:[#allocation153_spill] sm:$0xff]  ;;  %vm4479_vm4 = vcmask 932864  }
0x1752   : > { %v10934_v10 = vpop.permute.xlu1 %4664 }
0x1753   : > { %5426 = vperm.xlu1 %7942, %v5421_v28   ;;  %5488 = vperm.xlu0 %7949, %v5483_v24   ;;  %v4666_v62 = vrot.slane %v10934_v10, 4  ;;  %v10962_v28 = vrot.slane %v6161_v16, %v8986_v7  ;;  %v14274_v16 = vmov 39  }
0x1755   : > { %v4668_v1 = vsel %vm4667_vm3, %v4666_v62, %v10934_v10  ;;  %v5783_v10 = vld [vmem:[%s13952_s0 + $0x4] sm:$0xf]  ;;  %vm4742_vm3 = vcmask 990208  }
0x1756   : > { %v6285_v19 = vpop.permute.xlu1 %6284  ;;  %v4671_v15 = vmul.f32 %v10694_v21, %v4668_v1 }
0x1757   : > { %7943 = vset.pattern.permute.xlu1 %v14265_v0  ;;  %7952 = vset.pattern.permute.xlu0 %v14266_v45  ;;  %v10970_v45 = vld [vmem:[#allocation2 + $0x4] sm:$0xff] }
0x1758   : > { %5819 = vperm.xlu1 %7943, %v5814_v9   ;;  %6627 = vperm.xlu0 %7952, %v6622_v25   ;;  %v4685_v24 = vmul.f32 %v10956_v63, %v4671_v15  ;;  %v6248_v25 = vld [vmem:[%s13952_s0 + $0x4] sm:$0xf]  ;;  %v8339_v15 = vmov 91  }
0x175a   : > { %v10965_v9 = vpop.permute.xlu1 %4739 }
0x175c   : > { %7945 = vset.pattern.permute.xlu1 %v14267_v33  ;;  %4248 = vrot.lane.b32.xlu0 %v14244_v58, %s8334_s21  ;;  %v6310_v58 = vld [vmem:[%s13952_s0 + $0x4] sm:$0xf]  ;;  %v4521_v33 = vmul.f32 %v10694_v21, %v4518_v39  ;;  %s8340_s21 = smov 107  }
0x175d   : > { %6191 = vperm.xlu1 %7945, %v6186_v48   ;;  %7953 = vset.pattern.permute.xlu0 %v8335_v41  ;;  %v4534_v48 = vrot.slane %v4526_v44, %v8986_v7  ;;  %v6156_v41 = vmul.f32 %v10970_v45, %v14272_v38  ;;  %v6808_v44 = vld [vmem:[%s13952_s0 + $0x4] sm:$0xf]  ;;  %v14277_v38 = vmov 11  }
0x175e   : > { %v10981_v27 = vpop.permute.xlu1 %4814 }
0x1760   : > { %4862 = vperm.xlu0 %7953, %v4851_v13   ;;  %v14273_v13 = vmov 21  }
0x1761   : > { %7946 = vset.pattern.permute.xlu1 %v14268_v26  ;;  %v4522_v26 = vmul.f32 %v4516_v47, %v10919_v8 }
0x1762   : > { %6565 = vperm.xlu1 %7946, %v6560_v56   ;;  %v6170_v56 = vmul.f32 %v10962_v28, %v6156_v41 }
0x1764   : > { %7956 = vset.pattern.permute.xlu0 %v14269_v14  ;;  %v8338_v14 = vmov 126  }
0x1765   : > { %6315 = vperm.xlu0 %7956, %v6310_v58   ;;  %v4535_v58 = vmul.f32 %v4534_v48, %v4521_v33 }
0x1766   : > { %7947 = vset.pattern.permute.xlu1 %v8336_v12  ;;  %v4816_v12 = vrot.slane %v10981_v27, 4 }
0x1767   : > { %4335 = vperm.xlu1 %7947, %v4323_v5   ;;  %v10985_v5 = vpop.permute.xlu0 %4750 }
0x1769   : > { %4616 = vrot.lane.b32.xlu0 %v4611_v55, %s14090_s2  ;;  %v4536_v55 = vmul.f32 %v4534_v48, %v4522_v26  ;;  %v14276_v48 = vld [vmem:[#allocation165_spill] sm:$0xff] }
0x176a   : > { %7959 = vset.pattern.permute.xlu0 %v14270_v34  ;;  %v4818_v34 = vsel %vm4817_vm7, %v4816_v12, %v10981_v27  ;;  %v6280_v33 = vmul.f32 %v10970_v45, %v14276_v48  ;;  %vm4100_vm7 = vcmask 826368  }
0x176b   : > { %7948 = vset.pattern.permute.xlu1 %v8337_v36  ;;  %v14275_v36 = vld [vmem:[#allocation159_spill] sm:$0xff]  ;;  %v4826_v47 = vpop.permute.xlu0 %4825 }
0x176c   : > { %4787 = vperm.xlu1 %7948, %v4776_v3   ;;  %v10996_v3 = vrot.slane %v10913_v46, %v8986_v7  ;;  %v6218_v1 = vmul.f32 %v10970_v45, %v14275_v36  ;;  %v11006_v35 = vrot.slane %v4826_v47, %v8986_v7  ;;  %v4821_v46 = vmul.f32 %v10694_v21, %v4818_v34 }
0x176d   : > { %4777 = vrot.lane.b32.xlu0 %v14245_v51, %s14098_s25  ;;  %v14281_v47 = vmov 0  }
0x176e   : > { %v4835_v39 = vmul.f32 %v11006_v35, %v4821_v46 }
0x1770   : > { %7950 = vset.pattern.permute.xlu1 %v14271_v23  ;;  %v11015_v23 = vrot.slane %v6285_v19, %v8986_v7  ;;  %v4593_v19 = vsel %vm4592_vm8, %v4591_v30, %v10902_v52  ;;  %vm4251_vm8 = vcmask 859136  }
0x1771   : > { %5881 = vperm.xlu1 %7950, %v5876_v32   ;;  %6005 = vperm.xlu0 %7959, %v6000_v59   ;;  %v6232_v32 = vmul.f32 %v10996_v3, %v6218_v1  ;;  %v5545_v59 = vld [vmem:[%s13952_s0] sm:$0xf] }
0x1775   : > { %7951 = vset.pattern.permute.xlu1 %v14273_v13  ;;  %4689 = vrot.lane.b32.xlu0 %v4685_v24, %s14098_s25  ;;  %v6347_v24 = vpop.permute.xlu0 %6346  ;;  %v6294_v13 = vmul.f32 %v11015_v23, %v6280_v33  ;;  %v8343_v33 = vmov 118  }
0x1776   : > { %6253 = vperm.xlu1 %7951, %v6248_v25   ;;  %7963 = vset.pattern.permute.xlu0 %v14274_v16  ;;  %v5938_v25 = vld [vmem:[%s13952_s0 + $0x4] sm:$0xf]  ;;  %v11029_v41 = vrot.slane %v6347_v24, %v8986_v7  ;;  %v6409_v16 = vpop.permute.xlu1 %6408 }
0x1777   : > { %v11041_v30 = vrot.slane %v6409_v16, %v8986_v7  ;;  %v6372_v24 = vld [vmem:[%s13952_s0 + $0x4] sm:$0xf] }
0x1779   : > { %6174 = vrot.lane.b32.xlu0 %v6170_v56, %s14152_s22  ;;  %v14278_v56 = vld [vmem:[#allocation173_spill] sm:$0xff] }
0x177a   : > { %4539 = vrot.lane.b32.xlu1 %v4535_v58, %s14152_s22  ;;  %v6342_v26 = vmul.f32 %v10970_v45, %v14278_v56  ;;  %v6684_v58 = vld [vmem:[%s13952_s0 + $0x4] sm:$0xf]  ;;  %v14286_v56 = vmov 37  }
0x177b   : > { %7954 = vset.pattern.permute.xlu1 %v8338_v14  ;;  %v4596_v14 = vmul.f32 %v10694_v21, %v4593_v19  ;;  %v5311_v19 = vld [vmem:[%s13952_s0] sm:$0xf] }
0x177c   : > { %v6356_v52 = vmul.f32 %v11029_v41, %v6342_v26 }
0x177d   : > { %4852 = vrot.lane.b32.xlu0 %v14247_v40, %s14090_s2  ;;  %v4610_v36 = vmul.f32 %v10925_v53, %v4596_v14  ;;  %v5607_v53 = vld [vmem:[%s13952_s0 + $0x4] sm:$0xf] }
0x177e   : > { %4541 = vrot.lane.b32.xlu1 %v4536_v55, %s14152_s22  ;;  %v14279_v55 = vmov 35  }
0x1781   : > { %6813 = vperm.xlu0 %7963, %v6808_v44   ;;  %v14280_v44 = vld [vmem:[#allocation181_spill] sm:$0xff] }
0x1782   : > { %4702 = vrot.lane.b32.xlu1 %v14243_v4, %s14109_s23  ;;  %v6404_v34 = vmul.f32 %v10970_v45, %v14280_v44 }
0x1784   : > { %v6418_v1 = vmul.f32 %v11041_v30, %v6404_v34  ;;  %v14289_v34 = vld [vmem:[#allocation151_spill] sm:$0xff] }
0x1785   : > { %6236 = vrot.lane.b32.xlu0 %v6232_v32, %s14090_s2  ;;  %v4427_v32 = vld [vmem:[%s13952_s0] sm:$0xf] }
0x1786   : > { %5550 = vperm.xlu1 %7954, %v5545_v59   ;;  %7964 = vset.pattern.permute.xlu0 %v8339_v15  ;;  %v5328_v59 = vld [vmem:[%s13952_s0] sm:$0xf] }
0x1789   : > { %4839 = vrot.lane.b32.xlu0 %v4835_v39, %s14119_s29  ;;  %v8341_v39 = vmov 119  }
0x178a   : > { %7955 = vset.pattern.permute.xlu1 %v14277_v38  ;;  %v6746_v38 = vld [vmem:[%s13952_s0 + $0x4] sm:$0xf] }
0x178b   : > { %5943 = vperm.xlu1 %7955, %v5938_v25   ;;  %v14284_v25 = vmov 25  }
0x178d   : > { %6298 = vrot.lane.b32.xlu0 %v6294_v13, %s14098_s25  ;;  %v4672_v13 = vmul.f32 %v4666_v62, %v10919_v8  ;;  %v11096_v62 = vld [vmem:[#allocation2 + $0xc] sm:$0xf] }
0x178f   : > { %7957 = vset.pattern.permute.xlu1 %v14279_v55  ;;  %v4741_v55 = vrot.slane %v10965_v9, 4 }
0x1790   : > { %6689 = vperm.xlu1 %7957, %v6684_v58  }
0x1791   : > { %6360 = vrot.lane.b32.xlu0 %v6356_v52, %s14109_s23  ;;  %v4686_v52 = vmul.f32 %v10956_v63, %v4672_v13 }
0x1794   : > { %4614 = vrot.lane.b32.xlu1 %v4610_v36, %s14090_s2  ;;  %v6157_v36 = vmul.f32 %v11096_v62, %v14289_v34 }
0x1795   : > { %6422 = vrot.lane.b32.xlu0 %v6418_v1, %s14119_s29  ;;  %7958 = vset.pattern.permute.xlu1 %v14281_v47  ;;  %v11055_v46 = vpop.permute.xlu0 %4046  ;;  %v11071_v48 = vpop.permute.xlu1 %4048  ;;  %v14290_v1 = vmov 6  }
0x1796   : > { %14282 = vst [vmem:[#allocation179_spill] sm:$0xff] %v11055_v46  ;;  %14285 = vst [vmem:[#allocation199_spill] sm:$0xff] %v11071_v48 }
0x1798   : > { %4324 = vrot.lane.b32.xlu1 %v14246_v43, %s8340_s21  ;;  %s8360_s21 = smov 106  }
0x1799   : > { %4439 = vperm.xlu0 %7964, %v4427_v32   ;;  %v11064_v15 = vpop.permute.xlu0 %4059 }
0x179a   : > { %14283 = vst [vmem:[#allocation192_spill] sm:$0xff] %v11064_v15  ;;  %v13831_v43 = vrot.slane %v11064_v15, 4 }
0x179c   : > { %5612 = vperm.xlu1 %7958, %v5607_v53   ;;  %v4063_v16 = vsel %vm4062_vm9, %v13831_v43, %v11064_v15  ;;  %v14291_v53 = vmov 27   ;;  %vm4327_vm9 = vcmask 875520  }
0x179d   : > { %7967 = vset.pattern.permute.xlu0 %v8341_v39  ;;  %v4066_v58 = vmul.f32 %v10694_v21, %v4063_v16  ;;  %v4743_v39 = vsel %vm4742_vm3, %v4741_v55, %v10965_v9  ;;  %v5099_v9 = vld [vmem:[%s13952_s0] sm:$0xf]  ;;  %vm4175_vm3 = vcmask 842752  }
0x179e   : > { %5333 = vperm.xlu0 %7967, %v5328_v59   ;;  %v6171_v59 = vmul.f32 %v10962_v28, %v6157_v36  ;;  %v8344_v28 = vmov 111  }
0x17a0   : > { %7960 = vset.pattern.permute.xlu1 %v14284_v25  ;;  %v6434_v25 = vld [vmem:[%s13952_s0 + $0x4] sm:$0xf] }
0x17a1   : > { %6377 = vperm.xlu1 %7960, %v6372_v24  }
0x17a2   : > { %4428 = vrot.lane.b32.xlu0 %v14145_v57, %s8342_s28 }
0x17a3   : > { %7971 = vset.pattern.permute.xlu0 %v8343_v33  ;;  %v4759_v33 = vrot.slane %v10985_v5, %v8986_v7  ;;  %v6512_v5 = vld [vmem:[%s13952_s0 + $0x4] sm:$0xf] }
0x17a5   : > { %7961 = vset.pattern.permute.xlu1 %v14286_v56 }
0x17a6   : > { %v4071_v26 = vpop.permute.xlu1 %4070  ;;  %6751 = vperm.xlu1 %7961, %v6746_v38   ;;  %5316 = vperm.xlu0 %7971, %v5311_v19   ;;  %v4746_v38 = vmul.f32 %v10694_v21, %v4743_v39  ;;  %v14295_v39 = vld [vmem:[#allocation148_spill] sm:$0xff] }
0x17a7   : > { %v11090_v14 = vrot.slane %v4071_v26, %v8986_v7  ;;  %v14293_v26 = vmov 29  }
0x17a8   : > { %v4760_v13 = vmul.f32 %v4759_v33, %v4746_v38 }
0x17a9   : > { %14287 = vst [vmem:[#allocation197_spill] sm:$0xff] %v11090_v14  ;;  %v11100_v44 = vmul.f32 %v11090_v14, %v4066_v58  ;;  %v8345_v58 = vmov 84  }
0x17aa   : > { %4691 = vrot.lane.b32.xlu1 %v4686_v52, %s14098_s25  ;;  %7974 = vset.pattern.permute.xlu0 %v14290_v1  ;;  %v4488_v63 = vpop.permute.xlu0 %4487 }
0x17ab   : > { %14288 = vst [vmem:[#allocation205_spill] sm:$0xff] %v11100_v44  ;;  %v11106_v32 = vpop.permute.xlu1 %4108  ;;  %5788 = vperm.xlu0 %7974, %v5783_v10   ;;  %7962 = vset.pattern.permute.xlu1 %v14291_v53  ;;  %v14294_v10 = vld [vmem:[#allocation157_spill] sm:$0xff]  ;;  %v4496_v53 = vrot.slane %v4488_v63, %v8986_v7 }
0x17ae   : > { %6176 = vrot.lane.b32.xlu1 %v6171_v59, %s14152_s22 }
0x17af   : > { %4135 = vrot.lane.b32.xlu0 %v14241_v31, %s14292_s3  ;;  %v11114_v24 = vpop.permute.xlu0 %4562  ;;  %v4747_v31 = vmul.f32 %v4741_v55, %v10919_v8  ;;  %v6219_v55 = vmul.f32 %v11096_v62, %v14294_v10 }
0x17b0   : > { %v4464_v19 = vpop.permute.xlu1 %4463  ;;  %7978 = vset.pattern.permute.xlu0 %v8344_v28 }
0x17b1   : > { %v4761_v52 = vmul.f32 %v4759_v33, %v4747_v31  ;;  %v6233_v28 = vmul.f32 %v10996_v3, %v6219_v55  ;;  %v4822_v33 = vmul.f32 %v4816_v12, %v10919_v8 }
0x17b2   : > { %6439 = vperm.xlu1 %7962, %v6434_v25   ;;  %v6126_v25 = vmul.f32 %v11096_v62, %v14295_v39  ;;  %v11176_v39 = vld [vmem:[#allocation2 + $0xc] sm:$0xf] }
0x17b3   : > { %5104 = vperm.xlu0 %7978, %v5099_v9   ;;  %v4836_v55 = vmul.f32 %v11006_v35, %v4822_v33 }
0x17b4   : > { %v11126_v16 = vpop.permute.xlu0 %4637 }
0x17b5   : > { %v11128_v56 = vpop.permute.xlu1 %4183 }
0x17b6   : > { %4764 = vrot.lane.b32.xlu1 %v4760_v13, %s14109_s23  ;;  %v8346_v13 = vmov 90  }
0x17b7   : > { %7981 = vset.pattern.permute.xlu0 %v14293_v26  ;;  %7965 = vset.pattern.permute.xlu1 %v8345_v58 }
0x17b8   : > { %6517 = vperm.xlu0 %7981, %v6512_v5  }
0x17b9   : > { %v4477_v34 = vpop.permute.xlu1 %4476  ;;  %v6130_v36 = vpop.permute.xlu0 %6129 }
0x17ba   : > { %v4478_v59 = vrot.slane %v4477_v34, 4  ;;  %v11141_v38 = vrot.slane %v6130_v36, %v8986_v7  ;;  %4766 = vrot.lane.b32.xlu1 %v4761_v52, %s14109_s23  ;;  %v11162_v52 = vrot.slane %v4464_v19, %v8986_v7  ;;  %v4361_v36 = vld [vmem:[%s13952_s0] sm:$0xf] }
0x17bc   : > { %v4480_v9 = vsel %vm4479_vm4, %v4478_v59, %v4477_v34  ;;  %v4484_v31 = vmul.f32 %v4478_v59, %v10919_v8  ;;  %v11150_v63 = vmul.f32 %v11141_v38, %v6126_v25  ;;  %7983 = vset.pattern.permute.xlu0 %v8346_v13  ;;  %v14296_v59 = vld [vmem:[#allocation163_spill] sm:$0xff]  ;;  %vm4455_vm4 = vcmask 924672  }
0x17bd   : > { %v4483_v5 = vmul.f32 %v10694_v21, %v4480_v9  ;;  %v11153_v26 = vpop.permute.xlu1 %5364  ;;  %v11155_v58 = vpop.permute.xlu0 %4452  ;;  %v14299_v13 = vld [vmem:[#allocation171_spill] sm:$0xff] }
0x17be   : > { %v13832_v3 = vrot.slane %v11155_v58, 4  ;;  %6238 = vrot.lane.b32.xlu1 %v6233_v28, %s14090_s2  ;;  %v4498_v27 = vmul.f32 %v4496_v53, %v4484_v31  ;;  %v14298_v28 = vld [vmem:[#allocation90_spill] sm:$0xff] }
0x17bf   : > { %v11159_v12 = vmul.f32 %v4496_v53, %v4483_v5  ;;  %v6281_v53 = vmul.f32 %v11096_v62, %v14296_v59  ;;  %v5754_v35 = vmul.f32 %v11176_v39, %v14298_v28  ;;  %v6343_v5 = vmul.f32 %v11096_v62, %v14299_v13 }
0x17c0   : > { %v4460_v10 = vmul.f32 %v13832_v3, %v10919_v8  ;;  %4503 = vrot.lane.b32.xlu0 %v4498_v27, %s14152_s22  ;;  %v14301_v28 = vmov 10   ;;  %v14303_v3 = vld [vmem:[#allocation180_spill] sm:$0xff] }
0x17c1   : > { %v11169_v34 = vpop.permute.xlu0 %4712  ;;  %v6295_v9 = vmul.f32 %v11015_v23, %v6281_v53  ;;  %v6357_v53 = vmul.f32 %v11029_v41, %v6343_v5 }
0x17c2   : > { %v5758_v19 = vpop.permute.xlu1 %5757  ;;  %4841 = vrot.lane.b32.xlu1 %v4836_v55, %s14119_s29  ;;  %v11180_v25 = vmul.f32 %v11162_v52, %v4460_v10  ;;  %v5907_v55 = vld [vmem:[%s13952_s0 + $0x4] sm:$0xf] }
0x17c3   : > { %v11185_v33 = vrot.slane %v5758_v19, %v8986_v7  ;;  %v14300_v19 = vld [vmem:[#allocation183_spill] sm:$0xff] }
0x17c4   : > { %14297 = vst [vmem:[#allocation203_spill] sm:$0xff] %v11180_v25  ;;  %4373 = vperm.xlu0 %7983, %v4361_v36   ;;  %v6109_v23 = vmul.f32 %v11096_v62, %v14300_v19  ;;  %v6405_v19 = vmul.f32 %v11096_v62, %v14303_v3  ;;  %v8347_v3 = vmov 115  }
0x17c5   : > { %v11189_v31 = vmul.f32 %v11185_v33, %v5754_v35  ;;  %v4117_v35 = vrot.slane %v11106_v32, %v8986_v7 }
0x17c6   : > { %v4098_v27 = vpop.permute.xlu1 %4097  ;;  %6300 = vrot.lane.b32.xlu1 %v6295_v9, %s14098_s25  ;;  %v6113_v10 = vpop.permute.xlu0 %6112  ;;  %v6419_v32 = vmul.f32 %v11041_v30, %v6405_v19  ;;  %v4134_v30 = vld [vmem:[%s13952_s0] sm:$0xf] }
0x17c7   : > { %v4099_v59 = vrot.slane %v4098_v27, 4  ;;  %v11200_v36 = vrot.slane %v6113_v10, %v8986_v7 }
0x17c8   : > { %7986 = vset.pattern.permute.xlu0 %v14301_v28 }
0x17c9   : > { %v4101_v9 = vsel %vm4100_vm7, %v4099_v59, %v4098_v27  ;;  %v4105_v13 = vmul.f32 %v4099_v59, %v10775_v49  ;;  %v11208_v43 = vmul.f32 %v11200_v36, %v6109_v23  ;;  %5912 = vperm.xlu0 %7986, %v5907_v55   ;;  %v4646_v59 = vrot.slane %v11126_v16, %v8986_v7 }
0x17ca   : > { %v4104_v10 = vmul.f32 %v10694_v21, %v4101_v9  ;;  %v11213_v1 = vpop.permute.xlu1 %4259  ;;  %6362 = vrot.lane.b32.xlu1 %v6357_v53, %s14109_s23  ;;  %v11216_v41 = vpop.permute.xlu0 %4172  ;;  %v4571_v21 = vrot.slane %v11114_v24, %v8986_v7  ;;  %v14304_v24 = vld [vmem:[#allocation73_spill] sm:$0xff]  ;;  %vm4365_vm7 = vcmask 883712  }
0x17cb   : > { %14302 = vst [vmem:[#allocation211_spill] sm:$0xff] %v11208_v43  ;;  %v4119_v5 = vmul.f32 %v4117_v35, %v4105_v13  ;;  %v11233_v13 = vld [vmem:[#allocation2] sm:$0xff] }
0x17cc   : > { %v11219_v27 = vmul.f32 %v4117_v35, %v4104_v10  ;;  %v5422_v10 = vmul.f32 %v10970_v45, %v14304_v24 }
0x17cd   : > { %4124 = vrot.lane.b32.xlu0 %v4119_v5, %s14090_s2  ;;  %v11238_v5 = vld [vmem:[#allocation2 + $0xc] sm:$0xf] }
0x17ce   : > { %v4553_v49 = vpop.permute.xlu1 %4552  ;;  %6424 = vrot.lane.b32.xlu1 %v6419_v32, %s14119_s29  ;;  %v4628_v55 = vpop.permute.xlu0 %4627  ;;  %7988 = vset.pattern.permute.xlu0 %v8347_v3  ;;  %v14305_v32 = vld [vmem:[#allocation76_spill] sm:$0xff] }
0x17cf   : > { %v4554_v23 = vrot.slane %v4553_v49, 4  ;;  %v4629_v53 = vrot.slane %v4628_v55, 4  ;;  %v5485_v3 = vmul.f32 %v11238_v5, %v14305_v32 }
0x17d1   : > { %v4555_v28 = vsel %vm1453_vm10, %v4554_v23, %v4553_v49  ;;  %v4559_v35 = vmul.f32 %v4554_v23, %v10919_v8  ;;  %v4634_v9 = vmul.f32 %v4629_v53, %v10919_v8  ;;  %v4630_v2 = vsel %vm1358_vm1, %v4629_v53, %v4628_v55  ;;  %v6715_v55 = vld [vmem:[%s13952_s0 + $0x4] sm:$0xf] }
0x17d2   : > { %v4558_v19 = vmul.f32 %v11233_v13, %v4555_v28  ;;  %v5427_v16 = vpop.permute.xlu1 %5426  ;;  %4145 = vperm.xlu1 %7965, %v4134_v30   ;;  %v5489_v18 = vpop.permute.xlu0 %5488  ;;  %v4979_v30 = vld [vmem:[%s13952_s0] sm:$0xf]  ;;  %v4633_v53 = vmul.f32 %v11233_v13, %v4630_v2 }
0x17d3   : > { %v11243_v49 = vrot.slane %v5427_v16, %v8986_v7  ;;  %v11246_v23 = vrot.slane %v5489_v18, %v8986_v7  ;;  %v4573_v0 = vmul.f32 %v4571_v21, %v4559_v35  ;;  %v11248_v57 = vmul.f32 %v4646_v59, %v4634_v9  ;;  %v5219_v18 = vld [vmem:[%s13952_s0] sm:$0xf]  ;;  %v11265_v35 = vld [vmem:[#allocation2 + $0xc] sm:$0xf] }
0x17d4   : > { %v11250_v28 = vmul.f32 %v4571_v21, %v4558_v19  ;;  %v8348_v16 = vmov 107   ;;  %v14307_v19 = vld [vmem:[#allocation95_spill] sm:$0xff]  ;;  %v4209_v2 = vld [vmem:[%s13952_s0] sm:$0xf] }
0x17d5   : > { %v11256_v24 = vmul.f32 %v11243_v49, %v5422_v10  ;;  %v11259_v32 = vmul.f32 %v11246_v23, %v5485_v3  ;;  %4578 = vrot.lane.b32.xlu0 %v4573_v0, %s14090_s2  ;;  %v5815_v10 = vmul.f32 %v10970_v45, %v14307_v19  ;;  %v14308_v3 = vld [vmem:[#allocation193_spill] sm:$0xff] }
0x17d6   : > { %7966 = vset.pattern.permute.xlu1 %v8348_v16  ;;  %v6624_v0 = vmul.f32 %v11265_v35, %v14308_v3 }
0x17d7   : > { %14306 = vst [vmem:[#allocation209_spill] sm:$0xff] %v11259_v32  ;;  %v5820_v21 = vpop.permute.xlu1 %5819  ;;  %4984 = vperm.xlu1 %7966, %v4979_v30   ;;  %v6628_v9 = vpop.permute.xlu0 %6627  ;;  %v5721_v30 = vld [vmem:[%s13952_s0 + $0x4] sm:$0xf]  ;;  %v8355_v32 = vmov 123  }
0x17d8   : > { %v11270_v29 = vrot.slane %v5820_v21, %v8986_v7  ;;  %v11275_v16 = vrot.slane %v6628_v9, %v8986_v7  ;;  %v14310_v21 = vmov 4  }
0x17d9   : > { %5224 = vperm.xlu0 %7988, %v5219_v18  }
0x17da   : > { %v11282_v54 = vmul.f32 %v11270_v29, %v5815_v10  ;;  %v11285_v19 = vmul.f32 %v11275_v16, %v6624_v0  ;;  %v14311_v10 = vld [vmem:[#allocation155_spill] sm:$0xff] }
0x17db   : > { %7968 = vset.pattern.permute.xlu1 %v14310_v21  ;;  %v11288_v3 = vpop.permute.xlu0 %4248  ;;  %v6187_v17 = vmul.f32 %v10970_v45, %v14311_v10  ;;  %v14312_v21 = vmov 36  }
0x17dc   : > { %14309 = vst [vmem:[#allocation18_spill] sm:$0xff] %v11285_v19  ;;  %v13839_v18 = vrot.slane %v11288_v3, 4  ;;  %v6192_v9 = vpop.permute.xlu1 %6191  ;;  %5726 = vperm.xlu1 %7968, %v5721_v30   ;;  %v11309_v30 = vrot.slane %v11213_v1, %v8986_v7  ;;  %v14314_v1 = vld [vmem:[#allocation189_spill] sm:$0xff] }
0x17dd   : > { %v11298_v0 = vrot.slane %v6192_v9, %v8986_v7  ;;  %7991 = vset.pattern.permute.xlu0 %v14312_v21  ;;  %v11319_v21 = vrot.slane %v11153_v26, %v8986_v7  ;;  %v5039_v26 = vld [vmem:[%s13952_s0] sm:$0xf] }
0x17de   : > { %v4252_v50 = vsel %vm4251_vm8, %v13839_v18, %v11288_v3  ;;  %6720 = vperm.xlu0 %7991, %v6715_v55   ;;  %v4647_v55 = vmul.f32 %v4646_v59, %v4633_v53  ;;  %v8349_v18 = vmov 86   ;;  %v14316_v59 = vmov 14  }
0x17df   : > { %v4255_v10 = vmul.f32 %v11233_v13, %v4252_v50  ;;  %v11313_v9 = vmul.f32 %v11298_v0, %v6187_v17  ;;  %v11315_v11 = vpop.permute.xlu0 %4862  ;;  %v6561_v50 = vmul.f32 %v10970_v45, %v14314_v1  ;;  %v5360_v17 = vmul.f32 %v10970_v45, %v14315_v60 }
0x17e0   : > { %7969 = vset.pattern.permute.xlu1 %v8349_v18  ;;  %v8350_v1 = vmov 109   ;;  %vm4213_vm8 = vcmask 850944  }
0x17e1   : > { %14313 = vst [vmem:[#allocation19_spill] sm:$0xff] %v11313_v9  ;;  %v11322_v20 = vmul.f32 %v11309_v30, %v4255_v10  ;;  %v6566_v42 = vpop.permute.xlu1 %6565  ;;  %4221 = vperm.xlu1 %7969, %v4209_v2   ;;  %v5374_v53 = vmul.f32 %v11319_v21, %v5360_v17  ;;  %v14318_v10 = vld [vmem:[#allocation167_spill] sm:$0xff] }
0x17e2   : > { %v11329_v22 = vrot.slane %v6566_v42, %v8986_v7  ;;  %4651 = vrot.lane.b32.xlu0 %v4647_v55, %s14098_s25  ;;  %v6312_v60 = vmul.f32 %v11096_v62, %v14318_v10  ;;  %v14319_v55 = vld [vmem:[#allocation91_spill] sm:$0xff]  ;;  %v14321_v10 = vld [vmem:[#allocation149_spill] sm:$0xff] }
0x17e3   : > { %7993 = vset.pattern.permute.xlu0 %v14316_v59  ;;  %v5753_v6 = vmul.f32 %v10970_v45, %v14319_v55  ;;  %v8351_v55 = vmov 121  }
0x17e4   : > { %v11338_v18 = vmul.f32 %v11329_v22, %v6561_v50  ;;  %v6316_v2 = vpop.permute.xlu0 %6315 }
0x17e5   : > { %v11343_v42 = vrot.slane %v6316_v2, %v8986_v7  ;;  %7970 = vset.pattern.permute.xlu1 %v8350_v1  ;;  %v5767_v17 = vmul.f32 %v11185_v33, %v5753_v6  ;;  %v5390_v2 = vld [vmem:[%s13952_s0] sm:$0xf]  ;;  %v6125_v1 = vmul.f32 %v10970_v45, %v14321_v10  ;;  %v5704_v33 = vld [vmem:[%s13952_s0 + $0x4] sm:$0xf] }
0x17e6   : > { %14317 = vst [vmem:[#allocation20_spill] sm:$0xff] %v11338_v18  ;;  %v11347_v61 = vpop.permute.xlu1 %4335  ;;  %5044 = vperm.xlu1 %7970, %v5039_v26   ;;  %5378 = vrot.lane.b32.xlu0 %v5374_v53, %s14152_s22  ;;  %v14345_v18 = vld [vmem:[#allocation198_spill] sm:$0xff] }
0x17e7   : > { %v11351_v50 = vmul.f32 %v11343_v42, %v6312_v60  ;;  %v6139_v53 = vmul.f32 %v11141_v38, %v6125_v1  ;;  %v14323_v38 = vld [vmem:[#allocation98_spill] sm:$0xff]  ;;  %v6686_v9 = vmul.f32 %v11265_v35, %v14345_v18  ;;  %v14347_v18 = vld [vmem:[#allocation188_spill] sm:$0xff] }
0x17e8   : > { %v11354_v59 = vpop.permute.xlu0 %4616  ;;  %v5878_v1 = vmul.f32 %v11176_v39, %v14323_v38 }
0x17e9   : > { %14320 = vst [vmem:[#allocation21_spill] sm:$0xff] %v11351_v50 }
0x17ea   : > { %7972 = vset.pattern.permute.xlu1 %v8351_v55  ;;  %5771 = vrot.lane.b32.xlu0 %v5767_v17, %s14152_s22 }
0x17eb   : > { %v4788_v26 = vpop.permute.xlu1 %4787  ;;  %5395 = vperm.xlu1 %7972, %v5390_v2   ;;  %v14322_v2 = vmov 3  }
0x17ec   : > { %v11363_v60 = vpop.permute.xlu0 %4777  ;;  %v11371_v10 = vrot.slane %v4788_v26, %v8986_v7 }
0x17ed   : > { %v13848_v6 = vrot.slane %v11363_v60, 4 }
0x17ee   : > { %6143 = vrot.lane.b32.xlu0 %v6139_v53, %s14152_s22  ;;  %v6002_v53 = vmul.f32 %v11176_v39, %v14324_v37  ;;  %v6031_v37 = vld [vmem:[%s13952_s0 + $0x4] sm:$0xf] }
0x17ef   : > { %v4784_v17 = vmul.f32 %v13848_v6, %v10919_v8  ;;  %7973 = vset.pattern.permute.xlu1 %v14322_v2  ;;  %v14329_v6 = vmov 15  }
0x17f0   : > { %v5882_v55 = vpop.permute.xlu1 %5881  ;;  %5709 = vperm.xlu1 %7973, %v5704_v33   ;;  %v6006_v46 = vpop.permute.xlu0 %6005  ;;  %v6090_v33 = vld [vmem:[%s13952_s0 + $0x4] sm:$0xf] }
0x17f1   : > { %v11380_v48 = vrot.slane %v5882_v55, %v8986_v7  ;;  %v11385_v26 = vrot.slane %v6006_v46, %v8986_v7  ;;  %v11388_v47 = vmul.f32 %v11371_v10, %v4784_v17  ;;  %v11403_v46 = vld [vmem:[#allocation2 + $0x8] sm:$0xf]  ;;  %v14328_v17 = vrot.slane %v11288_v3, 4 }
0x17f2   : > { %4362 = vrot.lane.b32.xlu0 %v14247_v40, %s8352_s1 }
0x17f3   : > { %14325 = vst [vmem:[#allocation22_spill] sm:$0xff] %v11388_v47  ;;  %v11395_v38 = vmul.f32 %v11380_v48, %v5878_v1  ;;  %v11398_v55 = vmul.f32 %v11385_v26, %v6002_v53  ;;  %v4256_v40 = vmul.f32 %v11403_v46, %v14328_v17  ;;  %v14330_v1 = vld [vmem:[#allocation160_spill] sm:$0xff] }
0x17f4   : > { %7975 = vset.pattern.permute.xlu1 %v14329_v6  ;;  %v11409_v2 = vpop.permute.xlu0 %4689  ;;  %v6250_v53 = vmul.f32 %v11096_v62, %v14330_v1  ;;  %v4285_v1 = vld [vmem:[%s13952_s0] sm:$0xf] }
0x17f5   : > { %14326 = vst [vmem:[#allocation24_spill] sm:$0xff] %v11395_v38  ;;  %14327 = vst [vmem:[#allocation25_spill] sm:$0xff] %v11398_v55  ;;  %v6254_v44 = vpop.permute.xlu1 %6253  ;;  %6095 = vperm.xlu1 %7975, %v6090_v33   ;;  %v6529_v55 = vld [vmem:[%s13952_s0 + $0x4] sm:$0xf]  ;;  %v4270_v6 = vmul.f32 %v11309_v30, %v4256_v40  ;;  %v14332_v33 = vmov 30  }
0x17f6   : > { %v11414_v43 = vrot.slane %v6254_v44, %v8986_v7  ;;  %6036 = vperm.xlu0 %7993, %v6031_v37   ;;  %v8353_v44 = vmov 106  }
0x17f8   : > { %v11420_v3 = vmul.f32 %v11414_v43, %v6250_v53  ;;  %v11422_v17 = vpop.permute.xlu0 %6174  ;;  %v11436_v53 = vrot.slane %v11315_v11, %v8986_v7 }
0x17f9   : > { %v11425_v50 = vpop.permute.xlu1 %4539  ;;  %7976 = vset.pattern.permute.xlu1 %v14332_v33  ;;  %v8354_v33 = vmov 88  }
0x17fa   : > { %14331 = vst [vmem:[#allocation26_spill] sm:$0xff] %v11420_v3  ;;  %6534 = vperm.xlu1 %7976, %v6529_v55   ;;  %4275 = vrot.lane.b32.xlu0 %v4270_v6, %s14109_s23  ;;  %v5452_v3 = vld [vmem:[%s13952_s0] sm:$0xf] }
0x17fb   : > { %7996 = vset.pattern.permute.xlu0 %v8353_v44  ;;  %v14333_v44 = vld [vmem:[#allocation210_spill] sm:$0xff] }
0x17fc   : > { %v11429_v37 = vpop.permute.xlu0 %4852  ;;  %v6810_v25 = vmul.f32 %v11265_v35, %v14333_v44 }
0x17fd   : > { %v13849_v30 = vrot.slane %v11429_v37, 4  ;;  %v11439_v40 = vpop.permute.xlu1 %4541 }
0x17fe   : > { %7977 = vset.pattern.permute.xlu1 %v8354_v33  ;;  %v4721_v33 = vrot.slane %v11169_v34, %v8986_v7 }
0x17ff   : > { %v4859_v55 = vmul.f32 %v13849_v30, %v10919_v8  ;;  %4297 = vperm.xlu1 %7977, %v4285_v1  }
0x1800   : > { %v6814_v6 = vpop.permute.xlu0 %6813 }
0x1801   : > { %v11447_v19 = vrot.slane %v6814_v6, %v8986_v7  ;;  %v4703_v11 = vpop.permute.xlu1 %4702  ;;  %v11453_v38 = vmul.f32 %v11436_v53, %v4859_v55 }
0x1802   : > { %v4704_v30 = vrot.slane %v4703_v11, 4 }
0x1803   : > { %14334 = vst [vmem:[#allocation27_spill] sm:$0xff] %v11453_v38  ;;  %v11458_v1 = vmul.f32 %v11447_v19, %v6810_v25  ;;  %7979 = vset.pattern.permute.xlu1 %v8355_v32  ;;  %v14336_v38 = vld [vmem:[#allocation81_spill] sm:$0xff]  ;;  %v5845_v32 = vld [vmem:[%s13952_s0 + $0x4] sm:$0xf] }
0x1804   : > { %v4705_v6 = vsel %vm1263_vm14, %v4704_v30, %v4703_v11  ;;  %v4709_v44 = vmul.f32 %v4704_v30, %v10919_v8  ;;  %5457 = vperm.xlu1 %7979, %v5452_v3   ;;  %v11462_v47 = vpop.permute.xlu0 %6236  ;;  %v5547_v15 = vmul.f32 %v11238_v5, %v14336_v38  ;;  %v14337_v8 = vld [vmem:[#allocation72_spill] sm:$0xff] }
0x1805   : > { %14335 = vst [vmem:[#allocation28_spill] sm:$0xff] %v11458_v1  ;;  %v4708_v14 = vmul.f32 %v11233_v13, %v4705_v6  ;;  %v5551_v55 = vpop.permute.xlu1 %5550  ;;  %v5423_v3 = vmul.f32 %v11238_v5, %v14337_v8  ;;  %v14339_v6 = vmov 8   ;;  %v14340_v1 = vld [vmem:[#allocation102_spill] sm:$0xff] }
0x1806   : > { %v11468_v34 = vrot.slane %v5551_v55, %v8986_v7  ;;  %v4723_v25 = vmul.f32 %v4721_v33, %v4709_v44  ;;  %v14341_v8 = vld [vmem:[#allocation94_spill] sm:$0xff] }
0x1807   : > { %v11473_v11 = vmul.f32 %v4721_v33, %v4708_v14  ;;  %v5437_v44 = vmul.f32 %v11243_v49, %v5423_v3  ;;  %v5940_v14 = vmul.f32 %v11176_v39, %v14340_v1 }
0x1808   : > { %v11478_v30 = vmul.f32 %v11468_v34, %v5547_v15  ;;  %7980 = vset.pattern.permute.xlu1 %v14339_v6  ;;  %4728 = vrot.lane.b32.xlu0 %v4723_v25, %s14109_s23  ;;  %v11482_v38 = vpop.permute.xlu0 %4839  ;;  %v6591_v15 = vld [vmem:[%s13952_s0 + $0x4] sm:$0xf]  ;;  %v5816_v6 = vmul.f32 %v11176_v39, %v14341_v8 }
0x1809   : > { %5850 = vperm.xlu1 %7980, %v5845_v32   ;;  %v14343_v32 = vmov 32  }
0x180a   : > { %14338 = vst [vmem:[#allocation29_spill] sm:$0xff] %v11478_v30  ;;  %v5944_v55 = vpop.permute.xlu1 %5943  ;;  %v5830_v1 = vmul.f32 %v11270_v29, %v5816_v6  ;;  %v6562_v6 = vmul.f32 %v11265_v35, %v14347_v18 }
0x180b   : > { %v11488_v33 = vrot.slane %v5944_v55, %v8986_v7  ;;  %v14344_v55 = vld [vmem:[#allocation154_spill] sm:$0xff] }
0x180c   : > { %5442 = vrot.lane.b32.xlu0 %v5437_v44, %s14090_s2  ;;  %v11496_v25 = vpop.permute.xlu0 %6298  ;;  %v6188_v30 = vmul.f32 %v11096_v62, %v14344_v55  ;;  %v4344_v55 = vrot.slane %v11347_v61, %v8986_v7  ;;  %v5514_v61 = vld [vmem:[%s13952_s0] sm:$0xf] }
0x180d   : > { %v11499_v49 = vmul.f32 %v11488_v33, %v5940_v14  ;;  %7982 = vset.pattern.permute.xlu1 %v14343_v32 }
0x180e   : > { %6596 = vperm.xlu1 %7982, %v6591_v15   ;;  %v6202_v14 = vmul.f32 %v11298_v0, %v6188_v30  ;;  %v8356_v15 = vmov 113  }
0x180f   : > { %14342 = vst [vmem:[#allocation30_spill] sm:$0xff] %v11499_v49  ;;  %v6690_v3 = vpop.permute.xlu1 %6689 }
0x1810   : > { %v11508_v8 = vrot.slane %v6690_v3, %v8986_v7  ;;  %5835 = vrot.lane.b32.xlu0 %v5830_v1, %s14090_s2  ;;  %v11511_v44 = vpop.permute.xlu0 %6360  ;;  %v6576_v3 = vmul.f32 %v11329_v22, %v6562_v6  ;;  %v14349_v22 = vrot.slane %v11363_v60, 4 }
0x1812   : > { %v11515_v32 = vmul.f32 %v11508_v8, %v6686_v9  ;;  %4501 = vrot.lane.b32.xlu1 %v11159_v12, %s14152_s22  ;;  %v5159_v12 = vld [vmem:[%s13952_s0] sm:$0xf] }
0x1813   : > { %v11519_v29 = vpop.permute.xlu1 %4614  ;;  %7984 = vset.pattern.permute.xlu1 %v8356_v15 }
0x1814   : > { %14346 = vst [vmem:[#allocation153_spill] sm:$0xff] %v11515_v32  ;;  %6207 = vrot.lane.b32.xlu0 %v6202_v14, %s14090_s2  ;;  %v11524_v1 = vpop.permute.xlu0 %6422  ;;  %v4780_v14 = vsel %vm1168_vm13, %v14349_v22, %v11363_v60  ;;  %v14350_v32 = vld [vmem:[#allocation85_spill] sm:$0xff]  ;;  %v14352_v22 = vld [vmem:[#allocation66_spill] sm:$0xff] }
0x1815   : > { %v4783_v60 = vmul.f32 %v11233_v13, %v4780_v14 }
0x1816   : > { %4210 = vrot.lane.b32.xlu1 %v14243_v4, %s8357_s4 }
0x1817   : > { %v4325_v0 = vpop.permute.xlu1 %4324 }
0x1818   : > { %v4326_v9 = vrot.slane %v4325_v0, 4  ;;  %6581 = vrot.lane.b32.xlu0 %v6576_v3, %s14152_s22  ;;  %v11532_v30 = vpop.permute.xlu0 %4439  ;;  %v5609_v3 = vmul.f32 %v11238_v5, %v14350_v32 }
0x1819   : > { %14348 = vst [vmem:[#allocation159_spill] sm:$0xff] %v11532_v30 }
0x181a   : > { %v4328_v4 = vsel %vm4327_vm9, %v4326_v9, %v4325_v0  ;;  %v4332_v15 = vmul.f32 %v11403_v46, %v4326_v9  ;;  %5164 = vperm.xlu1 %7984, %v5159_v12   ;;  %vm3962_vm9 = vcmask 793600  }
0x181b   : > { %v4331_v18 = vmul.f32 %v11233_v13, %v4328_v4  ;;  %v5613_v6 = vpop.permute.xlu1 %5612  ;;  %v5330_v4 = vmul.f32 %v11238_v5, %v14352_v22 }
0x181c   : > { %v11545_v30 = vrot.slane %v5613_v6, %v8986_v7  ;;  %v11550_v49 = vmul.f32 %v4344_v55, %v4332_v15  ;;  %v8358_v6 = vmov 125  }
0x181d   : > { %v4345_v0 = vmul.f32 %v4344_v55, %v4331_v18  ;;  %v5334_v9 = vpop.permute.xlu0 %5333  ;;  %v4797_v55 = vmul.f32 %v11371_v10, %v4783_v60  ;;  %v14354_v18 = vld [vmem:[#allocation175_spill] sm:$0xff] }
0x181e   : > { %v11554_v12 = vmul.f32 %v11545_v30, %v5609_v3  ;;  %v11559_v32 = vrot.slane %v5334_v9, %v8986_v7  ;;  %7985 = vset.pattern.permute.xlu1 %v8358_v6  ;;  %v6374_v3 = vmul.f32 %v11096_v62, %v14354_v18  ;;  %v14356_v9 = vld [vmem:[#allocation78_spill] sm:$0xff]  ;;  %v14358_v6 = vmov 34   ;;  %v14360_v18 = vld [vmem:[#allocation204_spill] sm:$0xff] }
0x181f   : > { %5519 = vperm.xlu1 %7985, %v5514_v61   ;;  %4349 = vrot.lane.b32.xlu0 %v4345_v0, %s14119_s29  ;;  %v6653_v61 = vld [vmem:[%s13952_s0 + $0x4] sm:$0xf]  ;;  %v5484_v0 = vmul.f32 %v10970_v45, %v14356_v9 }
0x1820   : > { %14351 = vst [vmem:[#allocation165_spill] sm:$0xff] %v11554_v12  ;;  %v11563_v15 = vmul.f32 %v11559_v32, %v5330_v4  ;;  %v6378_v14 = vpop.permute.xlu1 %6377  ;;  %v14361_v9 = vld [vmem:[#allocation100_spill] sm:$0xff] }
0x1821   : > { %v11569_v12 = vrot.slane %v6378_v14, %v8986_v7  ;;  %v11571_v22 = vpop.permute.xlu0 %4428  ;;  %v5498_v10 = vmul.f32 %v11246_v23, %v5484_v0 }
0x1822   : > { %14353 = vst [vmem:[#allocation173_spill] sm:$0xff] %v11563_v15  ;;  %14355 = vst [vmem:[#allocation181_spill] sm:$0xff] %v11571_v22  ;;  %v6748_v22 = vmul.f32 %v11265_v35, %v14360_v18 }
0x1823   : > { %v11579_v4 = vmul.f32 %v11569_v12, %v6374_v3  ;;  %7987 = vset.pattern.permute.xlu1 %v14358_v6  ;;  %4801 = vrot.lane.b32.xlu0 %v4797_v55, %s14119_s29  ;;  %v5877_v3 = vmul.f32 %v10970_v45, %v14361_v9 }
0x1824   : > { %6658 = vperm.xlu1 %7987, %v6653_v61   ;;  %v8359_v61 = vmov 127  }
0x1825   : > { %14357 = vst [vmem:[#allocation151_spill] sm:$0xff] %v11579_v4  ;;  %v6752_v60 = vpop.permute.xlu1 %6751  ;;  %v11584_v14 = vpop.permute.xlu0 %5316  ;;  %v5891_v23 = vmul.f32 %v11380_v48, %v5877_v3  ;;  %v14366_v3 = vrot.slane %v11429_v37, 4 }
0x1826   : > { %14359 = vst [vmem:[#allocation157_spill] sm:$0xff] %v11584_v14  ;;  %v11589_v15 = vrot.slane %v6752_v60, %v8986_v7  ;;  %v14363_v60 = vld [vmem:[#allocation161_spill] sm:$0xff]  ;;  %v14364_v14 = vld [vmem:[#allocation92_spill] sm:$0xff] }
0x1827   : > { %5502 = vrot.lane.b32.xlu0 %v5498_v10, %s14098_s25  ;;  %v6249_v18 = vmul.f32 %v10970_v45, %v14363_v60  ;;  %v5785_v9 = vmul.f32 %v11176_v39, %v14364_v14  ;;  %v4855_v14 = vsel %vm1073_vm12, %v14366_v3, %v11429_v37  ;;  %v5576_v37 = vld [vmem:[%s13952_s0] sm:$0xf] }
0x1828   : > { %v11595_v6 = vmul.f32 %v11589_v15, %v6748_v22  ;;  %4122 = vrot.lane.b32.xlu1 %v11219_v27, %s14090_s2  ;;  %v4858_v60 = vmul.f32 %v11233_v13, %v4855_v14 }
0x1829   : > { %v11600_v55 = vpop.permute.xlu1 %4691  ;;  %7989 = vset.pattern.permute.xlu1 %v8359_v61  ;;  %v6263_v48 = vmul.f32 %v11414_v43, %v6249_v18 }
0x182a   : > { %14362 = vst [vmem:[#allocation148_spill] sm:$0xff] %v11595_v6  ;;  %v5789_v0 = vpop.permute.xlu0 %5788  ;;  %v4872_v14 = vmul.f32 %v11436_v53, %v4858_v60  ;;  %v4192_v53 = vrot.slane %v11128_v56, %v8986_v7  ;;  %v4543_v60 = vrot.slane %v11425_v50, 4  ;;  %v14376_v6 = vld [vmem:[#allocation103_spill] sm:$0xff]  ;;  %v4619_v56 = vrot.slane %v11354_v59, 4 }
0x182b   : > { %v11607_v10 = vrot.slane %v5789_v0, %v8986_v7  ;;  %5895 = vrot.lane.b32.xlu0 %v5891_v23, %s14098_s25  ;;  %v14367_v0 = vld [vmem:[#allocation194_spill] sm:$0xff] }
0x182c   : > { %4576 = vrot.lane.b32.xlu1 %v11250_v28, %s14090_s2  ;;  %v6623_v23 = vmul.f32 %v10970_v45, %v14367_v0  ;;  %v4174_v28 = vrot.slane %v11216_v41, 4 }
0x182d   : > { %v11614_v27 = vmul.f32 %v11607_v10, %v5785_v9  ;;  %v11616_v22 = vpop.permute.xlu1 %6176  ;;  %v14368_v9 = vld [vmem:[#allocation168_spill] sm:$0xff] }
0x182e   : > { %v11622_v61 = vpop.permute.xlu0 %4135  ;;  %v6637_v43 = vmul.f32 %v11275_v16, %v6623_v23  ;;  %v6436_v3 = vmul.f32 %v11096_v62, %v14368_v9  ;;  %v5969_v62 = vld [vmem:[%s13952_s0 + $0x4] sm:$0xf] }
0x182f   : > { %14365 = vst [vmem:[#allocation163_spill] sm:$0xff] %v11614_v27  ;;  %6267 = vrot.lane.b32.xlu0 %v6263_v48, %s14098_s25  ;;  %v4544_v27 = vrot.slane %v11439_v40, 4 }
0x1830   : > { %4286 = vrot.lane.b32.xlu1 %v14245_v51, %s8360_s21  ;;  %v4176_v51 = vsel %vm4175_vm3, %v4174_v28, %v11216_v41  ;;  %v14372_v41 = vld [vmem:[#allocation82_spill] sm:$0xff]  ;;  %vm4431_vm3 = vcmask 916480   ;;  %s14703_s21 = sld [smem:[#allocation220_spill]] }
0x1831   : > { %v6440_v18 = vpop.permute.xlu1 %6439  ;;  %v4545_v4 = vsel %vm686_vm0, %v4543_v60, %v4544_v27 }
0x1832   : > { %v11637_v48 = vrot.slane %v6440_v18, %v8986_v7  ;;  %v11639_v0 = vpop.permute.xlu0 %5104  ;;  %v14371_v18 = vrot.slane %v11155_v58, 4 }
0x1833   : > { %14369 = vst [vmem:[#allocation90_spill] sm:$0xff] %v11639_v0  ;;  %6641 = vrot.lane.b32.xlu0 %v6637_v43, %s14090_s2  ;;  %v4179_v43 = vmul.f32 %v11233_v13, %v4176_v51 }
0x1834   : > { %v11644_v16 = vmul.f32 %v11637_v48, %v6436_v3  ;;  %5581 = vperm.xlu1 %7989, %v5576_v37   ;;  %v4456_v9 = vsel %vm4455_vm4, %v14371_v18, %v11155_v58  ;;  %v5546_v3 = vmul.f32 %v10970_v45, %v14372_v41  ;;  %v14373_v37 = vmov 12  }
0x1835   : > { %v4765_v23 = vpop.permute.xlu1 %4764  ;;  %v4618_v58 = vrot.slane %v11519_v29, 4  ;;  %v5939_v41 = vmul.f32 %v10970_v45, %v14376_v6  ;;  %v4193_v0 = vmul.f32 %v4192_v53, %v4179_v43  ;;  %v14378_v43 = vmov 1  }
0x1836   : > { %14370 = vst [vmem:[#allocation171_spill] sm:$0xff] %v11644_v16  ;;  %v5560_v16 = vmul.f32 %v11468_v34, %v5546_v3  ;;  %v4694_v34 = vrot.slane %v11600_v55, 4  ;;  %v4693_v3 = vrot.slane %v11409_v2, 4  ;;  %vm1476_vm4 = vcmask 130048  }
0x1837   : > { %4876 = vrot.lane.b32.xlu0 %v4872_v14, %s14144_s24  ;;  %v11664_v18 = vpop.permute.xlu0 %6517  ;;  %v4459_v14 = vmul.f32 %v11233_v13, %v4456_v9  ;;  %v14377_v9 = vld [vmem:[#allocation169_spill] sm:$0xff] }
0x1838   : > { %7990 = vset.pattern.permute.xlu1 %v14373_v37  ;;  %14374 = vst [vmem:[#allocation183_spill] sm:$0xff] %v11664_v18  ;;  %v4180_v37 = vmul.f32 %v11403_v46, %v4174_v28  ;;  %v4620_v18 = vsel %vm686_vm0, %v4618_v58, %v4619_v56  ;;  %v11683_v28 = vld [vmem:[#allocation2 + $0x4] sm:$0xff]  ;;  %v4695_v60 = vsel %vm686_vm0, %v4693_v3, %v4694_v34  ;;  %v4768_v58 = vrot.slane %v4765_v23, 4 }
0x1839   : > { %v11666_v51 = vpop.permute.xlu1 %4766  ;;  %5974 = vperm.xlu1 %7990, %v5969_v62   ;;  %v5953_v62 = vmul.f32 %v11488_v33, %v5939_v41  ;;  %v6311_v27 = vmul.f32 %v11683_v28, %v14377_v9  ;;  %v4473_v33 = vmul.f32 %v11162_v52, %v4459_v14  ;;  %v4621_v56 = vsel %vm1073_vm12, %v11519_v29, %v4620_v18 }
0x183a   : > { %14375 = vst [vmem:[#allocation180_spill] sm:$0xff] %v11666_v51  ;;  %v4769_v45 = vrot.slane %v11666_v51, 4  ;;  %v4843_v52 = vrot.slane %v11482_v38, 4  ;;  %v4696_v14 = vsel %vm1168_vm13, %v11409_v2, %v4695_v60 }
0x183b   : > { %5564 = vrot.lane.b32.xlu0 %v5560_v16, %s14109_s23  ;;  %v4546_v16 = vsel %vm978_vm11, %v11425_v50, %v4545_v4  ;;  %v11692_v41 = vpop.permute.xlu0 %4503  ;;  %v6325_v9 = vmul.f32 %v11343_v42, %v6311_v27 }
0x183c   : > { %v4549_v51 = vadd.f32 %v4546_v16, %v4473_v33  ;;  %v4770_v50 = vsel %vm686_vm0, %v4768_v58, %v4769_v45  ;;  %v14381_v58 = vld [vmem:[#allocation99_spill] sm:$0xff] }
0x183d   : > { %v11680_v6 = vpop.permute.xlu1 %6238  ;;  %4197 = vrot.lane.b32.xlu1 %v4193_v0, %s14098_s25  ;;  %v4194_v0 = vmul.f32 %v4192_v53, %v4180_v37  ;;  %v14379_v53 = vld [vmem:[#allocation200_spill] sm:$0xff]  ;;  %v4771_v18 = vsel %vm1263_vm14, %v4765_v23, %v4770_v50 }
0x183e   : > { %7992 = vset.pattern.permute.xlu1 %v14378_v43  ;;  %v6685_v37 = vmul.f32 %v11683_v28, %v14379_v53  ;;  %v4624_v29 = vadd.f32 %v4621_v56, %v4549_v51  ;;  %v14385_v53 = vld [vmem:[#allocation141_spill] sm:$0xff]  ;;  %v14429_v43 = vld [vmem:[#allocation30_spill] sm:$0xff] }
0x183f   : > { %5957 = vrot.lane.b32.xlu0 %v5953_v62, %s14109_s23  ;;  %v14380_v62 = vld [vmem:[#allocation68_spill] sm:$0xff] }
0x1840   : > { %v5361_v45 = vmul.f32 %v11238_v5, %v14380_v62  ;;  %v6699_v27 = vmul.f32 %v11508_v8, %v6685_v37  ;;  %v4699_v2 = vadd.f32 %v4696_v14, %v4624_v29  ;;  %v4137_v14 = vrot.slane %v11622_v61, 4  ;;  %v14386_v62 = vld [vmem:[#allocation177_spill] sm:$0xff] }
0x1841   : > { %v11699_v4 = vpop.permute.xlu1 %4841  ;;  %4199 = vrot.lane.b32.xlu1 %v4194_v0, %s14098_s25  ;;  %v5909_v0 = vmul.f32 %v11176_v39, %v14381_v58  ;;  %v6001_v37 = vmul.f32 %v11683_v28, %v14385_v53 }
0x1842   : > { %v4844_v34 = vrot.slane %v11699_v4, 4  ;;  %v5375_v33 = vmul.f32 %v11319_v21, %v5361_v45  ;;  %v4774_v23 = vadd.f32 %v4771_v18, %v4699_v2  ;;  %v6373_v45 = vmul.f32 %v11683_v28, %v14386_v62  ;;  %v14390_v62 = vld [vmem:[#allocation166_spill] sm:$0xff] }
0x1843   : > { %6329 = vrot.lane.b32.xlu0 %v6325_v9, %s14109_s23  ;;  %v11709_v42 = vpop.permute.xlu0 %4373  ;;  %v14382_v9 = vld [vmem:[#allocation86_spill] sm:$0xff]  ;;  %v6015_v29 = vmul.f32 %v11385_v26, %v6001_v37  ;;  %v6179_v26 = vrot.slane %v11616_v22, 4  ;;  %v6178_v2 = vrot.slane %v11422_v17, 4  ;;  %v6302_v37 = vrot.slane %v11496_v25, 4 }
0x1844   : > { %v4845_v3 = vsel %vm686_vm0, %v4843_v52, %v4844_v34 }
0x1845   : > { %v11716_v16 = vpop.permute.xlu1 %6300  ;;  %4653 = vrot.lane.b32.xlu1 %v11248_v57, %s14098_s25  ;;  %v4846_v51 = vsel %vm1358_vm1, %v11482_v38, %v4845_v3  ;;  %v5608_v38 = vmul.f32 %v11683_v28, %v14382_v9  ;;  %v5638_v3 = vld [vmem:[%s13952_s0 + $0x4] sm:$0xf] }
0x1846   : > { %v4849_v57 = vadd.f32 %v4846_v51, %v4774_v23  ;;  %v6387_v51 = vmul.f32 %v11569_v12, %v6373_v45  ;;  %v6303_v9 = vrot.slane %v11716_v16, 4  ;;  %v6777_v12 = vld [vmem:[%s13952_s0 + $0x4] sm:$0xf]  ;;  %v6435_v45 = vmul.f32 %v11683_v28, %v14390_v62 }
0x1847   : > { %6703 = vrot.lane.b32.xlu0 %v6699_v27, %s14098_s25  ;;  %v5622_v50 = vmul.f32 %v11545_v30, %v5608_v38  ;;  %v4142_v30 = vmul.f32 %v11403_v46, %v4137_v14  ;;  %v14388_v38 = vld [vmem:[#allocation185_spill] sm:$0xff] }
0x1848   : > { %v5913_v60 = vpop.permute.xlu0 %5912 }
0x1849   : > { %v11727_v8 = vrot.slane %v5913_v60, %v8986_v7  ;;  %v11729_v56 = vpop.permute.xlu1 %6362  ;;  %5380 = vrot.lane.b32.xlu1 %v5375_v33, %s14152_s22  ;;  %v6241_v33 = vrot.slane %v11680_v6, 4  ;;  %v14387_v60 = vld [vmem:[#allocation206_spill] sm:$0xff] }
0x184a   : > { %v6747_v58 = vmul.f32 %v11683_v28, %v14387_v60  ;;  %v6304_v60 = vsel %vm686_vm0, %v6302_v37, %v6303_v9 }
0x184b   : > { %v11735_v21 = vmul.f32 %v11727_v8, %v5909_v0  ;;  %4890 = vrot.lane.b32.xlu0 %v4849_v57, %s14220_s6  ;;  %v6240_v0 = vrot.slane %v11462_v47, 4  ;;  %v6180_v57 = vsel %vm686_vm0, %v6178_v2, %v6179_v26  ;;  %v6305_v37 = vsel %vm1168_vm13, %v11496_v25, %v6304_v60 }
0x184c   : > { %v11744_v34 = vpop.permute.xlu0 %4124  ;;  %v6181_v26 = vsel %vm978_vm11, %v11422_v17, %v6180_v57 }
0x184d   : > { %14383 = vst [vmem:[#allocation73_spill] sm:$0xff] %v11735_v21  ;;  %v11739_v52 = vpop.permute.xlu1 %6424  ;;  %5773 = vrot.lane.b32.xlu1 %v11189_v31, %s14152_s22  ;;  %14384 = vst [vmem:[#allocation76_spill] sm:$0xff] %v11744_v34 }
0x184f   : > { %5626 = vrot.lane.b32.xlu0 %v5622_v50, %s14119_s29  ;;  %v6108_v50 = vmul.f32 %v11683_v28, %v14388_v38 }
0x1850   : > { %v11765_v27 = vpop.permute.xlu0 %4578 }
0x1851   : > { %v4146_v18 = vpop.permute.xlu1 %4145  ;;  %6145 = vrot.lane.b32.xlu1 %v11150_v63, %s14152_s22  ;;  %v6122_v2 = vmul.f32 %v11200_v36, %v6108_v50  ;;  %v6426_v36 = vrot.slane %v11524_v1, 4 }
0x1852   : > { %v11756_v31 = vrot.slane %v4146_v18, %v8986_v7  ;;  %v6242_v18 = vsel %vm686_vm0, %v6240_v0, %v6241_v33  ;;  %v14391_v0 = vld [vmem:[#allocation88_spill] sm:$0xff] }
0x1853   : > { %6019 = vrot.lane.b32.xlu0 %v6015_v29, %s14119_s29  ;;  %v6761_v29 = vmul.f32 %v11589_v15, %v6747_v58  ;;  %v6427_v15 = vrot.slane %v11739_v52, 4  ;;  %v6243_v58 = vsel %vm1073_vm12, %v11462_v47, %v6242_v18  ;;  %v5723_v38 = vmul.f32 %v11176_v39, %v14391_v0  ;;  %v14392_v39 = vld [vmem:[#allocation212_spill] sm:$0xff] }
0x1854   : > { %v11768_v63 = vmul.f32 %v11756_v31, %v4142_v30  ;;  %v6365_v30 = vrot.slane %v11729_v56, 4  ;;  %v6184_v57 = vadd.f32 %v6181_v26, %v6122_v2 }
0x1855   : > { %5643 = vperm.xlu1 %7992, %v5638_v3   ;;  %v14389_v3 = vmov 38  }
0x1856   : > { %v11773_v23 = vpop.permute.xlu1 %4984  ;;  %v6246_v18 = vadd.f32 %v6243_v58, %v6184_v57  ;;  %v8361_v57 = vmov 117  }
0x1857   : > { %6391 = vrot.lane.b32.xlu0 %v6387_v51, %s14119_s29  ;;  %v6364_v51 = vrot.slane %v11511_v44, 4 }
0x1858   : > { %v11786_v53 = vpop.permute.xlu0 %5224 }
0x1859   : > { %7994 = vset.pattern.permute.xlu1 %v14389_v3  ;;  %v6366_v9 = vsel %vm686_vm0, %v6364_v51, %v6365_v30  ;;  %v6428_v3 = vsel %vm686_vm0, %v6426_v36, %v6427_v15  ;;  %v14394_v15 = vld [vmem:[#allocation70_spill] sm:$0xff]  ;;  %v14396_v36 = vld [vmem:[#allocation19_spill] sm:$0xff] }
0x185a   : > { %6782 = vperm.xlu1 %7994, %v6777_v12   ;;  %v6449_v12 = vmul.f32 %v11637_v48, %v6435_v45  ;;  %v14393_v48 = vmov 40   ;;  %v6367_v30 = vsel %vm1263_vm14, %v11511_v44, %v6366_v9  ;;  %v6308_v45 = vadd.f32 %v6305_v37, %v6246_v18  ;;  %v6839_v18 = vld [vmem:[%s13952_s0 + $0x4] sm:$0xf] }
0x185b   : > { %v5727_v33 = vpop.permute.xlu1 %5726  ;;  %6765 = vrot.lane.b32.xlu0 %v6761_v29, %s14109_s23  ;;  %v6809_v29 = vmul.f32 %v11683_v28, %v14392_v39  ;;  %v11873_v9 = vrot.slane %v11709_v42, %v8986_v7  ;;  %v14397_v39 = vld [vmem:[#allocation20_spill] sm:$0xff]  ;;  %v14399_v42 = vmov 28  }
0x185c   : > { %v11807_v17 = vrot.slane %v5727_v33, %v8986_v7  ;;  %v6370_v2 = vadd.f32 %v6367_v30, %v6308_v45  ;;  %v5392_v33 = vmul.f32 %v11238_v5, %v14394_v15  ;;  %v14400_v30 = vld [vmem:[#allocation192_spill] sm:$0xff] }
0x185d   : > { %v11812_v50 = vpop.permute.xlu0 %6720  ;;  %v6823_v62 = vmul.f32 %v11447_v19, %v6809_v29  ;;  %v4950_v19 = vld [vmem:[%s13952_s0] sm:$0xf]  ;;  %v6495_v29 = vld [vmem:[%s13952_s0 + $0x4] sm:$0xf] }
0x185e   : > { %v11817_v47 = vmul.f32 %v11807_v17, %v5723_v38  ;;  %4273 = vrot.lane.b32.xlu1 %v11322_v20, %s14109_s23  ;;  %v6429_v20 = vsel %vm1358_vm1, %v11524_v1, %v6428_v3  ;;  %v5294_v38 = vld [vmem:[%s13952_s0] sm:$0xf] }
0x185f   : > { %6453 = vrot.lane.b32.xlu0 %v6449_v12, %s14144_s24  ;;  %7995 = vset.pattern.permute.xlu1 %v14393_v48  ;;  %v6432_v44 = vadd.f32 %v6429_v20, %v6370_v2  ;;  %v4138_v20 = vsel %vm838_vm5, %v4137_v14, %v11622_v61  ;;  %v8362_v61 = vmov 116   ;;  %vm4289_vm5 = vcmask 867328  }
0x1860   : > { %v11828_v25 = vpop.permute.xlu1 %4221 }
0x1861   : > { %v11831_v26 = vpop.permute.xlu0 %4651 }
0x1862   : > { %4726 = vrot.lane.b32.xlu1 %v11473_v11, %s14109_s23 }
0x1863   : > { %6827 = vrot.lane.b32.xlu0 %v6823_v62, %s14119_s29  ;;  %v14401_v62 = vrot.slane %v14400_v30, 4 }
0x1865   : > { %v11838_v51 = vpop.permute.xlu1 %5044  ;;  %v11840_v60 = vpop.permute.xlu0 %5378  ;;  %v4067_v45 = vmul.f32 %v11403_v46, %v14401_v62 }
0x1866   : > { %5440 = vrot.lane.b32.xlu1 %v11256_v24, %s14090_s2 }
0x1867   : > { %6467 = vrot.lane.b32.xlu0 %v6432_v44, %s14220_s6  ;;  %v14403_v44 = vld [vmem:[#allocation197_spill] sm:$0xff] }
0x1869   : > { %v11848_v11 = vpop.permute.xlu0 %5771 }
0x186a   : > { %v5396_v1 = vpop.permute.xlu1 %5395  ;;  %5833 = vrot.lane.b32.xlu1 %v11282_v54, %s14090_s2 }
0x186b   : > { %v11855_v58 = vrot.slane %v5396_v1, %v8986_v7  ;;  %4955 = vperm.xlu0 %7996, %v4950_v19   ;;  %v4081_v19 = vmul.f32 %v14403_v44, %v4067_v45  ;;  %v4141_v1 = vmul.f32 %v11233_v13, %v4138_v20  ;;  %v8363_v13 = vmov 105   ;;  %v14409_v45 = vld [vmem:[#allocation209_spill] sm:$0xff] }
0x186d   : > { %v11858_v24 = vmul.f32 %v11855_v58, %v5392_v33  ;;  %v11860_v0 = vpop.permute.xlu0 %6143  ;;  %v14404_v33 = vld [vmem:[#allocation186_spill] sm:$0xff]  ;;  %v4155_v14 = vmul.f32 %v11756_v31, %v4141_v1  ;;  %v14406_v31 = vld [vmem:[#allocation22_spill] sm:$0xff] }
0x186e   : > { %14395 = vst [vmem:[#allocation95_spill] sm:$0xff] %v11860_v0  ;;  %6205 = vrot.lane.b32.xlu1 %v14396_v36, %s14090_s2  ;;  %v14443_v0 = vld [vmem:[#allocation90_spill] sm:$0xff] }
0x186f   : > { %v11867_v54 = vpop.permute.xlu1 %5709  ;;  %7999 = vset.pattern.permute.xlu0 %v8361_v57  ;;  %v11913_v57 = vrot.slane %v11773_v23, %v8986_v7  ;;  %v12075_v21 = vrot.slane %v14443_v0, %v8986_v7 }
0x1870   : > { %5299 = vperm.xlu0 %7999, %v5294_v38   ;;  %v6531_v38 = vmul.f32 %v11265_v35, %v14404_v33  ;;  %v14411_v33 = vld [vmem:[#allocation89_spill] sm:$0xff] }
0x1871   : > { %v11869_v12 = vpop.permute.xlu0 %4362 }
0x1872   : > { %v13854_v37 = vrot.slane %v11869_v12, 4  ;;  %6579 = vrot.lane.b32.xlu1 %v14397_v39, %s14152_s22 }
0x1874   : > { %v4370_v3 = vmul.f32 %v11403_v46, %v13854_v37  ;;  %v11887_v48 = vpop.permute.xlu1 %6095  ;;  %8002 = vset.pattern.permute.xlu0 %v14399_v42  ;;  %v14407_v42 = vld [vmem:[#allocation67_spill] sm:$0xff] }
0x1875   : > { %14398 = vst [vmem:[#allocation193_spill] sm:$0xff] %v11887_v48  ;;  %6500 = vperm.xlu0 %8002, %v6495_v29   ;;  %v11915_v39 = vpop.permute.xlu0 %6036  ;;  %v5329_v30 = vmul.f32 %v11683_v28, %v14407_v42  ;;  %v14416_v42 = vld [vmem:[#allocation26_spill] sm:$0xff]  ;;  %v12066_v48 = vld [vmem:[#allocation2] sm:$0xff] }
0x1876   : > { %6844 = vperm.xlu1 %7995, %v6839_v18   ;;  %v11898_v2 = vmul.f32 %v11873_v9, %v4370_v3  ;;  %v14405_v18 = vld [vmem:[#allocation47_spill] sm:$0xff] }
0x1877   : > { %v4980_v3 = vmul.f32 %v11683_v28, %v14405_v18  ;;  %v5343_v20 = vmul.f32 %v11559_v32, %v5329_v30  ;;  %v11967_v30 = vrot.slane %v11838_v51, %v8986_v7 }
0x1878   : > { %14402 = vst [vmem:[#allocation155_spill] sm:$0xff] %v11898_v2  ;;  %v14483_v2 = vld [vmem:[#allocation173_spill] sm:$0xff] }
0x1879   : > { %v6535_v15 = vpop.permute.xlu1 %6534  ;;  %4086 = vrot.lane.b32.xlu0 %v4081_v19, %s14090_s2  ;;  %v4994_v23 = vmul.f32 %v11913_v57, %v4980_v3  ;;  %v11931_v62 = vpop.permute.xlu0 %4275  ;;  %v14410_v19 = vld [vmem:[#allocation74_spill] sm:$0xff]  ;;  %v14415_v3 = vld [vmem:[#allocation96_spill] sm:$0xff] }
0x187a   : > { %v11906_v36 = vrot.slane %v6535_v15, %v8986_v7  ;;  %4351 = vrot.lane.b32.xlu1 %v11550_v49, %s14119_s29  ;;  %8005 = vset.pattern.permute.xlu0 %v8362_v61  ;;  %14408 = vst [vmem:[#allocation189_spill] sm:$0xff] %v11931_v62  ;;  %v5454_v1 = vmul.f32 %v11238_v5, %v14410_v19  ;;  %v11952_v5 = vld [vmem:[#allocation2 + $0xc] sm:$0xf] }
0x187b   : > { %7997 = vset.pattern.permute.xlu1 %v8363_v13  ;;  %14414 = vst [vmem:[#allocation167_spill] sm:$0xff] %v11952_v5 }
0x187c   : > { %v11918_v29 = vmul.f32 %v11906_v36, %v6531_v38  ;;  %v5722_v38 = vmul.f32 %v11683_v28, %v14411_v33  ;;  %v14419_v33 = vld [vmem:[#allocation190_spill] sm:$0xff] }
0x187d   : > { %4159 = vrot.lane.b32.xlu0 %v4155_v14, %s14098_s25  ;;  %v14412_v14 = vld [vmem:[#allocation24_spill] sm:$0xff]  ;;  %v11950_v13 = vpop.permute.xlu0 %4728 }
0x187e   : > { %v11923_v49 = vpop.permute.xlu1 %4297  ;;  %4803 = vrot.lane.b32.xlu1 %v14406_v31, %s14119_s29  ;;  %v5736_v32 = vmul.f32 %v11807_v17, %v5722_v38  ;;  %14413 = vst [vmem:[#allocation69_spill] sm:$0xff] %v11950_v13  ;;  %v5847_v31 = vmul.f32 %v11952_v5, %v14415_v3  ;;  %v5250_v17 = vld [vmem:[%s13952_s0] sm:$0xf]  ;;  %v6593_v38 = vmul.f32 %v11265_v35, %v14419_v33  ;;  %v14421_v3 = vld [vmem:[#allocation71_spill] sm:$0xff]  ;;  %v14424_v33 = vld [vmem:[#allocation93_spill] sm:$0xff] }
0x1881   : > { %4998 = vrot.lane.b32.xlu0 %v4994_v23, %s14152_s22 }
0x1882   : > { %5504 = vrot.lane.b32.xlu1 %v14409_v45, %s14098_s25 }
0x1883   : > { %v5458_v44 = vpop.permute.xlu1 %5457 }
0x1884   : > { %v11939_v15 = vrot.slane %v5458_v44, %v8986_v7 }
0x1885   : > { %5347 = vrot.lane.b32.xlu0 %v5343_v20, %s14152_s22  ;;  %v14417_v20 = vld [vmem:[#allocation51_spill] sm:$0xff] }
0x1886   : > { %v11945_v61 = vmul.f32 %v11939_v15, %v5454_v1  ;;  %5897 = vrot.lane.b32.xlu1 %v14412_v14, %s14098_s25  ;;  %v5040_v44 = vmul.f32 %v11683_v28, %v14417_v20  ;;  %v11974_v1 = vpop.permute.xlu0 %5442 }
0x1887   : > { %14418 = vst [vmem:[#allocation91_spill] sm:$0xff] %v11974_v1 }
0x1888   : > { %v5851_v18 = vpop.permute.xlu1 %5850  ;;  %v5054_v51 = vmul.f32 %v11967_v30, %v5040_v44  ;;  %v5784_v44 = vmul.f32 %v11683_v28, %v14424_v33 }
0x1889   : > { %v11957_v23 = vrot.slane %v5851_v18, %v8986_v7  ;;  %5740 = vrot.lane.b32.xlu0 %v5736_v32, %s14152_s22  ;;  %v14420_v32 = vld [vmem:[#allocation18_spill] sm:$0xff] }
0x188a   : > { %6269 = vrot.lane.b32.xlu1 %v14416_v42, %s14098_s25 }
0x188b   : > { %v11970_v45 = vmul.f32 %v11957_v23, %v5847_v31  ;;  %v5391_v31 = vmul.f32 %v11683_v28, %v14421_v3  ;;  %v5798_v3 = vmul.f32 %v11607_v10, %v5784_v44 }
0x188d   : > { %v6597_v19 = vpop.permute.xlu1 %6596  ;;  %5255 = vperm.xlu0 %8005, %v5250_v17   ;;  %v14422_v17 = vld [vmem:[#allocation27_spill] sm:$0xff]  ;;  %v5405_v20 = vmul.f32 %v11855_v58, %v5391_v31 }
0x188e   : > { %v11979_v14 = vrot.slane %v6597_v19, %v8986_v7  ;;  %6643 = vrot.lane.b32.xlu1 %v14420_v32, %s14090_s2  ;;  %v11995_v19 = vpop.permute.xlu0 %5835  ;;  %v14427_v58 = vld [vmem:[#allocation203_spill] sm:$0xff] }
0x188f   : > { %14423 = vst [vmem:[#allocation149_spill] sm:$0xff] %v11995_v19  ;;  %v4550_v31 = vadd.f32 %v11439_v40, %v14427_v58 }
0x1890   : > { %v11985_v18 = vmul.f32 %v11979_v14, %v6593_v38  ;;  %v14425_v38 = vld [vmem:[#allocation29_spill] sm:$0xff] }
0x1891   : > { %v11989_v42 = vpop.permute.xlu1 %4501  ;;  %5058 = vrot.lane.b32.xlu0 %v5054_v51, %s14090_s2  ;;  %v14426_v51 = vld [vmem:[#allocation187_spill] sm:$0xff]  ;;  %v4625_v10 = vadd.f32 %v11354_v59, %v4550_v31  ;;  %v14435_v59 = vld [vmem:[#allocation180_spill] sm:$0xff]  ;;  %v14436_v31 = vld [vmem:[#allocation153_spill] sm:$0xff] }
0x1892   : > { %4878 = vrot.lane.b32.xlu1 %v14422_v17, %s14144_s24  ;;  %v6530_v37 = vmul.f32 %v11683_v28, %v14426_v51  ;;  %v12012_v33 = vpop.permute.xlu0 %6207  ;;  %v12021_v51 = vld [vmem:[#allocation2 + $0xc] sm:$0xf] }
0x1893   : > { %14428 = vst [vmem:[#allocation98_spill] sm:$0xff] %v12012_v33  ;;  %14431 = vst [vmem:[#allocation139_spill] sm:$0xff] %v12021_v51  ;;  %v14437_v33 = vld [vmem:[#allocation195_spill] sm:$0xff] }
0x1895   : > { %v11999_v32 = vpop.permute.xlu1 %4210  ;;  %5409 = vrot.lane.b32.xlu0 %v5405_v20, %s14090_s2  ;;  %v6544_v20 = vmul.f32 %v11906_v36, %v6530_v37 }
0x1896   : > { %5566 = vrot.lane.b32.xlu1 %v14425_v38, %s14109_s23  ;;  %v14430_v38 = vld [vmem:[#allocation21_spill] sm:$0xff]  ;;  %v12029_v5 = vpop.permute.xlu0 %6581 }
0x1897   : > { %14433 = vst [vmem:[#allocation160_spill] sm:$0xff] %v12029_v5 }
0x1899   : > { %v12007_v17 = vpop.permute.xlu1 %5164  ;;  %5802 = vrot.lane.b32.xlu0 %v5798_v3, %s14090_s2  ;;  %v14432_v3 = vld [vmem:[#allocation79_spill] sm:$0xff] }
0x189a   : > { %5959 = vrot.lane.b32.xlu1 %v14429_v43, %s14109_s23  ;;  %v5516_v40 = vmul.f32 %v12021_v51, %v14432_v3  ;;  %v4700_v43 = vadd.f32 %v11600_v55, %v4625_v10  ;;  %v6655_v3 = vmul.f32 %v11265_v35, %v14437_v33  ;;  %v12043_v55 = vpop.permute.xlu0 %4349  ;;  %v14440_v35 = vld [vmem:[#allocation25_spill] sm:$0xff] }
0x189c   : > { %v4775_v36 = vadd.f32 %v14435_v59, %v4700_v43  ;;  %v14439_v43 = vld [vmem:[#allocation165_spill] sm:$0xff] }
0x189d   : > { %6548 = vrot.lane.b32.xlu0 %v6544_v20, %s14152_s22 }
0x189e   : > { %v5520_v44 = vpop.permute.xlu1 %5519  ;;  %6331 = vrot.lane.b32.xlu1 %v14430_v38, %s14109_s23  ;;  %v4850_v38 = vadd.f32 %v11699_v4, %v4775_v36  ;;  %v12055_v4 = vpop.permute.xlu0 %4801 }
0x189f   : > { %v12026_v58 = vrot.slane %v5520_v44, %v8986_v7 }
0x18a1   : > { %v12032_v37 = vmul.f32 %v12026_v58, %v5516_v40 }
0x18a2   : > { %6705 = vrot.lane.b32.xlu1 %v14436_v31, %s14098_s25  ;;  %v4306_v31 = vrot.slane %v11923_v49, %v8986_v7 }
0x18a3   : > { %14434 = vst [vmem:[#allocation210_spill] sm:$0xff] %v12032_v37  ;;  %v6659_v20 = vpop.permute.xlu1 %6658 }
0x18a4   : > { %v12041_v44 = vrot.slane %v6659_v20, %v8986_v7  ;;  %v12061_v20 = vpop.permute.xlu0 %5502 }
0x18a5   : > { %14441 = vst [vmem:[#allocation72_spill] sm:$0xff] %v12061_v20 }
0x18a6   : > { %v12046_v10 = vmul.f32 %v12041_v44, %v6655_v3  ;;  %4892 = vrot.lane.b32.xlu1 %v4850_v38, %s14220_s6 }
0x18a7   : > { %v12049_v40 = vpop.permute.xlu1 %4122 }
0x18a8   : > { %14438 = vst [vmem:[#allocation81_spill] sm:$0xff] %v12046_v10  ;;  %v12084_v51 = vpop.permute.xlu0 %5895 }
0x18a9   : > { %14447 = vst [vmem:[#allocation102_spill] sm:$0xff] %v12084_v51 }
0x18aa   : > { %5628 = vrot.lane.b32.xlu1 %v14439_v43, %s14119_s29  ;;  %v14442_v43 = vld [vmem:[#allocation151_spill] sm:$0xff] }
0x18ab   : > { %v12053_v59 = vpop.permute.xlu1 %4576 }
0x18ac   : > { %v12100_v51 = vpop.permute.xlu0 %6267 }
0x18ad   : > { %14450 = vst [vmem:[#allocation94_spill] sm:$0xff] %v12100_v51  ;;  %v4212_v51 = vrot.slane %v11999_v32, 4 }
0x18ae   : > { %6021 = vrot.lane.b32.xlu1 %v14440_v35, %s14119_s29 }
0x18af   : > { %v4287_v33 = vpop.permute.xlu1 %4286 }
0x18b0   : > { %v4288_v36 = vrot.slane %v4287_v33, 4 }
0x18b2   : > { %v4290_v38 = vsel %vm4289_vm5, %v4288_v36, %v4287_v33  ;;  %v4294_v3 = vmul.f32 %v11403_v46, %v4288_v36  ;;  %6393 = vrot.lane.b32.xlu1 %v14442_v43, %s14119_s29  ;;  %v14444_v33 = vld [vmem:[#allocation148_spill] sm:$0xff]  ;;  %v14445_v46 = vld [vmem:[#allocation55_spill] sm:$0xff]  ;;  %vm2443_vm5 = vcmask 785408  }
0x18b3   : > { %v4293_v10 = vmul.f32 %v12066_v48, %v4290_v38  ;;  %v12069_v5 = vpop.permute.xlu1 %5581  ;;  %v5100_v36 = vmul.f32 %v11683_v28, %v14445_v46  ;;  %v14446_v43 = vld [vmem:[#allocation211_spill] sm:$0xff] }
0x18b4   : > { %v12071_v35 = vmul.f32 %v4306_v31, %v4294_v3  ;;  %v6185_v38 = vadd.f32 %v11616_v22, %v14446_v43 }
0x18b5   : > { %v4307_v49 = vmul.f32 %v4306_v31, %v4293_v10  ;;  %v5114_v37 = vmul.f32 %v12075_v21, %v5100_v36  ;;  %v14448_v10 = vld [vmem:[#allocation171_spill] sm:$0xff]  ;;  %v14452_v36 = vld [vmem:[#allocation97_spill] sm:$0xff] }
0x18b6   : > { %6767 = vrot.lane.b32.xlu1 %v14444_v33, %s14109_s23  ;;  %v6247_v0 = vadd.f32 %v11680_v6, %v6185_v38  ;;  %v14449_v31 = vld [vmem:[#allocation75_spill] sm:$0xff]  ;;  %v14451_v6 = vld [vmem:[#allocation28_spill] sm:$0xff]  ;;  %v5846_v38 = vmul.f32 %v11683_v28, %v14452_v36  ;;  %v12136_v36 = vrot.slane %v12007_v17, %v8986_v7  ;;  %v8365_v17 = vmov 104  }
0x18b7   : > { %4311 = vrot.lane.b32.xlu0 %v4307_v49, %s14119_s29  ;;  %v5453_v33 = vmul.f32 %v11683_v28, %v14449_v31 }
0x18b8   : > { %v12086_v3 = vpop.permute.xlu1 %5974  ;;  %v6309_v49 = vadd.f32 %v11716_v16, %v6247_v0  ;;  %v5860_v0 = vmul.f32 %v11957_v23, %v5846_v38  ;;  %14459 = vst [vmem:[#allocation66_spill] sm:$0xff] %v12136_v36  ;;  %8006 = vset.pattern.permute.xlu0 %v8365_v17  ;;  %v8366_v17 = vmov 110  }
0x18b9   : > { %v5467_v22 = vmul.f32 %v11939_v15, %v5453_v33  ;;  %v4933_v33 = vld [vmem:[%s13952_s0] sm:$0xf] }
0x18ba   : > { %6455 = vrot.lane.b32.xlu1 %v14448_v10, %s14144_s24  ;;  %v6371_v43 = vadd.f32 %v11729_v56, %v6309_v49  ;;  %v14454_v56 = vrot.slane %v11869_v12, 4  ;;  %v14455_v10 = vld [vmem:[#allocation191_spill] sm:$0xff] }
0x18bb   : > { %5118 = vrot.lane.b32.xlu0 %v5114_v37, %s14098_s25  ;;  %v6592_v31 = vmul.f32 %v11683_v28, %v14455_v10  ;;  %v14463_v10 = vld [vmem:[#allocation80_spill] sm:$0xff] }
0x18bc   : > { %v12096_v46 = vpop.permute.xlu1 %4197  ;;  %v6433_v37 = vadd.f32 %v11739_v52, %v6371_v43  ;;  %v4366_v15 = vsel %vm4365_vm7, %v14454_v56, %v11869_v12  ;;  %v12121_v52 = vpop.permute.xlu0 %6641  ;;  %v5010_v43 = vld [vmem:[%s13952_s0] sm:$0xf] }
0x18bd   : > { %14456 = vst [vmem:[#allocation198_spill] sm:$0xff] %v12121_v52  ;;  %v4369_v23 = vmul.f32 %v12066_v48, %v4366_v15 }
0x18be   : > { %6829 = vrot.lane.b32.xlu1 %v14451_v6, %s14119_s29 }
0x18bf   : > { %5471 = vrot.lane.b32.xlu0 %v5467_v22, %s14098_s25  ;;  %v6606_v22 = vmul.f32 %v11979_v14, %v6592_v31  ;;  %v4383_v6 = vmul.f32 %v11873_v9, %v4369_v23  ;;  %v14461_v14 = vld [vmem:[#allocation59_spill] sm:$0xff]  ;;  %v5687_v9 = vld [vmem:[%s13952_s0 + $0x4] sm:$0xf]  ;;  %v5515_v31 = vmul.f32 %v11683_v28, %v14463_v10 }
0x18c0   : > { %v12108_v16 = vpop.permute.xlu1 %4199  ;;  %v12138_v38 = vpop.permute.xlu0 %4876 }
0x18c1   : > { %14453 = vst [vmem:[#allocation154_spill] sm:$0xff] %v12108_v16  ;;  %14460 = vst [vmem:[#allocation175_spill] sm:$0xff] %v12138_v38 }
0x18c2   : > { %6469 = vrot.lane.b32.xlu1 %v6433_v37, %s14220_s6  ;;  %v8364_v37 = vmov 108  }
0x18c3   : > { %5864 = vrot.lane.b32.xlu0 %v5860_v0, %s14098_s25  ;;  %v5160_v0 = vmul.f32 %v11683_v28, %v14461_v14 }
0x18c4   : > { %v12123_v49 = vpop.permute.xlu1 %4653  ;;  %v12153_v23 = vpop.permute.xlu0 %5564 }
0x18c5   : > { %14457 = vst [vmem:[#allocation188_spill] sm:$0xff] %v12123_v49  ;;  %v5174_v15 = vmul.f32 %v12136_v36, %v5160_v0  ;;  %14465 = vst [vmem:[#allocation204_spill] sm:$0xff] %v12153_v23  ;;  %v4202_v36 = vrot.slane %v12108_v16, 4 }
0x18c6   : > { %4938 = vperm.xlu1 %7997, %v4933_v33   ;;  %v14464_v33 = vmov 2  }
0x18c7   : > { %6610 = vrot.lane.b32.xlu0 %v6606_v22, %s14090_s2 }
0x18c8   : > { %v12128_v12 = vpop.permute.xlu1 %5380  ;;  %v12167_v10 = vpop.permute.xlu0 %5957 }
0x18c9   : > { %14458 = vst [vmem:[#allocation85_spill] sm:$0xff] %v12128_v12  ;;  %14468 = vst [vmem:[#allocation161_spill] sm:$0xff] %v12167_v10  ;;  %v14480_v10 = vld [vmem:[#allocation179_spill] sm:$0xff] }
0x18ca   : > { %7998 = vset.pattern.permute.xlu1 %v8364_v37  ;;  %v14467_v37 = vld [vmem:[#allocation101_spill] sm:$0xff] }
0x18cb   : > { %5015 = vperm.xlu1 %7998, %v5010_v43   ;;  %4387 = vrot.lane.b32.xlu0 %v4383_v6, %s14144_s24  ;;  %v5529_v43 = vmul.f32 %v12026_v58, %v5515_v31  ;;  %v5070_v6 = vld [vmem:[%s13952_s0] sm:$0xf]  ;;  %v5908_v14 = vmul.f32 %v11683_v28, %v14467_v37 }
0x18cc   : > { %v12143_v56 = vpop.permute.xlu1 %5773  ;;  %v5130_v31 = vld [vmem:[%s13952_s0] sm:$0xf] }
0x18cd   : > { %14462 = vst [vmem:[#allocation78_spill] sm:$0xff] %v12143_v56 }
0x18cf   : > { %8000 = vset.pattern.permute.xlu1 %v14464_v33  ;;  %5178 = vrot.lane.b32.xlu0 %v5174_v15, %s14109_s23  ;;  %v5922_v15 = vmul.f32 %v11727_v8, %v5908_v14  ;;  %v8367_v33 = vmov 112   ;;  %v12179_v8 = vpop.permute.xlu0 %6329  ;;  %v14471_v14 = vld [vmem:[#allocation205_spill] sm:$0xff] }
0x18d0   : > { %v12155_v22 = vpop.permute.xlu1 %6145  ;;  %5692 = vperm.xlu1 %8000, %v5687_v9   ;;  %v14469_v9 = vld [vmem:[#allocation196_spill] sm:$0xff]  ;;  %14470 = vst [vmem:[#allocation92_spill] sm:$0xff] %v12179_v8 }
0x18d1   : > { %14466 = vst [vmem:[#allocation100_spill] sm:$0xff] %v12155_v22  ;;  %v6654_v58 = vmul.f32 %v11683_v28, %v14469_v9 }
0x18d3   : > { %5533 = vrot.lane.b32.xlu0 %v5529_v43, %s14109_s23  ;;  %v6668_v43 = vmul.f32 %v12041_v44, %v6654_v58  ;;  %v12188_v9 = vpop.permute.xlu0 %6703 }
0x18d4   : > { %v12164_v0 = vpop.permute.xlu1 %5643  ;;  %8001 = vset.pattern.permute.xlu1 %v8366_v17  ;;  %v8368_v17 = vmov 114   ;;  %14472 = vst [vmem:[#allocation194_spill] sm:$0xff] %v12188_v9 }
0x18d5   : > { %5075 = vperm.xlu1 %8001, %v5070_v6  }
0x18d7   : > { %5926 = vrot.lane.b32.xlu0 %v5922_v15, %s14109_s23  ;;  %v5190_v15 = vld [vmem:[%s13952_s0] sm:$0xf]  ;;  %v12200_v8 = vpop.permute.xlu0 %4890 }
0x18d8   : > { %14476 = vst [vmem:[#allocation82_spill] sm:$0xff] %v12200_v8 }
0x18d9   : > { %v12176_v37 = vpop.permute.xlu1 %6782  ;;  %8003 = vset.pattern.permute.xlu1 %v8367_v33  ;;  %v12190_v33 = vld [vmem:[#allocation2 + $0xc] sm:$0xf] }
0x18da   : > { %5135 = vperm.xlu1 %8003, %v5130_v31   ;;  %14473 = vst [vmem:[#allocation168_spill] sm:$0xff] %v12190_v33  ;;  %v14474_v31 = vld [vmem:[#allocation45_spill] sm:$0xff] }
0x18db   : > { %6672 = vrot.lane.b32.xlu0 %v6668_v43, %s14098_s25  ;;  %v4981_v43 = vmul.f32 %v12190_v33, %v14474_v31  ;;  %v14479_v31 = vld [vmem:[#allocation199_spill] sm:$0xff]  ;;  %v12216_v8 = vpop.permute.xlu0 %5626 }
0x18dc   : > { %v4051_v22 = vrot.slane %v14479_v31, 4  ;;  %14482 = vst [vmem:[#allocation200_spill] sm:$0xff] %v12216_v8  ;;  %v4230_v8 = vrot.slane %v11828_v25, %v8986_v7 }
0x18dd   : > { %v4274_v6 = vpop.permute.xlu1 %4273 }
0x18de   : > { %4084 = vrot.lane.b32.xlu1 %v14471_v14, %s14090_s2  ;;  %v14475_v14 = vmov 0   ;;  %v4277_v19 = vrot.slane %v4274_v6, 4 }
0x18df   : > { %8004 = vset.pattern.permute.xlu1 %v8368_v17  ;;  %v4995_v17 = vmul.f32 %v11913_v57, %v4981_v43  ;;  %v4126_v43 = vrot.slane %v12049_v40, 4 }
0x18e1   : > { %v12186_v44 = vpop.permute.xlu1 %4726 }
0x18e2   : > { %5195 = vperm.xlu1 %8004, %v5190_v15   ;;  %v14478_v15 = vld [vmem:[#allocation158_spill] sm:$0xff] }
0x18e3   : > { %v13875_v52 = vrot.slane %v14478_v15, 4 }
0x18e5   : > { %v12192_v58 = vpop.permute.xlu1 %5440  ;;  %v3963_v57 = vsel %vm3962_vm9, %v13875_v52, %v14478_v15 }
0x18e6   : > { %4161 = vrot.lane.b32.xlu1 %v11768_v63, %s14098_s25  ;;  %v4050_v63 = vrot.slane %v14480_v10, 4  ;;  %v3966_v52 = vmul.f32 %v12066_v48, %v3963_v57  ;;  %v12241_v57 = vld [vmem:[#allocation2 + $0x8] sm:$0xf] }
0x18e7   : > { %8008 = vset.pattern.permute.xlu1 %v14475_v14  ;;  %v4214_v14 = vsel %vm4213_vm8, %v4212_v51, %v11999_v32  ;;  %v4127_v32 = vrot.slane %v11744_v34, 4  ;;  %14486 = vst [vmem:[#allocation99_spill] sm:$0xff] %v12241_v57 }
0x18e8   : > { %v4052_v38 = vsel %vm686_vm0, %v4050_v63, %v4051_v22  ;;  %v4278_v63 = vrot.slane %v11931_v62, 4 }
0x18e9   : > { %v12203_v9 = vpop.permute.xlu1 %5833 }
0x18ea   : > { %14477 = vst [vmem:[#allocation103_spill] sm:$0xff] %v12203_v9  ;;  %5000 = vrot.lane.b32.xlu1 %v4995_v17, %s14152_s22  ;;  %v14484_v17 = vld [vmem:[#allocation162_spill] sm:$0xff]  ;;  %v4279_v34 = vsel %vm686_vm0, %v4277_v19, %v4278_v63  ;;  %v14489_v63 = vld [vmem:[#allocation63_spill] sm:$0xff] }
0x18eb   : > { %v12222_v9 = vrot.slane %v14484_v17, %v8986_v7  ;;  %v4201_v17 = vrot.slane %v12096_v46, 4 }
0x18ed   : > { %v12210_v23 = vpop.permute.xlu1 %6205  ;;  %v3980_v22 = vmul.f32 %v12222_v9, %v3966_v52 }
0x18ee   : > { %14481 = vst [vmem:[#allocation169_spill] sm:$0xff] %v12210_v23  ;;  %5349 = vrot.lane.b32.xlu1 %v14483_v2, %s14152_s22  ;;  %v4217_v23 = vmul.f32 %v12066_v48, %v4214_v14  ;;  %v4128_v2 = vsel %vm686_vm0, %v4126_v43, %v4127_v32  ;;  %v4053_v14 = vsel %vm978_vm11, %v14480_v10, %v4052_v38  ;;  %v12245_v32 = vpop.permute.xlu0 %6019 }
0x18ef   : > { %v4203_v43 = vsel %vm686_vm0, %v4201_v17, %v4202_v36  ;;  %v4129_v16 = vsel %vm1073_vm12, %v12049_v40, %v4128_v2  ;;  %v4056_v52 = vadd.f32 %v4053_v14, %v3980_v22  ;;  %v14487_v17 = vld [vmem:[#allocation50_spill] sm:$0xff]  ;;  %v4353_v40 = vrot.slane %v12043_v55, 4 }
0x18f0   : > { %v4231_v25 = vmul.f32 %v4230_v8, %v4217_v23  ;;  %v4204_v38 = vsel %vm1168_vm13, %v12096_v46, %v4203_v43  ;;  %v4280_v23 = vsel %vm1263_vm14, %v4274_v6, %v4279_v34  ;;  %v5041_v62 = vmul.f32 %v12190_v33, %v14487_v17  ;;  %v14493_v17 = vld [vmem:[#allocation137_spill] sm:$0xff] }
0x18f1   : > { %v12229_v20 = vpop.permute.xlu1 %6579  ;;  %v4132_v10 = vadd.f32 %v4129_v16, %v4056_v52  ;;  %v12273_v6 = vrot.slane %v11786_v53, %v8986_v7  ;;  %v14491_v53 = vld [vmem:[#allocation84_spill] sm:$0xff] }
0x18f2   : > { %14485 = vst [vmem:[#allocation68_spill] sm:$0xff] %v12229_v20  ;;  %5742 = vrot.lane.b32.xlu1 %v11817_v47, %s14152_s22  ;;  %v4218_v20 = vmul.f32 %v12241_v57, %v4212_v51  ;;  %v12261_v2 = vpop.permute.xlu0 %6391  ;;  %v5055_v46 = vmul.f32 %v11967_v30, %v5041_v62  ;;  %v5577_v52 = vmul.f32 %v11683_v28, %v14491_v53  ;;  %v14498_v53 = vld [vmem:[#allocation87_spill] sm:$0xff] }
0x18f3   : > { %v4207_v22 = vadd.f32 %v4204_v38, %v4132_v10 }
0x18f4   : > { %v4232_v51 = vmul.f32 %v4230_v8, %v4218_v20 }
0x18f5   : > { %v12249_v47 = vpop.permute.xlu1 %6844  ;;  %v4283_v16 = vadd.f32 %v4280_v23, %v4207_v22  ;;  %v12311_v22 = vrot.slane %v11812_v50, %v8986_v7 }
0x18f6   : > { %4235 = vrot.lane.b32.xlu1 %v4231_v25, %s14109_s23  ;;  %v5220_v25 = vmul.f32 %v11683_v28, %v14489_v63  ;;  %v12278_v43 = vpop.permute.xlu0 %6765  ;;  %v12328_v63 = vrot.slane %v12164_v0, %v8986_v7 }
0x18f8   : > { %v5234_v30 = vmul.f32 %v12273_v6, %v5220_v25 }
0x18f9   : > { %v12256_v36 = vpop.permute.xlu1 %4351 }
0x18fa   : > { %v4354_v19 = vrot.slane %v12256_v36, 4  ;;  %4237 = vrot.lane.b32.xlu1 %v4232_v51, %s14109_s23  ;;  %v12298_v51 = vrot.slane %v12086_v3, %v8986_v7  ;;  %v12300_v23 = vpop.permute.xlu0 %6453  ;;  %v14495_v3 = vld [vmem:[#allocation202_spill] sm:$0xff] }
0x18fc   : > { %v4355_v20 = vsel %vm686_vm0, %v4353_v40, %v4354_v19 }
0x18fd   : > { %v12267_v34 = vpop.permute.xlu1 %4803  ;;  %v4356_v8 = vsel %vm1358_vm1, %v12043_v55, %v4355_v20  ;;  %v12286_v55 = vrot.slane %v12069_v5, %v8986_v7  ;;  %v14492_v5 = vld [vmem:[#allocation163_spill] sm:$0xff] }
0x18fe   : > { %14488 = vst [vmem:[#allocation86_spill] sm:$0xff] %v12267_v34  ;;  %5060 = vrot.lane.b32.xlu1 %v5055_v46, %s14090_s2  ;;  %v4359_v14 = vadd.f32 %v4356_v8, %v4283_v16  ;;  %v6716_v46 = vmul.f32 %v11683_v28, %v14495_v3  ;;  %v12318_v16 = vpop.permute.xlu0 %6827  ;;  %v14496_v8 = vld [vmem:[#allocation54_spill] sm:$0xff] }
0x18ff   : > { %v5591_v10 = vmul.f32 %v12286_v55, %v5577_v52  ;;  %v5639_v52 = vmul.f32 %v11683_v28, %v14498_v53 }
0x1900   : > { %4401 = vrot.lane.b32.xlu0 %v4359_v14, %s14220_s6  ;;  %v5101_v14 = vmul.f32 %v12190_v33, %v14496_v8  ;;  %v6730_v50 = vmul.f32 %v12311_v22, %v6716_v46  ;;  %v4506_v8 = vrot.slane %v11692_v41, 4 }
0x1901   : > { %v12281_v62 = vpop.permute.xlu1 %5504  ;;  %v5653_v0 = vmul.f32 %v12328_v63, %v5639_v52  ;;  %v4656_v52 = vrot.slane %v12123_v49, 4  ;;  %v14511_v49 = vld [vmem:[#allocation58_spill] sm:$0xff] }
0x1902   : > { %14490 = vst [vmem:[#allocation141_spill] sm:$0xff] %v12281_v62  ;;  %5411 = vrot.lane.b32.xlu1 %v11858_v24, %s14090_s2  ;;  %v5970_v24 = vmul.f32 %v11683_v28, %v14493_v17  ;;  %v12344_v17 = vpop.permute.xlu0 %6467 }
0x1904   : > { %5238 = vrot.lane.b32.xlu0 %v5234_v30, %s14119_s29  ;;  %v5984_v19 = vmul.f32 %v12298_v51, %v5970_v24  ;;  %v5115_v30 = vmul.f32 %v12075_v21, %v5101_v14  ;;  %v14501_v21 = vrot.slane %v14478_v15, 4  ;;  %v4505_v24 = vrot.slane %v11989_v42, 4 }
0x1905   : > { %v12293_v38 = vpop.permute.xlu1 %5897  ;;  %v4580_v15 = vrot.slane %v12053_v59, 4 }
0x1906   : > { %5804 = vrot.lane.b32.xlu1 %v14492_v5, %s14090_s2  ;;  %v12341_v5 = vrot.slane %v11915_v39, %v8986_v7 }
0x1908   : > { %5595 = vrot.lane.b32.xlu0 %v5591_v10, %s14119_s29  ;;  %14500 = vst [vmem:[#allocation185_spill] sm:$0xff] %v12341_v5 }
0x1909   : > { %v12307_v40 = vpop.permute.xlu1 %6269 }
0x190a   : > { %14494 = vst [vmem:[#allocation177_spill] sm:$0xff] %v12307_v40  ;;  %6550 = vrot.lane.b32.xlu1 %v11918_v29, %s14152_s22  ;;  %v14497_v29 = vld [vmem:[#allocation181_spill] sm:$0xff] }
0x190b   : > { %v13883_v25 = vrot.slane %v14497_v29, 4 }
0x190c   : > { %5988 = vrot.lane.b32.xlu0 %v5984_v19, %s14119_s29  ;;  %v14502_v19 = vld [vmem:[#allocation143_spill] sm:$0xff] }
0x190d   : > { %v12321_v20 = vpop.permute.xlu1 %6643  ;;  %v6032_v3 = vmul.f32 %v11683_v28, %v14502_v19  ;;  %v4432_v39 = vsel %vm4431_vm3, %v13883_v25, %v14497_v29  ;;  %v14509_v25 = vld [vmem:[#allocation208_spill] sm:$0xff] }
0x190e   : > { %4313 = vrot.lane.b32.xlu1 %v12071_v35, %s14119_s29  ;;  %v3967_v35 = vmul.f32 %v12241_v57, %v14501_v21  ;;  %v12371_v21 = vrot.slane %v12176_v37, %v8986_v7  ;;  %v6778_v57 = vmul.f32 %v11683_v28, %v14509_v25  ;;  %v14510_v37 = vld [vmem:[#allocation38_spill] sm:$0xff]  ;;  %v5383_v25 = vrot.slane %v12128_v12, 4 }
0x190f   : > { %v6046_v53 = vmul.f32 %v12341_v5, %v6032_v3  ;;  %v4507_v3 = vsel %vm686_vm0, %v4505_v24, %v4506_v8  ;;  %v5312_v5 = vmul.f32 %v11683_v28, %v14510_v37 }
0x1910   : > { %6734 = vrot.lane.b32.xlu0 %v6730_v50, %s14109_s23  ;;  %v3981_v46 = vmul.f32 %v12222_v9, %v3967_v35  ;;  %v14504_v50 = vld [vmem:[#allocation159_spill] sm:$0xff]  ;;  %14505 = vst [vmem:[#allocation88_spill] sm:$0xff] %v12371_v21  ;;  %v4435_v9 = vmul.f32 %v12066_v48, %v4432_v39  ;;  %v14507_v35 = vld [vmem:[#allocation157_spill] sm:$0xff]  ;;  %v4508_v37 = vsel %vm978_vm11, %v11989_v42, %v4507_v3  ;;  %v4805_v3 = vrot.slane %v12055_v4, 4 }
0x1911   : > { %v12337_v10 = vpop.permute.xlu1 %4878  ;;  %v12380_v19 = vrot.slane %v14507_v35, %v8986_v7  ;;  %v14512_v39 = vld [vmem:[#allocation43_spill] sm:$0xff]  ;;  %v12416_v42 = vrot.slane %v11867_v54, %v8986_v7 }
0x1912   : > { %14499 = vst [vmem:[#allocation206_spill] sm:$0xff] %v12337_v10  ;;  %5120 = vrot.lane.b32.xlu1 %v5115_v30, %s14098_s25  ;;  %v12365_v30 = vrot.slane %v14504_v50, %v8986_v7  ;;  %v4581_v50 = vrot.slane %v11765_v27, 4  ;;  %v12393_v48 = vadd.f32 %v14479_v31, %v3981_v46  ;;  %v12397_v35 = vmul.f32 %v11683_v28, %v14512_v39 }
0x1913   : > { %14508 = vst [vmem:[#allocation70_spill] sm:$0xff] %v12380_v19  ;;  %v4730_v31 = vrot.slane %v12186_v44, 4  ;;  %v5326_v28 = vmul.f32 %v12380_v19, %v5312_v5  ;;  %v5382_v46 = vrot.slane %v11840_v60, 4 }
0x1914   : > { %5657 = vrot.lane.b32.xlu0 %v5653_v0, %s14144_s24  ;;  %v12373_v0 = vpop.permute.xlu0 %4955  ;;  %v4582_v24 = vsel %vm686_vm0, %v4580_v15, %v4581_v50  ;;  %v5775_v15 = vrot.slane %v11848_v11, 4  ;;  %v4449_v50 = vmul.f32 %v12365_v30, %v4435_v9 }
0x1915   : > { %v12361_v14 = vpop.permute.xlu1 %5566  ;;  %14506 = vst [vmem:[#allocation212_spill] sm:$0xff] %v12373_v0  ;;  %v4655_v0 = vrot.slane %v11831_v26, 4  ;;  %v5384_v9 = vsel %vm686_vm0, %v5382_v46, %v5383_v25  ;;  %v14515_v46 = vld [vmem:[#allocation72_spill] sm:$0xff] }
0x1916   : > { %14503 = vst [vmem:[#allocation166_spill] sm:$0xff] %v12361_v14  ;;  %5473 = vrot.lane.b32.xlu1 %v11945_v61, %s14098_s25  ;;  %v5161_v61 = vmul.f32 %v12190_v33, %v14511_v49  ;;  %v4511_v5 = vadd.f32 %v4508_v37, %v4449_v50  ;;  %v5445_v37 = vrot.slane %v11974_v1, 4  ;;  %v5506_v50 = vrot.slane %v14515_v46, 4  ;;  %v14518_v1 = vld [vmem:[#allocation103_spill] sm:$0xff] }
0x1917   : > { %v4657_v49 = vsel %vm686_vm0, %v4655_v0, %v4656_v52  ;;  %v4731_v52 = vrot.slane %v11950_v13, 4  ;;  %v14517_v13 = vld [vmem:[#allocation175_spill] sm:$0xff] }
0x1918   : > { %6050 = vrot.lane.b32.xlu0 %v6046_v53, %s14144_s24  ;;  %v6792_v53 = vmul.f32 %v12371_v21, %v6778_v57  ;;  %v4583_v57 = vsel %vm1073_vm12, %v12053_v59, %v4582_v24  ;;  %v12421_v0 = vpop.permute.xlu0 %5299  ;;  %v4658_v54 = vsel %vm1168_vm13, %v11831_v26, %v4657_v49  ;;  %v5776_v21 = vrot.slane %v12143_v56, 4  ;;  %v14516_v49 = vld [vmem:[#allocation66_spill] sm:$0xff] }
0x1919   : > { %v12401_v8 = vpop.permute.xlu1 %5959  ;;  %14513 = vst [vmem:[#allocation19_spill] sm:$0xff] %v12421_v0  ;;  %v4732_v59 = vsel %vm686_vm0, %v4730_v31, %v4731_v52  ;;  %v5444_v24 = vrot.slane %v12192_v58, 4  ;;  %v4881_v0 = vrot.slane %v12337_v10, 4  ;;  %v4586_v26 = vadd.f32 %v4583_v57, %v4511_v5 }
0x191a   : > { %5866 = vrot.lane.b32.xlu1 %v11970_v45, %s14098_s25  ;;  %v4806_v45 = vrot.slane %v12267_v34, 4  ;;  %v5175_v34 = vmul.f32 %v14516_v49, %v5161_v61  ;;  %v4880_v56 = vrot.slane %v14517_v13, 4  ;;  %v5507_v52 = vrot.slane %v12281_v62, 4 }
0x191b   : > { %v4661_v12 = vadd.f32 %v4658_v54, %v4586_v26  ;;  %v4733_v10 = vsel %vm1263_vm14, %v12186_v44, %v4732_v59  ;;  %v5777_v57 = vsel %vm686_vm0, %v5775_v15, %v5776_v21  ;;  %v5446_v61 = vsel %vm686_vm0, %v5444_v24, %v5445_v37  ;;  %v14521_v54 = vld [vmem:[#allocation155_spill] sm:$0xff]  ;;  %v14522_v44 = vld [vmem:[#allocation102_spill] sm:$0xff] }
0x191c   : > { %6796 = vrot.lane.b32.xlu0 %v6792_v53, %s14119_s29  ;;  %v14514_v53 = vld [vmem:[#allocation149_spill] sm:$0xff]  ;;  %v4807_v31 = vsel %vm686_vm0, %v4805_v3, %v4806_v45  ;;  %v12453_v5 = vpop.permute.xlu0 %6500  ;;  %v4882_v45 = vsel %vm686_vm0, %v4880_v56, %v4881_v0  ;;  %v5569_v3 = vrot.slane %v12361_v14, 4  ;;  %v5899_v59 = vrot.slane %v14522_v44, 4  ;;  %v14524_v26 = vld [vmem:[#allocation82_spill] sm:$0xff] }
0x191d   : > { %v12429_v39 = vpop.permute.xlu1 %6331  ;;  %v5838_v25 = vrot.slane %v14514_v53, 4  ;;  %v5837_v53 = vrot.slane %v14518_v1, 4  ;;  %14520 = vst [vmem:[#allocation192_spill] sm:$0xff] %v12453_v5  ;;  %v4894_v49 = vrot.slane %v14524_v26, 4  ;;  %v4808_v21 = vsel %vm1358_vm1, %v12055_v4, %v4807_v31 }
0x191e   : > { %6612 = vrot.lane.b32.xlu1 %v11985_v18, %s14090_s2  ;;  %v5385_v18 = vsel %vm978_vm11, %v11840_v60, %v5384_v9  ;;  %v14523_v60 = vld [vmem:[#allocation204_spill] sm:$0xff]  ;;  %v4736_v15 = vadd.f32 %v4733_v10, %v4661_v12  ;;  %v5508_v37 = vsel %vm686_vm0, %v5506_v50, %v5507_v52  ;;  %v5900_v56 = vrot.slane %v12293_v38, 4 }
0x191f   : > { %v5568_v9 = vrot.slane %v14523_v60, 4  ;;  %v5388_v24 = vadd.f32 %v5385_v18, %v5326_v28  ;;  %v5447_v0 = vsel %vm1073_vm12, %v12192_v58, %v5446_v61  ;;  %v5839_v5 = vsel %vm686_vm0, %v5837_v53, %v5838_v25  ;;  %v14526_v53 = vld [vmem:[#allocation200_spill] sm:$0xff] }
0x1920   : > { %v4883_v14 = vsel %vm1453_vm10, %v14517_v13, %v4882_v45  ;;  %v4811_v4 = vadd.f32 %v4808_v21, %v4736_v15  ;;  %v5962_v10 = vrot.slane %v12401_v8, 4  ;;  %v5719_v58 = vmul.f32 %v12416_v42, %v12397_v35  ;;  %v12485_v52 = vpop.permute.xlu0 %4086  ;;  %v14529_v15 = vld [vmem:[#allocation76_spill] sm:$0xff] }
0x1921   : > { %v12449_v19 = vpop.permute.xlu1 %6705  ;;  %v5570_v12 = vsel %vm686_vm0, %v5568_v9, %v5569_v3  ;;  %v5630_v25 = vrot.slane %v14526_v53, 4  ;;  %v5509_v13 = vsel %vm1168_vm13, %v14515_v46, %v5508_v37  ;;  %v5450_v31 = vadd.f32 %v5447_v0, %v5388_v24  ;;  %14527 = vst [vmem:[#allocation197_spill] sm:$0xff] %v12485_v52  ;;  %v14531_v37 = vld [vmem:[#allocation83_spill] sm:$0xff] }
0x1922   : > { %14519 = vst [vmem:[#allocation20_spill] sm:$0xff] %v12449_v19  ;;  %4389 = vrot.lane.b32.xlu1 %v14521_v54, %s14144_s24  ;;  %v5778_v54 = vsel %vm978_vm11, %v11848_v11, %v5777_v57  ;;  %v14525_v11 = vld [vmem:[#allocation161_spill] sm:$0xff]  ;;  %v5901_v18 = vsel %vm686_vm0, %v5899_v59, %v5900_v56  ;;  %v4886_v61 = vadd.f32 %v4883_v14, %v4811_v4 }
0x1923   : > { %v5961_v50 = vrot.slane %v14525_v11, 4  ;;  %v5781_v45 = vadd.f32 %v5778_v54, %v5719_v58  ;;  %v5571_v35 = vsel %vm1263_vm14, %v14523_v60, %v5570_v12  ;;  %v5512_v9 = vadd.f32 %v5509_v13, %v5450_v31  ;;  %v14534_v12 = vld [vmem:[#allocation154_spill] sm:$0xff] }
0x1924   : > { %v5902_v24 = vsel %vm1168_vm13, %v14522_v44, %v5901_v18  ;;  %v12522_v31 = vpop.permute.xlu0 %4159 }
0x1925   : > { %v12473_v62 = vpop.permute.xlu1 %4892  ;;  %v5963_v21 = vsel %vm686_vm0, %v5961_v50, %v5962_v10  ;;  %v5574_v4 = vadd.f32 %v5571_v35, %v5512_v9  ;;  %v14535_v50 = vld [vmem:[#allocation100_spill] sm:$0xff]  ;;  %14536 = vst [vmem:[#allocation186_spill] sm:$0xff] %v12522_v31  ;;  %v14539_v35 = vld [vmem:[#allocation130_spill] sm:$0xff]  ;;  %v6272_v31 = vrot.slane %v12307_v40, 4 }
0x1926   : > { %v4895_v28 = vrot.slane %v12473_v62, 4  ;;  %5180 = vrot.lane.b32.xlu1 %v5175_v34, %s14109_s23  ;;  %v5840_v34 = vsel %vm1073_vm12, %v14518_v1, %v5839_v5  ;;  %v4133_v1 = vadd.f32 %v14529_v15, %v12393_v48  ;;  %v14530_v5 = vld [vmem:[#allocation62_spill] sm:$0xff]  ;;  %v6023_v48 = vrot.slane %v12245_v32, 4  ;;  %v14543_v15 = vld [vmem:[#allocation68_spill] sm:$0xff] }
0x1927   : > { %v5221_v60 = vmul.f32 %v12190_v33, %v14530_v5  ;;  %v5843_v0 = vadd.f32 %v5840_v34, %v5781_v45  ;;  %v6148_v13 = vrot.slane %v14535_v50, 4  ;;  %v12527_v45 = vld [vmem:[#allocation2 + $0x4] sm:$0xff]  ;;  %v14538_v34 = vld [vmem:[#allocation131_spill] sm:$0xff] }
0x1928   : > { %v4896_v57 = vsel %vm686_vm0, %v4894_v49, %v4895_v28  ;;  %v14528_v49 = vld [vmem:[#allocation210_spill] sm:$0xff]  ;;  %v4208_v10 = vadd.f32 %v14534_v12, %v4133_v1  ;;  %v5964_v28 = vsel %vm1263_vm14, %v14525_v11, %v5963_v21  ;;  %v6091_v11 = vmul.f32 %v12527_v45, %v14538_v34  ;;  %v14541_v21 = vld [vmem:[#allocation183_spill] sm:$0xff]  ;;  %v14546_v12 = vld [vmem:[#allocation189_spill] sm:$0xff] }
0x1929   : > { %v12493_v3 = vpop.permute.xlu1 %5628  ;;  %v4897_v46 = vsel %vm1466_vm15, %v14524_v26, %v4896_v57  ;;  %v14532_v26 = vld [vmem:[#allocation139_spill] sm:$0xff]  ;;  %v14537_v57 = vld [vmem:[#allocation73_spill] sm:$0xff]  ;;  %v6583_v1 = vrot.slane %v14543_v15, 4  ;;  %v14554_v40 = vld [vmem:[#allocation92_spill] sm:$0xff] }
0x192a   : > { %v5631_v59 = vrot.slane %v12493_v3, 4  ;;  %5535 = vrot.lane.b32.xlu1 %v14528_v49, %s14109_s23  ;;  %v4900_v14 = vadd.f32 %v4897_v46, %v4886_v61  ;;  %v12509_v56 = vmul.f32 %v14532_v26, %v14531_v37  ;;  %v6513_v46 = vmul.f32 %v12527_v45, %v14539_v35  ;;  %v14542_v49 = vld [vmem:[#allocation95_spill] sm:$0xff]  ;;  %v14544_v37 = vld [vmem:[#allocation160_spill] sm:$0xff] }
0x192c   : > { %v5632_v54 = vsel %vm686_vm0, %v5630_v25, %v5631_v59  ;;  %4904 = vrot.lane.b32.xlu0 %v4900_v14, %s14533_s19  ;;  %v5905_v25 = vadd.f32 %v5902_v24, %v5843_v0  ;;  %v12537_v59 = vrot.slane %v14541_v21, %v8986_v7  ;;  %v6147_v14 = vrot.slane %v14542_v49, 4  ;;  %v14549_v21 = vld [vmem:[#allocation98_spill] sm:$0xff] }
0x192d   : > { %v12517_v58 = vpop.permute.xlu1 %6021  ;;  %v5633_v44 = vsel %vm1358_vm1, %v14526_v53, %v5632_v54  ;;  %v14540_v53 = vld [vmem:[#allocation132_spill] sm:$0xff]  ;;  %v6584_v0 = vrot.slane %v14544_v37, 4  ;;  %v14545_v54 = vld [vmem:[#allocation169_spill] sm:$0xff] }
0x192e   : > { %v6024_v18 = vrot.slane %v12517_v58, 4  ;;  %5928 = vrot.lane.b32.xlu1 %v14537_v57, %s14109_s23  ;;  %v5636_v61 = vadd.f32 %v5633_v44, %v5574_v4  ;;  %v6840_v9 = vmul.f32 %v12527_v45, %v14540_v53  ;;  %v5967_v24 = vadd.f32 %v5964_v28, %v5905_v25  ;;  %v14547_v28 = vld [vmem:[#allocation81_spill] sm:$0xff] }
0x192f   : > { %v6209_v4 = vrot.slane %v14545_v54, 4  ;;  %v4284_v44 = vadd.f32 %v14546_v12, %v4208_v10  ;;  %v6149_v35 = vsel %vm686_vm0, %v6147_v14, %v6148_v13  ;;  %v12553_v53 = vrot.slane %v12249_v47, %v8986_v7  ;;  %v14548_v10 = vld [vmem:[#allocation193_spill] sm:$0xff]  ;;  %v12567_v12 = vpop.permute.xlu0 %4998 }
0x1930   : > { %v6025_v5 = vsel %vm686_vm0, %v6023_v48, %v6024_v18  ;;  %5671 = vrot.lane.b32.xlu0 %v5636_v61, %s14220_s6  ;;  %v6646_v48 = vrot.slane %v12321_v20, 4  ;;  %v6527_v18 = vmul.f32 %v12537_v59, %v6513_v46  ;;  %v12561_v61 = vrot.slane %v14548_v10, %v8986_v7  ;;  %14551 = vst [vmem:[#allocation47_spill] sm:$0xff] %v12567_v12  ;;  %v14552_v46 = vld [vmem:[#allocation94_spill] sm:$0xff] }
0x1931   : > { %v12546_v57 = vpop.permute.xlu1 %6393  ;;  %v6026_v34 = vsel %vm1358_vm1, %v12245_v32, %v6025_v5  ;;  %v6210_v32 = vrot.slane %v14549_v21, 4  ;;  %v14550_v5 = vld [vmem:[#allocation198_spill] sm:$0xff]  ;;  %v6585_v14 = vsel %vm686_vm0, %v6583_v1, %v6584_v0  ;;  %v4360_v47 = vadd.f32 %v12256_v36, %v4284_v44 }
0x1932   : > { %6674 = vrot.lane.b32.xlu1 %v14547_v28, %s14098_s25  ;;  %v6029_v25 = vadd.f32 %v6026_v34, %v5967_v24  ;;  %v6645_v13 = vrot.slane %v14550_v5, 4  ;;  %v6708_v24 = vrot.slane %v12449_v19, 4  ;;  %v6271_v34 = vrot.slane %v14552_v46, 4  ;;  %v14553_v28 = vld [vmem:[#allocation194_spill] sm:$0xff] }
0x1933   : > { %v6707_v10 = vrot.slane %v14553_v28, 4  ;;  %v6150_v52 = vsel %vm978_vm11, %v14542_v49, %v6149_v35  ;;  %v6211_v33 = vsel %vm686_vm0, %v6209_v4, %v6210_v32  ;;  %v6854_v36 = vmul.f32 %v12553_v53, %v6840_v9 }
0x1934   : > { %6064 = vrot.lane.b32.xlu0 %v6029_v25, %s14220_s6  ;;  %v6647_v0 = vsel %vm686_vm0, %v6645_v13, %v6646_v48  ;;  %v6334_v44 = vrot.slane %v12429_v39, 4  ;;  %v5235_v25 = vmul.f32 %v12273_v6, %v5221_v60  ;;  %v6105_v19 = vmul.f32 %v12561_v61, %v6091_v11 }
0x1935   : > { %v12577_v1 = vpop.permute.xlu1 %6767  ;;  %v6333_v49 = vrot.slane %v14554_v40, 4  ;;  %v6586_v4 = vsel %vm978_vm11, %v14543_v15, %v6585_v14  ;;  %v6769_v35 = vrot.slane %v12278_v43, 4  ;;  %v6273_v9 = vsel %vm686_vm0, %v6271_v34, %v6272_v31 }
0x1936   : > { %v6770_v12 = vrot.slane %v12577_v1, 4  ;;  %4403 = vrot.lane.b32.xlu1 %v4360_v47, %s14220_s6  ;;  %v6709_v48 = vsel %vm686_vm0, %v6707_v10, %v6708_v24  ;;  %v6396_v32 = vrot.slane %v12546_v57, 4  ;;  %v6395_v13 = vrot.slane %v12261_v2, 4  ;;  %v12601_v47 = vpop.permute.xlu0 %5347 }
0x1937   : > { %v6153_v6 = vadd.f32 %v6150_v52, %v6105_v19  ;;  %v6212_v60 = vsel %vm1073_vm12, %v14545_v54, %v6211_v33  ;;  %v6648_v11 = vsel %vm1073_vm12, %v14550_v5, %v6647_v0  ;;  %v6589_v14 = vadd.f32 %v6586_v4, %v6527_v18 }
0x1938   : > { %6858 = vrot.lane.b32.xlu0 %v6854_v36, %s14144_s24  ;;  %v6335_v31 = vsel %vm686_vm0, %v6333_v49, %v6334_v44  ;;  %v6771_v24 = vsel %vm686_vm0, %v6769_v35, %v6770_v12  ;;  %v5592_v19 = vmul.f32 %v12286_v55, %v12509_v56  ;;  %v6274_v33 = vsel %vm1168_vm13, %v14552_v46, %v6273_v9  ;;  %v14555_v12 = vld [vmem:[#allocation136_spill] sm:$0xff]  ;;  %v14556_v36 = vld [vmem:[#allocation167_spill] sm:$0xff]  ;;  %v8061_v35 = vld [vmem:[#allocation2 + $0x8] sm:$0xf] }
0x1939   : > { %v12599_v15 = vpop.permute.xlu1 %6455  ;;  %v6710_v52 = vsel %vm1168_vm13, %v14553_v28, %v6709_v48  ;;  %v6457_v54 = vrot.slane %v12300_v23, 4  ;;  %v6215_v18 = vadd.f32 %v6212_v60, %v6153_v6  ;;  %v6651_v5 = vadd.f32 %v6648_v11, %v6589_v14  ;;  %v12635_v11 = vld [vmem:[#allocation2 + $0xc] sm:$0xf] }
0x193a   : > { %v6458_v34 = vrot.slane %v12599_v15, 4  ;;  %5240 = vrot.lane.b32.xlu1 %v5235_v25, %s14119_s29  ;;  %v6397_v10 = vsel %vm686_vm0, %v6395_v13, %v6396_v32  ;;  %v5971_v0 = vmul.f32 %v14556_v36, %v14555_v12  ;;  %v6831_v44 = vrot.slane %v12318_v16, 4  ;;  %v14558_v14 = vld [vmem:[#allocation201_spill] sm:$0xff] }
0x193b   : > { %v6336_v55 = vsel %vm1263_vm14, %v14554_v40, %v6335_v31  ;;  %v6772_v56 = vsel %vm1263_vm14, %v12278_v43, %v6771_v24  ;;  %v6277_v28 = vadd.f32 %v6274_v33, %v6215_v18  ;;  %v6713_v25 = vadd.f32 %v6710_v52, %v6651_v5  ;;  %v12632_v43 = vpop.permute.xlu0 %5740 }
0x193c   : > { %v6459_v49 = vsel %vm686_vm0, %v6457_v54, %v6458_v34  ;;  %v14557_v9 = vrot.slane %v14497_v29, 4  ;;  %v6398_v40 = vsel %vm1358_vm1, %v12261_v2, %v6397_v10  ;;  %v5985_v32 = vmul.f32 %v12298_v51, %v5971_v0 }
0x193d   : > { %v12622_v46 = vpop.permute.xlu1 %6829  ;;  %v6339_v13 = vadd.f32 %v6336_v55, %v6277_v28  ;;  %v6775_v60 = vadd.f32 %v6772_v56, %v6713_v25  ;;  %v6717_v31 = vmul.f32 %v12635_v11, %v14558_v14  ;;  %v6460_v29 = vsel %vm1453_vm10, %v12300_v23, %v6459_v49  ;;  %v4918_v55 = vld [vmem:[%s13952_s0] sm:$0xf]  ;;  %v14560_v56 = vld [vmem:[#allocation37_spill] sm:$0xff] }
0x193e   : > { %v6832_v4 = vrot.slane %v12622_v46, 4  ;;  %5597 = vrot.lane.b32.xlu1 %v5592_v19, %s14119_s29  ;;  %v4436_v48 = vmul.f32 %v8061_v35, %v14557_v9  ;;  %v6471_v51 = vrot.slane %v12344_v17, 4  ;;  %v14562_v25 = vld [vmem:[#allocation188_spill] sm:$0xff]  ;;  %v14564_v9 = vld [vmem:[#allocation70_spill] sm:$0xff]  ;;  %v14567_v14 = vld [vmem:[#allocation85_spill] sm:$0xff] }
0x193f   : > { %v6401_v34 = vadd.f32 %v6398_v40, %v6339_v13  ;;  %v6731_v54 = vmul.f32 %v12311_v22, %v6717_v31  ;;  %v12657_v12 = vpop.permute.xlu0 %5255  ;;  %v14559_v22 = vld [vmem:[#allocation39_spill] sm:$0xff]  ;;  %v14565_v40 = vld [vmem:[#allocation185_spill] sm:$0xff] }
0x1940   : > { %v6833_v6 = vsel %vm686_vm0, %v6831_v44, %v6832_v4  ;;  %v4450_v52 = vmul.f32 %v12365_v30, %v4436_v48  ;;  %v5654_v44 = vmul.f32 %v12328_v63, %v14559_v22  ;;  %v14575_v22 = vld [vmem:[#allocation206_spill] sm:$0xff] }
0x1941   : > { %v12641_v24 = vpop.permute.xlu1 %6469  ;;  %v6834_v2 = vsel %vm1358_vm1, %v12318_v16, %v6833_v6  ;;  %v6463_v23 = vadd.f32 %v6460_v29, %v6401_v34  ;;  %v14566_v6 = vld [vmem:[#allocation41_spill] sm:$0xff]  ;;  %v14568_v29 = vld [vmem:[#allocation207_spill] sm:$0xff] }
0x1942   : > { %v6472_v19 = vrot.slane %v12641_v24, 4  ;;  %5990 = vrot.lane.b32.xlu1 %v5985_v32, %s14119_s29  ;;  %v6837_v33 = vadd.f32 %v6834_v2, %v6775_v60  ;;  %v4512_v10 = vadd.f32 %v11692_v41, %v4450_v52  ;;  %v14561_v41 = vld [vmem:[#allocation142_spill] sm:$0xff]  ;;  %v5706_v60 = vmul.f32 %v14556_v36, %v14566_v6  ;;  %v14570_v52 = vld [vmem:[#allocation88_spill] sm:$0xff]  ;;  %v14582_v6 = vld [vmem:[#allocation77_spill] sm:$0xff] }
0x1943   : > { %v6033_v28 = vmul.f32 %v14556_v36, %v14561_v41  ;;  %v12680_v13 = vpop.permute.xlu0 %5058  ;;  %v6779_v2 = vmul.f32 %v12635_v11, %v14568_v29  ;;  %v14572_v36 = vmov 0  }
0x1944   : > { %v6473_v18 = vsel %vm686_vm0, %v6471_v51, %v6472_v19  ;;  %6872 = vrot.lane.b32.xlu0 %v6837_v33, %s14220_s6  ;;  %v4587_v30 = vadd.f32 %v11765_v27, %v4512_v10  ;;  %v14563_v27 = vld [vmem:[#allocation49_spill] sm:$0xff]  ;;  %v5720_v33 = vmul.f32 %v12416_v42, %v5706_v60 }
0x1945   : > { %v12652_v5 = vpop.permute.xlu1 %4938  ;;  %v6474_v16 = vsel %vm1466_vm15, %v12344_v17, %v6473_v18  ;;  %v5313_v17 = vmul.f32 %v14532_v26, %v14560_v56  ;;  %v5011_v63 = vmul.f32 %v12527_v45, %v14563_v27  ;;  %v6047_v32 = vmul.f32 %v14565_v40, %v6033_v28  ;;  %v14569_v51 = vld [vmem:[#allocation69_spill] sm:$0xff]  ;;  %v14571_v18 = vld [vmem:[#allocation86_spill] sm:$0xff] }
0x1946   : > { %6736 = vrot.lane.b32.xlu1 %v6731_v54, %s14109_s23  ;;  %v6477_v0 = vadd.f32 %v6474_v16, %v6463_v23  ;;  %v4662_v49 = vadd.f32 %v14562_v25, %v4587_v30  ;;  %v6793_v54 = vmul.f32 %v14570_v52, %v6779_v2  ;;  %v14573_v16 = vld [vmem:[#allocation78_spill] sm:$0xff]  ;;  %v14577_v56 = vld [vmem:[#allocation141_spill] sm:$0xff] }
0x1947   : > { %v5327_v48 = vmul.f32 %v14564_v9, %v5313_v17  ;;  %v5782_v10 = vadd.f32 %v14573_v16, %v5720_v33  ;;  %v14578_v28 = vld [vmem:[#allocation53_spill] sm:$0xff]  ;;  %v14581_v40 = vld [vmem:[#allocation166_spill] sm:$0xff] }
0x1948   : > { %6481 = vrot.lane.b32.xlu0 %v6477_v0, %s14248_s26  ;;  %v4737_v34 = vadd.f32 %v14569_v51, %v4662_v49  ;;  %v14574_v0 = vld [vmem:[#allocation91_spill] sm:$0xff]  ;;  %v5071_v25 = vmul.f32 %v12527_v45, %v14578_v28  ;;  %v14579_v27 = vld [vmem:[#allocation129_spill] sm:$0xff] }
0x1949   : > { %v5389_v31 = vadd.f32 %v14567_v14, %v5327_v48  ;;  %v14580_v9 = vld [vmem:[#allocation149_spill] sm:$0xff] }
0x194a   : > { %v5016_v4 = vpop.permute.xlu1 %5015  ;;  %5659 = vrot.lane.b32.xlu1 %v5654_v44, %s14144_s24  ;;  %v4812_v23 = vadd.f32 %v14571_v18, %v4737_v34  ;;  %v5844_v48 = vadd.f32 %v14580_v9, %v5782_v10  ;;  %v14584_v2 = vld [vmem:[#allocation57_spill] sm:$0xff]  ;;  %v14590_v9 = vld [vmem:[#allocation212_spill] sm:$0xff] }
0x194b   : > { %v12676_v35 = vrot.slane %v5016_v4, %v8986_v7  ;;  %v5451_v30 = vadd.f32 %v14574_v0, %v5389_v31  ;;  %v8063_v4 = vld [vmem:[#allocation2 + $0xc] sm:$0xf]  ;;  %v5131_v51 = vmul.f32 %v12527_v45, %v14584_v2 }
0x194c   : > { %4922 = vperm.xlu0 %8006, %v4918_v55   ;;  %v4887_v44 = vadd.f32 %v14575_v22, %v4812_v23  ;;  %v12700_v55 = vpop.permute.xlu0 %5409  ;;  %v5906_v14 = vadd.f32 %v12293_v38, %v5844_v48  ;;  %v14585_v16 = vld [vmem:[#allocation133_spill] sm:$0xff]  ;;  %v4964_v48 = vrot.slane %v14590_v9, %v8986_v7 }
0x194d   : > { %v5025_v26 = vmul.f32 %v12676_v35, %v5011_v63  ;;  %14576 = vst [vmem:[#allocation22_spill] sm:$0xff] %v12700_v55  ;;  %v5513_v42 = vadd.f32 %v14577_v56, %v5451_v30  ;;  %v6092_v63 = vmul.f32 %v8063_v4, %v14579_v27  ;;  %v6841_v10 = vmul.f32 %v12635_v11, %v14585_v16  ;;  %v14587_v30 = vld [vmem:[#allocation20_spill] sm:$0xff] }
0x194e   : > { %6052 = vrot.lane.b32.xlu1 %v6047_v32, %s14144_s24  ;;  %v4901_v17 = vadd.f32 %v12473_v62, %v4887_v44  ;;  %v6514_v62 = vmul.f32 %v12635_v11, %v14582_v6  ;;  %v14589_v27 = vld [vmem:[#allocation65_spill] sm:$0xff] }
0x194f   : > { %v12690_v19 = vpop.permute.xlu1 %5692  ;;  %v5575_v32 = vadd.f32 %v14581_v40, %v5513_v42  ;;  %v6106_v60 = vmul.f32 %v12561_v61, %v6092_v63 }
0x1950   : > { %5029 = vrot.lane.b32.xlu0 %v5025_v26, %s14090_s2  ;;  %v12719_v31 = vpop.permute.xlu0 %5802  ;;  %v6528_v33 = vmul.f32 %v12537_v59, %v6514_v62  ;;  %v14592_v62 = vld [vmem:[#allocation44_spill] sm:$0xff] }
0x1951   : > { %8007 = vset.pattern.permute.xlu0 %v14572_v36  ;;  %14583 = vst [vmem:[#allocation67_spill] sm:$0xff] %v12719_v31  ;;  %v5637_v29 = vadd.f32 %v12493_v3, %v5575_v32  ;;  %v6154_v52 = vadd.f32 %v14535_v50, %v6106_v60  ;;  %v14591_v32 = vld [vmem:[#allocation46_spill] sm:$0xff]  ;;  %v14593_v60 = vld [vmem:[#allocation168_spill] sm:$0xff] }
0x1952   : > { %6798 = vrot.lane.b32.xlu1 %v6793_v54, %s14119_s29  ;;  %v5968_v54 = vadd.f32 %v12401_v8, %v5906_v14  ;;  %v6590_v38 = vadd.f32 %v14544_v37, %v6528_v33  ;;  %v6855_v8 = vmul.f32 %v12553_v53, %v6841_v10  ;;  %v14586_v37 = vld [vmem:[#allocation177_spill] sm:$0xff]  ;;  %v5264_v53 = vrot.slane %v12657_v12, %v8986_v7 }
0x1953   : > { %v6216_v59 = vadd.f32 %v14549_v21, %v6154_v52  ;;  %v4952_v14 = vmul.f32 %v14593_v60, %v14592_v62  ;;  %v14611_v62 = vld [vmem:[#allocation35_spill] sm:$0xff] }
0x1954   : > { %v5076_v41 = vpop.permute.xlu1 %5075  ;;  %v6030_v3 = vadd.f32 %v12517_v58, %v5968_v54  ;;  %v6652_v50 = vadd.f32 %v12321_v20, %v6590_v38  ;;  %v12738_v0 = vpop.permute.xlu0 %6548  ;;  %v14588_v20 = vld [vmem:[#allocation61_spill] sm:$0xff]  ;;  %v14597_v38 = vld [vmem:[#allocation52_spill] sm:$0xff] }
0x1955   : > { %v12708_v49 = vrot.slane %v5076_v41, %v8986_v7  ;;  %v6278_v58 = vadd.f32 %v14586_v37, %v6216_v59  ;;  %v14598_v59 = vld [vmem:[#allocation56_spill] sm:$0xff] }
0x1956   : > { %4906 = vrot.lane.b32.xlu1 %v4901_v17, %s14533_s19  ;;  %v6714_v22 = vadd.f32 %v14587_v30, %v6652_v50  ;;  %v5191_v17 = vmul.f32 %v12527_v45, %v14588_v20  ;;  %v5132_v50 = vmul.f32 %v14593_v60, %v14598_v59 }
0x1957   : > { %v5085_v26 = vmul.f32 %v12708_v49, %v5071_v25  ;;  %v6340_v56 = vadd.f32 %v12429_v39, %v6278_v58 }
0x1958   : > { %v12746_v42 = vpop.permute.xlu0 %4311  ;;  %v6776_v21 = vadd.f32 %v12577_v1, %v6714_v22  ;;  %v5251_v1 = vmul.f32 %v12527_v45, %v14589_v27 }
0x1959   : > { %v5136_v34 = vpop.permute.xlu1 %5135  ;;  %5089 = vrot.lane.b32.xlu0 %v5085_v26, %s14098_s25  ;;  %v6402_v28 = vadd.f32 %v12546_v57, %v6340_v56  ;;  %v4951_v26 = vmul.f32 %v12527_v45, %v14591_v32  ;;  %v14610_v32 = vld [vmem:[#allocation134_spill] sm:$0xff] }
0x195a   : > { %v5144_v61 = vrot.slane %v5136_v34, %v8986_v7  ;;  %5673 = vrot.lane.b32.xlu1 %v5637_v29, %s14220_s6  ;;  %v6838_v25 = vadd.f32 %v12622_v46, %v6776_v21  ;;  %v5265_v12 = vmul.f32 %v5264_v53, %v5251_v1  ;;  %v6552_v1 = vrot.slane %v12738_v0, 4 }
0x195b   : > { %v6464_v63 = vadd.f32 %v12599_v15, %v6402_v28  ;;  %v4965_v15 = vmul.f32 %v4964_v48, %v4951_v26  ;;  %v6496_v26 = vmul.f32 %v12527_v45, %v14610_v32 }
0x195c   : > { %v5145_v18 = vmul.f32 %v5144_v61, %v5131_v51  ;;  %v12766_v40 = vpop.permute.xlu0 %5118  ;;  %v14595_v51 = vld [vmem:[#allocation48_spill] sm:$0xff] }
0x195d   : > { %v12732_v23 = vpop.permute.xlu1 %4084  ;;  %v6478_v57 = vadd.f32 %v12641_v24, %v6464_v63  ;;  %v4966_v24 = vmul.f32 %v4964_v48, %v4952_v14  ;;  %v5012_v34 = vmul.f32 %v14593_v60, %v14595_v51  ;;  %v14608_v48 = vld [vmem:[#allocation192_spill] sm:$0xff]  ;;  %v12846_v14 = vrot.slane %v14611_v62, 4 }
0x195e   : > { %6066 = vrot.lane.b32.xlu1 %v6030_v3, %s14220_s6  ;;  %5149 = vrot.lane.b32.xlu0 %v5145_v18, %s14109_s23  ;;  %v5072_v3 = vmul.f32 %v14593_v60, %v14597_v38  ;;  %v14614_v38 = vld [vmem:[#allocation117_spill] sm:$0xff] }
0x195f   : > { %v5026_v52 = vmul.f32 %v12676_v35, %v5012_v34  ;;  %v14599_v35 = vld [vmem:[#allocation60_spill] sm:$0xff] }
0x1960   : > { %v12779_v29 = vpop.permute.xlu0 %5471  ;;  %v5086_v18 = vmul.f32 %v12708_v49, %v5072_v3  ;;  %v5192_v58 = vmul.f32 %v14593_v60, %v14599_v35  ;;  %v1550_v3 = vrot.slane %v14614_v38, 4 }
0x1961   : > { %v5196_v44 = vpop.permute.xlu1 %5195  ;;  %14594 = vst [vmem:[#allocation209_spill] sm:$0xff] %v12779_v29  ;;  %v14626_v29 = vld [vmem:[#allocation178_spill] sm:$0xff] }
0x1962   : > { %v5204_v41 = vrot.slane %v5196_v44, %v8986_v7  ;;  %6860 = vrot.lane.b32.xlu1 %v6855_v8, %s14144_s24  ;;  %v5146_v8 = vmul.f32 %v5144_v61, %v5132_v50  ;;  %v14600_v44 = vld [vmem:[#allocation64_spill] sm:$0xff] }
0x1963   : > { %v5252_v56 = vmul.f32 %v14593_v60, %v14600_v44  ;;  %v14617_v44 = vld [vmem:[#allocation172_spill] sm:$0xff] }
0x1964   : > { %v5205_v4 = vmul.f32 %v5204_v41, %v5191_v17  ;;  %v12787_v33 = vpop.permute.xlu0 %5864  ;;  %v5206_v22 = vmul.f32 %v5204_v41, %v5192_v58  ;;  %v14616_v58 = vld [vmem:[#allocation170_spill] sm:$0xff] }
0x1965   : > { %v12757_v39 = vpop.permute.xlu1 %4161  ;;  %14596 = vst [vmem:[#allocation74_spill] sm:$0xff] %v12787_v33  ;;  %v5266_v21 = vmul.f32 %v5264_v53, %v5252_v56  ;;  %v4012_v56 = vrot.slane %v14617_v44, 4 }
0x1966   : > { %6874 = vrot.lane.b32.xlu1 %v6838_v25, %s14220_s6  ;;  %5209 = vrot.lane.b32.xlu0 %v5205_v4, %s14119_s29 }
0x1968   : > { %v6611_v10 = vpop.permute.xlu0 %6610 }
0x1969   : > { %v12769_v46 = vpop.permute.xlu1 %5000  ;;  %v6614_v59 = vrot.slane %v6611_v10, 4 }
0x196a   : > { %6483 = vrot.lane.b32.xlu1 %v6478_v57, %s14248_s26  ;;  %5269 = vrot.lane.b32.xlu0 %v5265_v12, %s14144_s24  ;;  %v12838_v12 = vrot.slane %v14608_v48, %v8986_v7 }
0x196c   : > { %v12806_v30 = vpop.permute.xlu0 %4387  ;;  %14609 = vst [vmem:[#allocation71_spill] sm:$0xff] %v12838_v12 }
0x196d   : > { %v12775_v6 = vpop.permute.xlu1 %5349 }
0x196e   : > { %4969 = vrot.lane.b32.xlu1 %v4965_v15, %s14152_s22 }
0x1970   : > { %v12815_v61 = vpop.permute.xlu0 %5178 }
0x1971   : > { %v12782_v2 = vpop.permute.xlu1 %5742 }
0x1972   : > { %4971 = vrot.lane.b32.xlu1 %v4966_v24, %s14152_s22  ;;  %v14612_v24 = vld [vmem:[#allocation116_spill] sm:$0xff] }
0x1973   : > { %v1551_v51 = vrot.slane %v14612_v24, 4 }
0x1974   : > { %v12820_v28 = vpop.permute.xlu0 %5533 }
0x1975   : > { %v12790_v54 = vpop.permute.xlu1 %4235  ;;  %14603 = vst [vmem:[#allocation96_spill] sm:$0xff] %v12820_v28 }
0x1976   : > { %5031 = vrot.lane.b32.xlu1 %v5026_v52, %s14090_s2  ;;  %s14704_s2 = sld [smem:[#allocation221_spill]] }
0x1978   : > { %v12826_v4 = vpop.permute.xlu0 %5926 }
0x1979   : > { %v12796_v16 = vpop.permute.xlu1 %4237  ;;  %14604 = vst [vmem:[#allocation26_spill] sm:$0xff] %v12826_v4 }
0x197a   : > { %5091 = vrot.lane.b32.xlu1 %v5086_v18, %s14098_s25  ;;  %v6510_v18 = vmul.f32 %v12838_v12, %v6496_v26  ;;  %s14706_s25 = sld [smem:[#allocation23_spill]] }
0x197c   : > { %v12832_v63 = vpop.permute.xlu0 %6672 }
0x197d   : > { %v12801_v37 = vpop.permute.xlu1 %5060  ;;  %14606 = vst [vmem:[#allocation190_spill] sm:$0xff] %v12832_v63 }
0x197e   : > { %5151 = vrot.lane.b32.xlu1 %v5146_v8, %s14109_s23  ;;  %v14615_v8 = vld [vmem:[#allocation144_spill] sm:$0xff]  ;;  %s14668_s23 = smov 64  }
0x197f   : > { %v3938_v35 = vrot.slane %v14615_v8, 4 }
0x1980   : > { %v12843_v15 = vpop.permute.xlu0 %4401 }
0x1981   : > { %v12808_v49 = vpop.permute.xlu1 %5411 }
0x1982   : > { %5211 = vrot.lane.b32.xlu1 %v5206_v22, %s14119_s29  ;;  %v4013_v22 = vrot.slane %v14616_v58, 4  ;;  %s14708_s29 = sld [smem:[#allocation10_spill]] }
0x1984   : > { %v4014_v4 = vsel %vm686_vm0, %v4012_v56, %v4013_v22  ;;  %v14627_v56 = vld [vmem:[#allocation197_spill] sm:$0xff] }
0x1985   : > { %v12813_v20 = vpop.permute.xlu1 %5804 }
0x1986   : > { %14601 = vst [vmem:[#allocation89_spill] sm:$0xff] %v12813_v20  ;;  %5271 = vrot.lane.b32.xlu1 %v5266_v21, %s14144_s24 }
0x1988   : > { %s7557_s1 = sshll.u32 %s14708_s29, 7 }
0x1989   : > { %v12818_v17 = vpop.permute.xlu1 %6550 }
0x198a   : > { %14602 = vst [vmem:[#allocation24_spill] sm:$0xff] %v12818_v17  ;;  %v6553_v53 = vrot.slane %v12818_v17, 4  ;;  %v14623_v17 = vld [vmem:[#allocation164_spill] sm:$0xff] }
0x198b   : > { %v3955_v63 = vrot.slane %v14623_v17, %v8986_v7  ;;  %v4934_v17 = vmul.f32 %v12527_v45, %v14626_v29 }
0x198c   : > { %v6554_v57 = vsel %vm686_vm0, %v6552_v1, %v6553_v53  ;;  %v14618_v1 = vld [vmem:[#allocation42_spill] sm:$0xff] }
0x198d   : > { %v12822_v25 = vpop.permute.xlu1 %4313  ;;  %v6555_v34 = vsel %vm978_vm11, %v12738_v0, %v6554_v57  ;;  %v12862_v0 = vsel %vm1476_vm4, %v12846_v14, %v14611_v62  ;;  %v1493_v48 = vrot.slane %v14618_v1, %v8986_v7  ;;  %v8064_v57 = vld [vmem:[#allocation2 + $0x8] sm:$0xf]  ;;  %v12875_v62 = vpop.permute.xlu0 %5238  ;;  %v14621_v1 = vld [vmem:[#allocation118_spill] sm:$0xff] }
0x198e   : > { %v6558_v21 = vadd.f32 %v6555_v34, %v6510_v18  ;;  %v1481_v32 = vmul.f32 %v8064_v57, %v12846_v14  ;;  %v1552_v18 = vsel %vm686_vm0, %v1550_v3, %v1551_v51  ;;  %v1627_v57 = vrot.slane %v14621_v1, 4  ;;  %v14624_v3 = vld [vmem:[#allocation34_spill] sm:$0xff] }
0x198f   : > { %v1553_v51 = vsel %vm978_vm11, %v14614_v38, %v1552_v18  ;;  %v4015_v38 = vsel %vm978_vm11, %v14617_v44, %v4014_v4  ;;  %v4240_v4 = vrot.slane %v12796_v16, 4 }
0x1990   : > { %v1495_v28 = vmul.f32 %v1493_v48, %v1481_v32  ;;  %v4164_v32 = vrot.slane %v12757_v39, 4 }
0x1991   : > { %v12824_v41 = vpop.permute.xlu1 %5120 }
0x1992   : > { %v12898_v22 = vadd.f32 %v14612_v24, %v1495_v28 }
0x1995   : > { %v12828_v27 = vpop.permute.xlu1 %5473 }
0x1996   : > { %14605 = vst [vmem:[#allocation51_spill] sm:$0xff] %v12828_v27  ;;  %v14625_v27 = vld [vmem:[#allocation99_spill] sm:$0xff] }
0x1997   : > { %v3943_v33 = vmul.f32 %v14625_v27, %v3938_v35  ;;  %v12907_v27 = vpop.permute.xlu0 %5595 }
0x1998   : > { %14628 = vst [vmem:[#allocation187_spill] sm:$0xff] %v12907_v27  ;;  %v5062_v27 = vrot.slane %v12680_v13, 4 }
0x1999   : > { %v12834_v9 = vpop.permute.xlu1 %5866 }
0x199a   : > { %14607 = vst [vmem:[#allocation18_spill] sm:$0xff] %v12834_v9 }
0x199b   : > { %v12938_v12 = vpop.permute.xlu0 %5988 }
0x199d   : > { %v12851_v52 = vpop.permute.xlu1 %6612 }
0x199e   : > { %14613 = vst [vmem:[#allocation27_spill] sm:$0xff] %v12851_v52  ;;  %v6615_v50 = vrot.slane %v12851_v52, 4  ;;  %v12870_v52 = vld [vmem:[#allocation2] sm:$0xff] }
0x199f   : > { %14619 = vst [vmem:[#allocation93_spill] sm:$0xff] %v12870_v52  ;;  %v1480_v34 = vmul.f32 %v12870_v52, %v12862_v0 }
0x19a0   : > { %v6616_v53 = vsel %vm686_vm0, %v6614_v59, %v6615_v50  ;;  %v3939_v50 = vsel %vm2443_vm5, %v3938_v35, %v14615_v8  ;;  %v14629_v35 = vld [vmem:[#allocation120_spill] sm:$0xff] }
0x19a1   : > { %v6617_v26 = vsel %vm1073_vm12, %v6611_v10, %v6616_v53  ;;  %v12868_v36 = vpop.permute.xlu1 %4389  ;;  %v14622_v10 = vld [vmem:[#allocation119_spill] sm:$0xff]  ;;  %v1494_v8 = vmul.f32 %v1493_v48, %v1480_v34  ;;  %v3942_v9 = vmul.f32 %v12870_v52, %v3939_v50  ;;  %v3957_v50 = vmul.f32 %v3955_v63, %v3943_v33  ;;  %v14632_v52 = vld [vmem:[#allocation121_spill] sm:$0xff] }
0x19a2   : > { %v12877_v59 = vadd.f32 %v6617_v26, %v6558_v21  ;;  %v1626_v53 = vrot.slane %v14622_v10, 4  ;;  %v4935_v21 = vmul.f32 %v14593_v60, %v14624_v3  ;;  %v4088_v26 = vrot.slane %v12732_v23, 4  ;;  %v14630_v3 = vld [vmem:[#allocation186_spill] sm:$0xff] }
0x19a3   : > { %v4089_v60 = vrot.slane %v14627_v56, 4  ;;  %v12904_v18 = vadd.f32 %v1553_v51, %v1494_v8  ;;  %v3956_v34 = vmul.f32 %v3955_v63, %v3942_v9  ;;  %v1703_v29 = vrot.slane %v14629_v35, 4 }
0x19a4   : > { %14620 = vst [vmem:[#allocation29_spill] sm:$0xff] %v12877_v59  ;;  %v1628_v48 = vsel %vm686_vm0, %v1626_v53, %v1627_v57  ;;  %v4163_v28 = vrot.slane %v14630_v3, 4  ;;  %v1702_v31 = vrot.slane %v14632_v52, 4  ;;  %v4019_v51 = vadd.f32 %v14616_v58, %v3957_v50 }
0x19a5   : > { %v12891_v59 = vpop.permute.xlu1 %5180  ;;  %v4090_v24 = vsel %vm686_vm0, %v4088_v26, %v4089_v60  ;;  %v4018_v8 = vadd.f32 %v4015_v38, %v3956_v34  ;;  %v5003_v9 = vrot.slane %v12769_v46, 4  ;;  %v4947_v33 = vrot.slane %v12652_v5, %v8986_v7  ;;  %v14633_v60 = vld [vmem:[#allocation47_spill] sm:$0xff] }
0x19a6   : > { %v4165_v63 = vsel %vm686_vm0, %v4163_v28, %v4164_v32  ;;  %v4239_v57 = vrot.slane %v12790_v54, 4  ;;  %v4316_v53 = vrot.slane %v12822_v25, 4  ;;  %v4095_v26 = vadd.f32 %v14627_v56, %v4019_v51 }
0x19a7   : > { %v4091_v58 = vsel %vm1073_vm12, %v12732_v23, %v4090_v24  ;;  %v4315_v38 = vrot.slane %v12746_v42, 4  ;;  %v5122_v34 = vrot.slane %v12766_v40, 4  ;;  %v5063_v32 = vrot.slane %v12801_v37, 4 }
0x19a8   : > { %v4241_v5 = vsel %vm686_vm0, %v4239_v57, %v4240_v4  ;;  %v4166_v56 = vsel %vm1168_vm13, %v14630_v3, %v4165_v63  ;;  %v4170_v28 = vadd.f32 %v12757_v39, %v4095_v26  ;;  %v4392_v23 = vrot.slane %v12868_v36, 4 }
0x19a9   : > { %v12913_v44 = vpop.permute.xlu1 %5535  ;;  %v4391_v24 = vrot.slane %v12806_v30, 4  ;;  %v4949_v55 = vmul.f32 %v4947_v33, %v4935_v21  ;;  %v4094_v20 = vadd.f32 %v4091_v58, %v4018_v8  ;;  %v4317_v4 = vsel %vm686_vm0, %v4315_v38, %v4316_v53 }
0x19aa   : > { %14631 = vst [vmem:[#allocation203_spill] sm:$0xff] %v12913_v44  ;;  %v5002_v44 = vrot.slane %v14633_v60, 4  ;;  %v4948_v57 = vmul.f32 %v4947_v33, %v4934_v17  ;;  %v4246_v3 = vadd.f32 %v12796_v16, %v4170_v28  ;;  %v5123_v39 = vrot.slane %v12824_v41, 4  ;;  %v14637_v28 = vld [vmem:[#allocation124_spill] sm:$0xff] }
0x19ab   : > { %v4169_v63 = vadd.f32 %v4166_v56, %v4094_v20  ;;  %v5064_v26 = vsel %vm686_vm0, %v5062_v27, %v5063_v32  ;;  %v4318_v17 = vsel %vm1358_vm1, %v12746_v42, %v4317_v4  ;;  %v5183_v16 = vrot.slane %v12891_v59, 4  ;;  %v14636_v56 = vld [vmem:[#allocation123_spill] sm:$0xff]  ;;  %v14638_v4 = vld [vmem:[#allocation125_spill] sm:$0xff] }
0x19ac   : > { %v5004_v51 = vsel %vm686_vm0, %v5002_v44, %v5003_v9  ;;  %v5009_v9 = vadd.f32 %v12769_v46, %v4949_v55  ;;  %v4322_v8 = vadd.f32 %v12822_v25, %v4246_v3  ;;  %v1629_v20 = vsel %vm1073_vm12, %v14622_v10, %v1628_v48 }
0x19ad   : > { %v12932_v50 = vpop.permute.xlu1 %5928  ;;  %v5005_v44 = vsel %vm978_vm11, %v14633_v60, %v5004_v51  ;;  %v1704_v33 = vsel %vm686_vm0, %v1702_v31, %v1703_v29  ;;  %v5182_v55 = vrot.slane %v12815_v61, 4  ;;  %v12963_v60 = vpop.permute.xlu0 %6734  ;;  %v5124_v42 = vsel %vm686_vm0, %v5122_v34, %v5123_v39 }
0x19ae   : > { %14634 = vst [vmem:[#allocation30_spill] sm:$0xff] %v12932_v50  ;;  %v4242_v50 = vsel %vm1263_vm14, %v12790_v54, %v4241_v5  ;;  %v4393_v54 = vsel %vm686_vm0, %v4391_v24, %v4392_v23  ;;  %v5008_v27 = vadd.f32 %v5005_v44, %v4948_v57  ;;  %v5069_v53 = vadd.f32 %v12801_v37, %v5009_v9 }
0x19af   : > { %v4245_v46 = vadd.f32 %v4242_v50, %v4169_v63  ;;  %v4398_v25 = vadd.f32 %v12868_v36, %v4322_v8  ;;  %v4405_v58 = vrot.slane %v12843_v15, 4  ;;  %v5065_v38 = vsel %vm1073_vm12, %v12680_v13, %v5064_v26  ;;  %v14635_v50 = vld [vmem:[#allocation122_spill] sm:$0xff] }
0x19b0   : > { %v4394_v31 = vsel %vm1453_vm10, %v12806_v30, %v4393_v54  ;;  %v5129_v29 = vadd.f32 %v12824_v41, %v5069_v53  ;;  %v5184_v37 = vsel %vm686_vm0, %v5182_v55, %v5183_v16  ;;  %v1779_v34 = vrot.slane %v14635_v50, 4  ;;  %v14639_v16 = vld [vmem:[#allocation126_spill] sm:$0xff] }
0x19b1   : > { %v12951_v21 = vpop.permute.xlu1 %6674  ;;  %v4321_v10 = vadd.f32 %v4318_v17, %v4245_v46  ;;  %v1778_v36 = vrot.slane %v14636_v56, 4  ;;  %v1855_v51 = vrot.slane %v14637_v28, 4  ;;  %v5125_v13 = vsel %vm1168_vm13, %v12766_v40, %v5124_v42  ;;  %v12988_v40 = vpop.permute.xlu0 %5657  ;;  %v14640_v46 = vld [vmem:[#allocation127_spill] sm:$0xff] }
0x19b2   : > { %v5068_v23 = vadd.f32 %v5065_v38, %v5008_v27  ;;  %v5189_v24 = vadd.f32 %v12891_v59, %v5129_v29  ;;  %v1854_v57 = vrot.slane %v14638_v4, 4  ;;  %v5242_v3 = vrot.slane %v12875_v62, 4  ;;  %v14642_v29 = vld [vmem:[#allocation184_spill] sm:$0xff] }
0x19b3   : > { %v4397_v41 = vadd.f32 %v4394_v31, %v4321_v10  ;;  %v5185_v39 = vsel %vm1263_vm14, %v12815_v61, %v5184_v37  ;;  %v1633_v8 = vadd.f32 %v14621_v1, %v12898_v22  ;;  %v1780_v54 = vsel %vm686_vm0, %v1778_v36, %v1779_v34  ;;  %v14641_v22 = vld [vmem:[#allocation174_spill] sm:$0xff]  ;;  %v14643_v36 = vld [vmem:[#allocation147_spill] sm:$0xff] }
0x19b4   : > { %v5128_v9 = vadd.f32 %v5125_v13, %v5068_v23  ;;  %v1931_v55 = vrot.slane %v14639_v16, 4  ;;  %v1930_v27 = vrot.slane %v14640_v46, 4  ;;  %v1705_v61 = vsel %vm1168_vm13, %v14632_v52, %v1704_v33 }
0x19b5   : > { %v4404_v48 = vpop.permute.xlu1 %4403  ;;  %v1632_v42 = vadd.f32 %v1629_v20, %v12904_v18  ;;  %v1856_v1 = vsel %vm686_vm0, %v1854_v57, %v1855_v51  ;;  %v1709_v52 = vadd.f32 %v14629_v35, %v1633_v8  ;;  %v1781_v33 = vsel %vm1263_vm14, %v14636_v56, %v1780_v54  ;;  %v8066_v57 = vld [vmem:[#allocation2 + $0xc] sm:$0xf] }
0x19b6   : > { %v4406_v5 = vrot.slane %v4404_v48, 4  ;;  %v4412_v32 = vadd.f32 %v4404_v48, %v4398_v25  ;;  %v5188_v53 = vadd.f32 %v5185_v39, %v5128_v9  ;;  %v1944_v25 = vrot.slane %v14641_v22, 4  ;;  %v14645_v39 = vld [vmem:[#allocation40_spill] sm:$0xff] }
0x19b7   : > { %v1708_v31 = vadd.f32 %v1705_v61, %v1632_v42  ;;  %v1932_v48 = vsel %vm686_vm0, %v1930_v27, %v1931_v55  ;;  %v1945_v18 = vrot.slane %v14642_v29, 4  ;;  %v1785_v20 = vadd.f32 %v14635_v50, %v1709_v52  ;;  %v14648_v55 = vld [vmem:[#allocation128_spill] sm:$0xff]  ;;  %v14650_v42 = vld [vmem:[#allocation135_spill] sm:$0xff] }
0x19b8   : > { %v4407_v30 = vsel %vm686_vm0, %v4405_v58, %v4406_v5  ;;  %4417 = vrot.lane.b32.xlu1 %v4412_v32, %s14533_s19  ;;  %v1857_v37 = vsel %vm1358_vm1, %v14638_v4, %v1856_v1  ;;  %v13015_v5 = vpop.permute.xlu0 %6050  ;;  %v1933_v56 = vsel %vm1453_vm10, %v14640_v46, %v1932_v48  ;;  %v2935_v51 = vrot.slane %v14643_v36, 4  ;;  %v14651_v48 = vld [vmem:[#allocation89_spill] sm:$0xff] }
0x19b9   : > { %v5241_v63 = vpop.permute.xlu1 %5240  ;;  %v4408_v44 = vsel %vm1466_vm15, %v12843_v15, %v4407_v30  ;;  %v1946_v35 = vsel %vm686_vm0, %v1944_v25, %v1945_v18  ;;  %v1861_v34 = vadd.f32 %v14637_v28, %v1785_v20  ;;  %v5295_v4 = vmul.f32 %v12527_v45, %v12862_v0  ;;  %v14647_v0 = vld [vmem:[#allocation19_spill] sm:$0xff] }
0x19ba   : > { %v5243_v59 = vrot.slane %v5241_v63, 4  ;;  %v5249_v26 = vadd.f32 %v5241_v63, %v5189_v24  ;;  %v4411_v17 = vadd.f32 %v4408_v44, %v4397_v41  ;;  %v1947_v23 = vsel %vm1466_vm15, %v14641_v22, %v1946_v35  ;;  %v14644_v24 = vld [vmem:[#allocation138_spill] sm:$0xff] }
0x19bb   : > { %v1937_v13 = vadd.f32 %v14639_v16, %v1861_v34  ;;  %v2936_v30 = vrot.slane %v14644_v24, 4  ;;  %v5296_v28 = vmul.f32 %v8066_v57, %v12846_v14  ;;  %v5352_v8 = vrot.slane %v12775_v6, 4  ;;  %v14653_v34 = vld [vmem:[#allocation71_spill] sm:$0xff] }
0x19bc   : > { %v5244_v15 = vsel %vm686_vm0, %v5242_v3, %v5243_v59  ;;  %5283 = vrot.lane.b32.xlu1 %v5249_v26, %s14220_s6  ;;  %4415 = vrot.lane.b32.xlu0 %v4411_v17, %s14533_s19  ;;  %v8067_v3 = vld [vmem:[#allocation2 + $0xc] sm:$0xf]  ;;  %v14646_v26 = vld [vmem:[#allocation146_spill] sm:$0xff]  ;;  %v13039_v54 = vpop.permute.xlu0 %6796  ;;  %v5308_v14 = vrot.slane %v14647_v0, %v8986_v7  ;;  %v5688_v46 = vmul.f32 %v12527_v45, %v14648_v55  ;;  %v5745_v27 = vrot.slane %v12782_v2, 4  ;;  %v14659_v0 = vld [vmem:[#allocation96_spill] sm:$0xff]  ;;  %s14711_s19 = smov %s14710_s30 }
0x19bd   : > { %v13003_v58 = vpop.permute.xlu1 %5597  ;;  %v5245_v38 = vsel %vm1358_vm1, %v12875_v62, %v5244_v15  ;;  %v1784_v62 = vadd.f32 %v1781_v33, %v1708_v31  ;;  %v5689_v63 = vmul.f32 %v8067_v3, %v14645_v39  ;;  %v1951_v9 = vadd.f32 %v14642_v29, %v1937_v13  ;;  %v14649_v15 = vld [vmem:[#allocation156_spill] sm:$0xff] }
0x19be   : > { %v5248_v10 = vadd.f32 %v5245_v38, %v5188_v53  ;;  %v2937_v59 = vsel %vm686_vm0, %v2935_v51, %v2936_v30  ;;  %v3925_v17 = vrot.slane %v14646_v26, 4  ;;  %v3926_v53 = vrot.slane %v14649_v15, 4 }
0x19bf   : > { %v1860_v50 = vadd.f32 %v1857_v37, %v1784_v62  ;;  %v2942_v61 = vadd.f32 %v14644_v24, %v1951_v9  ;;  %v6497_v1 = vmul.f32 %v12635_v11, %v14650_v42  ;;  %v5351_v22 = vrot.slane %v12601_v47, 4  ;;  %v14652_v62 = vld [vmem:[#allocation22_spill] sm:$0xff] }
0x19c0   : > { %5281 = vrot.lane.b32.xlu0 %v5248_v10, %s14220_s6  ;;  %v13055_v25 = vsel %vm2443_vm5, %v14643_v36, %v2937_v59  ;;  %v5744_v38 = vrot.slane %v12632_v43, 4  ;;  %v5701_v45 = vrot.slane %v12690_v19, %v8986_v7  ;;  %v5414_v52 = vrot.slane %v12808_v49, 4  ;;  %v13071_v18 = vpop.permute.xlu0 %4904  ;;  %v14654_v36 = vld [vmem:[#allocation67_spill] sm:$0xff] }
0x19c1   : > { %v13019_v32 = vpop.permute.xlu1 %5990  ;;  %v1936_v41 = vadd.f32 %v1933_v56, %v1860_v50  ;;  %v13064_v10 = vadd.f32 %v14649_v15, %v2942_v61  ;;  %v13067_v11 = vsel %vm686_vm0, %v3925_v17, %v3926_v53  ;;  %v5353_v31 = vsel %vm686_vm0, %v5351_v22, %v5352_v8  ;;  %v14655_v50 = vld [vmem:[#allocation209_spill] sm:$0xff]  ;;  %v14658_v17 = vld [vmem:[#allocation18_spill] sm:$0xff] }
0x19c2   : > { %v5807_v29 = vrot.slane %v14651_v48, 4  ;;  %v5309_v20 = vmul.f32 %v5308_v14, %v5295_v4  ;;  %v5310_v37 = vmul.f32 %v5308_v14, %v5296_v28  ;;  %v5413_v19 = vrot.slane %v14652_v62, 4  ;;  %v14657_v4 = vld [vmem:[#allocation51_spill] sm:$0xff]  ;;  %v14660_v14 = vld [vmem:[#allocation26_spill] sm:$0xff] }
0x19c3   : > { %v13041_v16 = vadd.f32 %v1947_v23, %v1936_v41  ;;  %v5746_v35 = vsel %vm686_vm0, %v5744_v38, %v5745_v27  ;;  %v6511_v56 = vmul.f32 %v14653_v34, %v6497_v1  ;;  %v5806_v51 = vrot.slane %v14654_v36, 4  ;;  %v14656_v23 = vld [vmem:[#allocation74_spill] sm:$0xff] }
0x19c4   : > { %v5475_v13 = vrot.slane %v14655_v50, 4  ;;  %v5868_v24 = vrot.slane %v14656_v23, 4  ;;  %v5703_v30 = vmul.f32 %v5701_v45, %v5689_v63  ;;  %v5354_v41 = vsel %vm978_vm11, %v12601_v47, %v5353_v31  ;;  %v14661_v47 = vld [vmem:[#allocation190_spill] sm:$0xff] }
0x19c5   : > { %v13033_v44 = vpop.permute.xlu1 %6736  ;;  %v5415_v57 = vsel %vm686_vm0, %v5413_v19, %v5414_v52  ;;  %v5476_v28 = vrot.slane %v14657_v4, 4  ;;  %v5358_v39 = vadd.f32 %v12775_v6, %v5310_v37  ;;  %v5747_v9 = vsel %vm978_vm11, %v12632_v43, %v5746_v35  ;;  %v13097_v43 = vpop.permute.xlu0 %5671  ;;  %v14662_v52 = vld [vmem:[#allocation30_spill] sm:$0xff] }
0x19c6   : > { %v5808_v59 = vsel %vm686_vm0, %v5806_v51, %v5807_v29  ;;  %v5869_v8 = vrot.slane %v14658_v17, 4  ;;  %v5537_v63 = vrot.slane %v14659_v0, 4  ;;  %v5930_v55 = vrot.slane %v14660_v14, 4 }
0x19c7   : > { %v6676_v27 = vrot.slane %v14661_v47, 4  ;;  %v5702_v61 = vmul.f32 %v5701_v45, %v5688_v46  ;;  %v5357_v15 = vadd.f32 %v5354_v41, %v5309_v20  ;;  %v5751_v53 = vadd.f32 %v12782_v2, %v5703_v30  ;;  %v14663_v46 = vld [vmem:[#allocation187_spill] sm:$0xff] }
0x19c8   : > { %v5416_v6 = vsel %vm1073_vm12, %v14652_v62, %v5415_v57  ;;  %v5420_v42 = vadd.f32 %v12808_v49, %v5358_v39  ;;  %v5809_v22 = vsel %vm1073_vm12, %v14654_v36, %v5808_v59  ;;  %v5477_v38 = vsel %vm686_vm0, %v5475_v13, %v5476_v28  ;;  %v14664_v13 = vld [vmem:[#allocation203_spill] sm:$0xff] }
0x19c9   : > { %v13061_v33 = vpop.permute.xlu1 %5659  ;;  %v5750_v1 = vadd.f32 %v5747_v9, %v5702_v61  ;;  %v5931_v31 = vrot.slane %v14662_v52, 4  ;;  %v5599_v45 = vrot.slane %v14663_v46, 4  ;;  %v5870_v20 = vsel %vm686_vm0, %v5868_v24, %v5869_v8  ;;  %v6065_v9 = vpop.permute.xlu0 %6064 }
0x19ca   : > { %v5482_v2 = vadd.f32 %v14657_v4, %v5420_v42  ;;  %v5993_v49 = vrot.slane %v13019_v32, 4  ;;  %v5992_v37 = vrot.slane %v12938_v12, 4  ;;  %v5419_v62 = vadd.f32 %v5416_v6, %v5357_v15 }
0x19cb   : > { %v6738_v19 = vrot.slane %v12963_v60, 4  ;;  %v5813_v35 = vadd.f32 %v14651_v48, %v5751_v53  ;;  %v5812_v34 = vadd.f32 %v5809_v22, %v5750_v1  ;;  %v5661_v36 = vrot.slane %v12988_v40, 4  ;;  %v14665_v48 = vld [vmem:[#allocation24_spill] sm:$0xff] }
0x19cc   : > { %v5478_v51 = vsel %vm1168_vm13, %v14655_v50, %v5477_v38  ;;  %v5544_v30 = vadd.f32 %v14664_v13, %v5482_v2  ;;  %v5871_v24 = vsel %vm1168_vm13, %v14656_v23, %v5870_v20  ;;  %v5538_v57 = vrot.slane %v14664_v13, 4 }
0x19cd   : > { %v13083_v3 = vpop.permute.xlu1 %6052  ;;  %v5875_v41 = vadd.f32 %v14658_v17, %v5813_v35  ;;  %v5932_v4 = vsel %vm686_vm0, %v5930_v55, %v5931_v31  ;;  %v6559_v39 = vadd.f32 %v14665_v48, %v6511_v56  ;;  %v5994_v50 = vsel %vm686_vm0, %v5992_v37, %v5993_v49 }
0x19ce   : > { %v5606_v59 = vadd.f32 %v13003_v58, %v5544_v30  ;;  %v6055_v8 = vrot.slane %v13083_v3, 4  ;;  %v6054_v61 = vrot.slane %v13015_v5, 4  ;;  %v6800_v23 = vrot.slane %v13039_v54, 4 }
0x19cf   : > { %v5481_v17 = vadd.f32 %v5478_v51, %v5419_v62  ;;  %v5937_v15 = vadd.f32 %v14662_v52, %v5875_v41  ;;  %v5874_v53 = vadd.f32 %v5871_v24, %v5812_v34  ;;  %v5933_v55 = vsel %vm1263_vm14, %v14660_v14, %v5932_v4  ;;  %v6859_v62 = vpop.permute.xlu0 %6858 }
0x19d0   : > { %v6677_v56 = vrot.slane %v12951_v21, 4  ;;  %v5668_v6 = vadd.f32 %v13061_v33, %v5606_v59  ;;  %v5539_v42 = vsel %vm686_vm0, %v5537_v63, %v5538_v57  ;;  %v5600_v1 = vrot.slane %v13003_v58, 4 }
0x19d1   : > { %v13103_v29 = vpop.permute.xlu1 %6798  ;;  %v5995_v22 = vsel %vm1358_vm1, %v12938_v12, %v5994_v50  ;;  %v5999_v38 = vadd.f32 %v13019_v32, %v5937_v15  ;;  %v6739_v52 = vrot.slane %v13033_v44, 4  ;;  %v6056_v2 = vsel %vm686_vm0, %v6054_v61, %v6055_v8 }
0x19d2   : > { %v4908_v49 = vrot.slane %v13071_v18, 4  ;;  %v6068_v37 = vrot.slane %v6065_v9, 4  ;;  %v5936_v63 = vadd.f32 %v5933_v55, %v5874_v53  ;;  %v5662_v58 = vrot.slane %v13061_v33, 4  ;;  %v14666_v53 = vld [vmem:[#allocation29_spill] sm:$0xff] }
0x19d3   : > { %v6678_v12 = vsel %vm686_vm0, %v6676_v27, %v6677_v56  ;;  %v6061_v32 = vadd.f32 %v13083_v3, %v5999_v38  ;;  %v6801_v35 = vrot.slane %v13103_v29, 4  ;;  %v5540_v51 = vsel %vm1263_vm14, %v14659_v0, %v5539_v42  ;;  %v6873_v59 = vpop.permute.xlu0 %6872 }
0x19d4   : > { %v5998_v13 = vadd.f32 %v5995_v22, %v5936_v63  ;;  %v6057_v30 = vsel %vm1453_vm10, %v13015_v5, %v6056_v2  ;;  %v6740_v33 = vsel %vm686_vm0, %v6738_v19, %v6739_v52  ;;  %v5675_v3 = vrot.slane %v13097_v43, 4 }
0x19d5   : > { %v13121_v28 = vpop.permute.xlu1 %4906  ;;  %v6862_v4 = vrot.slane %v6859_v62, 4  ;;  %v6679_v48 = vsel %vm1168_vm13, %v14661_v47, %v6678_v12  ;;  %v5663_v0 = vsel %vm686_vm0, %v5661_v36, %v5662_v58  ;;  %v5543_v8 = vadd.f32 %v5540_v51, %v5481_v17  ;;  %v14667_v17 = vld [vmem:[#allocation27_spill] sm:$0xff] }
0x19d6   : > { %v4915_v14 = vadd.f32 %v13121_v28, %v13064_v10  ;;  %v5601_v10 = vsel %vm686_vm0, %v5599_v45, %v5600_v1  ;;  %v6802_v45 = vsel %vm686_vm0, %v6800_v23, %v6801_v35  ;;  %v4909_v50 = vrot.slane %v13121_v28, 4 }
0x19d7   : > { %v6060_v19 = vadd.f32 %v6057_v30, %v5998_v13  ;;  %v5602_v61 = vsel %vm1358_vm1, %v14663_v46, %v5601_v10  ;;  %v6741_v15 = vsel %vm1263_vm14, %v12963_v60, %v6740_v33  ;;  %v6682_v55 = vadd.f32 %v6679_v48, %v14666_v53  ;;  %v6482_v2 = vpop.permute.xlu0 %6481 }
0x19d8   : > { %v6621_v42 = vadd.f32 %v14667_v17, %v6559_v39  ;;  %v5664_v46 = vsel %vm1453_vm10, %v12988_v40, %v5663_v0  ;;  %v6803_v60 = vsel %vm1358_vm1, %v13039_v54, %v6802_v45  ;;  %v5605_v1 = vadd.f32 %v5602_v61, %v5543_v8  ;;  %v6908_v54 = vld [vmem:[%s13510_s7] sm:$0xf]  ;;  %v14676_v17 = vld [vmem:[#allocation31_spill] sm:$0xff] }
0x19d9   : > { %v5674_v31 = vpop.permute.xlu1 %5673  ;;  %v4910_v22 = vsel %vm686_vm0, %v4908_v49, %v4909_v50  ;;  %v6876_v52 = vrot.slane %v6873_v59, 4  ;;  %v6485_v58 = vrot.slane %v6482_v2, 4 }
0x19da   : > { %v5682_v20 = vadd.f32 %v5674_v31, %v5668_v6  ;;  %v5676_v41 = vrot.slane %v5674_v31, 4  ;;  %v3928_v6 = vsel %vm2949_vm2, %v14646_v26, %v13067_v11  ;;  %v2941_v31 = vadd.f32 %v13055_v25, %v13041_v16 }
0x19db   : > { %v6683_v26 = vadd.f32 %v12951_v21, %v6621_v42  ;;  %v4911_v16 = vsel %vm1958_vm6, %v13071_v18, %v4910_v22  ;;  %v14669_v18 = vmov 2   ;;  %v14677_v42 = vld [vmem:[#allocation93_spill] sm:$0xff]  ;;  %v14679_v22 = vld [vmem:[#allocation111_spill] sm:$0xff] }
0x19dc   : > { %v13148_v34 = vadd.f32 %v5682_v20, %v4915_v14  ;;  %v5677_v23 = vsel %vm686_vm0, %v5675_v3, %v5676_v41  ;;  %v5667_v14 = vadd.f32 %v5664_v46, %v5605_v1  ;;  %v4923_v3 = vpop.permute.xlu0 %4922  ;;  %v887_v46 = vmul.f32 %v14677_v42, %v14676_v17  ;;  %v14678_v1 = vld [vmem:[#allocation110_spill] sm:$0xff] }
0x19dd   : > { %v6067_v24 = vpop.permute.xlu1 %6066  ;;  %v5678_v11 = vsel %vm1466_vm15, %v13097_v43, %v5677_v23  ;;  %v6745_v21 = vadd.f32 %v13033_v44, %v6683_v26  ;;  %v14674_v23 = vld [vmem:[#allocation108_spill] sm:$0xff] }
0x19de   : > { %v6069_v27 = vrot.slane %v6067_v24, 4  ;;  %v6075_v57 = vadd.f32 %v6067_v24, %v6061_v32  ;;  %v5681_v25 = vadd.f32 %v5678_v11, %v5667_v14  ;;  %v14680_v26 = vld [vmem:[#allocation36_spill] sm:$0xff] }
0x19df   : > { %v6807_v32 = vadd.f32 %v13103_v29, %v6745_v21  ;;  %v899_v11 = vrot.slane %v14680_v26, %v8986_v7 }
0x19e0   : > { %v6070_v5 = vsel %vm686_vm0, %v6068_v37, %v6069_v27  ;;  %6080 = vrot.lane.b32.xlu1 %v6075_v57, %s14248_s26  ;;  %v3931_v37 = vadd.f32 %v3928_v6, %v2941_v31  ;;  %v13205_v48 = vpop.permute.xlu0 %5029 }
0x19e1   : > { %v6861_v47 = vpop.permute.xlu1 %6860  ;;  %v6071_v36 = vsel %vm1466_vm15, %v6065_v9, %v6070_v5  ;;  %v6744_v9 = vadd.f32 %v6741_v15, %v6682_v55  ;;  %v14672_v15 = vld [vmem:[#allocation106_spill] sm:$0xff] }
0x19e2   : > { %v6863_v28 = vrot.slane %v6861_v47, 4  ;;  %v6074_v56 = vadd.f32 %v6071_v36, %v6060_v19  ;;  %v4914_v35 = vadd.f32 %v4911_v16, %v3931_v37  ;;  %v6869_v13 = vadd.f32 %v6861_v47, %v6807_v32  ;;  %v14670_v19 = vld [vmem:[#allocation104_spill] sm:$0xff]  ;;  %v14673_v36 = vld [vmem:[#allocation107_spill] sm:$0xff] }
0x19e3   : > { %v6806_v20 = vadd.f32 %v6803_v60, %v6744_v9  ;;  %v976_v8 = vrot.slane %v14670_v19, 4  ;;  %v1071_v47 = vrot.slane %v14672_v15, 4  ;;  %v1070_v53 = vrot.slane %v14673_v36, 4  ;;  %v14684_v32 = vld [vmem:[#allocation115_spill] sm:$0xff] }
0x19e4   : > { %v6864_v38 = vsel %vm686_vm0, %v6862_v4, %v6863_v28  ;;  %6078 = vrot.lane.b32.xlu0 %v6074_v56, %s14248_s26  ;;  %v5683_v44 = vadd.f32 %v5681_v25, %v4914_v35  ;;  %v1166_v28 = vrot.slane %v14674_v23, 4  ;;  %v14675_v56 = vld [vmem:[#allocation109_spill] sm:$0xff]  ;;  %v1261_v9 = vrot.slane %v14678_v1, 4  ;;  %v14685_v23 = vld [vmem:[#allocation176_spill] sm:$0xff]  ;;  %s8369_s26 = smov 125  }
0x19e5   : > { %v6865_v40 = vsel %vm1453_vm10, %v6859_v62, %v6864_v38  ;;  %v6875_v39 = vpop.permute.xlu1 %6874  ;;  %v1165_v6 = vrot.slane %v14675_v56, 4  ;;  %v1260_v38 = vrot.slane %v14679_v22, 4  ;;  %v1450_v35 = vrot.slane %v14684_v32, 4  ;;  %v14687_v1 = vld [vmem:[#allocation145_spill] sm:$0xff] }
0x19e6   : > { %v6877_v49 = vrot.slane %v6875_v39, 4  ;;  %v6868_v63 = vadd.f32 %v6865_v40, %v6806_v20  ;;  %v6883_v33 = vadd.f32 %v6875_v39, %v6869_v13  ;;  %v1072_v40 = vsel %vm686_vm0, %v1070_v53, %v1071_v47  ;;  %v14682_v20 = vld [vmem:[#allocation113_spill] sm:$0xff] }
0x19e7   : > { %v1074_v16 = vsel %vm1073_vm12, %v14673_v36, %v1072_v40  ;;  %v1262_v21 = vsel %vm686_vm0, %v1260_v38, %v1261_v9  ;;  %v2440_v9 = vrot.slane %v14687_v1, 4 }
0x19e8   : > { %v6878_v43 = vsel %vm686_vm0, %v6876_v52, %v6877_v49  ;;  %6911 = vperm.xlu0 %8007, %v6908_v54   ;;  %v1167_v54 = vsel %vm686_vm0, %v1165_v6, %v1166_v28  ;;  %v900_v52 = vmul.f32 %v899_v11, %v887_v46  ;;  %v1355_v49 = vrot.slane %v14682_v20, 4 }
0x19e9   : > { %v6484_v62 = vpop.permute.xlu1 %6483  ;;  %v6879_v12 = vsel %vm1466_vm15, %v6873_v59, %v6878_v43  ;;  %v13207_v59 = vpop.permute.xlu0 %5089  ;;  %v1463_v28 = vrot.slane %v14685_v23, 4 }
0x19ea   : > { %v6486_v51 = vrot.slane %v6484_v62, 4  ;;  %v6882_v10 = vadd.f32 %v6879_v12, %v6868_v63  ;;  %v6492_v29 = vadd.f32 %v6484_v62, %v13148_v34  ;;  %v14671_v34 = vld [vmem:[#allocation105_spill] sm:$0xff]  ;;  %v14683_v62 = vld [vmem:[#allocation114_spill] sm:$0xff] }
0x19eb   : > { %v975_v61 = vrot.slane %v14671_v34, 4  ;;  %v1451_v12 = vrot.slane %v14683_v62, 4 }
0x19ec   : > { %v6487_v30 = vsel %vm686_vm0, %v6485_v58, %v6486_v51  ;;  %6886 = vrot.lane.b32.xlu1 %v6882_v10, %s14668_s23  ;;  %8010 = vset.pattern.permute.xlu0 %v14669_v18  ;;  %v1169_v58 = vsel %vm1168_vm13, %v14675_v56, %v1167_v54  ;;  %v14688_v54 = vld [vmem:[#allocation140_spill] sm:$0xff] }
0x19ed   : > { %v6488_v24 = vsel %vm2443_vm5, %v6482_v2, %v6487_v30  ;;  %v4970_v27 = vpop.permute.xlu1 %4969  ;;  %v13211_v50 = vpop.permute.xlu0 %5149  ;;  %v977_v60 = vsel %vm686_vm0, %v975_v61, %v976_v8  ;;  %v14681_v2 = vld [vmem:[#allocation112_spill] sm:$0xff]  ;;  %v1264_v30 = vsel %vm1263_vm14, %v14679_v22, %v1262_v21  ;;  %v5093_v61 = vrot.slane %v13207_v59, 4 }
0x19ee   : > { %v6491_v41 = vadd.f32 %v6488_v24, %v5683_v44  ;;  %v979_v39 = vsel %vm978_vm11, %v14671_v34, %v977_v60  ;;  %v1356_v14 = vrot.slane %v14681_v2, 4  ;;  %v4973_v51 = vrot.slane %v4970_v27, 4  ;;  %v8068_v8 = vld [vmem:[#allocation2 + $0x4] sm:$0xff] }
0x19ef   : > { %v981_v63 = vadd.f32 %v979_v39, %v900_v52  ;;  %v4919_v34 = vmul.f32 %v8068_v8, %v14676_v17  ;;  %v5153_v6 = vrot.slane %v13211_v50, 4  ;;  %v2441_v52 = vrot.slane %v14688_v54, 4  ;;  %v14689_v2 = vld [vmem:[#allocation152_spill] sm:$0xff] }
0x19f0   : > { %6888 = vrot.lane.b32.xlu1 %v6883_v33, %s14668_s23  ;;  %6898 = vrot.lane.b32.xlu0 %v6491_v41, %s8342_s28  ;;  %v1357_v44 = vsel %vm686_vm0, %v1355_v49, %v1356_v14  ;;  %v4931_v33 = vrot.slane %v4923_v3, %v8986_v7  ;;  %v5033_v41 = vrot.slane %v13205_v48, 4  ;;  %v3431_v14 = vrot.slane %v14689_v2, 4  ;;  %s14707_s23 = sld [smem:[#allocation7_spill]] }
0x19f1   : > { %v4972_v57 = vpop.permute.xlu1 %4971  ;;  %v13219_v55 = vpop.permute.xlu0 %5209  ;;  %v1076_v13 = vadd.f32 %v1074_v16, %v981_v63  ;;  %v1359_v3 = vsel %vm1358_vm1, %v14682_v20, %v1357_v44  ;;  %v2442_v63 = vsel %vm686_vm0, %v2440_v9, %v2441_v52 }
0x19f2   : > { %v4974_v25 = vrot.slane %v4972_v57, 4  ;;  %v4932_v56 = vmul.f32 %v4931_v33, %v4919_v34 }
0x19f3   : > { %v1171_v19 = vadd.f32 %v1169_v58, %v1076_v13 }
0x19f4   : > { %6900 = vrot.lane.b32.xlu1 %v6492_v29, %s8342_s28  ;;  %v4975_v29 = vsel %vm686_vm0, %v4973_v51, %v4974_v25 }
0x19f5   : > { %v5032_v4 = vpop.permute.xlu1 %5031  ;;  %v13238_v37 = vpop.permute.xlu0 %5269  ;;  %v1266_v53 = vadd.f32 %v1264_v30, %v1171_v19 }
0x19f6   : > { %v5034_v10 = vrot.slane %v5032_v4, 4  ;;  %v1452_v4 = vsel %vm686_vm0, %v1450_v35, %v1451_v12  ;;  %s674_s24 = sand.u32 1, %s14707_s23  }
0x19f7   : > { %v1454_v46 = vsel %vm1453_vm10, %v14684_v32, %v1452_v4  ;;  %v1361_v25 = vadd.f32 %v1359_v3, %v1266_v53 }
0x19f8   : > { %v5035_v15 = vsel %vm686_vm0, %v5033_v41, %v5034_v10 }
0x19f9   : > { %v5092_v0 = vpop.permute.xlu1 %5091  ;;  %v5036_v22 = vsel %vm1073_vm12, %v13205_v48, %v5035_v15  ;;  %v5273_v48 = vrot.slane %v13238_v37, 4  ;;  %v1456_v10 = vadd.f32 %v1454_v46, %v1361_v25 }
0x19fa   : > { %v5094_v57 = vrot.slane %v5092_v0, 4  ;;  %v4976_v0 = vsel %vm978_vm11, %v4970_v27, %v4975_v29  ;;  %v5213_v27 = vrot.slane %v13219_v55, 4 }
0x19fb   : > { %v4978_v26 = vadd.f32 %v4976_v0, %v4932_v56 }
0x19fc   : > { %v5095_v17 = vsel %vm686_vm0, %v5093_v61, %v5094_v57  ;;  %v2444_v57 = vsel %vm2443_vm5, %v14687_v1, %v2442_v63 }
0x19fd   : > { %v13209_v45 = vpop.permute.xlu1 %5151  ;;  %v5096_v20 = vsel %vm1168_vm13, %v13207_v59, %v5095_v17  ;;  %v5038_v49 = vadd.f32 %v5036_v22, %v4978_v26 }
0x19fe   : > { %v5154_v47 = vrot.slane %v13209_v45, 4  ;;  %v14686_v45 = vld [vmem:[#allocation182_spill] sm:$0xff] }
0x19ff   : > { %v1464_v60 = vrot.slane %v14686_v45, 4  ;;  %v5098_v12 = vadd.f32 %v5096_v20, %v5038_v49 }
0x1a00   : > { %v5155_v11 = vsel %vm686_vm0, %v5153_v6, %v5154_v47 }
0x1a01   : > { %v13213_v5 = vpop.permute.xlu1 %5211  ;;  %v5156_v62 = vsel %vm1263_vm14, %v13211_v50, %v5155_v11 }
0x1a02   : > { %v5214_v42 = vrot.slane %v13213_v5, 4  ;;  %v1465_v5 = vsel %vm686_vm0, %v1463_v28, %v1464_v60  ;;  %v5158_v41 = vadd.f32 %v5156_v62, %v5098_v12 }
0x1a03   : > { %v1467_v13 = vsel %vm1466_vm15, %v14685_v23, %v1465_v5 }
0x1a04   : > { %v5215_v16 = vsel %vm686_vm0, %v5213_v27, %v5214_v42  ;;  %v1469_v8 = vadd.f32 %v1467_v13, %v1456_v10  ;;  %v14693_v13 = vld [vmem:[#allocation32_spill] sm:$0xff] }
0x1a05   : > { %v13228_v31 = vpop.permute.xlu1 %5271  ;;  %v5216_v30 = vsel %vm1358_vm1, %v13219_v55, %v5215_v16 }
0x1a06   : > { %v5274_v40 = vrot.slane %v13228_v31, 4  ;;  %v14690_v31 = vld [vmem:[#allocation150_spill] sm:$0xff]  ;;  %v5218_v4 = vadd.f32 %v5216_v30, %v5158_v41  ;;  %v14694_v41 = vld [vmem:[#allocation33_spill] sm:$0xff] }
0x1a07   : > { %v3432_v58 = vrot.slane %v14690_v31, 4 }
0x1a08   : > { %v5275_v32 = vsel %vm686_vm0, %v5273_v48, %v5274_v40 }
0x1a09   : > { %v3433_v33 = vsel %vm686_vm0, %v3431_v14, %v3432_v58  ;;  %v5276_v19 = vsel %vm1453_vm10, %v13238_v37, %v5275_v32  ;;  %v6940_v32 = vld [vmem:[%s13511_s8] sm:$0x3] }
0x1a0a   : > { %v3434_v15 = vsel %vm2949_vm2, %v14689_v2, %v3433_v33 }
0x1a2a   : > { %v13243_v43 = vpop.permute.xlu1 %4417 }
0x1a2b   : > { %v4420_v50 = vrot.slane %v13243_v43, 4  ;;  %v2446_v43 = vadd.f32 %v2444_v57, %v1469_v8 }
0x1a2d   : > { %v3436_v28 = vadd.f32 %v3434_v15, %v2446_v43 }
0x1a2e   : > { %v13252_v24 = vpop.permute.xlu0 %4415  ;;  %v5284_v36 = vpop.permute.xlu1 %5283 }
0x1a2f   : > { %v5286_v35 = vrot.slane %v5284_v36, 4  ;;  %v4419_v59 = vrot.slane %v13252_v24, 4  ;;  %v5278_v36 = vadd.f32 %v5276_v19, %v5218_v4 }
0x1a31   : > { %v4421_v34 = vsel %vm686_vm0, %v4419_v59, %v4420_v50 }
0x1a32   : > { %v5282_v38 = vpop.permute.xlu0 %5281  ;;  %v4422_v23 = vsel %vm1958_vm6, %v13252_v24, %v4421_v34 }
0x1a33   : > { %v5285_v21 = vrot.slane %v5282_v38, 4  ;;  %v4424_v17 = vadd.f32 %v4422_v23, %v3436_v28  ;;  %v7020_v28 = vld [vmem:[%s13515_s12] sm:$0xf] }
0x1a35   : > { %v5287_v29 = vsel %vm686_vm0, %v5285_v21, %v5286_v35  ;;  %v14691_v35 = vld [vmem:[#allocation17_spill] sm:$0xff] }
0x1a36   : > { %v5288_v47 = vsel %vm1466_vm15, %v5282_v38, %v5287_v29 }
0x1a37   : > { %v5290_v37 = vadd.f32 %v5288_v47, %v5278_v36 }
0x1a39   : > { %v5291_v60 = vadd.f32 %v5290_v37, %v4424_v17  ;;  %v14696_v37 = vmov 1   ;;  %v14699_v17 = vmov 0  }
0x1a52   : > { %v6081_v39 = vpop.permute.xlu1 %6080 }
0x1a53   : > { %v6083_v53 = vrot.slane %v6081_v39, 4 }
0x1a56   : > { %v6079_v44 = vpop.permute.xlu0 %6078 }
0x1a57   : > { %v6082_v61 = vrot.slane %v6079_v44, 4 }
0x1a59   : > { %v6084_v0 = vsel %vm686_vm0, %v6082_v61, %v6083_v53  ;;  %v6976_v61 = vld [vmem:[%s13512_s9] sm:$0x3] }
0x1a5a   : > { %v6085_v46 = vsel %vm2443_vm5, %v6079_v44, %v6084_v0  ;;  %v6979_v53 = vld [vmem:[%s13513_s10] sm:$0xf] }
0x1a5b   : > { %v6087_v22 = vadd.f32 %v6085_v46, %v5291_v60  ;;  %v7308_v0 = vld [vmem:[%s13521_s18] sm:$0xf] }
0x1a5e   : > { %v6887_v51 = vpop.permute.xlu1 %6886 }
0x1a5f   : > { %v6890_v56 = vrot.slane %v6887_v51, 4 }
0x1a62   : > { %v6889_v55 = vpop.permute.xlu1 %6888 }
0x1a63   : > { %v6891_v3 = vrot.slane %v6889_v55, 4 }
0x1a65   : > { %v6892_v42 = vsel %vm686_vm0, %v6890_v56, %v6891_v3  ;;  %v14697_v56 = vmov 4  }
0x1a66   : > { %v6901_v45 = vpop.permute.xlu1 %6900  ;;  %v6893_v1 = vsel %vm2949_vm2, %v6887_v51, %v6892_v42  ;;  %v14692_v51 = vld [vmem:[#allocation16_spill] sm:$0xff] }
0x1a67   : > { %v6912_v6 = vpop.permute.xlu0 %6911  ;;  %v6903_v38 = vrot.slane %v6901_v45, 4  ;;  %v6895_v24 = vadd.f32 %v6893_v1, %v6087_v22  ;;  %v6999_v45 = vld [vmem:[%s13514_s11] sm:$0xf] }
0x1a68   : > { %v6919_v40 = vrot.slane %v6912_v6, %v8986_v7  ;;  %v14698_v6 = vmov 7  }
0x1a6b   : > { %v6899_v9 = vpop.permute.xlu0 %6898 }
0x1a6c   : > { %v6902_v27 = vrot.slane %v6899_v9, 4 }
0x1a6e   : > { %v6904_v26 = vsel %vm686_vm0, %v6902_v27, %v6903_v38 }
0x1a6f   : > { %v6905_v11 = vsel %vm4431_vm3, %v6899_v9, %v6904_v26 }
0x1a70   : > { %v6907_v39 = vadd.f32 %v6905_v11, %v6895_v24  ;;  %v14700_v11 = vmov 3  }
0x1a72   : > { %v6921_v5 = vadd.f32 %v6919_v40, %v6907_v39  ;;  %v7125_v40 = vld [vmem:[%s13516_s13] sm:$0xf] }
0x1a73   : > { %v7133_v39 = vld [vmem:[%s13523_s20] sm:$0xf] }
0x1a74   : > { %v6923_v54 = vmul.f32 0.044715, %v6921_v5  ;;  %v6922_v49 = vmul.f32 0.5, %v6921_v5 }
0x1a76   : > { %v6924_v52 = vmul.f32 %v6923_v54, %v6921_v5  ;;  %v7210_v54 = vld [vmem:[%s13518_s15] sm:$0xf] }
0x1a78   : > { %v6925_v2 = vmul.f32 %v6924_v52, %v6921_v5  ;;  %v7218_v52 = vld [vmem:[%s13519_s16] sm:$0xff] }
0x1a7a   : > { %v6926_v14 = vadd.f32 %v6925_v2, %v6921_v5  ;;  %v7190_v5 = vld [vmem:[%s13517_s14] sm:$0xf] }
0x1a7b   : > { %v7282_v2 = vld [vmem:[%s13520_s17] sm:$0xff] }
0x1a7c   : > { %v6927_v20 = vmul.f32 0.7978846, %v6926_v14  ;;  %v14701_v14 = vmov 5  }
0x1a7e   : > { %8031 = vtanh.f32 %v6927_v20  ;;  %v14702_v20 = vmov 6  }
0x1a88   : > { %v8032_v48 = vpop.eup %8031 }
0x1a89   : > { %v6929_v16 = vadd.f32 1.0, %v8032_v48  ;;  %v7436_v48 = vld [vmem:[%s14703_s21] sm:$0xf]  ;;  %s13461_s21 = scalar_lea.hbm %s14710_s30, %s7557_s1 }
0x1a8b   : > { %v13315_v21 = vmul.f32 %v6929_v16, %v6922_v49 }
0x1a8d   : > { %v6932_v25 = vcombine.high %v13315_v21, %v13315_v21  ;;  %v6934_v63 = vsel %vm686_vm0, %v13315_v21, 0.0 }
0x1a8f   : > { %v6935_v31 = vsel %vm686_vm0, %v6932_v25, 0.0  ;;  %v14705_v25 = vld [vmem:[#allocation15_spill] sm:$0xff] }
0x1a90   : > { %v6936_v58 = vadd.f32 %v6935_v31, %v6934_v63  ;;  %v13392_v63 = vsub.s32 4, %v14705_v25  ;;  %v13395_v31 = vsub.s32 6, %v14705_v25 }
0x1a92   : > { %6937 = vadd.xlane.f32.xlu0 %v6936_v58  ;;  %v13398_v58 = vsub.s32 5, %v14705_v25 }
0x1aa8   : > { %7074 = vperm.xlu0 %8010, %v7020_v28  }
0x1aac   : > { %8017 = vset.pattern.permute.xlu0 %v14696_v37 }
0x1aad   : > { %7325 = vperm.xlu0 %8017, %v7308_v0  }
0x1ab1   : > { %8020 = vset.pattern.permute.xlu0 %v14697_v56 }
0x1ab2   : > { %7373 = vperm.xlu0 %8020, %v7308_v0  }
0x1ab6   : > { %8023 = vset.pattern.permute.xlu0 %v14698_v6 }
0x1ab7   : > { %7421 = vperm.xlu0 %8023, %v7308_v0  }
0x1abb   : > { %8025 = vset.pattern.permute.xlu0 %v14699_v17 }
0x1b1f   : > { %v6938_v62 = vpop.xlane.xlu0 %6937 }
0x1b20   : > { %v6939_v12 = vmul.f32 0.00390625, %v6938_v62 }
0x1b22   : > { %v6949_v59 = vrot.slane %v6939_v12, %v14691_v35  ;;  %v6944_v10 = vrot.slane %v6939_v12, %v14692_v51  ;;  %v6959_v30 = vrot.slane %v6939_v12, %v14693_v13  ;;  %v6969_v50 = vrot.slane %v6939_v12, %v14694_v41 }
0x1b24   : > { %v6950_v44 = vmul.f32 %v6949_v59, %v6940_v32  ;;  %v6945_v33 = vmul.f32 %v6944_v10, %v6940_v32  ;;  %v6960_v29 = vmul.f32 %v6959_v30, %v6940_v32  ;;  %v6970_v57 = vmul.f32 %v6969_v50, %v6940_v32 }
0x1b25   : > { %v13402_v32 = vsub.s32 7, %v14705_v25 }
0x1b26   : > { %6952 = vrot.lane.b32.xlu1 %v6950_v44, %s14220_s6 }
0x1b2a   : > { %6962 = vrot.lane.b32.xlu1 %v6960_v29, %s14152_s22 }
0x1b2e   : > { %6972 = vrot.lane.b32.xlu1 %v6970_v57, %s8369_s26  ;;  %s7536_s26 = sshll.u32 %s674_s24, 3 }
0x1b98   : > { %v6953_v19 = vpop.permute.xlu1 %6952 }
0x1b99   : > { %v6955_v34 = vadd.f32 %v6953_v19, %v6945_v33 }
0x1b9c   : > { %v6963_v8 = vpop.permute.xlu1 %6962 }
0x1b9d   : > { %v6965_v4 = vadd.f32 %v6963_v8, %v6955_v34 }
0x1ba0   : > { %v6973_v55 = vpop.permute.xlu1 %6972 }
0x1ba1   : > { %v6975_v15 = vadd.f32 %v6973_v55, %v6965_v4 }
0x1ba3   : > { %v6977_v47 = vadd.f32 %v6976_v61, %v6975_v15  ;;  %v7075_v61 = vpop.permute.xlu0 %7074 }
0x1ba5   : > { %v6978_v43 = vmax.f32 %v6977_v47, 0.0 }
0x1ba7   : > { %v6988_v36 = vrot.slane %v6978_v43, %v14691_v35  ;;  %v6983_v42 = vrot.slane %v6978_v43, %v14692_v51 }
0x1ba9   : > { %6990 = vrot.lane.b32.xlu1 %v6988_v36, %s14695_s5  ;;  %v6984_v46 = vmul.f32 %v6983_v42, %v6979_v53  ;;  %s676_s5 = scalar_lea.vmem [#allocation3], %s7536_s26 }
0x1baa   : > { %s7473_s22 = sshll.u32 %s676_s5, 4  ;;  %s13463_s22 = int_to_ptr.vmem [resolvable:$true] %s7473_s22 }
0x1bab   : > { %s8070_s4 = scalar_lea.vmem %s13463_s22, 128 }
0x1bac   : > { %p8071_p11 = scmp.ne.s32.totalorder %s13463_s22, %s8070_s4 }
0x1bae   : > { %p8072_p12 = pnand %p8071_p11, %p8524_p5 }
0x1bb0   : > { %p8073_p13 = pneg %p8072_p12 }
0x1c1b   : > { %v6991_v3 = vpop.permute.xlu1 %6990 }
0x1c1c   : > { %v6993_v23 = vmul.f32 %v6991_v3, %v6979_v53 }
0x1c1e   : > { %6995 = vrot.lane.b32.xlu1 %v6993_v23, %s14220_s6  ;;  %s7459_s6 = scalar_lea.sflag [#allocation4], %s674_s24 }
0x1c90   : > { %v6996_v60 = vpop.permute.xlu1 %6995 }
0x1c91   : > { %v6998_v1 = vadd.f32 %v6996_v60, %v6984_v46 }
0x1c93   : > { %v7000_v9 = vadd.f32 %v6999_v45, %v6998_v1 }
0x1c95   : > { %v7001_v22 = vsub.f32 0.0, %v7000_v9 }
0x1c97   : > { %v7002_v38 = vmul.f32 1.442695, %v7001_v22 }
0x1c99   : > { %8033 = vpow2.f32 %v7002_v38 }
0x1ca3   : > { %v8034_v27 = vpop.eup %8033 }
0x1ca4   : > { %v7004_v24 = vadd.f32 1.0, %v8034_v27 }
0x1ca6   : > { %8035 = vrcp.f32 %v7004_v24 }
0x1cb0   : > { %v8036_v26 = vpop.eup %8035 }
0x1cb1   : > { %7009 = vperm.xlu1 %8008, %v8036_v26  }
0x1cb5   : > { %7023 = vperm.xlu1 %8008, %v7020_v28  }
0x1cb9   : > { %8009 = vset.pattern.permute.xlu1 %v14696_v37 }
0x1cba   : > { %7048 = vperm.xlu1 %8009, %v7020_v28  }
0x1cbe   : > { %8011 = vset.pattern.permute.xlu1 %v14700_v11 }
0x1cbf   : > { %7100 = vperm.xlu1 %8011, %v7020_v28  }
0x1cc3   : > { %8012 = vset.pattern.permute.xlu1 %v14699_v17 }
0x1cc4   : > { %7128 = vperm.xlu1 %8012, %v7125_v40  }
0x1cc8   : > { %7136 = vperm.xlu1 %8012, %v7133_v39  }
0x1ccc   : > { %7202 = vperm.xlu1 %8012, %v7190_v5  }
0x1cd0   : > { %7213 = vperm.xlu1 %8012, %v7210_v54  }
0x1cd4   : > { %7221 = vperm.xlu1 %8012, %v7218_v52  }
0x1cd8   : > { %8013 = vset.pattern.permute.xlu1 %v14696_v37 }
0x1cd9   : > { %7235 = vperm.xlu1 %8013, %v7218_v52  }
0x1cdd   : > { %8014 = vset.pattern.permute.xlu1 %v14669_v18 }
0x1cde   : > { %7251 = vperm.xlu1 %8014, %v7218_v52  }
0x1ce2   : > { %8015 = vset.pattern.permute.xlu1 %v14700_v11 }
0x1ce3   : > { %7267 = vperm.xlu1 %8015, %v7218_v52  }
0x1ce7   : > { %8016 = vset.pattern.permute.xlu1 %v14699_v17 }
0x1ce8   : > { %7285 = vperm.xlu1 %8016, %v7282_v2  }
0x1cec   : > { %7311 = vperm.xlu1 %8016, %v7308_v0  }
0x1cf0   : > { %8018 = vset.pattern.permute.xlu1 %v14669_v18  ;;  %v7444_v18 = vld [vmem:[%s14704_s2] sm:$0xf]  ;;  %s8370_s2 = smov [#allocation3]  }
0x1cf1   : > { %7341 = vperm.xlu1 %8018, %v7308_v0  }
0x1cf5   : > { %8019 = vset.pattern.permute.xlu1 %v14700_v11  ;;  %v8069_v11 = vld [vmem:[%s14706_s25] sm:$0xff]  ;;  %s8074_s25 = sshll.u32 %s8370_s2, 4  ;;  %s8075_s25 = int_to_ptr.vmem [resolvable:$false] %s8074_s25 }
0x1cf6   : > { %7357 = vperm.xlu1 %8019, %v7308_v0   ;;  %s8076_s23 = scalar_lea.vmem %s8075_s25, 256  ;;  %p8077_p0 = scmp.lt.s32.totalorder %s13463_s22, %s8075_s25 }
0x1cf7   : > { %p8078_p1 = scmp.lt.s32.totalorder %s8076_s23, %s8070_s4 }
0x1cf9   : > { %p8079_p2 = por %p8078_p1, %p8077_p0 }
0x1cfa   : > { %8021 = vset.pattern.permute.xlu1 %v14701_v14 }
0x1cfb   : > { %7389 = vperm.xlu1 %8021, %v7308_v0   ;;  %p8080_p3 = pnand %p8079_p2, %p8073_p13 }
0x1cff   : > { %8022 = vset.pattern.permute.xlu1 %v14702_v20 }
0x1d00   : > { %7405 = vperm.xlu1 %8022, %v7308_v0  }
0x1d04   : > { %8024 = vset.pattern.permute.xlu1 %v14699_v17 }
0x1d05   : > { %7439 = vperm.xlu1 %8024, %v7436_v48  }
0x1d09   : > { %7447 = vperm.xlu1 %8024, %v7444_v18  }
0x1d30   : > { %v7010_v49 = vpop.permute.xlu1 %7009 }
0x1d31   : > { %v7017_v16 = vrot.slane %v7010_v49, %v8986_v7 }
0x1d33   : > { %v7019_v62 = vmul.f32 %v7017_v16, %v13315_v21 }
0x1d34   : > { %v7024_v12 = vpop.permute.xlu1 %7023 }
0x1d35   : > { %v7030_v59 = vrot.slane %v7019_v62, %v14692_v51  ;;  %v7034_v10 = vrot.slane %v7019_v62, %v13392_v63  ;;  %v7080_v7 = vrot.slane %v7019_v62, %v14693_v13  ;;  %v7084_v30 = vrot.slane %v7019_v62, %v13395_v31 }
0x1d36   : > { %v7054_v44 = vrot.slane %v7019_v62, %v14691_v35  ;;  %v7058_v33 = vrot.slane %v7019_v62, %v13398_v58  ;;  %v7106_v15 = vrot.slane %v7019_v62, %v14694_v41  ;;  %v7110_v47 = vrot.slane %v7019_v62, %v13402_v32 }
0x1d37   : > { %v7040_v50 = vrot.slane %v7030_v59, %v14692_v51  ;;  %v7044_v21 = vrot.slane %v7034_v10, %v14692_v51  ;;  %v7090_v29 = vrot.slane %v7080_v7, %v14693_v13  ;;  %v7094_v57 = vrot.slane %v7084_v30, %v14693_v13 }
0x1d38   : > { %v7064_v19 = vrot.slane %v7054_v44, %v14691_v35  ;;  %v7068_v8 = vrot.slane %v7058_v33, %v14691_v35  ;;  %v7116_v37 = vrot.slane %v7106_v15, %v14694_v41  ;;  %v7120_v0 = vrot.slane %v7110_v47, %v14694_v41 }
0x1d39   : > { %v7045_v34 = vmul.f32 %v7040_v50, %v7024_v12  ;;  %v7046_v4 = vmul.f32 %v7044_v21, %v7024_v12  ;;  %v7049_v55 = vpop.permute.xlu1 %7048  ;;  %v7095_v53 = vmul.f32 %v7090_v29, %v7075_v61  ;;  %v7096_v3 = vmul.f32 %v7094_v57, %v7075_v61 }
0x1d3a   : > { %v7069_v43 = vmul.f32 %v7064_v19, %v7049_v55  ;;  %v7070_v36 = vmul.f32 %v7068_v8, %v7049_v55 }
0x1d3c   : > { %v7071_v23 = vadd.f32 %v7069_v43, %v7045_v34  ;;  %v7072_v28 = vadd.f32 %v7070_v36, %v7046_v4 }
0x1d3e   : > { %v7101_v56 = vpop.permute.xlu1 %7100  ;;  %v7097_v6 = vadd.f32 %v7095_v53, %v7071_v23  ;;  %v7098_v17 = vadd.f32 %v7096_v3, %v7072_v28 }
0x1d3f   : > { %v7121_v42 = vmul.f32 %v7116_v37, %v7101_v56  ;;  %v7122_v46 = vmul.f32 %v7120_v0, %v7101_v56 }
0x1d41   : > { %v7123_v45 = vadd.f32 %v7121_v42, %v7097_v6  ;;  %v7124_v60 = vadd.f32 %v7122_v46, %v7098_v17 }
0x1d43   : > { %v7129_v1 = vpop.permute.xlu1 %7128 }
0x1d44   : > { %v7131_v9 = vadd.f32 %v7129_v1, %v7123_v45  ;;  %v7132_v22 = vadd.f32 %v7129_v1, %v7124_v60 }
0x1d47   : > { %v7137_v38 = vpop.permute.xlu1 %7136 }
0x1d48   : > { %v7139_v27 = vmul.f32 %v7137_v38, %v7131_v9  ;;  %v7140_v24 = vmul.f32 %v7137_v38, %v7132_v22 }
0x1d4a   : > { %v7143_v26 = vcombine.low %v7139_v27, %v7140_v24 }
0x1d4b   : > { %v7203_v53 = vpop.permute.xlu1 %7202 }
0x1d4c   : > { %v13421_v40 = vadd.f32 %v8069_v11, %v7143_v26 }
0x1d4e   : > { %v7147_v39 = vcombine.high %v13421_v40, %v13421_v40  ;;  %v7149_v5 = vsel %vm686_vm0, %v13421_v40, 0.0 }
0x1d4f   : > { %v7150_v54 = vrot.slane %v7149_v5, 4  ;;  %v7214_v56 = vpop.permute.xlu1 %7213 }
0x1d50   : > { %v7156_v52 = vsel %vm686_vm0, %v7147_v39, 0.0 }
0x1d51   : > { %v7151_v2 = vadd.f32 %v7150_v54, %v7149_v5  ;;  %v7157_v14 = vrot.slane %v7156_v52, 4 }
0x1d53   : > { %v7152_v20 = vrot.slane %v7151_v2, 2  ;;  %v7158_v48 = vadd.f32 %v7157_v14, %v7156_v52  ;;  %v7222_v6 = vpop.permute.xlu1 %7221 }
0x1d55   : > { %v7153_v18 = vadd.f32 %v7152_v20, %v7151_v2  ;;  %v7159_v49 = vrot.slane %v7158_v48, 2 }
0x1d57   : > { %v7154_v16 = vrot.slane %v7153_v18, 1  ;;  %v7160_v25 = vadd.f32 %v7159_v49, %v7158_v48 }
0x1d58   : > { %v7236_v46 = vpop.permute.xlu1 %7235 }
0x1d59   : > { %v7155_v62 = vadd.f32 %v7154_v16, %v7153_v18  ;;  %v7161_v12 = vrot.slane %v7160_v25, 1 }
0x1d5b   : > { %v7162_v59 = vadd.f32 %v7161_v12, %v7160_v25  ;;  %v7163_v10 = vmul.f32 0.25, %v7155_v62 }
0x1d5d   : > { %v7164_v7 = vmul.f32 0.25, %v7162_v59  ;;  %v7252_v22 = vpop.permute.xlu1 %7251 }
0x1d5f   : > { %v7167_v30 = vcombine.low %v7163_v10, %v7164_v7 }
0x1d61   : > { %v7169_v44 = vsub.f32 %v13421_v40, %v7167_v30 }
0x1d62   : > { %v7268_v18 = vpop.permute.xlu1 %7267 }
0x1d63   : > { %v7170_v33 = vmul.f32 %v7169_v44, %v7169_v44 }
0x1d65   : > { %v7172_v50 = vcombine.high %v7170_v33, %v7170_v33  ;;  %v7174_v21 = vsel %vm686_vm0, %v7170_v33, 0.0 }
0x1d66   : > { %v7175_v29 = vrot.slane %v7174_v21, 4 }
0x1d67   : > { %v7181_v57 = vsel %vm686_vm0, %v7172_v50, 0.0  ;;  %v7286_v50 = vpop.permute.xlu1 %7285 }
0x1d68   : > { %v7176_v19 = vadd.f32 %v7175_v29, %v7174_v21  ;;  %v7182_v8 = vrot.slane %v7181_v57, 4 }
0x1d6a   : > { %v7177_v34 = vrot.slane %v7176_v19, 2  ;;  %v7183_v4 = vadd.f32 %v7182_v8, %v7181_v57 }
0x1d6c   : > { %v7184_v61 = vrot.slane %v7183_v4, 2  ;;  %v7178_v55 = vadd.f32 %v7177_v34, %v7176_v19 }
0x1d6e   : > { %v7179_v15 = vrot.slane %v7178_v55, 1  ;;  %v7185_v47 = vadd.f32 %v7184_v61, %v7183_v4 }
0x1d70   : > { %v7180_v43 = vadd.f32 %v7179_v15, %v7178_v55  ;;  %v7186_v36 = vrot.slane %v7185_v47, 1 }
0x1d72   : > { %v7187_v3 = vadd.f32 %v7186_v36, %v7185_v47  ;;  %v7188_v23 = vmul.f32 0.25, %v7180_v43 }
0x1d74   : > { %v7189_v28 = vmul.f32 0.25, %v7187_v3  ;;  %v7191_v37 = vadd.f32 1e-06, %v7188_v23 }
0x1d76   : > { %v7192_v0 = vadd.f32 1e-06, %v7189_v28  ;;  %8037 = vrsqrt.f32 %v7191_v37 }
0x1d78   : > { %8039 = vrsqrt.f32 %v7192_v0 }
0x1d80   : > { %v8038_v17 = vpop.eup %8037 }
0x1d82   : > { %v8040_v42 = vpop.eup %8039 }
0x1d83   : > { %v7197_v45 = vcombine.low %v8038_v17, %v8040_v42 }
0x1d85   : > { %v7199_v60 = vmul.f32 %v7197_v45, %v7169_v44 }
0x1d87   : > { %v7206_v1 = vcombine.high %v7199_v60, %v7199_v60  ;;  %v7208_v9 = vmul.f32 %v7203_v53, %v7199_v60  ;;  %v7326_v60 = vpop.permute.xlu0 %7325 }
0x1d89   : > { %v7209_v38 = vmul.f32 %v7206_v1, %v7203_v53  ;;  %v7216_v27 = vadd.f32 %v7214_v56, %v7208_v9  ;;  %v7312_v53 = vpop.permute.xlu1 %7311 }
0x1d8b   : > { %v7217_v24 = vadd.f32 %v7214_v56, %v7209_v38  ;;  %v7227_v26 = vrot.slane %v7216_v27, %v14692_v51  ;;  %v7241_v11 = vrot.slane %v7216_v27, %v14691_v35  ;;  %v7257_v39 = vrot.slane %v7216_v27, %v14693_v13 }
0x1d8c   : > { %v7273_v5 = vrot.slane %v7216_v27, %v14694_v41 }
0x1d8d   : > { %v7231_v54 = vrot.slane %v7217_v24, %v14692_v51  ;;  %v7232_v52 = vmul.f32 %v7227_v26, %v7222_v6  ;;  %v7245_v2 = vrot.slane %v7217_v24, %v14691_v35  ;;  %v7246_v14 = vmul.f32 %v7241_v11, %v7236_v46  ;;  %v7342_v3 = vpop.permute.xlu1 %7341 }
0x1d8e   : > { %v7261_v20 = vrot.slane %v7217_v24, %v14693_v13  ;;  %v7262_v48 = vmul.f32 %v7257_v39, %v7252_v22  ;;  %v7277_v62 = vrot.slane %v7217_v24, %v14694_v41  ;;  %v7278_v7 = vmul.f32 %v7273_v5, %v7268_v18 }
0x1d8f   : > { %v7233_v49 = vmul.f32 %v7231_v54, %v7222_v6  ;;  %v7247_v16 = vmul.f32 %v7245_v2, %v7236_v46  ;;  %v7248_v25 = vadd.f32 %v7246_v14, %v7232_v52 }
0x1d90   : > { %v7263_v59 = vmul.f32 %v7261_v20, %v7252_v22  ;;  %v7279_v44 = vmul.f32 %v7277_v62, %v7268_v18  ;;  %v7374_v18 = vpop.permute.xlu0 %7373 }
0x1d91   : > { %v7249_v12 = vadd.f32 %v7247_v16, %v7233_v49  ;;  %v7264_v10 = vadd.f32 %v7262_v48, %v7248_v25  ;;  %v7358_v42 = vpop.permute.xlu1 %7357 }
0x1d93   : > { %v7265_v30 = vadd.f32 %v7263_v59, %v7249_v12  ;;  %v7280_v33 = vadd.f32 %v7278_v7, %v7264_v10 }
0x1d95   : > { %v7281_v21 = vadd.f32 %v7279_v44, %v7265_v30  ;;  %v7288_v29 = vadd.f32 %v7286_v50, %v7280_v33  ;;  %v7390_v5 = vpop.permute.xlu1 %7389 }
0x1d97   : > { %v7289_v57 = vadd.f32 %v7286_v50, %v7281_v21  ;;  %v7292_v19 = vmul.f32 0.044715, %v7288_v29  ;;  %v7290_v28 = vmul.f32 0.5, %v7288_v29 }
0x1d99   : > { %v7293_v8 = vmul.f32 0.044715, %v7289_v57  ;;  %v7294_v34 = vmul.f32 %v7292_v19, %v7288_v29  ;;  %v7291_v56 = vmul.f32 0.5, %v7289_v57  ;;  %v7406_v30 = vpop.permute.xlu1 %7405 }
0x1d9b   : > { %v7295_v4 = vmul.f32 %v7293_v8, %v7289_v57  ;;  %v7296_v61 = vmul.f32 %v7294_v34, %v7288_v29 }
0x1d9d   : > { %v7297_v55 = vmul.f32 %v7295_v4, %v7289_v57  ;;  %v7298_v15 = vadd.f32 %v7296_v61, %v7288_v29 }
0x1d9f   : > { %v7299_v47 = vadd.f32 %v7297_v55, %v7289_v57  ;;  %v7300_v43 = vmul.f32 0.7978846, %v7298_v15 }
0x1da1   : > { %v7301_v36 = vmul.f32 0.7978846, %v7299_v47  ;;  %8041 = vtanh.f32 %v7300_v43  ;;  %v7440_v47 = vpop.permute.xlu1 %7439 }
0x1da3   : > { %8043 = vtanh.f32 %v7301_v36 }
0x1dab   : > { %v8042_v23 = vpop.eup %8041 }
0x1dac   : > { %v7304_v37 = vadd.f32 1.0, %v8042_v23 }
0x1dad   : > { %v8044_v0 = vpop.eup %8043 }
0x1dae   : > { %v7305_v6 = vadd.f32 1.0, %v8044_v0  ;;  %v7306_v17 = vmul.f32 %v7304_v37, %v7290_v28  ;;  %v7448_v28 = vpop.permute.xlu1 %7447 }
0x1db0   : > { %v7307_v46 = vmul.f32 %v7305_v6, %v7291_v56  ;;  %v7317_v45 = vrot.slane %v7306_v17, %v14692_v51  ;;  %v7347_v1 = vrot.slane %v7306_v17, %v14693_v13  ;;  %v7331_v9 = vrot.slane %v7306_v17, %v14691_v35 }
0x1db1   : > { %v7363_v27 = vrot.slane %v7306_v17, %v14694_v41  ;;  %v7379_v54 = vrot.slane %v7306_v17, %v13392_v63  ;;  %v7411_v62 = vrot.slane %v7306_v17, %v13395_v31  ;;  %v7427_v29 = vrot.slane %v7306_v17, %v13402_v32 }
0x1db2   : > { %v7321_v22 = vrot.slane %v7307_v46, %v14692_v51  ;;  %v7322_v38 = vmul.f32 %v7317_v45, %v7312_v53  ;;  %v7351_v24 = vrot.slane %v7307_v46, %v14693_v13  ;;  %v7335_v26 = vrot.slane %v7307_v46, %v14691_v35 }
0x1db3   : > { %v7336_v11 = vmul.f32 %v7331_v9, %v7326_v60  ;;  %v7352_v52 = vmul.f32 %v7347_v1, %v7342_v3  ;;  %v7367_v2 = vrot.slane %v7307_v46, %v14694_v41  ;;  %v7368_v48 = vmul.f32 %v7363_v27, %v7358_v42 }
0x1db4   : > { %v7323_v39 = vmul.f32 %v7321_v22, %v7312_v53  ;;  %v7337_v14 = vmul.f32 %v7335_v26, %v7326_v60  ;;  %v7395_v51 = vrot.slane %v7306_v17, %v13398_v58  ;;  %v7353_v49 = vmul.f32 %v7351_v24, %v7342_v3 }
0x1db5   : > { %v7338_v20 = vadd.f32 %v7336_v11, %v7322_v38  ;;  %v7383_v13 = vrot.slane %v7307_v46, %v13392_v63  ;;  %v7399_v35 = vrot.slane %v7307_v46, %v13398_v58  ;;  %v7369_v12 = vmul.f32 %v7367_v2, %v7358_v42  ;;  %v7422_v63 = vpop.permute.xlu0 %7421 }
0x1db6   : > { %v7339_v16 = vadd.f32 %v7337_v14, %v7323_v39  ;;  %v7384_v7 = vmul.f32 %v7379_v54, %v7374_v18  ;;  %v7400_v41 = vmul.f32 %v7395_v51, %v7390_v5  ;;  %v7415_v44 = vrot.slane %v7307_v46, %v13395_v31 }
0x1db7   : > { %v7354_v25 = vadd.f32 %v7352_v52, %v7338_v20  ;;  %v7385_v50 = vmul.f32 %v7383_v13, %v7374_v18  ;;  %v7401_v57 = vmul.f32 %v7399_v35, %v7390_v5  ;;  %v7416_v8 = vmul.f32 %v7411_v62, %v7406_v30 }
0x1db8   : > { %v7355_v59 = vadd.f32 %v7353_v49, %v7339_v16  ;;  %v7431_v34 = vrot.slane %v7307_v46, %v13402_v32  ;;  %v7417_v61 = vmul.f32 %v7415_v44, %v7406_v30  ;;  %v7432_v15 = vmul.f32 %v7427_v29, %v7422_v63 }
0x1db9   : > { %v7370_v10 = vadd.f32 %v7368_v48, %v7354_v25 }
0x1dba   : > { %v7371_v33 = vadd.f32 %v7369_v12, %v7355_v59  ;;  %v7433_v43 = vmul.f32 %v7431_v34, %v7422_v63 }
0x1dbb   : > { %v7386_v21 = vadd.f32 %v7384_v7, %v7370_v10 }
0x1dbc   : > { %v7387_v19 = vadd.f32 %v7385_v50, %v7371_v33 }
0x1dbd   : > { %v7402_v58 = vadd.f32 %v7400_v41, %v7386_v21 }
0x1dbe   : > { %v7403_v4 = vadd.f32 %v7401_v57, %v7387_v19 }
0x1dbf   : > { %v7418_v55 = vadd.f32 %v7416_v8, %v7402_v58 }
0x1dc0   : > { %v7419_v31 = vadd.f32 %v7417_v61, %v7403_v4 }
0x1dc1   : > { %v7434_v36 = vadd.f32 %v7432_v15, %v7418_v55 }
0x1dc2   : > { %v7435_v53 = vadd.f32 %v7433_v43, %v7419_v31 }
0x1dc3   : > { %v7442_v3 = vadd.f32 %v7440_v47, %v7434_v36 }
0x1dc4   : > { %v7443_v23 = vadd.f32 %v7440_v47, %v7435_v53 }
0x1dc5   : > { %v7450_v37 = vmul.f32 %v7448_v28, %v7442_v3 }
0x1dc6   : > { %v7451_v0 = vmul.f32 %v7448_v28, %v7443_v23 }
0x1dc8   : > { %v7454_v32 = vcombine.low %v7450_v37, %v7451_v0 }
0x1dca   : > { %v7456_v56 = vadd.f32 %v7454_v32, %v13421_v40 }
0x1dcc   : > { %7457 = vst [vmem:[%s676_s5] sm:$0xff] %v7456_v56 }
0x1dcd   : > { %8083 = shalt.err (!%p8080_p3)
}
0x1dce   : > { %s8084_s29 = scalar_lea.hbm %s13461_s21, 128  ;;  %s8088_s1 = scalar_lea.hbm %s14711_s19, 256 }
0x1dcf   : > { %p8085_p4 = scmp.ne.s32.totalorder %s13461_s21, %s8084_s29  ;;  %p8089_p9 = scmp.lt.u32.totalorder %s13461_s21, %s14711_s19 }
0x1dd0   : > { %p8090_p10 = scmp.lt.u32.totalorder %s8088_s1, %s8084_s29  ;;  %p8092_p12 = scmp.lt.u32.totalorder %s8084_s29, %s13461_s21 }
0x1dd1   : > { %p8086_p7 = pnand %p8085_p4, %p8524_p5 }
0x1dd2   : > { %p8091_p11 = por %p8090_p10, %p8089_p9 }
0x1dd3   : > { %p8087_p8 = pneg %p8086_p7 }
0x1dd4   : > { %p8093_p13 = por %p8092_p12, %p8091_p11 }
0x1dd6   : > { %p8094_p0 = pnand %p8093_p13, %p8087_p8 }
0x1dd8   : > { %8097 = shalt.err (!%p8094_p0)
}
0x1dd9   : > { %7558 = dma.vmem_to_hbm [thread:$0]  (%p8524_p5), %s13463_s22, 128, %s13461_s21, %s7459_s6  }
0x1dda PF: > { %s14712_s3 = sld [smem:[#allocation9_spill]]  ;;  %s14713_s30 = sld [smem:[#allocation6_spill]] }
0x1de0   : > { %p7564_p1 = scmp.ge.s32.totalorder %s14712_s3, 2  ;;  %s7485_s2 = sand.u32 1, %s14713_s30  }
0x1de1   : > { %s7486_s25 = scalar_lea.sflag [#allocation4], %s7485_s2 }
0x1de2   : > { %p7561_p2 = pnand %p7564_p1, %p8528_p6 }
0x1de4   : > { %8115 = dma.done.wait (!%p7561_p2), %s7486_s25, 128  }
0x1de5   : > { %8117 = vsyncadd (!%p7561_p2), %s7486_s25, 4294967168  ;;  %s14715_s30 = sld [smem:[#allocation11_spill]]  ;;  %s14716_s3 = sld [smem:[#allocation7_spill]] }
0x1de6   : > { %s14717_s28 = sld [smem:[#allocation8_spill]]  ;;  %s14718_s29 = sld [smem:[#allocation12_spill]] }
0x1deb   : > { %p32_p3 = scmp.ge.s32.totalorder %s14715_s30, 4  }
0x1ded   :  { %34 = sbr.rel (!%p32_p3) target bundleno = 14 (0xe), region = 155 }
0x1df4   :  { %7491 = vsyncpa [#allocation4], 1 }
0x1df5   :  { %7493 = vsyncpa [#allocation4 + $0x1], 1 }

</bundles_post_ra>
